<compile_context>
chip_gen: v7x
topology: tpu7x:2x2x1
jax: 0.10.0
libtpu: 0.0.40
codegen_flags: <defaults>
</compile_context>

<pallas_src>
import math

import numpy as np
import jax
import jax.numpy as jnp
from jax.experimental import pallas as pl
from jax.experimental.pallas import tpu as pltpu

D = 28 * 28              # 784 features (mask hard-coded to 28x28 in the module)
HALF = D // 2            # 392 — checkerboard splits features exactly in half
N_HIDDEN = 1024
N_FLOWS = 4
N_LAYERS = 2 * N_FLOWS   # 8 coupling layers
ALPHA = 1e-5
LOG_2PI = math.log(2.0 * math.pi)
LOG_256 = math.log(256.0)


# --------------------------------------------------------------------------
# checkerboard permutation: idx_a = positions with mask==1, idx_b = mask==0
# --------------------------------------------------------------------------
def checkerboard_indices():
    ij = np.add.outer(np.arange(28), np.arange(28)).reshape(-1)
    idx_a = np.nonzero(ij % 2 == 0)[0]
    idx_b = np.nonzero(ij % 2 == 1)[0]
    assert idx_a.size == HALF and idx_b.size == HALF
    return idx_a, idx_b


# --------------------------------------------------------------------------
# fused kernel: grid = (batch_blocks, n_layers); state (z halves, ldj) lives in
# VMEM scratch across the layer axis.
# --------------------------------------------------------------------------
def flow_kernel(xa_ref, xb_ref, ua_ref, ub_ref,
                w1_ref, b1_ref, w2_ref, b2_ref,
                w3h_ref, b3h_ref, w3t_ref, b3t_ref,
                logpx_ref,
                za_ref, zb_ref, ldj_ref):
    layer = pl.program_id(1)

    # ---- layer 0: dequantize + logit-normalize into resident VMEM state ----
    @pl.when(layer == 0)
    def _init():
        za = (xa_ref[...] + ua_ref[...]) / 256.0
        zb = (xb_ref[...] + ub_ref[...]) / 256.0
        za = za * (1.0 - ALPHA) + ALPHA * 0.5
        zb = zb * (1.0 - ALPHA) + ALPHA * 0.5
        log_za, log_1za = jnp.log(za), jnp.log(1.0 - za)
        log_zb, log_1zb = jnp.log(zb), jnp.log(1.0 - zb)
        ldj = jnp.full((za.shape[0], 1), -LOG_256 * D, dtype=jnp.float32)
        ldj = ldj + jnp.sum(-log_za - log_1za, axis=1, keepdims=True)
        ldj = ldj + jnp.sum(-log_zb - log_1zb, axis=1, keepdims=True)
        za_ref[...] = log_za - log_1za
        zb_ref[...] = log_zb - log_1zb
        ldj_ref[...] = ldj

    # ---- one coupling layer; the mask alternates with layer parity ----------
    even = (1 - (layer % 2)).astype(jnp.float32)   # 1.0 for even layers, else 0.0
    odd = 1.0 - even
    za = za_ref[...]
    zb = zb_ref[...]
    # masked (MLP input) half: z_a for even layers, z_b for odd layers
    x_in = (even * za + odd * zb).astype(jnp.bfloat16)
    h1 = jnp.maximum(
        jnp.dot(x_in, w1_ref[0], preferred_element_type=jnp.float32)
        + b1_ref[0], 0.0)
    h2 = jnp.maximum(
        jnp.dot(h1.astype(jnp.bfloat16), w2_ref[0],
                preferred_element_type=jnp.float32) + b2_ref[0], 0.0)
    h2b = h2.astype(jnp.bfloat16)
    h = jnp.dot(h2b, w3h_ref[0], preferred_element_type=jnp.float32) + b3h_ref[0]
    t = jnp.dot(h2b, w3t_ref[0], preferred_element_type=jnp.float32) + b3t_ref[0]
    log_scale = jnp.tanh(h)
    # passive (updated) half: z_b for even layers, z_a for odd layers
    z_pas = even * zb + odd * za
    z_new = z_pas * jnp.exp(log_scale) + t
    za_ref[...] = even * za + odd * z_new
    zb_ref[...] = even * z_new + odd * zb
    ldj_ref[...] += jnp.sum(log_scale, axis=1, keepdims=True)

    # ---- last layer: standard-Gaussian log prior + accumulated log-det ------
    @pl.when(layer == pl.num_programs(1) - 1)
    def _finish():
        za_f = za_ref[...]
        zb_f = zb_ref[...]
        log_pz = (jnp.sum(-0.5 * za_f * za_f, axis=1, keepdims=True)
                  + jnp.sum(-0.5 * zb_f * zb_f, axis=1, keepdims=True)
                  - 0.5 * LOG_2PI * D)
        logpx_ref[...] = log_pz + ldj_ref[...]


def model_forward(x, u, packed, idx_a, idx_b, *, batch_block=None):
    """Pallas pipeline equivalent of Model.forward -> log_px, shape (B,)."""
    B = x.shape[0]
    if batch_block is None:
        batch_block = B
    assert B % batch_block == 0
    # one-time feature permutation into the two checkerboard halves (layout only)
    xa, xb = x[:, idx_a], x[:, idx_b]
    ua, ub = u[:, idx_a], u[:, idx_b]

    n_layers = packed[0].shape[0]
    act_spec = pl.BlockSpec((batch_block, HALF), lambda b, l: (b, 0))

    def w_spec(*shape):
        return pl.BlockSpec((1,) + shape, lambda b, l: (l, 0, 0))

    grid_spec = pltpu.PrefetchScalarGridSpec(
        num_scalar_prefetch=0,
        grid=(B // batch_block, n_layers),
        in_specs=[act_spec, act_spec, act_spec, act_spec,
                  w_spec(HALF, N_HIDDEN), w_spec(1, N_HIDDEN),
                  w_spec(N_HIDDEN, N_HIDDEN), w_spec(1, N_HIDDEN),
                  w_spec(N_HIDDEN, HALF), w_spec(1, HALF),
                  w_spec(N_HIDDEN, HALF), w_spec(1, HALF)],
        out_specs=pl.BlockSpec((batch_block, 1), lambda b, l: (b, 0)),
        scratch_shapes=[pltpu.VMEM((batch_block, HALF), jnp.float32),  # z_a
                        pltpu.VMEM((batch_block, HALF), jnp.float32),  # z_b
                        pltpu.VMEM((batch_block, 1), jnp.float32)],    # ldj
    )
    log_px = pl.pallas_call(
        flow_kernel,
        out_shape=jax.ShapeDtypeStruct((B, 1), jnp.float32),
        grid_spec=grid_spec,
        compiler_params=pltpu.CompilerParams(
            dimension_semantics=("parallel", "arbitrary"),
            vmem_limit_bytes=48 * 1024 * 1024),
    )(xa, xb, ua, ub, *packed)
    return log_px[:, 0]


# --------------------------------------------------------------------------
# parameter construction (deterministic, PyTorch-default-style uniform init)
# --------------------------------------------------------------------------
def init_linear(key, fan_in, fan_out, bound=None):
    if bound is None:
        bound = 1.0 / math.sqrt(fan_in)
    kw, kb = jax.random.split(key)
    w = jax.random.uniform(kw, (fan_in, fan_out), jnp.float32, -bound, bound)
    b = jax.random.uniform(kb, (1, fan_out), jnp.float32, -bound, bound)
    return w, b


def build_model(key):
    idx_a, _ = checkerboard_indices()
    mask_np = np.zeros((D,), dtype=np.float32)
    mask_np[idx_a] = 1.0
    base_mask = jnp.asarray(mask_np.reshape(1, D))

    layer_keys = jax.random.split(key, N_LAYERS)
    layers = []
    for i in range(N_LAYERS):
        m = base_mask if i % 2 == 0 else 1.0 - base_mask
        k1, k2, k3h, k3t = jax.random.split(layer_keys[i], 4)
        w1, b1 = init_linear(k1, D, N_HIDDEN)
        w2, b2 = init_linear(k2, N_HIDDEN, N_HIDDEN)
        # NOTE: the PyTorch module zeroes the last Linear at __init__ (identity
        # coupling).  Small random values are used instead so the affine-coupling
        # math path is actually exercised.
        w3h, b3h = init_linear(k3h, N_HIDDEN, D, bound=0.01)
        w3t, b3t = init_linear(k3t, N_HIDDEN, D, bound=0.01)
        layers.append((m, (w1, b1, w2, b2, w3h, b3h, w3t, b3t)))
    return layers


def pack_layers(layers, idx_a, idx_b):
    """Stack per-layer weights, keep only the checkerboard-relevant columns, bf16."""
    w1s, b1s, w2s, b2s, w3hs, b3hs, w3ts, b3ts = ([] for _ in range(8))
    for l, (_, (w1, b1, w2, b2, w3h, b3h, w3t, b3t)) in enumerate(layers):
        in_idx = idx_a if l % 2 == 0 else idx_b     # mask==1 rows feed the MLP
        out_idx = idx_b if l % 2 == 0 else idx_a    # mask==0 columns get updated
        w1s.append(w1[in_idx, :].astype(jnp.bfloat16))
        b1s.append(b1)
        w2s.append(w2.astype(jnp.bfloat16))
        b2s.append(b2)
        w3hs.append(w3h[:, out_idx].astype(jnp.bfloat16))
        b3hs.append(b3h[:, out_idx])
        w3ts.append(w3t[:, out_idx].astype(jnp.bfloat16))
        b3ts.append(b3t[:, out_idx])
    stk = lambda xs: jnp.stack(xs, axis=0)
    return (stk(w1s), stk(b1s), stk(w2s), stk(b2s),
            stk(w3hs), stk(b3hs), stk(w3ts), stk(b3ts))


# --------------------------------------------------------------------------
# pure-JAX reference (mirrors the PyTorch forward, full masks / full weights;
# dots use the same bf16 operands the kernel streams, f32 accumulation)
# --------------------------------------------------------------------------
def reference_forward(x, u, layers):
    def bdot(a, w):
        return jnp.dot(a.astype(jnp.bfloat16), w.astype(jnp.bfloat16),
                       preferred_element_type=jnp.float32)

    z = (x + u) / 256.0
    ldj = jnp.full((x.shape[0],), -LOG_256 * D, dtype=jnp.float32)
    z = z * (1.0 - ALPHA) + ALPHA * 0.5
    ldj = ldj + jnp.sum(-jnp.log(z) - jnp.log(1.0 - z), axis=1)
    z = jnp.log(z) - jnp.log(1.0 - z)
    for m, (w1, b1, w2, b2, w3h, b3h, w3t, b3t) in layers:
        x_in = m * z
        h1 = jax.nn.relu(bdot(x_in, w1) + b1)
        h2 = jax.nn.relu(bdot(h1, w2) + b2)
        h = bdot(h2, w3h) + b3h
        t = bdot(h2, w3t) + b3t
        ls = jnp.tanh(h)
        z = m * z + (1.0 - m) * (z * jnp.exp(ls) + t)
        ldj = ldj + jnp.sum((1.0 - m) * ls, axis=1)
    log_pz = jnp.sum(-0.5 * LOG_2PI - 0.5 * z * z, axis=1)
    return log_pz + ldj


if __name__ == "__main__":
    key = jax.random.PRNGKey(0)
    k_x, k_u, k_params = jax.random.split(key, 3)

    B = 8
    # synthetic "image" input with pixel-scale values in [0, 255]
    x = jax.random.uniform(k_x, (B, D), jnp.float32, 0.0, 255.0)
    # TODO(synk): torch.rand_like dequantization noise is generated host-side
    # (jax.random) and passed in, so kernel vs reference use identical noise.
    u = jax.random.uniform(k_u, (B, D), jnp.float32)

    layers = build_model(k_params)
    idx_a, idx_b = checkerboard_indices()
    packed = pack_layers(layers, idx_a, idx_b)

    log_px = jax.block_until_ready(model_forward(x, u, packed, idx_a, idx_b))
    assert log_px.shape == (B,)

    ref = jax.block_until_ready(reference_forward(x, u, layers))
    np.testing.assert_allclose(np.asarray(log_px), np.asarray(ref),
                               rtol=3e-3, atol=1.0)
    print("KERNEL_OK")
</pallas_src>

<mosaic_0001>
module attributes {stable_mosaic.version = 11 : i64} {
  func.func @flow_kernel(%arg0: i32, %arg1: i32, %arg2: memref<8x392xf32, #tpu.memory_space<vmem>>, %arg3: memref<8x392xf32, #tpu.memory_space<vmem>>, %arg4: memref<8x392xf32, #tpu.memory_space<vmem>>, %arg5: memref<8x392xf32, #tpu.memory_space<vmem>>, %arg6: memref<1x392x1024xbf16, #tpu.memory_space<vmem>>, %arg7: memref<1x1x1024xf32, #tpu.memory_space<vmem>>, %arg8: memref<1x1024x1024xbf16, #tpu.memory_space<vmem>>, %arg9: memref<1x1x1024xf32, #tpu.memory_space<vmem>>, %arg10: memref<1x1024x392xbf16, #tpu.memory_space<vmem>>, %arg11: memref<1x1x392xf32, #tpu.memory_space<vmem>>, %arg12: memref<1x1024x392xbf16, #tpu.memory_space<vmem>>, %arg13: memref<1x1x392xf32, #tpu.memory_space<vmem>>, %arg14: memref<8x1xf32, #tpu.memory_space<vmem>>, %arg15: memref<8x392xf32, #tpu.memory_space<vmem>>, %arg16: memref<8x392xf32, #tpu.memory_space<vmem>>, %arg17: memref<8x1xf32, #tpu.memory_space<vmem>>) attributes {dimension_semantics = [#tpu.dimension_semantics<parallel>, #tpu.dimension_semantics<arbitrary>], iteration_bounds = array<i64: 1, 8>, scalar_prefetch = 0 : i64, scratch_operands = 3 : i64, tpu.core_type = #tpu.core_type<tc>, window_params = [{transform_indices = @transform_0, window_bounds = array<i64: 8, 392>}, {transform_indices = @transform_1, window_bounds = array<i64: 8, 392>}, {transform_indices = @transform_2, window_bounds = array<i64: 8, 392>}, {transform_indices = @transform_3, window_bounds = array<i64: 8, 392>}, {transform_indices = @transform_4, window_bounds = array<i64: 1, 392, 1024>}, {transform_indices = @transform_5, window_bounds = array<i64: 1, 1, 1024>}, {transform_indices = @transform_6, window_bounds = array<i64: 1, 1024, 1024>}, {transform_indices = @transform_7, window_bounds = array<i64: 1, 1, 1024>}, {transform_indices = @transform_8, window_bounds = array<i64: 1, 1024, 392>}, {transform_indices = @transform_9, window_bounds = array<i64: 1, 1, 392>}, {transform_indices = @transform_10, window_bounds = array<i64: 1, 1024, 392>}, {transform_indices = @transform_11, window_bounds = array<i64: 1, 1, 392>}, {transform_indices = @transform_12, window_bounds = array<i64: 8, 1>}]} {
    %c0_i32 = arith.constant 0 : i32
    %0 = arith.cmpi eq, %arg1, %c0_i32 : i32
    %1 = arith.extui %0 : i1 to i32
    %c0_i32_0 = arith.constant 0 : i32
    %2 = arith.cmpi ne, %1, %c0_i32_0 : i32
    scf.if %2 {
      %c0_49 = arith.constant 0 : index
      %c0_50 = arith.constant 0 : index
      %87 = vector.load %arg2[%c0_49, %c0_50] : memref<8x392xf32, #tpu.memory_space<vmem>>, vector<8x392xf32>
      %c0_51 = arith.constant 0 : index
      %c0_52 = arith.constant 0 : index
      %88 = vector.load %arg4[%c0_51, %c0_52] : memref<8x392xf32, #tpu.memory_space<vmem>>, vector<8x392xf32>
      %89 = arith.addf %87, %88 : vector<8x392xf32>
      %cst_53 = arith.constant 2.560000e+02 : f32
      %90 = vector.broadcast %cst_53 : f32 to vector<8x392xf32>
      %91 = arith.divf %89, %90 : vector<8x392xf32>
      %c0_54 = arith.constant 0 : index
      %c0_55 = arith.constant 0 : index
      %92 = vector.load %arg3[%c0_54, %c0_55] : memref<8x392xf32, #tpu.memory_space<vmem>>, vector<8x392xf32>
      %c0_56 = arith.constant 0 : index
      %c0_57 = arith.constant 0 : index
      %93 = vector.load %arg5[%c0_56, %c0_57] : memref<8x392xf32, #tpu.memory_space<vmem>>, vector<8x392xf32>
      %94 = arith.addf %92, %93 : vector<8x392xf32>
      %cst_58 = arith.constant 2.560000e+02 : f32
      %95 = vector.broadcast %cst_58 : f32 to vector<8x392xf32>
      %96 = arith.divf %94, %95 : vector<8x392xf32>
      %cst_59 = arith.constant 0.999989986 : f32
      %97 = vector.broadcast %cst_59 : f32 to vector<8x392xf32>
      %98 = arith.mulf %91, %97 : vector<8x392xf32>
      %cst_60 = arith.constant 5.000000e-06 : f32
      %99 = vector.broadcast %cst_60 : f32 to vector<8x392xf32>
      %100 = arith.addf %98, %99 : vector<8x392xf32>
      %cst_61 = arith.constant 0.999989986 : f32
      %101 = vector.broadcast %cst_61 : f32 to vector<8x392xf32>
      %102 = arith.mulf %96, %101 : vector<8x392xf32>
      %cst_62 = arith.constant 5.000000e-06 : f32
      %103 = vector.broadcast %cst_62 : f32 to vector<8x392xf32>
      %104 = arith.addf %102, %103 : vector<8x392xf32>
      %105 = math.log %100 : vector<8x392xf32>
      %cst_63 = arith.constant 1.000000e+00 : f32
      %106 = vector.broadcast %cst_63 : f32 to vector<8x392xf32>
      %107 = arith.subf %106, %100 : vector<8x392xf32>
      %108 = math.log %107 : vector<8x392xf32>
      %109 = math.log %104 : vector<8x392xf32>
      %cst_64 = arith.constant 1.000000e+00 : f32
      %110 = vector.broadcast %cst_64 : f32 to vector<8x392xf32>
      %111 = arith.subf %110, %104 : vector<8x392xf32>
      %112 = math.log %111 : vector<8x392xf32>
      %cst_65 = arith.constant -4347.41895 : f32
      %113 = vector.broadcast %cst_65 : f32 to vector<8x1xf32>
      %cst_66 = arith.constant 0.000000e+00 : f32
      %114 = vector.broadcast %cst_66 : f32 to vector<8x392xf32>
      %115 = arith.subf %114, %105 : vector<8x392xf32>
      %116 = arith.subf %115, %108 : vector<8x392xf32>
      %cst_67 = arith.constant dense<0.000000e+00> : vector<8xf32>
      %117 = vector.multi_reduction <add>, %116, %cst_67 [1] : vector<8x392xf32> to vector<8xf32>
      %118 = vector.shape_cast %117 : vector<8xf32> to vector<8x1xf32>
      %119 = arith.addf %113, %118 : vector<8x1xf32>
      %cst_68 = arith.constant 0.000000e+00 : f32
      %120 = vector.broadcast %cst_68 : f32 to vector<8x392xf32>
      %121 = arith.subf %120, %109 : vector<8x392xf32>
      %122 = arith.subf %121, %112 : vector<8x392xf32>
      %cst_69 = arith.constant dense<0.000000e+00> : vector<8xf32>
      %123 = vector.multi_reduction <add>, %122, %cst_69 [1] : vector<8x392xf32> to vector<8xf32>
      %124 = vector.shape_cast %123 : vector<8xf32> to vector<8x1xf32>
      %125 = arith.addf %119, %124 : vector<8x1xf32>
      %126 = arith.subf %105, %108 : vector<8x392xf32>
      %c0_70 = arith.constant 0 : index
      %c0_71 = arith.constant 0 : index
      %127 = vector.load %arg15[%c0_70, %c0_71] : memref<8x392xf32, #tpu.memory_space<vmem>>, vector<8x392xf32>
      tpu.vector_store %arg15[%c0_70, %c0_71], %126 {strides = array<i32>} : memref<8x392xf32, #tpu.memory_space<vmem>>, vector<8x392xf32>,
      %128 = arith.subf %109, %112 : vector<8x392xf32>
      %c0_72 = arith.constant 0 : index
      %c0_73 = arith.constant 0 : index
      %129 = vector.load %arg16[%c0_72, %c0_73] : memref<8x392xf32, #tpu.memory_space<vmem>>, vector<8x392xf32>
      tpu.vector_store %arg16[%c0_72, %c0_73], %128 {strides = array<i32>} : memref<8x392xf32, #tpu.memory_space<vmem>>, vector<8x392xf32>,
      %c0_74 = arith.constant 0 : index
      %c0_75 = arith.constant 0 : index
      %130 = vector.load %arg17[%c0_74, %c0_75] : memref<8x1xf32, #tpu.memory_space<vmem>>, vector<8x1xf32>
      tpu.vector_store %arg17[%c0_74, %c0_75], %125 {strides = array<i32>} : memref<8x1xf32, #tpu.memory_space<vmem>>, vector<8x1xf32>,
    } else {
    }
    %c2_i32 = arith.constant 2 : i32
    %c0_i32_1 = arith.constant 0 : i32
    %3 = arith.cmpi eq, %c2_i32, %c0_i32_1 : i32
    %c1_i32 = arith.constant 1 : i32
    %4 = arith.select %3, %c1_i32, %c2_i32 : i32
    %5 = arith.remsi %arg1, %4 : i32
    %c0_i32_2 = arith.constant 0 : i32
    %6 = arith.cmpi ne, %5, %c0_i32_2 : i32
    %c0_i32_3 = arith.constant 0 : i32
    %7 = arith.cmpi slt, %5, %c0_i32_3 : i32
    %c0_i32_4 = arith.constant 0 : i32
    %8 = arith.cmpi slt, %4, %c0_i32_4 : i32
    %9 = arith.xori %7, %8 : i1
    %10 = arith.andi %9, %6 : i1
    %11 = arith.addi %5, %4 : i32
    %12 = arith.select %10, %11, %5 : i32
    %c1_i32_5 = arith.constant 1 : i32
    %13 = arith.subi %c1_i32_5, %12 : i32
    %14 = arith.sitofp %13 : i32 to f32
    %cst = arith.constant 1.000000e+00 : f32
    %15 = arith.subf %cst, %14 : f32
    %c0 = arith.constant 0 : index
    %c0_6 = arith.constant 0 : index
    %16 = vector.load %arg15[%c0, %c0_6] : memref<8x392xf32, #tpu.memory_space<vmem>>, vector<8x392xf32>
    %c0_7 = arith.constant 0 : index
    %c0_8 = arith.constant 0 : index
    %17 = vector.load %arg16[%c0_7, %c0_8] : memref<8x392xf32, #tpu.memory_space<vmem>>, vector<8x392xf32>
    %18 = vector.broadcast %14 : f32 to vector<8x392xf32>
    %19 = arith.mulf %18, %16 : vector<8x392xf32>
    %20 = vector.broadcast %15 : f32 to vector<8x392xf32>
    %21 = arith.mulf %20, %17 : vector<8x392xf32>
    %22 = arith.addf %19, %21 : vector<8x392xf32>
    %23 = arith.truncf %22 : vector<8x392xf32> to vector<8x392xbf16>
    %c0_9 = arith.constant 0 : index
    %c0_10 = arith.constant 0 : index
    %c0_11 = arith.constant 0 : index
    %24 = vector.load %arg6[%c0_9, %c0_10, %c0_11] : memref<1x392x1024xbf16, #tpu.memory_space<vmem>>, vector<1x392x1024xbf16>
    %25 = vector.shape_cast %24 : vector<1x392x1024xbf16> to vector<392x1024xbf16>
    %cst_12 = arith.constant dense<0.000000e+00> : vector<8x1024xf32>
    %26 = tpu.matmul %23, %25, %cst_12 {dimension_numbers = #tpu.dot_dimension_numbers<[1], [0], [0], [1], [0, 0, 1, 1], [], []>} : vector<8x392xbf16>, vector<392x1024xbf16>, vector<8x1024xf32> -> vector<8x1024xf32>
    %c0_13 = arith.constant 0 : index
    %c0_14 = arith.constant 0 : index
    %c0_15 = arith.constant 0 : index
    %27 = vector.load %arg7[%c0_13, %c0_14, %c0_15] : memref<1x1x1024xf32, #tpu.memory_space<vmem>>, vector<1x1x1024xf32>
    %28 = vector.shape_cast %27 : vector<1x1x1024xf32> to vector<1x1024xf32>
    %29 = vector.broadcast %28 : vector<1x1024xf32> to vector<8x1024xf32>
    %30 = arith.addf %26, %29 : vector<8x1024xf32>
    %cst_16 = arith.constant 0.000000e+00 : f32
    %31 = vector.broadcast %cst_16 : f32 to vector<8x1024xf32>
    %32 = arith.maximumf %30, %31 : vector<8x1024xf32>
    %33 = arith.truncf %32 : vector<8x1024xf32> to vector<8x1024xbf16>
    %c0_17 = arith.constant 0 : index
    %c0_18 = arith.constant 0 : index
    %c0_19 = arith.constant 0 : index
    %34 = vector.load %arg8[%c0_17, %c0_18, %c0_19] : memref<1x1024x1024xbf16, #tpu.memory_space<vmem>>, vector<1x1024x1024xbf16>
    %35 = vector.shape_cast %34 : vector<1x1024x1024xbf16> to vector<1024x1024xbf16>
    %cst_20 = arith.constant dense<0.000000e+00> : vector<8x1024xf32>
    %36 = tpu.matmul %33, %35, %cst_20 {dimension_numbers = #tpu.dot_dimension_numbers<[1], [0], [0], [1], [0, 0, 1, 1], [], []>} : vector<8x1024xbf16>, vector<1024x1024xbf16>, vector<8x1024xf32> -> vector<8x1024xf32>
    %c0_21 = arith.constant 0 : index
    %c0_22 = arith.constant 0 : index
    %c0_23 = arith.constant 0 : index
    %37 = vector.load %arg9[%c0_21, %c0_22, %c0_23] : memref<1x1x1024xf32, #tpu.memory_space<vmem>>, vector<1x1x1024xf32>
    %38 = vector.shape_cast %37 : vector<1x1x1024xf32> to vector<1x1024xf32>
    %39 = vector.broadcast %38 : vector<1x1024xf32> to vector<8x1024xf32>
    %40 = arith.addf %36, %39 : vector<8x1024xf32>
    %cst_24 = arith.constant 0.000000e+00 : f32
    %41 = vector.broadcast %cst_24 : f32 to vector<8x1024xf32>
    %42 = arith.maximumf %40, %41 : vector<8x1024xf32>
    %43 = arith.truncf %42 : vector<8x1024xf32> to vector<8x1024xbf16>
    %c0_25 = arith.constant 0 : index
    %c0_26 = arith.constant 0 : index
    %c0_27 = arith.constant 0 : index
    %44 = vector.load %arg10[%c0_25, %c0_26, %c0_27] : memref<1x1024x392xbf16, #tpu.memory_space<vmem>>, vector<1x1024x392xbf16>
    %45 = vector.shape_cast %44 : vector<1x1024x392xbf16> to vector<1024x392xbf16>
    %cst_28 = arith.constant dense<0.000000e+00> : vector<8x392xf32>
    %46 = tpu.matmul %43, %45, %cst_28 {dimension_numbers = #tpu.dot_dimension_numbers<[1], [0], [0], [1], [0, 0, 1, 1], [], []>} : vector<8x1024xbf16>, vector<1024x392xbf16>, vector<8x392xf32> -> vector<8x392xf32>
    %c0_29 = arith.constant 0 : index
    %c0_30 = arith.constant 0 : index
    %c0_31 = arith.constant 0 : index
    %47 = vector.load %arg11[%c0_29, %c0_30, %c0_31] : memref<1x1x392xf32, #tpu.memory_space<vmem>>, vector<1x1x392xf32>
    %48 = vector.shape_cast %47 : vector<1x1x392xf32> to vector<1x392xf32>
    %49 = vector.broadcast %48 : vector<1x392xf32> to vector<8x392xf32>
    %50 = arith.addf %46, %49 : vector<8x392xf32>
    %c0_32 = arith.constant 0 : index
    %c0_33 = arith.constant 0 : index
    %c0_34 = arith.constant 0 : index
    %51 = vector.load %arg12[%c0_32, %c0_33, %c0_34] : memref<1x1024x392xbf16, #tpu.memory_space<vmem>>, vector<1x1024x392xbf16>
    %52 = vector.shape_cast %51 : vector<1x1024x392xbf16> to vector<1024x392xbf16>
    %cst_35 = arith.constant dense<0.000000e+00> : vector<8x392xf32>
    %53 = tpu.matmul %43, %52, %cst_35 {dimension_numbers = #tpu.dot_dimension_numbers<[1], [0], [0], [1], [0, 0, 1, 1], [], []>} : vector<8x1024xbf16>, vector<1024x392xbf16>, vector<8x392xf32> -> vector<8x392xf32>
    %c0_36 = arith.constant 0 : index
    %c0_37 = arith.constant 0 : index
    %c0_38 = arith.constant 0 : index
    %54 = vector.load %arg13[%c0_36, %c0_37, %c0_38] : memref<1x1x392xf32, #tpu.memory_space<vmem>>, vector<1x1x392xf32>
    %55 = vector.shape_cast %54 : vector<1x1x392xf32> to vector<1x392xf32>
    %56 = vector.broadcast %55 : vector<1x392xf32> to vector<8x392xf32>
    %57 = arith.addf %53, %56 : vector<8x392xf32>
    %58 = math.tanh %50 : vector<8x392xf32>
    %59 = vector.broadcast %14 : f32 to vector<8x392xf32>
    %60 = arith.mulf %59, %17 : vector<8x392xf32>
    %61 = vector.broadcast %15 : f32 to vector<8x392xf32>
    %62 = arith.mulf %61, %16 : vector<8x392xf32>
    %63 = arith.addf %60, %62 : vector<8x392xf32>
    %64 = math.exp %58 : vector<8x392xf32>
    %65 = arith.mulf %63, %64 : vector<8x392xf32>
    %66 = arith.addf %65, %57 : vector<8x392xf32>
    %67 = vector.broadcast %14 : f32 to vector<8x392xf32>
    %68 = arith.mulf %67, %16 : vector<8x392xf32>
    %69 = vector.broadcast %15 : f32 to vector<8x392xf32>
    %70 = arith.mulf %69, %66 : vector<8x392xf32>
    %71 = arith.addf %68, %70 : vector<8x392xf32>
    %c0_39 = arith.constant 0 : index
    %c0_40 = arith.constant 0 : index
    %72 = vector.load %arg15[%c0_39, %c0_40] : memref<8x392xf32, #tpu.memory_space<vmem>>, vector<8x392xf32>
    tpu.vector_store %arg15[%c0_39, %c0_40], %71 {strides = array<i32>} : memref<8x392xf32, #tpu.memory_space<vmem>>, vector<8x392xf32>,
    %73 = vector.broadcast %14 : f32 to vector<8x392xf32>
    %74 = arith.mulf %73, %66 : vector<8x392xf32>
    %75 = vector.broadcast %15 : f32 to vector<8x392xf32>
    %76 = arith.mulf %75, %17 : vector<8x392xf32>
    %77 = arith.addf %74, %76 : vector<8x392xf32>
    %c0_41 = arith.constant 0 : index
    %c0_42 = arith.constant 0 : index
    %78 = vector.load %arg16[%c0_41, %c0_42] : memref<8x392xf32, #tpu.memory_space<vmem>>, vector<8x392xf32>
    tpu.vector_store %arg16[%c0_41, %c0_42], %77 {strides = array<i32>} : memref<8x392xf32, #tpu.memory_space<vmem>>, vector<8x392xf32>,
    %c0_43 = arith.constant 0 : index
    %c0_44 = arith.constant 0 : index
    %79 = vector.load %arg17[%c0_43, %c0_44] : memref<8x1xf32, #tpu.memory_space<vmem>>, vector<8x1xf32>
    %cst_45 = arith.constant dense<0.000000e+00> : vector<8xf32>
    %80 = vector.multi_reduction <add>, %58, %cst_45 [1] : vector<8x392xf32> to vector<8xf32>
    %81 = vector.shape_cast %80 : vector<8xf32> to vector<8x1xf32>
    %82 = arith.addf %79, %81 : vector<8x1xf32>
    %c0_46 = arith.constant 0 : index
    %c0_47 = arith.constant 0 : index
    %83 = vector.load %arg17[%c0_46, %c0_47] : memref<8x1xf32, #tpu.memory_space<vmem>>, vector<8x1xf32>
    tpu.vector_store %arg17[%c0_46, %c0_47], %82 {strides = array<i32>} : memref<8x1xf32, #tpu.memory_space<vmem>>, vector<8x1xf32>,
    %c7_i32 = arith.constant 7 : i32
    %84 = arith.cmpi eq, %arg1, %c7_i32 : i32
    %85 = arith.extui %84 : i1 to i32
    %c0_i32_48 = arith.constant 0 : i32
    %86 = arith.cmpi ne, %85, %c0_i32_48 : i32
    scf.if %86 {
      %c0_49 = arith.constant 0 : index
      %c0_50 = arith.constant 0 : index
      %87 = vector.load %arg15[%c0_49, %c0_50] : memref<8x392xf32, #tpu.memory_space<vmem>>, vector<8x392xf32>
      %c0_51 = arith.constant 0 : index
      %c0_52 = arith.constant 0 : index
      %88 = vector.load %arg16[%c0_51, %c0_52] : memref<8x392xf32, #tpu.memory_space<vmem>>, vector<8x392xf32>
      %cst_53 = arith.constant -5.000000e-01 : f32
      %89 = vector.broadcast %cst_53 : f32 to vector<8x392xf32>
      %90 = arith.mulf %89, %87 : vector<8x392xf32>
      %91 = arith.mulf %90, %87 : vector<8x392xf32>
      %cst_54 = arith.constant dense<0.000000e+00> : vector<8xf32>
      %92 = vector.multi_reduction <add>, %91, %cst_54 [1] : vector<8x392xf32> to vector<8xf32>
      %93 = vector.shape_cast %92 : vector<8xf32> to vector<8x1xf32>
      %cst_55 = arith.constant -5.000000e-01 : f32
      %94 = vector.broadcast %cst_55 : f32 to vector<8x392xf32>
      %95 = arith.mulf %94, %88 : vector<8x392xf32>
      %96 = arith.mulf %95, %88 : vector<8x392xf32>
      %cst_56 = arith.constant dense<0.000000e+00> : vector<8xf32>
      %97 = vector.multi_reduction <add>, %96, %cst_56 [1] : vector<8x392xf32> to vector<8xf32>
      %98 = vector.shape_cast %97 : vector<8xf32> to vector<8x1xf32>
      %99 = arith.addf %93, %98 : vector<8x1xf32>
      %cst_57 = arith.constant 720.447815 : f32
      %100 = vector.broadcast %cst_57 : f32 to vector<8x1xf32>
      %101 = arith.subf %99, %100 : vector<8x1xf32>
      %c0_58 = arith.constant 0 : index
      %c0_59 = arith.constant 0 : index
      %102 = vector.load %arg17[%c0_58, %c0_59] : memref<8x1xf32, #tpu.memory_space<vmem>>, vector<8x1xf32>
      %103 = arith.addf %101, %102 : vector<8x1xf32>
      %c0_60 = arith.constant 0 : index
      %c0_61 = arith.constant 0 : index
      %104 = vector.load %arg14[%c0_60, %c0_61] : memref<8x1xf32, #tpu.memory_space<vmem>>, vector<8x1xf32>
      tpu.vector_store %arg14[%c0_60, %c0_61], %103 {strides = array<i32>} : memref<8x1xf32, #tpu.memory_space<vmem>>, vector<8x1xf32>,
    } else {
    }
    return
  }
  func.func @transform_0(%arg0: i32, %arg1: i32) -> (i32, i32) {
    %c0_i32 = arith.constant 0 : i32
    %c0_i32_0 = arith.constant 0 : i32
    return %arg0, %c0_i32 : i32, i32
  }
  func.func @transform_1(%arg0: i32, %arg1: i32) -> (i32, i32) {
    %c0_i32 = arith.constant 0 : i32
    %c0_i32_0 = arith.constant 0 : i32
    return %arg0, %c0_i32 : i32, i32
  }
  func.func @transform_2(%arg0: i32, %arg1: i32) -> (i32, i32) {
    %c0_i32 = arith.constant 0 : i32
    %c0_i32_0 = arith.constant 0 : i32
    return %arg0, %c0_i32 : i32, i32
  }
  func.func @transform_3(%arg0: i32, %arg1: i32) -> (i32, i32) {
    %c0_i32 = arith.constant 0 : i32
    %c0_i32_0 = arith.constant 0 : i32
    return %arg0, %c0_i32 : i32, i32
  }
  func.func @transform_4(%arg0: i32, %arg1: i32) -> (i32, i32, i32) {
    %c0_i32 = arith.constant 0 : i32
    %c0_i32_0 = arith.constant 0 : i32
    %c0_i32_1 = arith.constant 0 : i32
    return %arg1, %c0_i32, %c0_i32_0 : i32, i32, i32
  }
  func.func @transform_5(%arg0: i32, %arg1: i32) -> (i32, i32, i32) {
    %c0_i32 = arith.constant 0 : i32
    %c0_i32_0 = arith.constant 0 : i32
    %c0_i32_1 = arith.constant 0 : i32
    return %arg1, %c0_i32, %c0_i32_0 : i32, i32, i32
  }
  func.func @transform_6(%arg0: i32, %arg1: i32) -> (i32, i32, i32) {
    %c0_i32 = arith.constant 0 : i32
    %c0_i32_0 = arith.constant 0 : i32
    %c0_i32_1 = arith.constant 0 : i32
    return %arg1, %c0_i32, %c0_i32_0 : i32, i32, i32
  }
  func.func @transform_7(%arg0: i32, %arg1: i32) -> (i32, i32, i32) {
    %c0_i32 = arith.constant 0 : i32
    %c0_i32_0 = arith.constant 0 : i32
    %c0_i32_1 = arith.constant 0 : i32
    return %arg1, %c0_i32, %c0_i32_0 : i32, i32, i32
  }
  func.func @transform_8(%arg0: i32, %arg1: i32) -> (i32, i32, i32) {
    %c0_i32 = arith.constant 0 : i32
    %c0_i32_0 = arith.constant 0 : i32
    %c0_i32_1 = arith.constant 0 : i32
    return %arg1, %c0_i32, %c0_i32_0 : i32, i32, i32
  }
  func.func @transform_9(%arg0: i32, %arg1: i32) -> (i32, i32, i32) {
    %c0_i32 = arith.constant 0 : i32
    %c0_i32_0 = arith.constant 0 : i32
    %c0_i32_1 = arith.constant 0 : i32
    return %arg1, %c0_i32, %c0_i32_0 : i32, i32, i32
  }
  func.func @transform_10(%arg0: i32, %arg1: i32) -> (i32, i32, i32) {
    %c0_i32 = arith.constant 0 : i32
    %c0_i32_0 = arith.constant 0 : i32
    %c0_i32_1 = arith.constant 0 : i32
    return %arg1, %c0_i32, %c0_i32_0 : i32, i32, i32
  }
  func.func @transform_11(%arg0: i32, %arg1: i32) -> (i32, i32, i32) {
    %c0_i32 = arith.constant 0 : i32
    %c0_i32_0 = arith.constant 0 : i32
    %c0_i32_1 = arith.constant 0 : i32
    return %arg1, %c0_i32, %c0_i32_0 : i32, i32, i32
  }
  func.func @transform_12(%arg0: i32, %arg1: i32) -> (i32, i32) {
    %c0_i32 = arith.constant 0 : i32
    %c0_i32_0 = arith.constant 0 : i32
    return %arg0, %c0_i32 : i32, i32
  }
}

</mosaic_0001>

<bundles_post_ra>
// kernel: tpu_custom_call.1
= control target key start
LH: loop header
LB: loop body
LE: loop exit
PB: predicated region body
PF: predicated region fallthrough
CT: control target
= control target key end

     0   :  { %s15245_s0 = inlined_call_operand.hbm [shape: f32[8,392], index: 0, kind: input, shape index: {}]   ;;  %s15246_s1 = inlined_call_operand.hbm [shape: f32[8,392], index: 1, kind: input, shape index: {}]   ;;  %s15247_s2 = inlined_call_operand.hbm [shape: f32[8,392], index: 2, kind: input, shape index: {}]   ;;  %s15248_s3 = inlined_call_operand.hbm [shape: f32[8,392], index: 3, kind: input, shape index: {}]   ;;  %s15249_s4 = inlined_call_operand.hbm [shape: bf16[8,392,1024], index: 4, kind: input, shape index: {}]   ;;  %s15250_s5 = inlined_call_operand.hbm [shape: f32[8,1,1024], index: 5, kind: input, shape index: {}]   ;;  %s15251_s6 = inlined_call_operand.hbm [shape: bf16[8,1024,1024], index: 6, kind: input, shape index: {}]   ;;  %s15252_s7 = inlined_call_operand.hbm [shape: f32[8,1,1024], index: 7, kind: input, shape index: {}]   ;;  %s15253_s8 = inlined_call_operand.vmem [shape: bf16[8,1024,392], index: 8, kind: input, shape index: {}]   ;;  %s15254_s9 = inlined_call_operand.hbm [shape: f32[8,1,392], index: 9, kind: input, shape index: {}]   ;;  %s15255_s10 = inlined_call_operand.vmem [shape: bf16[8,1024,392], index: 10, kind: input, shape index: {}]   ;;  %s15256_s11 = inlined_call_operand.hbm [shape: f32[8,1,392], index: 11, kind: input, shape index: {}]   ;;  %s15257_s12 = inlined_call_operand.hbm [shape: f32[8,1], index: 12, kind: output, shape index: {}]  }
   0x1   :  { %15280 = sst [smem:[#allocation31_spill]] %s15245_s0 }
   0x2   :  { %15281 = sst [smem:[#allocation32_spill]] %s15249_s4 }
   0x3   :  { %15282 = sst [smem:[#allocation33_spill]] %s15253_s8 }
   0x4   :  { %15283 = sst [smem:[#allocation34_spill]] %s15255_s10 }
   0x5   :  { %15284 = sst [smem:[#allocation35_spill]] %s15257_s12 }
   0x6   :  { %17 = vsyncpa [#allocation6], 0 }
   0x7   :  { %18 = vsyncpa [#allocation9], 0 }
   0x8   :  { %19 = vsyncpa [#allocation12], 0 }
   0x9   :  { %20 = vsyncpa [#allocation7], 0  ;;  %s13243_s21 = smov 0   ;;  %s13245_s22 = smov 0  }
   0xa   :  { %s13247_s23 = smov 0   ;;  %s13249_s24 = smov 0  }
   0xb   :  { %s13251_s25 = smov 0   ;;  %s13253_s26 = smov 0  }
   0xc LB: > { %15285 = sst [smem:[#allocation25_spill]] %s13151_s23  ;;  %s13272_s27 = sadd.s32 4294967295, %s13163_s26   ;;  %s13163_s26 = sphi %s13253_s26, %s26_s26   ;;  %s13159_s25 = sphi %s13251_s25, %s15340_s25   ;;  %s13155_s24 = sphi %s13249_s24, %s15339_s24   ;;  %s13151_s23 = sphi %s13247_s23, %s15335_s23   ;;  %s13147_s22 = sphi %s13245_s22, %s15338_s22   ;;  %s13143_s21 = sphi %s13243_s21, %s15337_s21  }
   0xd   : > { %15286 = sst [smem:[#allocation26_spill]] %s13155_s24  ;;  %p156_p0 = scmp.ne.s32.totalorder %s13151_s23, %s13147_s22 }
   0xe   : > { %15287 = sst [smem:[#allocation27_spill]] %s13163_s26  ;;  %p157_p1 = scmp.eq.s32.totalorder %s13163_s26, 0 }
   0xf   : > { %p162_p2 = scmp.ne.s32.totalorder %s13147_s22, %s13143_s21  ;;  %p15261_p3 = scmp.eq.s32.totalorder %s13272_s27, 0 }
  0x10   : > { %p13280_p4 = por %p157_p1, %p156_p0  ;;  %p10419_p5 = scmp.ge.s32.totalorder %s13163_s26, 1 }
  0x11   : > { %p13287_p6 = por %p15261_p3, %p162_p2  ;;  %p381_p7 = scmp.lt.s32.totalorder %s13163_s26, 9 }
  0x12   : > { %s15288_s29 = scalar_select %p13280_p4, 1, 0 }
  0x13   : > { %s15289_s30 = scalar_select %p13287_p6, 1, 0 }
  0x14   : > { %p13292_p8 = pnand %p10419_p5, %p381_p7  ;;  %s13165_s14 = smov [#allocation5]  }
  0x15   : > { %15290 = sst [smem:[#allocation28_spill]] %s15289_s30  ;;  %s397_s15 = sshll.u32 %s13165_s14, 4  ;;  %s398_s15 = int_to_ptr.vmem [resolvable:$true] %s397_s15 }
  0x16   : > { %s15291_s13 = scalar_select %p13292_p8, 1, 0 }
  0x17   : > { %p11847_p9 = pneg %p13292_p8  ;;  %s35_s17 = sadd.s32 1, %s13159_s25 }
  0x18   : > { %p13306_p12 = scmp.ge.s32.totalorder %s35_s17, 8  ;;  %s15294_s0 = sld [smem:[#allocation31_spill]] }
  0x19   : > { %p13301_p11 = pnand %p11847_p9, %p15261_p3 }
  0x1a   : > { %s15293_s18 = scalar_select %p13306_p12, 1, 0 }
  0x1b   : > { %s15292_s16 = scalar_select %p13301_p11, 1, 0 }
  0x1c   : > { %p13319_p0 = pneg %p13301_p11 }
  0x1e   : > { %s12779_s14 = scalar_lea.hbm %s15294_s0, 512 }
  0x1f   : > { %p12780_p13 = scmp.ne.s32.totalorder %s15294_s0, %s12779_s14  ;;  %p12786_p5 = scmp.lt.u32.totalorder %s12779_s14, %s15294_s0 }
  0x20   : > { %s15295_s10 = scalar_select %p13319_p0, 1, 0 }
  0x21   : > { %p12782_p1 = pnand %p13319_p0, %p12780_p13 }
  0x23   : > { %p12783_p2 = pneg %p12782_p1 }
  0x25   : > { %p12788_p7 = pnand %p12786_p5, %p12783_p2 }
  0x27   : > { %12791 = shalt.err (!%p12788_p7)
}
  0x28   : > { %s12792_s20 = scalar_lea.vmem %s398_s15, 512  ;;  %p12800_p6 = scmp.lt.s32.totalorder %s398_s15, %s398_s15 }
  0x29   : > { %p12793_p9 = scmp.ne.s32.totalorder %s398_s15, %s12792_s20  ;;  %p12801_p8 = scmp.lt.s32.totalorder %s12792_s20, %s12792_s20 }
  0x2b   : > { %p12795_p3 = pnand %p12793_p9, %p13319_p0  ;;  %p12802_p4 = por %p12801_p8, %p12800_p6 }
  0x2d   : > { %p12796_p10 = pneg %p12795_p3 }
  0x2f   : > { %p12803_p12 = pnand %p12802_p4, %p12796_p10 }
  0x31   : > { %12806 = shalt.err (!%p12803_p12)
}
  0x32   : > { %11850 = dma.hbm_to_vmem [thread:$0]  (!%p13301_p11), %s15294_s0, 512, %s398_s15, [#allocation6]  }
  0x33   : > { %p15296_p3 = scmp.ne.s32.totalorder %s15293_s18, 0  ;;  %s13340_s8 = sand.u32 1, %s13151_s23  }
  0x34   : > { %s11813_s24 = smul.u32 25088, %s13159_s25  ;;  %s15298_s4 = sld [smem:[#allocation32_spill]] }
  0x35   : > { %s15342_s17 = smov (%p15296_p3, %s35_s17), 0  ;;  %s11812_s14 = smul.u32 1568, %s13340_s8 }
  0x36   : > { %15297 = sst [smem:[#allocation29_spill]] %s15342_s17  ;;  %s146_s21 = ssub.s32 %s13159_s25, %s15342_s17 }
  0x37   : > { %p147_p4 = scmp.eq.s32.totalorder %s146_s21, 0  ;;  %p15299_p6 = scmp.ne.s32.totalorder %s15288_s29, 0 }
  0x38   : > { %p15300_p8 = scmp.lt.s32.totalorder %s13163_s26, 8  ;;  %s15302_s18 = sadd.s32 1, %s13151_s23 }
  0x39   : > { %s13362_s19 = scalar_select %p147_p4, %s13151_s23, %s15302_s18  }
  0x3a   : > { %s13349_s28 = scalar_lea.hbm %s15298_s4, %s11813_s24  ;;  %p13355_p10 = pnand %p15300_p8, %p15299_p6 }
  0x3b   : > { %15303 = sst [smem:[#allocation30_spill]] %s13362_s19  ;;  %s454_s21 = scalar_lea.vmem [#allocation13], %s11812_s14 }
  0x3c   : > { %s15301_s15 = scalar_select %p13355_p10, 1, 0 }
  0x3d   : > { %s461_s0 = sshll.u32 %s454_s21, 4  ;;  %s15304_s20 = sand.u32 1, %s13163_s26   ;;  %s13364_s0 = int_to_ptr.vmem [resolvable:$true] %s461_s0 }
  0x3e   : > { %s13369_s29 = scalar_lea.sflag [#allocation6], %s15304_s20  ;;  %s12807_s12 = scalar_lea.hbm %s13349_s28, 25088 }
  0x3f   : > { %p12808_p12 = scmp.ne.s32.totalorder %s13349_s28, %s12807_s12  ;;  %p13375_p13 = pneg %p13355_p10 }
  0x40   : > { %s12812_s21 = scalar_lea.hbm %s15298_s4, 200704  ;;  %p12813_p5 = scmp.lt.u32.totalorder %s13349_s28, %s15298_s4 }
  0x41   : > { %p12810_p1 = pnand %p13375_p13, %p12808_p12  ;;  %p12814_p7 = scmp.lt.u32.totalorder %s12812_s21, %s12807_s12 }
  0x42   : > { %p12816_p3 = scmp.lt.u32.totalorder %s12807_s12, %s13349_s28 }
  0x43   : > { %p12811_p2 = pneg %p12810_p1  ;;  %p12815_p9 = por %p12814_p7, %p12813_p5 }
  0x45   : > { %p12817_p4 = por %p12816_p3, %p12815_p9 }
  0x47   : > { %p12818_p6 = pnand %p12817_p4, %p12811_p2 }
  0x49   : > { %12821 = shalt.err (!%p12818_p6)
}
  0x4a   : > { %s12822_s20 = scalar_lea.vmem %s13364_s0, 25088  ;;  %s13166_s18 = smov [#allocation13]  }
  0x4b   : > { %p12823_p8 = scmp.ne.s32.totalorder %s13364_s0, %s12822_s20  ;;  %s12827_s14 = sshll.u32 %s13166_s18, 4  ;;  %s12828_s14 = int_to_ptr.vmem [resolvable:$false] %s12827_s14 }
  0x4c   : > { %s12829_s19 = scalar_lea.vmem %s12828_s14, 50176  ;;  %p12830_p11 = scmp.lt.s32.totalorder %s13364_s0, %s12828_s14 }
  0x4d   : > { %p12825_p12 = pnand %p12823_p8, %p13375_p13  ;;  %p12831_p0 = scmp.lt.s32.totalorder %s12829_s19, %s12822_s20 }
  0x4f   : > { %p12826_p1 = pneg %p12825_p12  ;;  %p12832_p5 = por %p12831_p0, %p12830_p11 }
  0x51   : > { %p12833_p7 = pnand %p12832_p5, %p12826_p1 }
  0x53   : > { %12836 = shalt.err (!%p12833_p7)
}
  0x54   : > { %s15274_s24 = smov 512   ;;  %s13168_s12 = smov 32  }
  0x55   : > { %11863 = dma.hbm_to_vmem [thread:$0]  (!%p13355_p10), %s13349_s28, 25088, %s13364_s0, %s13369_s29, %s15274_s24, %s15274_s24, %s13168_s12  }
  0x56   : > { %s15273_s21 = sshll.u32 %s13159_s25, 7  ;;  %s15306_s19 = sshll.u32 %s13340_s8, 3 }
  0x57   : > { %s13408_s14 = scalar_lea.hbm %s15250_s5, %s15273_s21  ;;  %s475_s4 = scalar_lea.vmem [#allocation14], %s15306_s19 }
  0x58   : > { %s483_s23 = sshll.u32 %s475_s4, 4  ;;  %s10429_s26 = sshll.u32 %s13340_s8, 12  ;;  %s484_s23 = int_to_ptr.vmem [resolvable:$true] %s483_s23 }
  0x59   : > { %s12837_s30 = scalar_lea.hbm %s13408_s14, 128  ;;  %s12842_s20 = scalar_lea.hbm %s15250_s5, 1024 }
  0x5a   : > { %p12838_p11 = scmp.ne.s32.totalorder %s13408_s14, %s12837_s30  ;;  %p12843_p9 = scmp.lt.u32.totalorder %s13408_s14, %s15250_s5 }
  0x5b   : > { %p12844_p3 = scmp.lt.u32.totalorder %s12842_s20, %s12837_s30  ;;  %p12846_p6 = scmp.lt.u32.totalorder %s12837_s30, %s13408_s14 }
  0x5c   : > { %p12840_p0 = pnand %p12838_p11, %p13375_p13 }
  0x5d   : > { %p12845_p4 = por %p12844_p3, %p12843_p9 }
  0x5e   : > { %p12841_p2 = pneg %p12840_p0 }
  0x5f   : > { %p12847_p8 = por %p12846_p6, %p12845_p4 }
  0x61   : > { %p12848_p12 = pnand %p12847_p8, %p12841_p2 }
  0x63   : > { %12851 = shalt.err (!%p12848_p12)
}
  0x64   : > { %s12852_s4 = scalar_lea.vmem %s484_s23, 128  ;;  %s13169_s19 = smov [#allocation14]  }
  0x65   : > { %p12853_p1 = scmp.ne.s32.totalorder %s484_s23, %s12852_s4  ;;  %s12857_s24 = sshll.u32 %s13169_s19, 4  ;;  %s12858_s24 = int_to_ptr.vmem [resolvable:$false] %s12857_s24 }
  0x66   : > { %s12859_s0 = scalar_lea.vmem %s12858_s24, 256  ;;  %p12860_p11 = scmp.lt.s32.totalorder %s484_s23, %s12858_s24 }
  0x67   : > { %p12855_p5 = pnand %p12853_p1, %p13375_p13  ;;  %p12861_p0 = scmp.lt.s32.totalorder %s12859_s0, %s12852_s4 }
  0x69   : > { %p12856_p7 = pneg %p12855_p5  ;;  %p12862_p10 = por %p12861_p0, %p12860_p11 }
  0x6b   : > { %p12863_p3 = pnand %p12862_p10, %p12856_p7 }
  0x6d   : > { %12866 = shalt.err (!%p12863_p3)
}
  0x6e   : > { %p15307_p9 = scmp.ne.s32.totalorder %s15301_s15, 0  ;;  %s11698_s30 = sshll.u32 %s13159_s25, 16 }
  0x6f   : > { %s13435_s20 = scalar_lea.hbm %s15251_s6, %s11698_s30  ;;  %s494_s24 = scalar_lea.vmem [#allocation15], %s10429_s26 }
  0x70   : > { %11866 = dma.hbm_to_vmem [thread:$0]  (!%p15307_p9), %s13408_s14, 128, %s484_s23, %s13369_s29  }
  0x71   : > { %s501_s18 = sshll.u32 %s494_s24, 4  ;;  %s12867_s4 = scalar_lea.hbm %s13435_s20, 65536  ;;  %s13439_s18 = int_to_ptr.vmem [resolvable:$true] %s501_s18 }
  0x72   : > { %p12868_p10 = scmp.ne.s32.totalorder %s13435_s20, %s12867_s4  ;;  %s12872_s19 = scalar_lea.hbm %s15251_s6, 524288 }
  0x73   : > { %p12873_p6 = scmp.lt.u32.totalorder %s13435_s20, %s15251_s6  ;;  %p12874_p8 = scmp.lt.u32.totalorder %s12872_s19, %s12867_s4 }
  0x74   : > { %p12870_p2 = pnand %p12868_p10, %p13375_p13  ;;  %p12876_p1 = scmp.lt.u32.totalorder %s12867_s4, %s13435_s20 }
  0x75   : > { %p12875_p12 = por %p12874_p8, %p12873_p6 }
  0x76   : > { %p12871_p4 = pneg %p12870_p2 }
  0x77   : > { %p12877_p5 = por %p12876_p1, %p12875_p12 }
  0x79   : > { %p12878_p7 = pnand %p12877_p5, %p12871_p4 }
  0x7b   : > { %12881 = shalt.err (!%p12878_p7)
}
  0x7c   : > { %s12882_s26 = scalar_lea.vmem %s13439_s18, 65536  ;;  %s13170_s21 = smov [#allocation15]  }
  0x7d   : > { %p12883_p11 = scmp.ne.s32.totalorder %s13439_s18, %s12882_s26  ;;  %s12887_s28 = sshll.u32 %s13170_s21, 4  ;;  %s12888_s28 = int_to_ptr.vmem [resolvable:$false] %s12887_s28 }
  0x7e   : > { %s12889_s24 = scalar_lea.vmem %s12888_s28, 131072  ;;  %p12890_p10 = scmp.lt.s32.totalorder %s13439_s18, %s12888_s28 }
  0x7f   : > { %p12885_p0 = pnand %p12883_p11, %p13375_p13  ;;  %p12891_p2 = scmp.lt.s32.totalorder %s12889_s24, %s12882_s26 }
  0x81   : > { %p12886_p3 = pneg %p12885_p0  ;;  %p12892_p6 = por %p12891_p2, %p12890_p10 }
  0x83   : > { %p12893_p8 = pnand %p12892_p6, %p12886_p3 }
  0x85   : > { %12896 = shalt.err (!%p12893_p8)
}
  0x86   : > { %s15308_s4 = smov 512   ;;  %s15309_s23 = sshll.u32 %s13159_s25, 7 }
  0x87   : > { %11869 = dma.hbm_to_vmem [thread:$0]  (!%p15307_p9), %s13435_s20, 65536, %s13439_s18, %s13369_s29, %s15308_s4, %s15308_s4, %s13168_s12  }
  0x88   : > { %s13471_s0 = scalar_lea.hbm %s15252_s7, %s15309_s23  ;;  %s15310_s30 = sshll.u32 %s13340_s8, 3 }
  0x89   : > { %s515_s26 = scalar_lea.vmem [#allocation16], %s15310_s30  ;;  %s12897_s28 = scalar_lea.hbm %s13471_s0, 128 }
  0x8a   : > { %s523_s21 = sshll.u32 %s515_s26, 4  ;;  %p12898_p4 = scmp.ne.s32.totalorder %s13471_s0, %s12897_s28  ;;  %s524_s21 = int_to_ptr.vmem [resolvable:$true] %s523_s21 }
  0x8b   : > { %s12902_s18 = scalar_lea.hbm %s15252_s7, 1024  ;;  %p12903_p5 = scmp.lt.u32.totalorder %s13471_s0, %s15252_s7 }
  0x8c   : > { %p12900_p12 = pnand %p12898_p4, %p13375_p13  ;;  %p12904_p7 = scmp.lt.u32.totalorder %s12902_s18, %s12897_s28 }
  0x8d   : > { %p12906_p0 = scmp.lt.u32.totalorder %s12897_s28, %s13471_s0 }
  0x8e   : > { %p12901_p1 = pneg %p12900_p12  ;;  %p12905_p11 = por %p12904_p7, %p12903_p5 }
  0x90   : > { %p12907_p3 = por %p12906_p0, %p12905_p11 }
  0x92   : > { %p12908_p10 = pnand %p12907_p3, %p12901_p1 }
  0x94   : > { %12911 = shalt.err (!%p12908_p10)
}
  0x95   : > { %s12912_s23 = scalar_lea.vmem %s524_s21, 128  ;;  %s13171_s14 = smov [#allocation16]  }
  0x96   : > { %p12913_p2 = scmp.ne.s32.totalorder %s524_s21, %s12912_s23  ;;  %s12917_s19 = sshll.u32 %s13171_s14, 4  ;;  %s12918_s19 = int_to_ptr.vmem [resolvable:$false] %s12917_s19 }
  0x97   : > { %s12919_s30 = scalar_lea.vmem %s12918_s19, 256  ;;  %p12920_p4 = scmp.lt.s32.totalorder %s524_s21, %s12918_s19 }
  0x98   : > { %p12915_p6 = pnand %p12913_p2, %p13375_p13  ;;  %p12921_p12 = scmp.lt.s32.totalorder %s12919_s30, %s12912_s23 }
  0x9a   : > { %p12916_p8 = pneg %p12915_p6  ;;  %p12922_p9 = por %p12921_p12, %p12920_p4 }
  0x9c   : > { %p12923_p5 = pnand %p12922_p9, %p12916_p8 }
  0x9e   : > { %12926 = shalt.err (!%p12923_p5)
}
  0x9f   : > { %p15311_p7 = scmp.ne.s32.totalorder %s15301_s15, 0  ;;  %s13172_s26 = smov [#allocation8]  }
  0xa0   : > { %s411_s28 = sshll.u32 %s13172_s26, 4  ;;  %s15279_s12 = sshll.u32 %s13340_s8, 2  ;;  %s412_s28 = int_to_ptr.vmem [resolvable:$true] %s411_s28 }
  0xa1   : > { %11872 = dma.hbm_to_vmem [thread:$0]  (!%p15311_p7), %s13471_s0, 128, %s524_s21, %s13369_s29  }
  0xa2   : > { %s12927_s24 = scalar_lea.hbm %s15246_s1, 512  ;;  %p15312_p1 = scmp.ne.s32.totalorder %s15295_s10, 0 }
  0xa3   : > { %p12928_p9 = scmp.ne.s32.totalorder %s15246_s1, %s12927_s24  ;;  %p12934_p3 = scmp.lt.u32.totalorder %s12927_s24, %s15246_s1 }
  0xa5   : > { %p12930_p11 = pnand %p12928_p9, %p15312_p1 }
  0xa7   : > { %p12931_p0 = pneg %p12930_p11 }
  0xa9   : > { %p12936_p10 = pnand %p12934_p3, %p12931_p0 }
  0xab   : > { %12939 = shalt.err (!%p12936_p10)
}
  0xac   : > { %s12940_s0 = scalar_lea.vmem %s412_s28, 512  ;;  %p12948_p4 = scmp.lt.s32.totalorder %s412_s28, %s412_s28 }
  0xad   : > { %p12941_p2 = scmp.ne.s32.totalorder %s412_s28, %s12940_s0  ;;  %p12949_p12 = scmp.lt.s32.totalorder %s12940_s0, %s12940_s0 }
  0xaf   : > { %p12943_p6 = pnand %p12941_p2, %p15312_p1  ;;  %p12950_p5 = por %p12949_p12, %p12948_p4 }
  0xb1   : > { %p12944_p8 = pneg %p12943_p6 }
  0xb3   : > { %p12951_p7 = pnand %p12950_p5, %p12944_p8 }
  0xb5   : > { %12954 = shalt.err (!%p12951_p7)
}
  0xb6   : > { %p15313_p9 = scmp.ne.s32.totalorder %s15292_s16, 0  ;;  %s11700_s26 = sshll.u32 %s13159_s25, 6 }
  0xb7   : > { %s542_s20 = scalar_lea.vmem [#allocation17], %s15279_s12  ;;  %s548_s23 = scalar_lea.hbm %s15254_s9, %s11700_s26 }
  0xb8   : > { %11853 = dma.hbm_to_vmem [thread:$0]  (!%p15313_p9), %s15246_s1, 512, %s412_s28, [#allocation9]  }
  0xb9   : > { %s550_s18 = sshll.u32 %s542_s20, 4  ;;  %s12955_s14 = scalar_lea.hbm %s548_s23, 64  ;;  %s551_s18 = int_to_ptr.vmem [resolvable:$true] %s550_s18 }
  0xba   : > { %p12956_p7 = scmp.ne.s32.totalorder %s548_s23, %s12955_s14  ;;  %s12960_s21 = scalar_lea.hbm %s15254_s9, 512 }
  0xbb   : > { %p12961_p3 = scmp.lt.u32.totalorder %s548_s23, %s15254_s9  ;;  %p12962_p10 = scmp.lt.u32.totalorder %s12960_s21, %s12955_s14 }
  0xbc   : > { %p12958_p11 = pnand %p12956_p7, %p13375_p13  ;;  %p12964_p6 = scmp.lt.u32.totalorder %s12955_s14, %s548_s23 }
  0xbd   : > { %p12963_p2 = por %p12962_p10, %p12961_p3 }
  0xbe   : > { %p12959_p0 = pneg %p12958_p11 }
  0xbf   : > { %p12965_p8 = por %p12964_p6, %p12963_p2 }
  0xc1   : > { %p12966_p4 = pnand %p12965_p8, %p12959_p0 }
  0xc3   : > { %12969 = shalt.err (!%p12966_p4)
}
  0xc4   : > { %s12970_s20 = scalar_lea.vmem %s551_s18, 64  ;;  %s13173_s24 = smov [#allocation17]  }
  0xc5   : > { %p12971_p12 = scmp.ne.s32.totalorder %s551_s18, %s12970_s20  ;;  %s12975_s4 = sshll.u32 %s13173_s24, 4  ;;  %s12976_s4 = int_to_ptr.vmem [resolvable:$false] %s12975_s4 }
  0xc6   : > { %s12977_s19 = scalar_lea.vmem %s12976_s4, 128  ;;  %p12978_p11 = scmp.lt.s32.totalorder %s551_s18, %s12976_s4 }
  0xc7   : > { %p12973_p5 = pnand %p12971_p12, %p13375_p13  ;;  %p12979_p9 = scmp.lt.s32.totalorder %s12977_s19, %s12970_s20 }
  0xc9   : > { %p12974_p7 = pneg %p12973_p5  ;;  %p12980_p1 = por %p12979_p9, %p12978_p11 }
  0xcb   : > { %p12981_p3 = pnand %p12980_p1, %p12974_p7 }
  0xcd   : > { %12984 = shalt.err (!%p12981_p3)
}
  0xce   : > { %p15314_p10 = scmp.ne.s32.totalorder %s15301_s15, 0  ;;  %s13174_s14 = smov [#allocation10]  }
  0xcf   : > { %s425_s0 = sshll.u32 %s13174_s14, 4  ;;  %s13175_s21 = smov [#allocation11]   ;;  %s426_s0 = int_to_ptr.vmem [resolvable:$true] %s425_s0 }
  0xd0   : > { %11875 = dma.hbm_to_vmem [thread:$0]  (!%p15314_p10), %s548_s23, 64, %s551_s18, %s13369_s29  }
  0xd1   : > { %s439_s28 = sshll.u32 %s13175_s21, 4  ;;  %s12985_s4 = scalar_lea.hbm %s15247_s2, 512  ;;  %s13533_s28 = int_to_ptr.vmem [resolvable:$true] %s439_s28 }
  0xd2   : > { %p12986_p1 = scmp.ne.s32.totalorder %s15247_s2, %s12985_s4  ;;  %p15315_p9 = scmp.ne.s32.totalorder %s15295_s10, 0 }
  0xd3   : > { %p12992_p6 = scmp.lt.u32.totalorder %s12985_s4, %s15247_s2 }
  0xd4   : > { %p12988_p0 = pnand %p12986_p1, %p15315_p9 }
  0xd6   : > { %p12989_p2 = pneg %p12988_p0 }
  0xd8   : > { %p12994_p8 = pnand %p12992_p6, %p12989_p2 }
  0xda   : > { %12997 = shalt.err (!%p12994_p8)
}
  0xdb   : > { %s12998_s23 = scalar_lea.vmem %s426_s0, 512  ;;  %p13006_p7 = scmp.lt.s32.totalorder %s426_s0, %s426_s0 }
  0xdc   : > { %p12999_p4 = scmp.ne.s32.totalorder %s426_s0, %s12998_s23  ;;  %p13007_p11 = scmp.lt.s32.totalorder %s12998_s23, %s12998_s23 }
  0xde   : > { %p13001_p12 = pnand %p12999_p4, %p15315_p9  ;;  %p13008_p3 = por %p13007_p11, %p13006_p7 }
  0xe0   : > { %p13002_p5 = pneg %p13001_p12 }
  0xe2   : > { %p13009_p10 = pnand %p13008_p3, %p13002_p5 }
  0xe4   : > { %13012 = shalt.err (!%p13009_p10)
}
  0xe5   : > { %p15316_p1 = scmp.ne.s32.totalorder %s15292_s16, 0  ;;  %s13013_s24 = scalar_lea.hbm %s15248_s3, 512 }
  0xe6   : > { %p13014_p0 = scmp.ne.s32.totalorder %s15248_s3, %s13013_s24  ;;  %p13020_p10 = scmp.lt.u32.totalorder %s13013_s24, %s15248_s3 }
  0xe7   : > { %11856 = dma.hbm_to_vmem [thread:$0]  (!%p15316_p1), %s15247_s2, 512, %s426_s0, [#allocation9]  }
  0xe8   : > { %p13016_p2 = pnand %p13014_p0, %p15315_p9 }
  0xea   : > { %p13017_p6 = pneg %p13016_p2 }
  0xec   : > { %p13022_p8 = pnand %p13020_p10, %p13017_p6 }
  0xee   : > { %13025 = shalt.err (!%p13022_p8)
}
  0xef   : > { %s13026_s0 = scalar_lea.vmem %s13533_s28, 512  ;;  %p13034_p7 = scmp.lt.s32.totalorder %s13533_s28, %s13533_s28 }
  0xf0   : > { %p13027_p4 = scmp.ne.s32.totalorder %s13533_s28, %s13026_s0  ;;  %p13035_p11 = scmp.lt.s32.totalorder %s13026_s0, %s13026_s0 }
  0xf2   : > { %p13029_p12 = pnand %p13027_p4, %p15315_p9  ;;  %p13036_p3 = por %p13035_p11, %p13034_p7 }
  0xf4   : > { %p13030_p5 = pneg %p13029_p12 }
  0xf6   : > { %p13037_p0 = pnand %p13036_p3, %p13030_p5 }
  0xf8   : > { %13040 = shalt.err (!%p13037_p0)
}
  0xf9   : > { %11859 = dma.hbm_to_vmem [thread:$0]  (!%p15316_p1), %s15248_s3, 512, %s13533_s28, [#allocation12]  }
  0xfa   : > { %s13581_s12 = scalar_lea.hbm %s15256_s11, %s11700_s26  ;;  %s15317_s30 = sshll.u32 %s13340_s8, 2 }
  0xfb   : > { %s569_s16 = scalar_lea.vmem [#allocation18], %s15317_s30  ;;  %s13041_s4 = scalar_lea.hbm %s13581_s12, 64 }
  0xfc   : > { %s577_s24 = sshll.u32 %s569_s16, 4  ;;  %p13042_p9 = scmp.ne.s32.totalorder %s13581_s12, %s13041_s4  ;;  %s578_s24 = int_to_ptr.vmem [resolvable:$true] %s577_s24 }
  0xfd   : > { %s13046_s19 = scalar_lea.hbm %s15256_s11, 512  ;;  %p13047_p1 = scmp.lt.u32.totalorder %s13581_s12, %s15256_s11 }
  0xfe   : > { %p13044_p2 = pnand %p13042_p9, %p13375_p13  ;;  %p13048_p10 = scmp.lt.u32.totalorder %s13046_s19, %s13041_s4 }
  0xff   : > { %p13050_p4 = scmp.lt.u32.totalorder %s13041_s4, %s13581_s12 }
 0x100   : > { %p13045_p6 = pneg %p13044_p2  ;;  %p13049_p8 = por %p13048_p10, %p13047_p1 }
 0x102   : > { %p13051_p12 = por %p13050_p4, %p13049_p8 }
 0x104   : > { %p13052_p5 = pnand %p13051_p12, %p13045_p6 }
 0x106   : > { %13055 = shalt.err (!%p13052_p5)
}
 0x107   : > { %s13056_s8 = scalar_lea.vmem %s578_s24, 64  ;;  %s13176_s0 = smov [#allocation18]  }
 0x108   : > { %p13057_p7 = scmp.ne.s32.totalorder %s578_s24, %s13056_s8  ;;  %s13061_s23 = sshll.u32 %s13176_s0, 4  ;;  %s13062_s23 = int_to_ptr.vmem [resolvable:$false] %s13061_s23 }
 0x109   : > { %s13063_s14 = scalar_lea.vmem %s13062_s23, 128  ;;  %p13064_p0 = scmp.lt.s32.totalorder %s578_s24, %s13062_s23 }
 0x10a   : > { %p13059_p11 = pnand %p13057_p7, %p13375_p13  ;;  %p13065_p9 = scmp.lt.s32.totalorder %s13063_s14, %s13056_s8 }
 0x10c   : > { %p13060_p3 = pneg %p13059_p11  ;;  %p13066_p2 = por %p13065_p9, %p13064_p0 }
 0x10e   : > { %p13067_p1 = pnand %p13066_p2, %p13060_p3 }
 0x110   : > { %13070 = shalt.err (!%p13067_p1)
}
 0x111   : > { %p15318_p10 = scmp.ne.s32.totalorder %s15301_s15, 0  ;;  %p15319_p6 = scmp.ne.s32.totalorder %s15291_s13, 0 }
 0x112   : > { %p15320_p13 = scmp.eq.s32.totalorder (!%p15319_p6), %s13272_s27, 0 }
 0x113   : > { %11878 = dma.hbm_to_vmem [thread:$0]  (!%p15318_p10), %s13581_s12, 64, %s578_s24, %s13369_s29  }
 0x114   : > { %586 = sbr.rel (%p15319_p6) target bundleno = 2231 (0x8b7), region = 68 }
 0x11b   : > { %13122 = dma.done.wait (%p15320_p13), [#allocation6], 512   ;;  %p15321_p8 = pmov %p15320_p13 }
 0x11d   : > { %13124 = vsyncadd (%p15321_p8), [#allocation6], 4294966784  ;;  %p15322_p4 = pmov %p15321_p8 }
 0x11f   : > { %13126 = dma.done.wait (%p15322_p4), [#allocation9], 1024   ;;  %p15323_p12 = pmov %p15322_p4 }
 0x120   : > { %p15324_p5 = pmov %p15322_p4 }
 0x121   : > { %13128 = vsyncadd (%p15323_p12), [#allocation9], 4294966272 }
 0x122   : > { %13130 = dma.done.wait (%p15324_p5), [#allocation12], 512   ;;  %p15325_p7 = pmov %p15322_p4 }
 0x123   : > { %s15326_s13 = sld [smem:[#allocation28_spill]]  ;;  %s604_s17 = sand.u32 1, %s13272_s27  }
 0x124   : > { %13132 = vsyncadd (%p15325_p7), [#allocation12], 4294966784  ;;  %s606_s15 = sand.u32 1, %s13147_s22   ;;  %s605_s10 = scalar_lea.sflag [#allocation6], %s604_s17 }
 0x125   : > { %s11814_s29 = smul.u32 1568, %s606_s15 }
 0x127   : > { %s13619_s21 = scalar_lea.vmem [#allocation13], %s11814_s29 }
 0x129   : > { %p15327_p11 = scmp.ne.s32.totalorder %s15326_s13, 0 }
 0x12b   : > { %13134 = dma.done.wait (%p15327_p11), %s605_s10, 91008  }
 0x12c   : > { %13136 = vsyncadd (%p15327_p11), %s605_s10, 4294876288  ;;  %s15328_s12 = sld [smem:[#allocation26_spill]]  ;;  %s10446_s30 = sshll.u32 %s606_s15, 3 }
 0x12d   : > { %s10447_s16 = sshll.u32 %s606_s15, 12  ;;  %s10449_s24 = sshll.u32 %s606_s15, 2 }
 0x12e   : > { %s15329_s18 = sld [smem:[#allocation33_spill]]  ;;  %s15330_s23 = sld [smem:[#allocation34_spill]] }
 0x12f   : > { %s13637_s13 = scalar_lea.vmem [#allocation14], %s10446_s30  ;;  %s13639_s17 = scalar_lea.vmem [#allocation15], %s10447_s16 }
 0x130   : > { %s13641_s29 = scalar_lea.vmem [#allocation16], %s10446_s30  ;;  %s13643_s15 = scalar_lea.vmem [#allocation17], %s10449_s24 }
 0x131   : > { %s13645_s10 = scalar_lea.vmem [#allocation18], %s10449_s24 }
 0x132   : > { %p724_p3 = scmp.lt.s32.totalorder %s15328_s12, 7  ;;  %p10455_p0 = scmp.ne.s32.totalorder %s15328_s12, 0 }
 0x133   : > { %v739_v0 = vld [vmem:[#allocation5] sm:$0xff] (!%p10455_p0)  ;;  %v740_v1 = vld [vmem:[#allocation5 + $0x8] sm:$0xff] (!%p10455_p0)  ;;  %v741_v2 = vld [vmem:[#allocation5 + $0x10] sm:$0xff] (!%p10455_p0)  ;;  %vm838_vm0 = vcmask (!%p10455_p0), 64512   ;;  %vm875_vm1 = vcmask (!%p10455_p0), 7168  }
 0x134   : > { %s725_s4 = scalar_select %p724_p3, %s15328_s12, 7 }
 0x135   : > { %738 = sbr.rel (%p10455_p0) target bundleno = 497 (0x1f1), region = 112  ;;  %v742_v3 = vld [vmem:[#allocation5 + $0x18] sm:$0xff] (!%p10455_p0)  ;;  %v743_v4 = vld [vmem:[#allocation10] sm:$0xff] (!%p10455_p0)  ;;  %v744_v5 = vld [vmem:[#allocation10 + $0x8] sm:$0xff] (!%p10455_p0) }
 0x136   : > { %s11702_s28 = sshll.u32 %s725_s4, 11  ;;  %v745_v6 = vld [vmem:[#allocation10 + $0x10] sm:$0xff] (!%p10455_p0)  ;;  %v746_v7 = vld [vmem:[#allocation10 + $0x18] sm:$0xff] (!%p10455_p0)  ;;  %v747_v8 = vadd.f32 (!%p10455_p0), %v743_v4, %v739_v0  ;;  %v748_v9 = vadd.f32 (!%p10455_p0), %v744_v5, %v740_v1  ;;  %v756_v10 = vld [vmem:[#allocation8] sm:$0xff] (!%p10455_p0) }
 0x137   : > { %s13630_s26 = scalar_lea.vmem %s15329_s18, %s11702_s28  ;;  %s13635_s14 = scalar_lea.vmem %s15330_s23, %s11702_s28  ;;  %v749_v11 = vadd.f32 (!%p10455_p0), %v745_v6, %v741_v2  ;;  %v750_v12 = vadd.f32 (!%p10455_p0), %v746_v7, %v742_v3  ;;  %v757_v13 = vld [vmem:[#allocation8 + $0x8] sm:$0xff] (!%p10455_p0)  ;;  %v758_v14 = vld [vmem:[#allocation8 + $0x10] sm:$0xff] (!%p10455_p0)  ;;  %v759_v15 = vld [vmem:[#allocation8 + $0x18] sm:$0xff] (!%p10455_p0) }
 0x138   : > { %v752_v16 = vmul.f32 (!%p10455_p0), 0.00390625, %v747_v8  ;;  %v753_v17 = vmul.f32 (!%p10455_p0), 0.00390625, %v748_v9  ;;  %v760_v18 = vld [vmem:[#allocation11] sm:$0xff] (!%p10455_p0)  ;;  %v761_v19 = vld [vmem:[#allocation11 + $0x8] sm:$0xff] (!%p10455_p0)  ;;  %v762_v20 = vld [vmem:[#allocation11 + $0x10] sm:$0xff] (!%p10455_p0) }
 0x139   : > { %v754_v21 = vmul.f32 (!%p10455_p0), 0.00390625, %v749_v11  ;;  %v755_v22 = vmul.f32 (!%p10455_p0), 0.00390625, %v750_v12  ;;  %v763_v23 = vld [vmem:[#allocation11 + $0x18] sm:$0xff] (!%p10455_p0)  ;;  %v764_v24 = vadd.f32 (!%p10455_p0), %v760_v18, %v756_v10  ;;  %v765_v25 = vadd.f32 (!%p10455_p0), %v761_v19, %v757_v13 }
 0x13a   : > { %v772_v26 = vmul.f32 (!%p10455_p0), 0.99999, %v752_v16  ;;  %v773_v27 = vmul.f32 (!%p10455_p0), 0.99999, %v753_v17  ;;  %v766_v28 = vadd.f32 (!%p10455_p0), %v762_v20, %v758_v14  ;;  %v767_v29 = vadd.f32 (!%p10455_p0), %v763_v23, %v759_v15 }
 0x13b   : > { %v774_v30 = vmul.f32 (!%p10455_p0), 0.99999, %v754_v21  ;;  %v775_v31 = vmul.f32 (!%p10455_p0), 0.99999, %v755_v22  ;;  %v768_v32 = vmul.f32 (!%p10455_p0), 0.00390625, %v764_v24  ;;  %v769_v33 = vmul.f32 (!%p10455_p0), 0.00390625, %v765_v25 }
 0x13c   : > { %v776_v34 = vadd.f32 5e-06, %v772_v26  ;;  %v777_v35 = vadd.f32 5e-06, %v773_v27  ;;  %v770_v36 = vmul.f32 0.00390625, %v766_v28  ;;  %v771_v39 = vmul.f32 0.00390625, %v767_v29 }
 0x13d   : > { %v778_v37 = vadd.f32 5e-06, %v774_v30  ;;  %v779_v38 = vadd.f32 5e-06, %v775_v31  ;;  %v780_v41 = vmul.f32 0.99999, %v768_v32 }
 0x13e   : > { %11945 = vlog2.f32 %v776_v34  ;;  %v796_v40 = vsub.f32 1.0, %v776_v34  ;;  %v797_v42 = vsub.f32 1.0, %v777_v35  ;;  %v781_v43 = vmul.f32 0.99999, %v769_v33 }
 0x13f   : > { %11947 = vlog2.f32 %v777_v35  ;;  %v798_v44 = vsub.f32 1.0, %v778_v37  ;;  %v782_v45 = vmul.f32 0.99999, %v770_v36  ;;  %v799_v46 = vsub.f32 1.0, %v779_v38 }
 0x140   : > { %11949 = vlog2.f32 %v778_v37  ;;  %v783_v47 = vmul.f32 0.99999, %v771_v39  ;;  %v784_v48 = vadd.f32 5e-06, %v780_v41  ;;  %v785_v49 = vadd.f32 5e-06, %v781_v43 }
 0x141   : > { %11951 = vlog2.f32 %v779_v38  ;;  %v786_v50 = vadd.f32 5e-06, %v782_v45 }
 0x142   : > { %11953 = vlog2.f32 %v796_v40  ;;  %v787_v51 = vadd.f32 5e-06, %v783_v47  ;;  %v816_v52 = vsub.f32 1.0, %v784_v48  ;;  %v817_v53 = vsub.f32 1.0, %v785_v49 }
 0x143   : > { %11955 = vlog2.f32 %v797_v42  ;;  %v818_v55 = vsub.f32 1.0, %v786_v50 }
 0x144   : > { %11957 = vlog2.f32 %v798_v44  ;;  %v819_v58 = vsub.f32 1.0, %v787_v51 }
 0x145   : > { %11959 = vlog2.f32 %v799_v46 }
 0x146   : > { %11961 = vlog2.f32 %v784_v48 }
 0x147   : > { %11963 = vlog2.f32 %v785_v49 }
 0x148   : > { %v11946_v54 = vpop.eup %11945  ;;  %11965 = vlog2.f32 %v786_v50 }
 0x149   : > { %v11948_v56 = vpop.eup %11947  ;;  %v789_v57 = vmul.f32 0.6931472, %v11946_v54  ;;  %11967 = vlog2.f32 %v787_v51 }
 0x14a   : > { %v11950_v59 = vpop.eup %11949  ;;  %v791_v60 = vmul.f32 0.6931472, %v11948_v56  ;;  %11969 = vlog2.f32 %v816_v52 }
 0x14b   : > { %v11952_v61 = vpop.eup %11951  ;;  %v793_v62 = vmul.f32 0.6931472, %v11950_v59  ;;  %v828_v63 = vsub.f32 0.0, %v789_v57  ;;  %11971 = vlog2.f32 %v817_v53 }
 0x14c   : > { %v11954_v0 = vpop.eup %11953  ;;  %v795_v1 = vmul.f32 0.6931472, %v11952_v61  ;;  %v829_v2 = vsub.f32 0.0, %v791_v60  ;;  %11973 = vlog2.f32 %v818_v55 }
 0x14d   : > { %v11956_v3 = vpop.eup %11955  ;;  %v801_v4 = vmul.f32 0.6931472, %v11954_v0  ;;  %v830_v5 = vsub.f32 0.0, %v793_v62  ;;  %11975 = vlog2.f32 %v819_v58 }
 0x14e   : > { %v11958_v6 = vpop.eup %11957  ;;  %v803_v7 = vmul.f32 0.6931472, %v11956_v3  ;;  %v831_v8 = vsub.f32 0.0, %v795_v1 }
 0x14f   : > { %v11960_v9 = vpop.eup %11959  ;;  %v805_v10 = vmul.f32 0.6931472, %v11958_v6  ;;  %v832_v11 = vsub.f32 %v828_v63, %v801_v4  ;;  %v859_v12 = vsub.f32 %v789_v57, %v801_v4 }
 0x150   : > { %v11962_v13 = vpop.eup %11961  ;;  %v807_v14 = vmul.f32 0.6931472, %v11960_v9  ;;  %v833_v15 = vsub.f32 %v829_v2, %v803_v7  ;;  %v860_v16 = vsub.f32 %v791_v60, %v803_v7 }
 0x151   : > { %v11964_v17 = vpop.eup %11963  ;;  %v834_v18 = vsub.f32 %v830_v5, %v805_v10  ;;  %v861_v19 = vsub.f32 %v793_v62, %v805_v10  ;;  %863 = vst [vmem:[#allocation2] sm:$0xff] %v859_v12  ;;  %v809_v20 = vmul.f32 0.6931472, %v11962_v13 }
 0x152   : > { %v11966_v21 = vpop.eup %11965  ;;  %v835_v22 = vsub.f32 %v831_v8, %v807_v14  ;;  %v836_v23 = vadd.f32 %v833_v15, %v832_v11  ;;  %v862_v24 = vsub.f32 %v795_v1, %v807_v14  ;;  %864 = vst [vmem:[#allocation2 + $0x8] sm:$0xff] %v860_v16  ;;  %v811_v25 = vmul.f32 0.6931472, %v11964_v17 }
 0x153   : > { %v11968_v26 = vpop.eup %11967  ;;  %865 = vst [vmem:[#allocation2 + $0x10] sm:$0xff] %v861_v19  ;;  %v813_v27 = vmul.f32 0.6931472, %v11966_v21  ;;  %v844_v28 = vsub.f32 0.0, %v809_v20 }
 0x154   : > { %v11970_v29 = vpop.eup %11969  ;;  %v837_v30 = vadd.f32 %v836_v23, %v834_v18  ;;  %v839_v31 = vsel %vm838_vm0, %v835_v22, 0.0  ;;  %866 = vst.msk [vmem:[#allocation2 + $0x18] sm:$0xff] %vm838_vm0, %v862_v24  ;;  %v815_v32 = vmul.f32 0.6931472, %v11968_v26  ;;  %v845_v33 = vsub.f32 0.0, %v811_v25 }
 0x155   : > { %v11972_v34 = vpop.eup %11971  ;;  %v821_v35 = vmul.f32 0.6931472, %v11970_v29  ;;  %v846_v36 = vsub.f32 0.0, %v813_v27 }
 0x156   : > { %v11974_v37 = vpop.eup %11973  ;;  %v840_v38 = vadd.f32 %v839_v31, %v837_v30  ;;  %v823_v39 = vmul.f32 0.6931472, %v11972_v34  ;;  %v847_v40 = vsub.f32 0.0, %v815_v32 }
 0x157   : > { %v11976_v41 = vpop.eup %11975  ;;  %v825_v42 = vmul.f32 0.6931472, %v11974_v37  ;;  %v848_v43 = vsub.f32 %v844_v28, %v821_v35  ;;  %v867_v44 = vsub.f32 %v809_v20, %v821_v35 }
 0x158   : > { %841 = vadd.xlane.f32.xlu0 %v840_v38  ;;  %v827_v45 = vmul.f32 0.6931472, %v11976_v41  ;;  %v849_v46 = vsub.f32 %v845_v33, %v823_v39  ;;  %v868_v47 = vsub.f32 %v811_v25, %v823_v39 }
 0x159   : > { %v850_v48 = vsub.f32 %v846_v36, %v825_v42  ;;  %v869_v49 = vsub.f32 %v813_v27, %v825_v42  ;;  %871 = vst [vmem:[#allocation3] sm:$0xff] %v867_v44 }
 0x15a   : > { %v851_v50 = vsub.f32 %v847_v40, %v827_v45  ;;  %v852_v51 = vadd.f32 %v849_v46, %v848_v43  ;;  %v870_v52 = vsub.f32 %v815_v32, %v827_v45  ;;  %872 = vst [vmem:[#allocation3 + $0x8] sm:$0xff] %v868_v47 }
 0x15b   : > { %873 = vst [vmem:[#allocation3 + $0x10] sm:$0xff] %v869_v49 }
 0x15c   : > { %v853_v53 = vadd.f32 %v852_v51, %v850_v48  ;;  %v854_v54 = vsel %vm838_vm0, %v851_v50, 0.0  ;;  %874 = vst.msk [vmem:[#allocation3 + $0x18] sm:$0xff] %vm838_vm0, %v870_v52 }
 0x15e   : > { %v855_v55 = vadd.f32 %v854_v54, %v853_v53 }
 0x160   : > { %856 = vadd.xlane.f32.xlu0 %v855_v55 }
 0x1e5   : > { %v842_v56 = vpop.xlane.xlu0 %841 }
 0x1e6   : > { %v843_v57 = vadd.f32 -4347.419, %v842_v56 }
 0x1ed   : > { %v857_v58 = vpop.xlane.xlu0 %856 }
 0x1ee   : > { %v858_v59 = vadd.f32 %v857_v58, %v843_v57 }
 0x1f0   : > { %876 = vst.msk [vmem:[#allocation4] sm:$0xff] %vm875_vm1, %v858_v59 }
 0x1f1 PF: > { %s15331_s12 = sld [smem:[#allocation26_spill]]  ;;  %v918_v60 = vld [vmem:[%s13619_s21] sm:$0xff]  ;;  %v919_v6 = vld [vmem:[%s13619_s21 + $0x8] sm:$0xff]  ;;  %vm2136_vm2 = vcmask 64512   ;;  %vm2140_vm3 = vcmask 1043456   ;;  %vm10131_vm4 = vcmask 7168  }
 0x1f2   : > { %v922_v61 = vld [vmem:[%s13619_s21 + $0x20] sm:$0xff]  ;;  %v923_v9 = vld [vmem:[%s13619_s21 + $0x28] sm:$0xff] }
 0x1f3   : > { %v926_v62 = vld [vmem:[%s13619_s21 + $0x40] sm:$0xff]  ;;  %v10460_v63 = vcombine.high %v918_v60, %v922_v61  ;;  %v10459_v0 = vcombine.low %v918_v60, %v922_v61  ;;  %v10462_v11 = vcombine.high %v919_v6, %v923_v9  ;;  %v10461_v12 = vcombine.low %v919_v6, %v923_v9  ;;  %v927_v13 = vld [vmem:[%s13619_s21 + $0x48] sm:$0xff] }
 0x1f4   : > { %v930_v1 = vld [vmem:[%s13619_s21 + $0x60] sm:$0xff]  ;;  %v931_v14 = vld [vmem:[%s13619_s21 + $0x68] sm:$0xff] }
 0x1f5   : > { %v10468_v2 = vcombine.high %v926_v62, %v930_v1  ;;  %v934_v3 = vld [vmem:[%s13619_s21 + $0x80] sm:$0xff]  ;;  %2165 = vmatprep.subr.bf16.mxu0 %v10460_v63  ;;  %v10467_v5 = vcombine.low %v926_v62, %v930_v1  ;;  %v10470_v15 = vcombine.high %v927_v13, %v931_v14  ;;  %v935_v16 = vld [vmem:[%s13619_s21 + $0x88] sm:$0xff]  ;;  %2247 = vmatprep.subr.bf16.mxu1 %v10462_v11 }
 0x1f6   : > { %v938_v4 = vld [vmem:[%s13619_s21 + $0xa0] sm:$0xff]  ;;  %2166 = vmatpush1.bf16.msra.mxu0 %v10459_v0  ;;  %v939_v17 = vld [vmem:[%s13619_s21 + $0xa8] sm:$0xff]  ;;  %2248 = vmatpush1.bf16.msra.mxu1 %v10461_v12  ;;  %v10469_v20 = vcombine.low %v927_v13, %v931_v14 }
 0x1f7   : > { %p877_p9 = scmp.lt.s32.totalorder %s15331_s12, 0  ;;  %s878_s30 = ssub.s32 0, %s15331_s12  ;;  %2167 = vmatprep.subr.bf16.mxu0 %v10468_v2  ;;  %v10476_v7 = vcombine.high %v934_v3, %v938_v4  ;;  %v942_v8 = vld [vmem:[%s13619_s21 + $0xc0] sm:$0xff]  ;;  %v10475_v18 = vcombine.low %v934_v3, %v938_v4  ;;  %2249 = vmatprep.subr.bf16.mxu1 %v10470_v15  ;;  %v10478_v23 = vcombine.high %v935_v16, %v939_v17  ;;  %v943_v24 = vld [vmem:[%s13619_s21 + $0xc8] sm:$0xff] }
 0x1f8   : > { %s10456_s16 = smin.u32 %s15331_s12, %s878_s30  ;;  %v946_v10 = vld [vmem:[%s13619_s21 + $0xe0] sm:$0xff]  ;;  %v947_v25 = vld [vmem:[%s13619_s21 + $0xe8] sm:$0xff]  ;;  %v10477_v28 = vcombine.low %v935_v16, %v939_v17  ;;  %p11691_p1 = scmp.ne.s32.totalorder %s15331_s12, 7 }
 0x1f9   : > { %s880_s24 = sand.u32 1, %s10456_s16   ;;  %v10484_v19 = vcombine.high %v942_v8, %v946_v10  ;;  %v950_v21 = vld [vmem:[%s13619_s21 + $0x100] sm:$0xff]  ;;  %v10483_v26 = vcombine.low %v942_v8, %v946_v10  ;;  %v10486_v31 = vcombine.high %v943_v24, %v947_v25  ;;  %v951_v32 = vld [vmem:[%s13619_s21 + $0x108] sm:$0xff]  ;;  %v10485_v38 = vcombine.low %v943_v24, %v947_v25 }
 0x1fa   : > { %s881_s4 = ssub.s32 0, %s880_s24  ;;  %2168 = vmatpush1.bf16.msra.mxu0 %v10467_v5  ;;  %v954_v22 = vld [vmem:[%s13619_s21 + $0x120] sm:$0xff]  ;;  %2250 = vmatpush1.bf16.msra.mxu1 %v10469_v20  ;;  %v955_v33 = vld [vmem:[%s13619_s21 + $0x128] sm:$0xff] }
 0x1fb   : > { %s15344_s4 = smov (!%p877_p9, %s881_s4), %s880_s24  ;;  %2169 = vmatprep.subr.bf16.mxu0 %v10476_v7  ;;  %v10492_v27 = vcombine.high %v950_v21, %v954_v22  ;;  %v958_v29 = vld [vmem:[%s13619_s21 + $0x140] sm:$0xff]  ;;  %2251 = vmatprep.subr.bf16.mxu1 %v10478_v23  ;;  %v10491_v36 = vcombine.low %v950_v21, %v954_v22  ;;  %v10494_v43 = vcombine.high %v951_v32, %v955_v33  ;;  %v959_v46 = vld [vmem:[%s13619_s21 + $0x148] sm:$0xff] }
 0x1fc   : > { %p10458_p2 = scmp.lt.s32.totalorder %s15344_s4, 0  ;;  %s887_s28 = sadd.s32 2, %s15344_s4  ;;  %v962_v30 = vld [vmem:[%s13619_s21 + $0x160] sm:$0xff]  ;;  %v963_v47 = vld [vmem:[%s13619_s21 + $0x168] sm:$0xff]  ;;  %v10493_v51 = vcombine.low %v951_v32, %v955_v33 }
 0x1fd   : > { %v10500_v37 = vcombine.high %v958_v29, %v962_v30  ;;  %v893_v39 = vld [vmem:[#allocation2 + $0x8] sm:$0xff]  ;;  %v10499_v48 = vcombine.low %v958_v29, %v962_v30  ;;  %v10502_v54 = vcombine.high %v959_v46, %v963_v47  ;;  %v967_v56 = vld [vmem:[%s13619_s21 + $0x188] sm:$0xff]  ;;  %v10501_v60 = vcombine.low %v959_v46, %v963_v47 }
 0x1fe   : > { %s15346_s28 = smov (!%p10458_p2, %s887_s28), %s15344_s4  ;;  %2170 = vmatpush1.bf16.msra.mxu0 %v10475_v18  ;;  %2252 = vmatpush1.bf16.msra.mxu1 %v10477_v28  ;;  %v897_v40 = vld [vmem:[#allocation3 + $0x8] sm:$0xff]  ;;  %v971_v57 = vld [vmem:[%s13619_s21 + $0x1a8] sm:$0xff] }
 0x1ff   : > { %s889_s20 = ssub.s32 1, %s15346_s28  ;;  %2171 = vmatprep.subr.bf16.mxu0 %v10484_v19  ;;  %v966_v41 = vld [vmem:[%s13619_s21 + $0x180] sm:$0xff]  ;;  %2253 = vmatprep.subr.bf16.mxu1 %v10486_v31  ;;  %v10510_v63 = vcombine.high %v967_v56, %v971_v57  ;;  %v975_v0 = vld [vmem:[%s13619_s21 + $0x1c8] sm:$0xff]  ;;  %v10509_v4 = vcombine.low %v967_v56, %v971_v57  ;;  %v892_v56 = vld [vmem:[#allocation2] sm:$0xff] }
 0x200   : > { %s890_s19 = scvt.s32.f32 %s889_s20  ;;  %v970_v42 = vld [vmem:[%s13619_s21 + $0x1a0] sm:$0xff]  ;;  %v979_v1 = vld [vmem:[%s13619_s21 + $0x1e8] sm:$0xff]  ;;  %v896_v57 = vld [vmem:[#allocation3] sm:$0xff] }
 0x201   : > { %v10508_v50 = vcombine.high %v966_v41, %v970_v42  ;;  %v974_v52 = vld [vmem:[%s13619_s21 + $0x1c0] sm:$0xff]  ;;  %v10507_v58 = vcombine.low %v966_v41, %v970_v42  ;;  %v10518_v7 = vcombine.high %v975_v0, %v979_v1  ;;  %v983_v8 = vld [vmem:[%s13619_s21 + $0x208] sm:$0xff]  ;;  %v10517_v12 = vcombine.low %v975_v0, %v979_v1 }
 0x202   : > { %s891_s18 = ssub.f32 1.0, %s890_s19  ;;  %v13679_v34 = vstv %s890_s19  ;;  %2172 = vmatpush1.bf16.msra.mxu0 %v10483_v26  ;;  %2254 = vmatpush1.bf16.msra.mxu1 %v10485_v38  ;;  %v978_v53 = vld [vmem:[%s13619_s21 + $0x1e0] sm:$0xff]  ;;  %v987_v9 = vld [vmem:[%s13619_s21 + $0x228] sm:$0xff] }
 0x203   : > { %2173 = vmatprep.subr.bf16.mxu0 %v10492_v27  ;;  %v13686_v44 = vmul.f32 %v13679_v34, %v893_v39  ;;  %2255 = vmatprep.subr.bf16.mxu1 %v10494_v43  ;;  %v10516_v59 = vcombine.high %v974_v52, %v978_v53  ;;  %v982_v61 = vld [vmem:[%s13619_s21 + $0x200] sm:$0xff]  ;;  %v10515_v2 = vcombine.low %v974_v52, %v978_v53  ;;  %v991_v16 = vld [vmem:[%s13619_s21 + $0x248] sm:$0xff] }
 0x204   : > { %v13681_v35 = vstv %s891_s18  ;;  %v986_v62 = vld [vmem:[%s13619_s21 + $0x220] sm:$0xff]  ;;  %v10526_v15 = vcombine.high %v983_v8, %v987_v9  ;;  %v995_v17 = vld [vmem:[%s13619_s21 + $0x268] sm:$0xff]  ;;  %v10525_v20 = vcombine.low %v983_v8, %v987_v9  ;;  %v13734_v1 = vmul.f32 %v13679_v34, %v892_v56 }
 0x205   : > { %v13689_v45 = vmul.f32 %v13681_v35, %v897_v40  ;;  %v10524_v3 = vcombine.high %v982_v61, %v986_v62  ;;  %v990_v5 = vld [vmem:[%s13619_s21 + $0x240] sm:$0xff]  ;;  %v10523_v10 = vcombine.low %v982_v61, %v986_v62  ;;  %v10534_v23 = vcombine.high %v991_v16, %v995_v17  ;;  %v999_v24 = vld [vmem:[%s13619_s21 + $0x288] sm:$0xff]  ;;  %v899_v61 = vld [vmem:[#allocation3 + $0x18] sm:$0xff] }
 0x206   : > { %2174 = vmatpush1.bf16.msra.mxu0 %v10491_v36  ;;  %2256 = vmatpush1.bf16.msra.mxu1 %v10493_v51  ;;  %v994_v6 = vld [vmem:[%s13619_s21 + $0x260] sm:$0xff]  ;;  %v1003_v25 = vld [vmem:[%s13619_s21 + $0x2a8] sm:$0xff]  ;;  %v10533_v28 = vcombine.low %v991_v16, %v995_v17  ;;  %v13747_v9 = vmul.f32 %v13681_v35, %v899_v61 }
 0x207   : > { %v911_v49 = vadd.f32 %v13689_v45, %v13686_v44  ;;  %2175 = vmatprep.subr.bf16.mxu0 %v10500_v37  ;;  %2257 = vmatprep.subr.bf16.mxu1 %v10502_v54  ;;  %v10532_v11 = vcombine.high %v990_v5, %v994_v6  ;;  %v998_v13 = vld [vmem:[%s13619_s21 + $0x280] sm:$0xff]  ;;  %v10531_v18 = vcombine.low %v990_v5, %v994_v6  ;;  %v1007_v32 = vld [vmem:[%s13619_s21 + $0x2c8] sm:$0xff] }
 0x208   : > { %v1002_v14 = vld [vmem:[%s13619_s21 + $0x2a0] sm:$0xff]  ;;  %v10542_v31 = vcombine.high %v999_v24, %v1003_v25  ;;  %v1011_v33 = vld [vmem:[%s13619_s21 + $0x2e8] sm:$0xff]  ;;  %v10541_v38 = vcombine.low %v999_v24, %v1003_v25 }
 0x209   : > { %v13697_v55 = vpack.c.bf16 %v911_v49, %v911_v49  ;;  %v10540_v19 = vcombine.high %v998_v13, %v1002_v14  ;;  %v1006_v21 = vld [vmem:[%s13619_s21 + $0x2c0] sm:$0xff]  ;;  %v10539_v26 = vcombine.low %v998_v13, %v1002_v14  ;;  %v10550_v41 = vcombine.high %v1007_v32, %v1011_v33  ;;  %v1015_v42 = vld [vmem:[%s13619_s21 + $0x308] sm:$0xff] }
 0x20a   : > { %2176 = vmatpush1.bf16.msra.mxu0 %v10499_v48  ;;  %2258 = vmatpush1.bf16.msra.mxu1 %v10501_v60  ;;  %v1010_v22 = vld [vmem:[%s13619_s21 + $0x2e0] sm:$0xff]  ;;  %v1019_v43 = vld [vmem:[%s13619_s21 + $0x328] sm:$0xff]  ;;  %v10549_v48 = vcombine.low %v1007_v32, %v1011_v33  ;;  %v895_v60 = vld [vmem:[#allocation2 + $0x18] sm:$0xff] }
 0x20b   : > { %2197 = vmatprep.mubr.bf16.mxu0 %v13697_v55  ;;  %2177 = vmatprep.subr.bf16.mxu0 %v10508_v50  ;;  %v10548_v27 = vcombine.high %v1006_v21, %v1010_v22  ;;  %v1014_v29 = vld [vmem:[%s13619_s21 + $0x300] sm:$0xff]  ;;  %v10547_v36 = vcombine.low %v1006_v21, %v1010_v22  ;;  %v10558_v51 = vcombine.high %v1015_v42, %v1019_v43  ;;  %v1023_v52 = vld [vmem:[%s13619_s21 + $0x348] sm:$0xff] }
 0x20c   : > { %2279 = vmatprep.mubr.bf16.mxu1 %v13697_v55  ;;  %2259 = vmatprep.subr.bf16.mxu1 %v10510_v63  ;;  %v1018_v30 = vld [vmem:[%s13619_s21 + $0x320] sm:$0xff]  ;;  %v1027_v53 = vld [vmem:[%s13619_s21 + $0x368] sm:$0xff]  ;;  %v13744_v8 = vmul.f32 %v13679_v34, %v895_v60 }
 0x20d   : > { %v10556_v37 = vcombine.high %v1014_v29, %v1018_v30  ;;  %v1022_v39 = vld [vmem:[%s13619_s21 + $0x340] sm:$0xff]  ;;  %v10555_v46 = vcombine.low %v1014_v29, %v1018_v30  ;;  %v10566_v0 = vcombine.high %v1023_v52, %v1027_v53  ;;  %v1039_v13 = vld [vmem:[%s13619_s21 + $0x3c8] sm:$0xff] }
 0x20e   : > { %2178 = vmatpush1.bf16.msra.mxu0 %v10507_v58  ;;  %2260 = vmatpush1.bf16.msra.mxu1 %v10509_v4  ;;  %v1026_v40 = vld [vmem:[%s13619_s21 + $0x360] sm:$0xff]  ;;  %v1035_v4 = vld [vmem:[%s13619_s21 + $0x3a8] sm:$0xff] }
 0x20f   : > { %2179 = vmatprep.subr.bf16.mxu0 %v10516_v59  ;;  %2261 = vmatprep.subr.bf16.mxu1 %v10518_v7  ;;  %v10564_v47 = vcombine.high %v1022_v39, %v1026_v40  ;;  %v1030_v49 = vld [vmem:[%s13619_s21 + $0x380] sm:$0xff]  ;;  %v10563_v54 = vcombine.low %v1022_v39, %v1026_v40  ;;  %v10557_v59 = vcombine.low %v1015_v42, %v1019_v43  ;;  %v1043_v14 = vld [vmem:[%s13619_s21 + $0x3e8] sm:$0xff] }
 0x210   : > { %v1034_v50 = vld [vmem:[%s13619_s21 + $0x3a0] sm:$0xff]  ;;  %v10582_v22 = vcombine.high %v1039_v13, %v1043_v14  ;;  %v1051_v24 = vld [vmem:[%s13619_s21 + $0x428] sm:$0xff] }
 0x211   : > { %v10572_v58 = vcombine.high %v1030_v49, %v1034_v50  ;;  %v1038_v62 = vld [vmem:[%s13619_s21 + $0x3c0] sm:$0xff]  ;;  %v10571_v5 = vcombine.low %v1030_v49, %v1034_v50  ;;  %v1055_v33 = vld [vmem:[%s13619_s21 + $0x448] sm:$0xff] }
 0x212   : > { %2180 = vmatpush1.bf16.msra.mxu0 %v10515_v2  ;;  %2262 = vmatpush1.bf16.msra.mxu1 %v10517_v12  ;;  %v1042_v63 = vld [vmem:[%s13619_s21 + $0x3e0] sm:$0xff]  ;;  %v13737_v2 = vmul.f32 %v13681_v35, %v896_v57  ;;  %v1063_v43 = vld [vmem:[%s13619_s21 + $0x488] sm:$0xff] }
 0x213   : > { %2181 = vmatprep.subr.bf16.mxu0 %v10524_v3  ;;  %2263 = vmatprep.subr.bf16.mxu1 %v10526_v15  ;;  %v1031_v3 = vld [vmem:[%s13619_s21 + $0x388] sm:$0xff]  ;;  %v1046_v6 = vld [vmem:[%s13619_s21 + $0x400] sm:$0xff]  ;;  %v10579_v16 = vcombine.low %v1038_v62, %v1042_v63 }
 0x214   : > { %v1050_v7 = vld [vmem:[%s13619_s21 + $0x420] sm:$0xff]  ;;  %v10574_v12 = vcombine.high %v1031_v3, %v1035_v4  ;;  %v910_v15 = vadd.f32 %v13737_v2, %v13734_v1  ;;  %v10573_v21 = vcombine.low %v1031_v3, %v1035_v4 }
 0x215   : > { %v1054_v17 = vld [vmem:[%s13619_s21 + $0x440] sm:$0xff] }
 0x216   : > { %2182 = vmatpush1.bf16.msra.mxu0 %v10523_v10  ;;  %2264 = vmatpush1.bf16.msra.mxu1 %v10525_v20  ;;  %v10580_v10 = vcombine.high %v1038_v62, %v1042_v63  ;;  %v10588_v20 = vcombine.high %v1046_v6, %v1050_v7  ;;  %v13759_v25 = vpack.c.bf16 %v910_v15, %v910_v15  ;;  %v1074_v39 = vld [vmem:[%s13619_s21 + $0x4e0] sm:$0xff]  ;;  %v1079_v62 = vld [vmem:[%s13619_s21 + $0x508] sm:$0xff] }
 0x217   : > { %2183 = vmatprep.subr.bf16.mxu0 %v10532_v11  ;;  %2265 = vmatprep.subr.bf16.mxu1 %v10534_v23  ;;  %v10565_v11 = vcombine.low %v1023_v52, %v1027_v53  ;;  %v1047_v23 = vld [vmem:[%s13619_s21 + $0x408] sm:$0xff]  ;;  %v1078_v50 = vld [vmem:[%s13619_s21 + $0x500] sm:$0xff] }
 0x218   : > { %v10590_v32 = vcombine.high %v1047_v23, %v1051_v24  ;;  %v1071_v53 = vld [vmem:[%s13619_s21 + $0x4c8] sm:$0xff]  ;;  %v1090_v60 = vld [vmem:[%s13619_s21 + $0x560] sm:$0xff] }
 0x219   : > { %v1083_v63 = vld [vmem:[%s13619_s21 + $0x528] sm:$0xff]  ;;  %v1106_v15 = vld [vmem:[%s13619_s21 + $0x5e0] sm:$0xff] }
 0x21a   : > { %2184 = vmatpush1.bf16.msra.mxu0 %v10531_v18  ;;  %2266 = vmatpush1.bf16.msra.mxu1 %v10533_v28  ;;  %v1058_v18 = vld [vmem:[%s13619_s21 + $0x460] sm:$0xff] }
 0x21b   : > { %2185 = vmatprep.subr.bf16.mxu0 %v10540_v19  ;;  %2267 = vmatprep.subr.bf16.mxu1 %v10542_v31  ;;  %v913_v19 = vadd.f32 %v13747_v9, %v13744_v8  ;;  %v1066_v28 = vld [vmem:[%s13619_s21 + $0x4a0] sm:$0xff]  ;;  %v10596_v30 = vcombine.high %v1054_v17, %v1058_v18  ;;  %v10581_v31 = vcombine.low %v1039_v13, %v1043_v14 }
 0x21c   : > { %v1102_v14 = vld [vmem:[%s13619_s21 + $0x5c0] sm:$0xff] }
 0x21d   : > { %v13763_v29 = vpack.c.bf16 %v913_v19, %v913_v19  ;;  %v898_v19 = vld [vmem:[#allocation3 + $0x10] sm:$0xff] }
 0x21e   : > { %2186 = vmatpush1.bf16.msra.mxu0 %v10539_v26  ;;  %2268 = vmatpush1.bf16.msra.mxu1 %v10541_v38  ;;  %v10587_v26 = vcombine.low %v1046_v6, %v1050_v7  ;;  %v1070_v38 = vld [vmem:[%s13619_s21 + $0x4c0] sm:$0xff]  ;;  %v10622_v7 = vcombine.high %v1079_v62, %v1083_v63 }
 0x21f   : > { %2187 = vmatprep.subr.bf16.mxu0 %v10548_v27  ;;  %2269 = vmatprep.subr.bf16.mxu1 %v10550_v41  ;;  %v1062_v27 = vld [vmem:[%s13619_s21 + $0x480] sm:$0xff]  ;;  %v10589_v41 = vcombine.low %v1047_v23, %v1051_v24  ;;  %v10611_v56 = vcombine.low %v1070_v38, %v1074_v39  ;;  %v10644_v23 = vcombine.high %v1102_v14, %v1106_v15 }
 0x220   : > { %v10604_v40 = vcombine.high %v1062_v27, %v1066_v28  ;;  %v1098_v6 = vld [vmem:[%s13619_s21 + $0x5a0] sm:$0xff] }
 0x221   : > { %v1110_v24 = vld [vmem:[%s13619_s21 + $0x600] sm:$0xff] }
 0x222   : > { %2188 = vmatpush1.bf16.msra.mxu0 %v10547_v36  ;;  %2270 = vmatpush1.bf16.msra.mxu1 %v10549_v48  ;;  %v1059_v36 = vld [vmem:[%s13619_s21 + $0x468] sm:$0xff]  ;;  %v10612_v48 = vcombine.high %v1070_v38, %v1074_v39  ;;  %v920_v38 = vld [vmem:[%s13619_s21 + $0x10] sm:$0xff] }
 0x223   : > { %2189 = vmatprep.subr.bf16.mxu0 %v10556_v37  ;;  %2271 = vmatprep.subr.bf16.mxu1 %v10558_v51  ;;  %v10595_v37 = vcombine.low %v1054_v17, %v1058_v18  ;;  %v10598_v42 = vcombine.high %v1055_v33, %v1059_v36  ;;  %v10597_v49 = vcombine.low %v1055_v33, %v1059_v36  ;;  %v1082_v51 = vld [vmem:[%s13619_s21 + $0x520] sm:$0xff]  ;;  %v1095_v17 = vld [vmem:[%s13619_s21 + $0x588] sm:$0xff]  ;;  %v924_v39 = vld [vmem:[%s13619_s21 + $0x30] sm:$0xff] }
 0x224   : > { %v10620_v57 = vcombine.high %v1078_v50, %v1082_v51  ;;  %v894_v18 = vld [vmem:[#allocation2 + $0x10] sm:$0xff]  ;;  %v10643_v33 = vcombine.low %v1102_v14, %v1106_v15  ;;  %v10652_v36 = vcombine.high %v1110_v24, %v1110_v24  ;;  %v952_v15 = vld [vmem:[%s13619_s21 + $0x110] sm:$0xff] }
 0x226   : > { %2190 = vmatpush1.bf16.msra.mxu0 %v10555_v46  ;;  %2272 = vmatpush1.bf16.msra.mxu1 %v10557_v59  ;;  %v1067_v46 = vld [vmem:[%s13619_s21 + $0x4a8] sm:$0xff]  ;;  %v1086_v59 = vld [vmem:[%s13619_s21 + $0x540] sm:$0xff] }
 0x227   : > { %2191 = vmatprep.subr.bf16.mxu0 %v10564_v47  ;;  %2273 = vmatprep.subr.bf16.mxu1 %v10566_v0  ;;  %v10603_v47 = vcombine.low %v1062_v27, %v1066_v28  ;;  %v10606_v52 = vcombine.high %v1063_v43, %v1067_v46  ;;  %v10619_v0 = vcombine.low %v1078_v50, %v1082_v51  ;;  %v1103_v27 = vld [vmem:[%s13619_s21 + $0x5c8] sm:$0xff]  ;;  %v921_v51 = vld [vmem:[%s13619_s21 + $0x18] sm:$0xff] }
 0x228   : > { %v10628_v3 = vcombine.high %v1086_v59, %v1090_v60 }
 0x22a   : > { %2192 = vmatpush1.bf16.msra.mxu0 %v10563_v54  ;;  %2274 = vmatpush1.bf16.msra.mxu1 %v10565_v11  ;;  %v1075_v54 = vld [vmem:[%s13619_s21 + $0x4e8] sm:$0xff] }
 0x22b   : > { %2193 = vmatprep.subr.bf16.mxu0 %v10572_v58  ;;  %2275 = vmatprep.subr.bf16.mxu1 %v10574_v12  ;;  %v10605_v58 = vcombine.low %v1063_v43, %v1067_v46  ;;  %v10614_v61 = vcombine.high %v1071_v53, %v1075_v54  ;;  %v10613_v4 = vcombine.low %v1071_v53, %v1075_v54  ;;  %v1091_v11 = vld [vmem:[%s13619_s21 + $0x568] sm:$0xff]  ;;  %v925_v54 = vld [vmem:[%s13619_s21 + $0x38] sm:$0xff] }
 0x22c   : > { %v10627_v12 = vcombine.low %v1086_v59, %v1090_v60  ;;  %v936_v59 = vld [vmem:[%s13619_s21 + $0x90] sm:$0xff] }
 0x22d   : > { %v940_v60 = vld [vmem:[%s13619_s21 + $0xb0] sm:$0xff] }
 0x22e   : > { %2194 = vmatpush1.bf16.msra.mxu0 %v10571_v5  ;;  %2276 = vmatpush1.bf16.msra.mxu1 %v10573_v21  ;;  %v1094_v5 = vld [vmem:[%s13619_s21 + $0x580] sm:$0xff]  ;;  %v1099_v21 = vld [vmem:[%s13619_s21 + $0x5a8] sm:$0xff] }
 0x22f   : > { %2195 = vmatprep.subr.bf16.mxu0 %v10580_v10  ;;  %2277 = vmatprep.subr.bf16.mxu1 %v10582_v22  ;;  %v1087_v10 = vld [vmem:[%s13619_s21 + $0x548] sm:$0xff]  ;;  %v10636_v13 = vcombine.high %v1094_v5, %v1098_v6  ;;  %v10635_v22 = vcombine.low %v1094_v5, %v1098_v6  ;;  %v10638_v28 = vcombine.high %v1095_v17, %v1099_v21  ;;  %v944_v5 = vld [vmem:[%s13619_s21 + $0xd0] sm:$0xff] }
 0x230   : > { %v948_v6 = vld [vmem:[%s13619_s21 + $0xf0] sm:$0xff] }
 0x231   : > { %v10488_v14 = vcombine.high %v944_v5, %v948_v6 }
 0x232   : > { %2196 = vmatpush1.bf16.msra.mxu0 %v10579_v16  ;;  %2278 = vmatpush1.bf16.msra.mxu1 %v10581_v31  ;;  %v10621_v16 = vcombine.low %v1079_v62, %v1083_v63  ;;  %v13797_v31 = vmul.f32 %v13679_v34, %v894_v18  ;;  %v10466_v63 = vcombine.high %v921_v51, %v925_v54  ;;  %v945_v18 = vld [vmem:[%s13619_s21 + $0xd8] sm:$0xff] }
 0x233   : > { %2206 = vmatprep.subr.bf16.mxu0 %v10588_v20  ;;  %2288 = vmatprep.subr.bf16.mxu1 %v10590_v32  ;;  %v10630_v20 = vcombine.high %v1087_v10, %v1091_v11  ;;  %v13800_v32 = vmul.f32 %v13681_v35, %v898_v19 }
 0x235   : > { %2198 = vmatmul.mubr.bf16.vlgmr.msra.gmra.mrb[0].mxu0 %v13759_v25  ;;  %2280 = vmatmul.mubr.bf16.vlgmr.msra.gmra.mrb[0].mxu1 %v13759_v25  ;;  %v912_v43 = vadd.f32 %v13800_v32, %v13797_v31 }
 0x236   : > { %2207 = vmatpush1.bf16.msra.mxu0 %v10587_v26  ;;  %10660 = vmatprep.mubr.msk.bf16.mxu0 %vm2136_vm2, %v13763_v29  ;;  %v10629_v26 = vcombine.low %v1087_v10, %v1091_v11  ;;  %v937_v10 = vld [vmem:[%s13619_s21 + $0x98] sm:$0xff] }
 0x237   : > { %2208 = vmatprep.subr.bf16.mxu0 %v10596_v30  ;;  %2289 = vmatpush1.bf16.msra.mxu1 %v10589_v41  ;;  %v1107_v30 = vld [vmem:[%s13619_s21 + $0x5e8] sm:$0xff] }
 0x238   : > { %2290 = vmatprep.subr.bf16.mxu1 %v10598_v42  ;;  %10662 = vmatprep.mubr.msk.bf16.mxu1 %vm2136_vm2, %v13763_v29  ;;  %v10646_v41 = vcombine.high %v1103_v27, %v1107_v30  ;;  %v1111_v42 = vld [vmem:[%s13619_s21 + $0x608] sm:$0xff]  ;;  %v10645_v50 = vcombine.low %v1103_v27, %v1107_v30  ;;  %v953_v27 = vld [vmem:[%s13619_s21 + $0x118] sm:$0xff] }
 0x239   : > { %v10653_v53 = vcombine.low %v1111_v42, %v1111_v42  ;;  %v957_v30 = vld [vmem:[%s13619_s21 + $0x138] sm:$0xff] }
 0x23a   : > { %2209 = vmatpush1.bf16.msra.mxu0 %v10595_v37  ;;  %v10651_v37 = vcombine.low %v1110_v24, %v1110_v24  ;;  %v964_v24 = vld [vmem:[%s13619_s21 + $0x170] sm:$0xff] }
 0x23b   : > { %2210 = vmatprep.subr.bf16.mxu0 %v10604_v40  ;;  %2291 = vmatpush1.bf16.msra.mxu1 %v10597_v49  ;;  %v10637_v40 = vcombine.low %v1095_v17, %v1099_v21  ;;  %v932_v49 = vld [vmem:[%s13619_s21 + $0x70] sm:$0xff]  ;;  %v2148_v62 = vsel %vm2140_vm3, %v10653_v53, 0  ;;  %v10487_v21 = vcombine.low %v944_v5, %v948_v6  ;;  %v985_v5 = vld [vmem:[%s13619_s21 + $0x218] sm:$0xff] }
 0x23c   : > { %2292 = vmatprep.subr.bf16.mxu1 %v10606_v52  ;;  %v2142_v46 = vsel %vm2140_vm3, %v10651_v37, 0  ;;  %v10654_v52 = vcombine.high %v1111_v42, %v1111_v42  ;;  %v972_v37 = vld [vmem:[%s13619_s21 + $0x1b0] sm:$0xff] }
 0x23e   : > { %2211 = vmatpush1.bf16.msra.mxu0 %v10603_v47  ;;  %v10464_v47 = vcombine.high %v920_v38, %v924_v39 }
 0x23f   : > { %2212 = vmatprep.subr.bf16.mxu0 %v10612_v48  ;;  %2293 = vmatpush1.bf16.msra.mxu1 %v10605_v58  ;;  %v928_v48 = vld [vmem:[%s13619_s21 + $0x50] sm:$0xff] }
 0x240   : > { %2294 = vmatprep.subr.bf16.mxu1 %v10614_v61  ;;  %v10472_v58 = vcombine.high %v928_v48, %v932_v49  ;;  %v929_v61 = vld [vmem:[%s13619_s21 + $0x58] sm:$0xff] }
 0x242   : > { %2213 = vmatpush1.bf16.msra.mxu0 %v10611_v56  ;;  %v13813_v56 = vpack.c.bf16 %v912_v43, %v912_v43 }
 0x243   : > { %2214 = vmatprep.subr.bf16.mxu0 %v10620_v57  ;;  %2295 = vmatpush1.bf16.msra.mxu1 %v10613_v4  ;;  %v10463_v57 = vcombine.low %v920_v38, %v924_v39  ;;  %v10480_v4 = vcombine.high %v936_v59, %v940_v60  ;;  %v961_v39 = vld [vmem:[%s13619_s21 + $0x158] sm:$0xff] }
 0x244   : > { %2296 = vmatprep.subr.bf16.mxu1 %v10622_v7  ;;  %v10465_v7 = vcombine.low %v921_v51, %v925_v54  ;;  %v973_v51 = vld [vmem:[%s13619_s21 + $0x1b8] sm:$0xff]  ;;  %v984_v54 = vld [vmem:[%s13619_s21 + $0x210] sm:$0xff] }
 0x246   : > { %2215 = vmatpush1.bf16.msra.mxu0 %v10619_v0  ;;  %v933_v0 = vld [vmem:[%s13619_s21 + $0x78] sm:$0xff] }
 0x247   : > { %2216 = vmatprep.subr.bf16.mxu0 %v10628_v3  ;;  %2297 = vmatpush1.bf16.msra.mxu1 %v10621_v16  ;;  %v10471_v3 = vcombine.low %v928_v48, %v932_v49  ;;  %v10474_v11 = vcombine.high %v929_v61, %v933_v0  ;;  %v956_v16 = vld [vmem:[%s13619_s21 + $0x130] sm:$0xff]  ;;  %v10473_v17 = vcombine.low %v929_v61, %v933_v0  ;;  %v969_v49 = vld [vmem:[%s13619_s21 + $0x198] sm:$0xff] }
 0x248   : > { %2298 = vmatprep.subr.bf16.mxu1 %v10630_v20  ;;  %v949_v20 = vld [vmem:[%s13619_s21 + $0xf8] sm:$0xff]  ;;  %v10497_v48 = vcombine.low %v953_v27, %v957_v30  ;;  %v992_v0 = vld [vmem:[%s13619_s21 + $0x250] sm:$0xff] }
 0x249   : > { %v10489_v38 = vcombine.low %v945_v18, %v949_v20  ;;  %v981_v61 = vld [vmem:[%s13619_s21 + $0x1f8] sm:$0xff] }
 0x24a   : > { %2217 = vmatpush1.bf16.msra.mxu0 %v10627_v12  ;;  %v941_v12 = vld [vmem:[%s13619_s21 + $0xb8] sm:$0xff] }
 0x24b   : > { %2218 = vmatprep.subr.bf16.mxu0 %v10636_v13  ;;  %2299 = vmatpush1.bf16.msra.mxu1 %v10629_v26  ;;  %v10479_v13 = vcombine.low %v936_v59, %v940_v60  ;;  %v10482_v19 = vcombine.high %v937_v10, %v941_v12  ;;  %v10481_v26 = vcombine.low %v937_v10, %v941_v12  ;;  %v977_v59 = vld [vmem:[%s13619_s21 + $0x1d8] sm:$0xff]  ;;  %v1004_v12 = vld [vmem:[%s13619_s21 + $0x2b0] sm:$0xff] }
 0x24c   : > { %2300 = vmatprep.subr.bf16.mxu1 %v10638_v28  ;;  %v10490_v28 = vcombine.high %v945_v18, %v949_v20  ;;  %v10514_v60 = vcombine.high %v969_v49, %v973_v51  ;;  %v10522_v6 = vcombine.high %v977_v59, %v981_v61  ;;  %v1012_v20 = vld [vmem:[%s13619_s21 + $0x2f0] sm:$0xff] }
 0x24e   : > { %2219 = vmatpush1.bf16.msra.mxu0 %v10635_v22  ;;  %v10496_v22 = vcombine.high %v952_v15, %v956_v16 }
 0x24f   : > { %2220 = vmatprep.subr.bf16.mxu0 %v10644_v23  ;;  %2301 = vmatpush1.bf16.msra.mxu1 %v10637_v40  ;;  %v960_v23 = vld [vmem:[%s13619_s21 + $0x150] sm:$0xff]  ;;  %v10498_v40 = vcombine.high %v953_v27, %v957_v30 }
 0x250   : > { %2302 = vmatprep.subr.bf16.mxu1 %v10646_v41  ;;  %v965_v41 = vld [vmem:[%s13619_s21 + $0x178] sm:$0xff]  ;;  %v10503_v42 = vcombine.low %v960_v23, %v964_v24  ;;  %v1020_v30 = vld [vmem:[%s13619_s21 + $0x330] sm:$0xff] }
 0x252   : > { %2221 = vmatpush1.bf16.msra.mxu0 %v10643_v33  ;;  %v10495_v33 = vcombine.low %v952_v15, %v956_v16  ;;  %v993_v15 = vld [vmem:[%s13619_s21 + $0x258] sm:$0xff] }
 0x253   : > { %10659 = vmatprep.subr.msk.bf16.mxu0 %vm2140_vm3, %v10652_v36  ;;  %2303 = vmatpush1.bf16.msra.mxu1 %v10645_v50  ;;  %v968_v36 = vld [vmem:[%s13619_s21 + $0x190] sm:$0xff]  ;;  %v10506_v50 = vcombine.high %v961_v39, %v965_v41  ;;  %v997_v16 = vld [vmem:[%s13619_s21 + $0x278] sm:$0xff] }
 0x254   : > { %10661 = vmatprep.subr.msk.bf16.mxu1 %vm2140_vm3, %v10654_v52  ;;  %v10512_v43 = vcombine.high %v968_v36, %v972_v37  ;;  %v10511_v52 = vcombine.low %v968_v36, %v972_v37  ;;  %v1009_v36 = vld [vmem:[%s13619_s21 + $0x2d8] sm:$0xff] }
 0x255   : > { %v1013_v37 = vld [vmem:[%s13619_s21 + $0x2f8] sm:$0xff] }
 0x256   : > { %2223 = vmatpush1.bf16.msra.mxu0 %v2142_v46  ;;  %v976_v46 = vld [vmem:[%s13619_s21 + $0x1d0] sm:$0xff] }
 0x257   : > { %2329 = vmatprep.subr.bf16.mxu0 %v10464_v47  ;;  %2305 = vmatpush1.bf16.msra.mxu1 %v2148_v62  ;;  %v980_v47 = vld [vmem:[%s13619_s21 + $0x1f0] sm:$0xff] }
 0x258   : > { %2411 = vmatprep.subr.bf16.mxu1 %v10466_v63  ;;  %v10520_v53 = vcombine.high %v976_v46, %v980_v47  ;;  %v10519_v62 = vcombine.low %v976_v46, %v980_v47  ;;  %v1017_v46 = vld [vmem:[%s13619_s21 + $0x318] sm:$0xff] }
 0x259   : > { %2239 = vmatmul.mubr.bf16.vlgmr.msra.gmra.mrb[0].mxu0 %v13813_v56  ;;  %v1021_v47 = vld [vmem:[%s13619_s21 + $0x338] sm:$0xff] }
 0x25a   : > { %2330 = vmatpush1.bf16.msra.mxu0 %v10463_v57  ;;  %2361 = vmatprep.mubr.bf16.mxu0 %v13697_v55  ;;  %v988_v57 = vld [vmem:[%s13619_s21 + $0x230] sm:$0xff] }
 0x25b   : > { %2331 = vmatprep.subr.bf16.mxu0 %v10472_v58  ;;  %2321 = vmatmul.mubr.bf16.vlgmr.msra.gmra.mrb[0].mxu1 %v13813_v56  ;;  %v10505_v58 = vcombine.low %v961_v39, %v965_v41  ;;  %v10528_v63 = vcombine.high %v984_v54, %v988_v57  ;;  %v10527_v10 = vcombine.low %v984_v54, %v988_v57  ;;  %v1028_v41 = vld [vmem:[%s13619_s21 + $0x370] sm:$0xff]  ;;  %v1025_v54 = vld [vmem:[%s13619_s21 + $0x358] sm:$0xff] }
 0x25c   : > { %2412 = vmatpush1.bf16.msra.mxu1 %v10465_v7  ;;  %2443 = vmatprep.mubr.bf16.mxu1 %v13697_v55  ;;  %v10504_v55 = vcombine.high %v960_v23, %v964_v24  ;;  %v989_v7 = vld [vmem:[%s13619_s21 + $0x238] sm:$0xff] }
 0x25d   : > { %2413 = vmatprep.subr.bf16.mxu1 %v10474_v11  ;;  %v1000_v11 = vld [vmem:[%s13619_s21 + $0x290] sm:$0xff]  ;;  %v1001_v23 = vld [vmem:[%s13619_s21 + $0x298] sm:$0xff] }
 0x25e   : > { %2332 = vmatpush1.bf16.msra.mxu0 %v10471_v3  ;;  %v996_v3 = vld [vmem:[%s13619_s21 + $0x270] sm:$0xff]  ;;  %v1005_v24 = vld [vmem:[%s13619_s21 + $0x2b8] sm:$0xff]  ;;  %v10543_v27 = vcombine.low %v1000_v11, %v1004_v12 }
 0x25f   : > { %2333 = vmatprep.subr.bf16.mxu0 %v10480_v4  ;;  %v10513_v4 = vcombine.low %v969_v49, %v973_v51  ;;  %v10535_v18 = vcombine.low %v992_v0, %v996_v3  ;;  %v1036_v51 = vld [vmem:[%s13619_s21 + $0x3b0] sm:$0xff]  ;;  %v1029_v57 = vld [vmem:[%s13619_s21 + $0x378] sm:$0xff] }
 0x260   : > { %2414 = vmatpush1.bf16.msra.mxu1 %v10473_v17  ;;  %v10530_v17 = vcombine.high %v985_v5, %v989_v7 }
 0x261   : > { %2415 = vmatprep.subr.bf16.mxu1 %v10482_v19  ;;  %v1008_v19 = vld [vmem:[%s13619_s21 + $0x2d0] sm:$0xff] }
 0x262   : > { %2334 = vmatpush1.bf16.msra.mxu0 %v10479_v13  ;;  %v10536_v13 = vcombine.high %v992_v0, %v996_v3  ;;  %v10551_v39 = vcombine.low %v1008_v19, %v1012_v20  ;;  %v1033_v0 = vld [vmem:[%s13619_s21 + $0x398] sm:$0xff] }
 0x263   : > { %2335 = vmatprep.subr.bf16.mxu0 %v10488_v14  ;;  %v10521_v14 = vcombine.low %v977_v59, %v981_v61  ;;  %v1044_v61 = vld [vmem:[%s13619_s21 + $0x3f0] sm:$0xff]  ;;  %v1037_v3 = vld [vmem:[%s13619_s21 + $0x3b8] sm:$0xff] }
 0x264   : > { %2416 = vmatpush1.bf16.msra.mxu1 %v10481_v26  ;;  %v10538_v26 = vcombine.high %v993_v15, %v997_v16 }
 0x265   : > { %2417 = vmatprep.subr.bf16.mxu1 %v10490_v28  ;;  %v1016_v28 = vld [vmem:[%s13619_s21 + $0x310] sm:$0xff] }
 0x266   : > { %2336 = vmatpush1.bf16.msra.mxu0 %v10487_v21  ;;  %v10544_v21 = vcombine.high %v1000_v11, %v1004_v12  ;;  %v10559_v49 = vcombine.low %v1016_v28, %v1020_v30  ;;  %v10569_v11 = vcombine.low %v1025_v54, %v1029_v57  ;;  %v1041_v12 = vld [vmem:[%s13619_s21 + $0x3d8] sm:$0xff] }
 0x267   : > { %2337 = vmatprep.subr.bf16.mxu0 %v10496_v22  ;;  %v10529_v22 = vcombine.low %v985_v5, %v989_v7  ;;  %v1052_v7 = vld [vmem:[%s13619_s21 + $0x430] sm:$0xff] }
 0x268   : > { %2418 = vmatpush1.bf16.msra.mxu1 %v10489_v38  ;;  %v10546_v38 = vcombine.high %v1001_v23, %v1005_v24 }
 0x269   : > { %2419 = vmatprep.subr.bf16.mxu1 %v10498_v40  ;;  %v1024_v40 = vld [vmem:[%s13619_s21 + $0x350] sm:$0xff] }
 0x26a   : > { %2338 = vmatpush1.bf16.msra.mxu0 %v10495_v33  ;;  %v10552_v33 = vcombine.high %v1008_v19, %v1012_v20  ;;  %v10567_v59 = vcombine.low %v1024_v40, %v1028_v41  ;;  %v10577_v19 = vcombine.low %v1033_v0, %v1037_v3  ;;  %v1049_v20 = vld [vmem:[%s13619_s21 + $0x418] sm:$0xff] }
 0x26b   : > { %2339 = vmatprep.subr.bf16.mxu0 %v10504_v55  ;;  %v10537_v55 = vcombine.low %v993_v15, %v997_v16  ;;  %v1056_v16 = vld [vmem:[%s13619_s21 + $0x450] sm:$0xff] }
 0x26c   : > { %2420 = vmatpush1.bf16.msra.mxu1 %v10497_v48  ;;  %v10554_v48 = vcombine.high %v1009_v36, %v1013_v37 }
 0x26d   : > { %2421 = vmatprep.subr.bf16.mxu1 %v10506_v50  ;;  %v1032_v50 = vld [vmem:[%s13619_s21 + $0x390] sm:$0xff] }
 0x26e   : > { %2340 = vmatpush1.bf16.msra.mxu0 %v10503_v42  ;;  %v10560_v42 = vcombine.high %v1016_v28, %v1020_v30  ;;  %v10575_v5 = vcombine.low %v1032_v50, %v1036_v51  ;;  %v1057_v30 = vld [vmem:[%s13619_s21 + $0x458] sm:$0xff] }
 0x26f   : > { %2341 = vmatprep.subr.bf16.mxu0 %v10512_v43  ;;  %v10545_v43 = vcombine.low %v1001_v23, %v1005_v24  ;;  %v1064_v24 = vld [vmem:[%s13619_s21 + $0x490] sm:$0xff] }
 0x270   : > { %2422 = vmatpush1.bf16.msra.mxu1 %v10505_v58  ;;  %v10562_v58 = vcombine.high %v1017_v46, %v1021_v47 }
 0x271   : > { %2423 = vmatprep.subr.bf16.mxu1 %v10514_v60  ;;  %v1040_v60 = vld [vmem:[%s13619_s21 + $0x3d0] sm:$0xff] }
 0x272   : > { %2342 = vmatpush1.bf16.msra.mxu0 %v10511_v52  ;;  %v10568_v52 = vcombine.high %v1024_v40, %v1028_v41  ;;  %v10583_v15 = vcombine.low %v1040_v60, %v1044_v61  ;;  %v1065_v41 = vld [vmem:[%s13619_s21 + $0x498] sm:$0xff] }
 0x273   : > { %2343 = vmatprep.subr.bf16.mxu0 %v10520_v53  ;;  %v10553_v53 = vcombine.low %v1009_v36, %v1013_v37  ;;  %v1072_v37 = vld [vmem:[%s13619_s21 + $0x4d0] sm:$0xff] }
 0x274   : > { %2424 = vmatpush1.bf16.msra.mxu1 %v10513_v4  ;;  %v10570_v4 = vcombine.high %v1025_v54, %v1029_v57  ;;  %v1088_v57 = vld [vmem:[%s13619_s21 + $0x550] sm:$0xff] }
 0x275   : > { %2425 = vmatprep.subr.bf16.mxu1 %v10522_v6  ;;  %v1048_v6 = vld [vmem:[%s13619_s21 + $0x410] sm:$0xff] }
 0x276   : > { %2344 = vmatpush1.bf16.msra.mxu0 %v10519_v62  ;;  %v10576_v62 = vcombine.high %v1032_v50, %v1036_v51  ;;  %v10591_v23 = vcombine.low %v1048_v6, %v1052_v7  ;;  %v1073_v51 = vld [vmem:[%s13619_s21 + $0x4d8] sm:$0xff] }
 0x277   : > { %2345 = vmatprep.subr.bf16.mxu0 %v10528_v63  ;;  %v10561_v63 = vcombine.low %v1017_v46, %v1021_v47  ;;  %v1080_v47 = vld [vmem:[%s13619_s21 + $0x510] sm:$0xff] }
 0x278   : > { %2426 = vmatpush1.bf16.msra.mxu1 %v10521_v14  ;;  %v10578_v14 = vcombine.high %v1033_v0, %v1037_v3  ;;  %v1100_v0 = vld [vmem:[%s13619_s21 + $0x5b0] sm:$0xff] }
 0x279   : > { %2427 = vmatprep.subr.bf16.mxu1 %v10530_v17  ;;  %v1060_v17 = vld [vmem:[%s13619_s21 + $0x470] sm:$0xff] }
 0x27a   : > { %2346 = vmatpush1.bf16.msra.mxu0 %v10527_v10  ;;  %v10584_v10 = vcombine.high %v1040_v60, %v1044_v61  ;;  %v10599_v36 = vcombine.low %v1056_v16, %v1060_v17  ;;  %v1081_v60 = vld [vmem:[%s13619_s21 + $0x518] sm:$0xff] }
 0x27b   : > { %2347 = vmatprep.subr.bf16.mxu0 %v10536_v13  ;;  %v1045_v13 = vld [vmem:[%s13619_s21 + $0x3f8] sm:$0xff] }
 0x27c   : > { %2428 = vmatpush1.bf16.msra.mxu1 %v10529_v22  ;;  %v10586_v22 = vcombine.high %v1041_v12, %v1045_v13  ;;  %v10585_v28 = vcombine.low %v1041_v12, %v1045_v13  ;;  %v1085_v61 = vld [vmem:[%s13619_s21 + $0x538] sm:$0xff]  ;;  %v1108_v12 = vld [vmem:[%s13619_s21 + $0x5f0] sm:$0xff] }
 0x27d   : > { %2429 = vmatprep.subr.bf16.mxu1 %v10538_v26  ;;  %v1068_v26 = vld [vmem:[%s13619_s21 + $0x4b0] sm:$0xff] }
 0x27e   : > { %2348 = vmatpush1.bf16.msra.mxu0 %v10535_v18  ;;  %v10592_v18 = vcombine.high %v1048_v6, %v1052_v7  ;;  %v10607_v46 = vcombine.low %v1064_v24, %v1068_v26  ;;  %v1089_v6 = vld [vmem:[%s13619_s21 + $0x558] sm:$0xff] }
 0x27f   : > { %2349 = vmatprep.subr.bf16.mxu0 %v10544_v21  ;;  %v1053_v21 = vld [vmem:[%s13619_s21 + $0x438] sm:$0xff] }
 0x280   : > { %2430 = vmatpush1.bf16.msra.mxu1 %v10537_v55  ;;  %v10594_v55 = vcombine.high %v1049_v20, %v1053_v21  ;;  %v10593_v40 = vcombine.low %v1049_v20, %v1053_v21  ;;  %v1093_v7 = vld [vmem:[%s13619_s21 + $0x578] sm:$0xff] }
 0x281   : > { %2431 = vmatprep.subr.bf16.mxu1 %v10546_v38  ;;  %v1076_v38 = vld [vmem:[%s13619_s21 + $0x4f0] sm:$0xff]  ;;  %v10633_v21 = vcombine.low %v1089_v6, %v1093_v7 }
 0x282   : > { %2350 = vmatpush1.bf16.msra.mxu0 %v10543_v27  ;;  %v10600_v27 = vcombine.high %v1056_v16, %v1060_v17  ;;  %v10615_v54 = vcombine.low %v1072_v37, %v1076_v38  ;;  %v1097_v16 = vld [vmem:[%s13619_s21 + $0x598] sm:$0xff] }
 0x283   : > { %2351 = vmatprep.subr.bf16.mxu0 %v10552_v33  ;;  %v1061_v33 = vld [vmem:[%s13619_s21 + $0x478] sm:$0xff] }
 0x284   : > { %2432 = vmatpush1.bf16.msra.mxu1 %v10545_v43  ;;  %v10602_v43 = vcombine.high %v1057_v30, %v1061_v33  ;;  %v10601_v50 = vcombine.low %v1057_v30, %v1061_v33  ;;  %v1101_v17 = vld [vmem:[%s13619_s21 + $0x5b8] sm:$0xff] }
 0x285   : > { %2433 = vmatprep.subr.bf16.mxu1 %v10554_v48  ;;  %v1084_v48 = vld [vmem:[%s13619_s21 + $0x530] sm:$0xff] }
 0x286   : > { %2352 = vmatpush1.bf16.msra.mxu0 %v10551_v39  ;;  %v10608_v39 = vcombine.high %v1064_v24, %v1068_v26  ;;  %v1109_v24 = vld [vmem:[%s13619_s21 + $0x5f8] sm:$0xff] }
 0x287   : > { %2353 = vmatprep.subr.bf16.mxu0 %v10560_v42  ;;  %v1069_v42 = vld [vmem:[%s13619_s21 + $0x4b8] sm:$0xff] }
 0x288   : > { %2434 = vmatpush1.bf16.msra.mxu1 %v10553_v53  ;;  %v10610_v53 = vcombine.high %v1065_v41, %v1069_v42 }
 0x289   : > { %2435 = vmatprep.subr.bf16.mxu1 %v10562_v58  ;;  %v1092_v58 = vld [vmem:[%s13619_s21 + $0x570] sm:$0xff] }
 0x28a   : > { %2354 = vmatpush1.bf16.msra.mxu0 %v10559_v49  ;;  %v10616_v49 = vcombine.high %v1072_v37, %v1076_v38  ;;  %v10632_v3 = vcombine.high %v1088_v57, %v1092_v58  ;;  %v2517_v38 = vld [vmem:[%s13639_s17 + $0x40] sm:$0xff] }
 0x28b   : > { %2355 = vmatprep.subr.bf16.mxu0 %v10568_v52  ;;  %v1077_v52 = vld [vmem:[%s13619_s21 + $0x4f8] sm:$0xff] }
 0x28c   : > { %2436 = vmatpush1.bf16.msra.mxu1 %v10561_v63  ;;  %v10623_v63 = vcombine.low %v1080_v47, %v1084_v48 }
 0x28d   : > { %2437 = vmatprep.subr.bf16.mxu1 %v10570_v4  ;;  %v10617_v4 = vcombine.low %v1073_v51, %v1077_v52 }
 0x28e   : > { %2356 = vmatpush1.bf16.msra.mxu0 %v10567_v59  ;;  %v10609_v59 = vcombine.low %v1065_v41, %v1069_v42  ;;  %v2510_v42 = vld [vmem:[%s13639_s17 + $0x8] sm:$0xff] }
 0x28f   : > { %2357 = vmatprep.subr.bf16.mxu0 %v10576_v62  ;;  %v10618_v62 = vcombine.high %v1073_v51, %v1077_v52  ;;  %v2518_v52 = vld [vmem:[%s13639_s17 + $0x48] sm:$0xff] }
 0x290   : > { %2438 = vmatpush1.bf16.msra.mxu1 %v10569_v11  ;;  %v1104_v11 = vld [vmem:[%s13619_s21 + $0x5d0] sm:$0xff] }
 0x291   : > { %2439 = vmatprep.subr.bf16.mxu1 %v10578_v14  ;;  %v10625_v14 = vcombine.low %v1081_v60, %v1085_v61  ;;  %v10648_v20 = vcombine.high %v1104_v11, %v1108_v12  ;;  %v10647_v26 = vcombine.low %v1104_v11, %v1108_v12  ;;  %v2545_v11 = vld [vmem:[%s13639_s17 + $0x120] sm:$0xff] }
 0x292   : > { %2358 = vmatpush1.bf16.msra.mxu0 %v10575_v5  ;;  %v10626_v5 = vcombine.high %v1081_v60, %v1085_v61 }
 0x293   : > { %2359 = vmatprep.subr.bf16.mxu0 %v10584_v10  ;;  %v10631_v10 = vcombine.low %v1088_v57, %v1092_v58 }
 0x294   : > { %2440 = vmatpush1.bf16.msra.mxu1 %v10577_v19  ;;  %v1112_v19 = vld [vmem:[%s13619_s21 + $0x610] sm:$0xff] }
 0x295   : > { %2441 = vmatprep.subr.bf16.mxu1 %v10586_v22  ;;  %v10642_v22 = vcombine.high %v1097_v16, %v1101_v17  ;;  %v10656_v30 = vcombine.high %v1112_v19, %v1112_v19  ;;  %v10655_v33 = vcombine.low %v1112_v19, %v1112_v19 }
 0x296   : > { %2360 = vmatpush1.bf16.msra.mxu0 %v10583_v15  ;;  %v10634_v15 = vcombine.high %v1089_v6, %v1093_v7  ;;  %v2534_v7 = vld [vmem:[%s13639_s17 + $0xc8] sm:$0xff] }
 0x297   : > { %2370 = vmatprep.subr.bf16.mxu0 %v10592_v18 }
 0x298   : > { %2442 = vmatpush1.bf16.msra.mxu1 %v10585_v28  ;;  %v2513_v28 = vld [vmem:[%s13639_s17 + $0x20] sm:$0xff] }
 0x299   : > { %2362 = vmatmul.mubr.bf16.vlgmr.msra.gmra.mrb[4].mxu0 %v13759_v25  ;;  %2452 = vmatprep.subr.bf16.mxu1 %v10594_v55  ;;  %v10641_v55 = vcombine.low %v1097_v16, %v1101_v17  ;;  %v2542_v16 = vld [vmem:[%s13639_s17 + $0x108] sm:$0xff] }
 0x29a   : > { %2371 = vmatpush1.bf16.msra.mxu0 %v10591_v23  ;;  %10664 = vmatprep.mubr.msk.bf16.mxu0 %vm2136_vm2, %v13763_v29  ;;  %v1105_v23 = vld [vmem:[%s13619_s21 + $0x5d8] sm:$0xff] }
 0x29b   : > { %2372 = vmatprep.subr.bf16.mxu0 %v10600_v27  ;;  %2444 = vmatmul.mubr.bf16.vlgmr.msra.gmra.mrb[4].mxu1 %v13759_v25  ;;  %v10624_v25 = vcombine.high %v1080_v47, %v1084_v48  ;;  %v2509_v27 = vld [vmem:[%s13639_s17] sm:$0xff]  ;;  %v10650_v37 = vcombine.high %v1105_v23, %v1109_v24  ;;  %v2546_v17 = vld [vmem:[%s13639_s17 + $0x128] sm:$0xff] }
 0x29c   : > { %2453 = vmatpush1.bf16.msra.mxu1 %v10593_v40  ;;  %10666 = vmatprep.mubr.msk.bf16.mxu1 %vm2136_vm2, %v13763_v29  ;;  %v1096_v29 = vld [vmem:[%s13619_s21 + $0x590] sm:$0xff]  ;;  %v10649_v40 = vcombine.low %v1105_v23, %v1109_v24  ;;  %v10668_v41 = vcombine.high %v2509_v27, %v2513_v28  ;;  %v2550_v24 = vld [vmem:[%s13639_s17 + $0x148] sm:$0xff] }
 0x29d   : > { %2454 = vmatprep.subr.bf16.mxu1 %v10602_v43  ;;  %v10640_v13 = vcombine.high %v1096_v29, %v1100_v0  ;;  %v10639_v18 = vcombine.low %v1096_v29, %v1100_v0  ;;  %v2514_v43 = vld [vmem:[%s13639_s17 + $0x28] sm:$0xff]  ;;  %v2537_v29 = vld [vmem:[%s13639_s17 + $0xe0] sm:$0xff] }
 0x29e   : > { %2373 = vmatpush1.bf16.msra.mxu0 %v10599_v36  ;;  %v1113_v36 = vld [vmem:[%s13619_s21 + $0x618] sm:$0xff]  ;;  %v10670_v58 = vcombine.high %v2510_v42, %v2514_v43  ;;  %v10669_v60 = vcombine.low %v2510_v42, %v2514_v43  ;;  %v2573_v42 = vld [vmem:[%s13639_s17 + $0x200] sm:$0xff] }
 0x29f   : > { %2374 = vmatprep.subr.bf16.mxu0 %v10608_v39  ;;  %v2154_v39 = vsel %vm2140_vm3, %v10655_v33, 0  ;;  %v10658_v47 = vcombine.high %v1113_v36, %v1113_v36  ;;  %v10657_v48 = vcombine.low %v1113_v36, %v1113_v36  ;;  %v2565_v33 = vld [vmem:[%s13639_s17 + $0x1c0] sm:$0xff] }
 0x2a0   : > { %2455 = vmatpush1.bf16.msra.mxu1 %v10601_v50  ;;  %v2525_v50 = vld [vmem:[%s13639_s17 + $0x80] sm:$0xff] }
 0x2a1   : > { %2456 = vmatprep.subr.bf16.mxu1 %v10610_v53  ;;  %v2522_v53 = vld [vmem:[%s13639_s17 + $0x68] sm:$0xff]  ;;  %v2160_v57 = vsel %vm2140_vm3, %v10657_v48, 0 }
 0x2a2   : > { %2375 = vmatpush1.bf16.msra.mxu0 %v10607_v46  ;;  %v2521_v46 = vld [vmem:[%s13639_s17 + $0x60] sm:$0xff]  ;;  %v10678_v0 = vcombine.high %v2518_v52, %v2522_v53  ;;  %v2570_v48 = vld [vmem:[%s13639_s17 + $0x1e8] sm:$0xff] }
 0x2a3   : > { %2376 = vmatprep.subr.bf16.mxu0 %v10616_v49  ;;  %v10667_v49 = vcombine.low %v2509_v27, %v2513_v28  ;;  %v10676_v51 = vcombine.high %v2517_v38, %v2521_v46  ;;  %v2561_v27 = vld [vmem:[%s13639_s17 + $0x1a0] sm:$0xff]  ;;  %v10702_v28 = vcombine.high %v2542_v16, %v2546_v17 }
 0x2a4   : > { %2457 = vmatpush1.bf16.msra.mxu1 %v10609_v59  ;;  %v2533_v59 = vld [vmem:[%s13639_s17 + $0xc0] sm:$0xff] }
 0x2a5   : > { %2458 = vmatprep.subr.bf16.mxu1 %v10618_v62  ;;  %v2526_v62 = vld [vmem:[%s13639_s17 + $0x88] sm:$0xff]  ;;  %v10692_v6 = vcombine.high %v2533_v59, %v2537_v29 }
 0x2a6   : > { %2377 = vmatpush1.bf16.msra.mxu0 %v10615_v54  ;;  %v2529_v54 = vld [vmem:[%s13639_s17 + $0xa0] sm:$0xff] }
 0x2a7   : > { %2378 = vmatprep.subr.bf16.mxu0 %v10624_v25  ;;  %v10675_v25 = vcombine.low %v2517_v38, %v2521_v46  ;;  %v10684_v61 = vcombine.high %v2525_v50, %v2529_v54  ;;  %v2562_v38 = vld [vmem:[%s13639_s17 + $0x1a8] sm:$0xff] }
 0x2a8   : > { %2459 = vmatpush1.bf16.msra.mxu1 %v10617_v4  ;;  %v2541_v4 = vld [vmem:[%s13639_s17 + $0x100] sm:$0xff] }
 0x2a9   : > { %2460 = vmatprep.subr.bf16.mxu1 %v10626_v5  ;;  %v10677_v5 = vcombine.low %v2518_v52, %v2522_v53  ;;  %v2581_v52 = vld [vmem:[%s13639_s17 + $0x240] sm:$0xff] }
 0x2aa   : > { %2379 = vmatpush1.bf16.msra.mxu0 %v10623_v63  ;;  %v2530_v63 = vld [vmem:[%s13639_s17 + $0xa8] sm:$0xff] }
 0x2ab   : > { %2380 = vmatprep.subr.bf16.mxu0 %v10632_v3  ;;  %v10683_v3 = vcombine.low %v2525_v50, %v2529_v54  ;;  %v10686_v12 = vcombine.high %v2526_v62, %v2530_v63 }
 0x2ac   : > { %2461 = vmatpush1.bf16.msra.mxu1 %v10625_v14  ;;  %v2549_v14 = vld [vmem:[%s13639_s17 + $0x140] sm:$0xff] }
 0x2ad   : > { %2462 = vmatprep.subr.bf16.mxu1 %v10634_v15  ;;  %v10700_v15 = vcombine.high %v2541_v4, %v2545_v11 }
 0x2ae   : > { %2381 = vmatpush1.bf16.msra.mxu0 %v10631_v10  ;;  %v2538_v10 = vld [vmem:[%s13639_s17 + $0xe8] sm:$0xff] }
 0x2af   : > { %2382 = vmatprep.subr.bf16.mxu0 %v10640_v13  ;;  %v10691_v13 = vcombine.low %v2533_v59, %v2537_v29  ;;  %v10694_v19 = vcombine.high %v2534_v7, %v2538_v10  ;;  %v2582_v29 = vld [vmem:[%s13639_s17 + $0x248] sm:$0xff] }
 0x2b0   : > { %2463 = vmatpush1.bf16.msra.mxu1 %v10633_v21  ;;  %v2557_v21 = vld [vmem:[%s13639_s17 + $0x180] sm:$0xff] }
 0x2b1   : > { %2464 = vmatprep.subr.bf16.mxu1 %v10642_v22  ;;  %v10693_v22 = vcombine.low %v2534_v7, %v2538_v10  ;;  %v10716_v36 = vcombine.high %v2557_v21, %v2561_v27 }
 0x2b2   : > { %2383 = vmatpush1.bf16.msra.mxu0 %v10639_v18  ;;  %v2553_v18 = vld [vmem:[%s13639_s17 + $0x160] sm:$0xff] }
 0x2b3   : > { %2384 = vmatprep.subr.bf16.mxu0 %v10648_v20  ;;  %v10699_v20 = vcombine.low %v2541_v4, %v2545_v11  ;;  %v10708_v23 = vcombine.high %v2549_v14, %v2553_v18  ;;  %v2590_v11 = vld [vmem:[%s13639_s17 + $0x288] sm:$0xff] }
 0x2b4   : > { %2465 = vmatpush1.bf16.msra.mxu1 %v10641_v55  ;;  %v10701_v55 = vcombine.low %v2542_v16, %v2546_v17 }
 0x2b5   : > { %2466 = vmatprep.subr.bf16.mxu1 %v10650_v37  ;;  %v2558_v37 = vld [vmem:[%s13639_s17 + $0x188] sm:$0xff] }
 0x2b6   : > { %2385 = vmatpush1.bf16.msra.mxu0 %v10647_v26  ;;  %v2554_v26 = vld [vmem:[%s13639_s17 + $0x168] sm:$0xff]  ;;  %v10718_v50 = vcombine.high %v2558_v37, %v2562_v38  ;;  %v10717_v53 = vcombine.low %v2558_v37, %v2562_v38 }
 0x2b7   : > { %10663 = vmatprep.subr.msk.bf16.mxu0 %vm2140_vm3, %v10656_v30  ;;  %v10707_v30 = vcombine.low %v2549_v14, %v2553_v18  ;;  %v10709_v43 = vcombine.low %v2550_v24, %v2554_v26  ;;  %v2598_v18 = vld [vmem:[%s13639_s17 + $0x2c8] sm:$0xff] }
 0x2b8   : > { %2467 = vmatpush1.bf16.msra.mxu1 %v10649_v40  ;;  %v10710_v40 = vcombine.high %v2550_v24, %v2554_v26 }
 0x2b9   : > { %10665 = vmatprep.subr.msk.bf16.mxu1 %vm2140_vm3, %v10658_v47  ;;  %v2566_v47 = vld [vmem:[%s13639_s17 + $0x1c8] sm:$0xff] }
 0x2ba   : > { %2387 = vmatpush1.bf16.msra.mxu0 %v2154_v39  ;;  %v2569_v39 = vld [vmem:[%s13639_s17 + $0x1e0] sm:$0xff]  ;;  %v10726_v59 = vcombine.high %v2566_v47, %v2570_v48 }
 0x2bb   : > { %5623 = vmatprep.subr.bf16.mxu0 %v10668_v41  ;;  %v10715_v41 = vcombine.low %v2557_v21, %v2561_v27  ;;  %v10724_v46 = vcombine.high %v2565_v33, %v2569_v39  ;;  %v2606_v27 = vld [vmem:[%s13639_s17 + $0x308] sm:$0xff] }
 0x2bc   : > { %2469 = vmatpush1.bf16.msra.mxu1 %v2160_v57  ;;  %v2574_v57 = vld [vmem:[%s13639_s17 + $0x208] sm:$0xff] }
 0x2bd   : > { %2403 = vmatmul.mubr.bf16.vlgmr.msra.gmra.mrb[4].mxu0 %v13813_v56  ;;  %5787 = vmatprep.subr.bf16.mxu1 %v10670_v58  ;;  %v2578_v58 = vld [vmem:[%s13639_s17 + $0x228] sm:$0xff] }
 0x2be   : > { %5624 = vmatpush1.bf16.msra.mxu0 %v10667_v49  ;;  %v2577_v49 = vld [vmem:[%s13639_s17 + $0x220] sm:$0xff]  ;;  %v10734_v4 = vcombine.high %v2574_v57, %v2578_v58  ;;  %v10733_v7 = vcombine.low %v2574_v57, %v2578_v58 }
 0x2bf   : > { %5625 = vmatprep.subr.bf16.mxu0 %v10676_v51  ;;  %2485 = vmatmul.mubr.bf16.vlgmr.msra.gmra.mrb[4].mxu1 %v13813_v56  ;;  %v10685_v56 = vcombine.low %v2526_v62, %v2530_v63  ;;  %v10723_v51 = vcombine.low %v2565_v33, %v2569_v39  ;;  %v10732_v54 = vcombine.high %v2573_v42, %v2577_v49  ;;  %v2614_v39 = vld [vmem:[%s13639_s17 + $0x348] sm:$0xff] }
 0x2c0   : > { %5788 = vmatpush1.bf16.msra.mxu1 %v10669_v60  ;;  %v10731_v60 = vcombine.low %v2573_v42, %v2577_v49  ;;  %v10725_v62 = vcombine.low %v2566_v47, %v2570_v48  ;;  %v2622_v49 = vld [vmem:[%s13639_s17 + $0x388] sm:$0xff] }
 0x2c1   : > { %5789 = vmatprep.subr.bf16.mxu1 %v10678_v0  ;;  %v2586_v0 = vld [vmem:[%s13639_s17 + $0x268] sm:$0xff] }
 0x2c2   : > { %5626 = vmatpush1.bf16.msra.mxu0 %v10675_v25  ;;  %v2585_v25 = vld [vmem:[%s13639_s17 + $0x260] sm:$0xff]  ;;  %v10742_v14 = vcombine.high %v2582_v29, %v2586_v0  ;;  %v10741_v16 = vcombine.low %v2582_v29, %v2586_v0  ;;  %v2638_v0 = vld [vmem:[%s13639_s17 + $0x408] sm:$0xff] }
 0x2c3   : > { %5627 = vmatprep.subr.bf16.mxu0 %v10684_v61  ;;  %v2589_v61 = vld [vmem:[%s13639_s17 + $0x280] sm:$0xff]  ;;  %v10740_v63 = vcombine.high %v2581_v52, %v2585_v25 }
 0x2c4   : > { %5790 = vmatpush1.bf16.msra.mxu1 %v10677_v5  ;;  %v10739_v5 = vcombine.low %v2581_v52, %v2585_v25  ;;  %v2630_v25 = vld [vmem:[%s13639_s17 + $0x3c8] sm:$0xff] }
 0x2c5   : > { %5791 = vmatprep.subr.bf16.mxu1 %v10686_v12  ;;  %v2594_v12 = vld [vmem:[%s13639_s17 + $0x2a8] sm:$0xff] }
 0x2c6   : > { %5628 = vmatpush1.bf16.msra.mxu0 %v10683_v3  ;;  %v2593_v3 = vld [vmem:[%s13639_s17 + $0x2a0] sm:$0xff]  ;;  %v10750_v21 = vcombine.high %v2590_v11, %v2594_v12  ;;  %v10749_v24 = vcombine.low %v2590_v11, %v2594_v12  ;;  %v14002_v12 = vld [vmem:[%s13637_s13] sm:$0xff] }
 0x2c7   : > { %5629 = vmatprep.subr.bf16.mxu0 %v10692_v6  ;;  %v2597_v6 = vld [vmem:[%s13639_s17 + $0x2c0] sm:$0xff]  ;;  %v10748_v10 = vcombine.high %v2589_v61, %v2593_v3 }
 0x2c8   : > { %5792 = vmatpush1.bf16.msra.mxu1 %v10685_v56  ;;  %v10747_v56 = vcombine.low %v2589_v61, %v2593_v3  ;;  %v2642_v3 = vld [vmem:[%s13639_s17 + $0x428] sm:$0xff] }
 0x2c9   : > { %5793 = vmatprep.subr.bf16.mxu1 %v10694_v19  ;;  %v2602_v19 = vld [vmem:[%s13639_s17 + $0x2e8] sm:$0xff] }
 0x2ca   : > { %5630 = vmatpush1.bf16.msra.mxu0 %v10691_v13  ;;  %v2601_v13 = vld [vmem:[%s13639_s17 + $0x2e0] sm:$0xff]  ;;  %v10758_v33 = vcombine.high %v2598_v18, %v2602_v19  ;;  %v10757_v37 = vcombine.low %v2598_v18, %v2602_v19 }
 0x2cb   : > { %5631 = vmatprep.subr.bf16.mxu0 %v10700_v15  ;;  %v2605_v15 = vld [vmem:[%s13639_s17 + $0x300] sm:$0xff]  ;;  %v10756_v17 = vcombine.high %v2597_v6, %v2601_v13 }
 0x2cc   : > { %5794 = vmatpush1.bf16.msra.mxu1 %v10693_v22  ;;  %v10755_v22 = vcombine.low %v2597_v6, %v2601_v13  ;;  %v10798_v6 = vcombine.high %v2638_v0, %v2642_v3 }
 0x2cd   : > { %5795 = vmatprep.subr.bf16.mxu1 %v10702_v28  ;;  %v2610_v28 = vld [vmem:[%s13639_s17 + $0x328] sm:$0xff] }
 0x2ce   : > { %5632 = vmatpush1.bf16.msra.mxu0 %v10699_v20  ;;  %v2609_v20 = vld [vmem:[%s13639_s17 + $0x320] sm:$0xff]  ;;  %v10766_v42 = vcombine.high %v2606_v27, %v2610_v28  ;;  %v10765_v47 = vcombine.low %v2606_v27, %v2610_v28  ;;  %v2646_v28 = vld [vmem:[%s13639_s17 + $0x448] sm:$0xff] }
 0x2cf   : > { %5633 = vmatprep.subr.bf16.mxu0 %v10708_v23  ;;  %v2613_v23 = vld [vmem:[%s13639_s17 + $0x340] sm:$0xff]  ;;  %v10764_v26 = vcombine.high %v2605_v15, %v2609_v20 }
 0x2d0   : > { %5796 = vmatpush1.bf16.msra.mxu1 %v10701_v55  ;;  %v10763_v55 = vcombine.low %v2605_v15, %v2609_v20  ;;  %v2649_v27 = vld [vmem:[%s13639_s17 + $0x460] sm:$0xff] }
 0x2d1   : > { %5797 = vmatprep.subr.bf16.mxu1 %v10710_v40  ;;  %v2618_v40 = vld [vmem:[%s13639_s17 + $0x368] sm:$0xff] }
 0x2d2   : > { %5634 = vmatpush1.bf16.msra.mxu0 %v10707_v30  ;;  %v2617_v30 = vld [vmem:[%s13639_s17 + $0x360] sm:$0xff]  ;;  %v10774_v52 = vcombine.high %v2614_v39, %v2618_v40  ;;  %v10773_v57 = vcombine.low %v2614_v39, %v2618_v40 }
 0x2d3   : > { %5635 = vmatprep.subr.bf16.mxu0 %v10716_v36  ;;  %v2621_v36 = vld [vmem:[%s13639_s17 + $0x380] sm:$0xff]  ;;  %v10772_v38 = vcombine.high %v2613_v23, %v2617_v30 }
 0x2d4   : > { %5798 = vmatpush1.bf16.msra.mxu1 %v10709_v43  ;;  %v10771_v43 = vcombine.low %v2613_v23, %v2617_v30  ;;  %v2645_v23 = vld [vmem:[%s13639_s17 + $0x440] sm:$0xff]  ;;  %v2650_v30 = vld [vmem:[%s13639_s17 + $0x468] sm:$0xff] }
 0x2d5   : > { %5799 = vmatprep.subr.bf16.mxu1 %v10718_v50  ;;  %v2626_v50 = vld [vmem:[%s13639_s17 + $0x3a8] sm:$0xff]  ;;  %v10804_v40 = vcombine.high %v2645_v23, %v2649_v27 }
 0x2d6   : > { %5636 = vmatpush1.bf16.msra.mxu0 %v10715_v41  ;;  %v2625_v41 = vld [vmem:[%s13639_s17 + $0x3a0] sm:$0xff]  ;;  %v10782_v61 = vcombine.high %v2622_v49, %v2626_v50 }
 0x2d7   : > { %5637 = vmatprep.subr.bf16.mxu0 %v10724_v46  ;;  %v2629_v46 = vld [vmem:[%s13639_s17 + $0x3c0] sm:$0xff]  ;;  %v10780_v48 = vcombine.high %v2621_v36, %v2625_v41 }
 0x2d8   : > { %5800 = vmatpush1.bf16.msra.mxu1 %v10717_v53  ;;  %v10779_v53 = vcombine.low %v2621_v36, %v2625_v41  ;;  %v10806_v41 = vcombine.high %v2646_v28, %v2650_v30 }
 0x2d9   : > { %5801 = vmatprep.subr.bf16.mxu1 %v10726_v59  ;;  %v2634_v59 = vld [vmem:[%s13639_s17 + $0x3e8] sm:$0xff] }
 0x2da   : > { %5638 = vmatpush1.bf16.msra.mxu0 %v10723_v51  ;;  %v2633_v51 = vld [vmem:[%s13639_s17 + $0x3e0] sm:$0xff] }
 0x2db   : > { %5639 = vmatprep.subr.bf16.mxu0 %v10732_v54  ;;  %v13988_v54 = vld [vmem:[%s13639_s17 + $0x400] sm:$0xff]  ;;  %v10788_v58 = vcombine.high %v2629_v46, %v2633_v51 }
 0x2dc   : > { %5802 = vmatpush1.bf16.msra.mxu1 %v10725_v62  ;;  %v10787_v62 = vcombine.low %v2629_v46, %v2633_v51 }
 0x2dd   : > { %5803 = vmatprep.subr.bf16.mxu1 %v10734_v4  ;;  %v10790_v4 = vcombine.high %v2630_v25, %v2634_v59 }
 0x2de   : > { %5640 = vmatpush1.bf16.msra.mxu0 %v10731_v60  ;;  %v2641_v60 = vld [vmem:[%s13639_s17 + $0x420] sm:$0xff] }
 0x2df   : > { %5641 = vmatprep.subr.bf16.mxu0 %v10740_v63  ;;  %v10781_v63 = vcombine.low %v2622_v49, %v2626_v50  ;;  %v10796_v29 = vcombine.high %v13988_v54, %v2641_v60  ;;  %v10795_v36 = vcombine.low %v13988_v54, %v2641_v60  ;;  %v2658_v49 = vld [vmem:[%s13639_s17 + $0x4a8] sm:$0xff] }
 0x2e0   : > { %5804 = vmatpush1.bf16.msra.mxu1 %v10733_v7  ;;  %v1116_v7 = vlaneseq  ;;  %v2662_v60 = vld [vmem:[%s13639_s17 + $0x4c8] sm:$0xff] }
 0x2e1   : > { %5805 = vmatprep.subr.bf16.mxu1 %v10742_v14 }
 0x2e2   : > { %5642 = vmatpush1.bf16.msra.mxu0 %v10739_v5  ;;  %v10789_v5 = vcombine.low %v2630_v25, %v2634_v59  ;;  %v2665_v59 = vld [vmem:[%s13639_s17 + $0x4e0] sm:$0xff] }
 0x2e3   : > { %5643 = vmatprep.subr.bf16.mxu0 %v10748_v10  ;;  %v13996_v10 = vshrl.u32 %v1116_v7, 7 }
 0x2e4   : > { %5806 = vmatpush1.bf16.msra.mxu1 %v10741_v16 }
 0x2e5   : > { %5807 = vmatprep.subr.bf16.mxu1 %v10750_v21  ;;  %v13999_v11 = vsub.s32 0, %v13996_v10  ;;  %v14005_v13 = vsub.s32 1, %v13996_v10  ;;  %v14012_v15 = vsub.s32 3, %v13996_v10 }
 0x2e6   : > { %5644 = vmatpush1.bf16.msra.mxu0 %v10747_v56 }
 0x2e7   : > { %5645 = vmatprep.subr.bf16.mxu0 %v10756_v17  ;;  %v1119_v14 = vrot.slane %v14002_v12, %v13999_v11  ;;  %v1123_v56 = vrot.slane %v14002_v12, %v14005_v13 }
 0x2e8   : > { %5808 = vmatpush1.bf16.msra.mxu1 %v10749_v24  ;;  %v1131_v24 = vrot.slane %v14002_v12, %v14012_v15 }
 0x2e9   : > { %5809 = vmatprep.subr.bf16.mxu1 %v10758_v33 }
 0x2ea   : > { %5646 = vmatpush1.bf16.msra.mxu0 %v10755_v22 }
 0x2eb   : > { %5647 = vmatprep.subr.bf16.mxu0 %v10764_v26 }
 0x2ec   : > { %5810 = vmatpush1.bf16.msra.mxu1 %v10757_v37  ;;  %v10797_v37 = vcombine.low %v2638_v0, %v2642_v3  ;;  %v2669_v3 = vld [vmem:[%s13639_s17 + $0x500] sm:$0xff] }
 0x2ed   : > { %5811 = vmatprep.subr.bf16.mxu1 %v10766_v42  ;;  %v2653_v42 = vld [vmem:[%s13639_s17 + $0x480] sm:$0xff] }
 0x2ee   : > { %5648 = vmatpush1.bf16.msra.mxu0 %v10763_v55 }
 0x2ef   : > { %5649 = vmatprep.subr.bf16.mxu0 %v10772_v38 }
 0x2f0   : > { %5812 = vmatpush1.bf16.msra.mxu1 %v10765_v47  ;;  %v2657_v47 = vld [vmem:[%s13639_s17 + $0x4a0] sm:$0xff] }
 0x2f1   : > { %5813 = vmatprep.subr.bf16.mxu1 %v10774_v52  ;;  %v10803_v52 = vcombine.low %v2645_v23, %v2649_v27  ;;  %v10812_v54 = vcombine.high %v2653_v42, %v2657_v47  ;;  %v2689_v27 = vld [vmem:[%s13639_s17 + $0x5a0] sm:$0xff] }
 0x2f2   : > { %5650 = vmatpush1.bf16.msra.mxu0 %v10771_v43 }
 0x2f3   : > { %5651 = vmatprep.subr.bf16.mxu0 %v10780_v48  ;;  %v2654_v48 = vld [vmem:[%s13639_s17 + $0x488] sm:$0xff] }
 0x2f4   : > { %5814 = vmatpush1.bf16.msra.mxu1 %v10773_v57  ;;  %v10814_v57 = vcombine.high %v2654_v48, %v2658_v49 }
 0x2f5   : > { %5815 = vmatprep.subr.bf16.mxu1 %v10782_v61  ;;  %v2666_v61 = vld [vmem:[%s13639_s17 + $0x4e8] sm:$0xff] }
 0x2f6   : > { %5652 = vmatpush1.bf16.msra.mxu0 %v10779_v53  ;;  %v10805_v53 = vcombine.low %v2646_v28, %v2650_v30  ;;  %v10822_v0 = vcombine.high %v2662_v60, %v2666_v61  ;;  %v2686_v28 = vld [vmem:[%s13639_s17 + $0x588] sm:$0xff] }
 0x2f7   : > { %5653 = vmatprep.subr.bf16.mxu0 %v10788_v58  ;;  %v2661_v58 = vld [vmem:[%s13639_s17 + $0x4c0] sm:$0xff]  ;;  %v2690_v30 = vld [vmem:[%s13639_s17 + $0x5a8] sm:$0xff] }
 0x2f8   : > { %5816 = vmatpush1.bf16.msra.mxu1 %v10781_v63  ;;  %v10813_v63 = vcombine.low %v2654_v48, %v2658_v49  ;;  %v10819_v7 = vcombine.low %v2661_v58, %v2665_v59  ;;  %v10845_v48 = vcombine.low %v2686_v28, %v2690_v30 }
 0x2f9   : > { %5817 = vmatprep.subr.bf16.mxu1 %v10790_v4  ;;  %v2673_v4 = vld [vmem:[%s13639_s17 + $0x520] sm:$0xff] }
 0x2fa   : > { %5654 = vmatpush1.bf16.msra.mxu0 %v10787_v62  ;;  %v10811_v62 = vcombine.low %v2653_v42, %v2657_v47  ;;  %v2697_v42 = vld [vmem:[%s13639_s17 + $0x5e0] sm:$0xff] }
 0x2fb   : > { %5664 = vmatprep.subr.bf16.mxu0 %v10796_v29  ;;  %v10820_v29 = vcombine.high %v2661_v58, %v2665_v59 }
 0x2fc   : > { %5818 = vmatpush1.bf16.msra.mxu1 %v10789_v5  ;;  %v2670_v5 = vld [vmem:[%s13639_s17 + $0x508] sm:$0xff] }
 0x2fd   : > { %5828 = vmatprep.subr.bf16.mxu1 %v10798_v6  ;;  %v2674_v6 = vld [vmem:[%s13639_s17 + $0x528] sm:$0xff] }
 0x32c   : > { %v2240_v16 = vpop.f32.mrb[0].mxu0 }
 0x32d   : > { %v11704_v17 = vadd.f32 %v2240_v16, %v1119_v14  ;;  %v2242_v18 = vpop.f32.mrb[1].mxu0  ;;  %v10821_v14 = vcombine.low %v2662_v60, %v2666_v61  ;;  %v10830_v16 = vcombine.high %v2670_v5, %v2674_v6  ;;  %v2709_v61 = vld [vmem:[%s13639_s17 + $0x640] sm:$0xff] }
 0x32e   : > { %v11705_v19 = vadd.f32 %v2242_v18, %v1123_v56  ;;  %v2244_v20 = vpop.f32.mrb[2].mxu0  ;;  %v14020_v33 = vpop.f32.mrb[0].mxu1  ;;  %v10828_v56 = vcombine.high %v2669_v3, %v2673_v4  ;;  %v2681_v18 = vld [vmem:[%s13639_s17 + $0x560] sm:$0xff] }
 0x32f   : > { %v2493_v21 = vmax.f32 %v11704_v17, 0.0  ;;  %v2245_v22 = vpop.f32.mrb[3].mxu0  ;;  %v2324_v38 = vpop.f32.mrb[1].mxu1  ;;  %v2677_v17 = vld [vmem:[%s13639_s17 + $0x540] sm:$0xff]  ;;  %v2682_v20 = vld [vmem:[%s13639_s17 + $0x568] sm:$0xff] }
 0x330   : > { %v2494_v26 = vmax.f32 %v11705_v19, 0.0  ;;  %v11707_v43 = vadd.f32 %v2324_v38, %v1131_v24  ;;  %v2326_v46 = vpop.f32.mrb[2].mxu1  ;;  %v2678_v19 = vld [vmem:[%s13639_s17 + $0x548] sm:$0xff]  ;;  %v10829_v22 = vcombine.low %v2670_v5, %v2674_v6  ;;  %v10836_v23 = vcombine.high %v2677_v17, %v2681_v18  ;;  %v2717_v6 = vld [vmem:[%s13639_s17 + $0x680] sm:$0xff] }
 0x331   : > { %v14025_v39 = vpack.c.bf16 %v2493_v21, %v2493_v21  ;;  %v2327_v50 = vpop.f32.mrb[3].mxu1  ;;  %v10827_v21 = vcombine.low %v2669_v3, %v2673_v4  ;;  %v10838_v24 = vcombine.high %v2678_v19, %v2682_v20  ;;  %v2698_v46 = vld [vmem:[%s13639_s17 + $0x5e8] sm:$0xff] }
 0x332   : > { %v14022_v55 = vpack.c.bf16 %v2494_v26, %v2494_v26  ;;  %v2496_v51 = vmax.f32 %v11707_v43, 0.0  ;;  %v2685_v26 = vld [vmem:[%s13639_s17 + $0x580] sm:$0xff]  ;;  %v2694_v43 = vld [vmem:[%s13639_s17 + $0x5c8] sm:$0xff] }
 0x333   : > { %v10844_v38 = vcombine.high %v2685_v26, %v2689_v27  ;;  %v10843_v47 = vcombine.low %v2685_v26, %v2689_v27  ;;  %v10854_v50 = vcombine.high %v2694_v43, %v2698_v46  ;;  %v10853_v58 = vcombine.low %v2694_v43, %v2698_v46  ;;  %v2741_v46 = vld [vmem:[%s13639_s17 + $0x740] sm:$0xff] }
 0x334   : > { %5655 = vmatprep.mubr.bf16.mxu0 %v14022_v55  ;;  %5819 = vmatprep.mubr.bf16.mxu1 %v14022_v55  ;;  %v14036_v25 = vpack.c.bf16 %v2496_v51, %v2496_v51  ;;  %v2701_v51 = vld [vmem:[%s13639_s17 + $0x600] sm:$0xff] }
 0x335   : > { %5656 = vmatmul.mubr.bf16.vlgmr.msra.gmra.mrb[8].mxu0 %v14025_v39  ;;  %5820 = vmatmul.mubr.bf16.vlgmr.msra.gmra.mrb[8].mxu1 %v14025_v39 }
 0x336   : > { %5665 = vmatpush1.bf16.msra.mxu0 %v10795_v36  ;;  %5829 = vmatpush1.bf16.msra.mxu1 %v10797_v37  ;;  %v10835_v36 = vcombine.low %v2677_v17, %v2681_v18  ;;  %v10837_v37 = vcombine.low %v2678_v19, %v2682_v20  ;;  %v2725_v20 = vld [vmem:[%s13639_s17 + $0x6c0] sm:$0xff] }
 0x337   : > { %5666 = vmatprep.subr.bf16.mxu0 %v10804_v40  ;;  %5830 = vmatprep.subr.bf16.mxu1 %v10806_v41  ;;  %v10846_v40 = vcombine.high %v2686_v28, %v2690_v30  ;;  %v2693_v41 = vld [vmem:[%s13639_s17 + $0x5c0] sm:$0xff] }
 0x338   : > { %5696 = vmatprep.mubr.bf16.mxu0 %v14036_v25  ;;  %5860 = vmatprep.mubr.bf16.mxu1 %v14036_v25  ;;  %v10852_v49 = vcombine.high %v2693_v41, %v2697_v42  ;;  %v2733_v30 = vld [vmem:[%s13639_s17 + $0x700] sm:$0xff] }
 0x33a   : > { %5667 = vmatpush1.bf16.msra.mxu0 %v10803_v52  ;;  %5831 = vmatpush1.bf16.msra.mxu1 %v10805_v53  ;;  %v2705_v52 = vld [vmem:[%s13639_s17 + $0x620] sm:$0xff]  ;;  %v2702_v53 = vld [vmem:[%s13639_s17 + $0x608] sm:$0xff] }
 0x33b   : > { %5668 = vmatprep.subr.bf16.mxu0 %v10812_v54  ;;  %5832 = vmatprep.subr.bf16.mxu1 %v10814_v57  ;;  %v2706_v54 = vld [vmem:[%s13639_s17 + $0x628] sm:$0xff]  ;;  %v10851_v57 = vcombine.low %v2693_v41, %v2697_v42  ;;  %v10860_v59 = vcombine.high %v2701_v51, %v2705_v52 }
 0x33c   : > { %v10862_v60 = vcombine.high %v2702_v53, %v2706_v54  ;;  %v10861_v3 = vcombine.low %v2702_v53, %v2706_v54 }
 0x33e   : > { %5669 = vmatpush1.bf16.msra.mxu0 %v10811_v62  ;;  %5833 = vmatpush1.bf16.msra.mxu1 %v10813_v63  ;;  %v2713_v62 = vld [vmem:[%s13639_s17 + $0x660] sm:$0xff]  ;;  %v2710_v63 = vld [vmem:[%s13639_s17 + $0x648] sm:$0xff] }
 0x33f   : > { %5670 = vmatprep.subr.bf16.mxu0 %v10820_v29  ;;  %5834 = vmatprep.subr.bf16.mxu1 %v10822_v0  ;;  %v2714_v29 = vld [vmem:[%s13639_s17 + $0x668] sm:$0xff]  ;;  %v10859_v0 = vcombine.low %v2701_v51, %v2705_v52  ;;  %v10868_v4 = vcombine.high %v2709_v61, %v2713_v62  ;;  %v14084_v52 = vsub.s32 2, %v13996_v10 }
 0x340   : > { %v10870_v5 = vcombine.high %v2710_v63, %v2714_v29  ;;  %v10869_v17 = vcombine.low %v2710_v63, %v2714_v29 }
 0x341   : > { %v1127_v63 = vrot.slane %v14002_v12, %v14084_v52 }
 0x342   : > { %5671 = vmatpush1.bf16.msra.mxu0 %v10819_v7  ;;  %5835 = vmatpush1.bf16.msra.mxu1 %v10821_v14  ;;  %v2721_v7 = vld [vmem:[%s13639_s17 + $0x6a0] sm:$0xff]  ;;  %v2718_v14 = vld [vmem:[%s13639_s17 + $0x688] sm:$0xff] }
 0x343   : > { %5672 = vmatprep.subr.bf16.mxu0 %v10828_v56  ;;  %5836 = vmatprep.subr.bf16.mxu1 %v10830_v16  ;;  %v2722_v56 = vld [vmem:[%s13639_s17 + $0x6a8] sm:$0xff]  ;;  %v10867_v16 = vcombine.low %v2709_v61, %v2713_v62  ;;  %v10876_v18 = vcombine.high %v2717_v6, %v2721_v7 }
 0x344   : > { %v10878_v19 = vcombine.high %v2718_v14, %v2722_v56  ;;  %v10877_v26 = vcombine.low %v2718_v14, %v2722_v56  ;;  %v11706_v56 = vadd.f32 %v14020_v33, %v1127_v63 }
 0x346   : > { %5673 = vmatpush1.bf16.msra.mxu0 %v10827_v21  ;;  %5837 = vmatpush1.bf16.msra.mxu1 %v10829_v22  ;;  %v2729_v21 = vld [vmem:[%s13639_s17 + $0x6e0] sm:$0xff]  ;;  %v2726_v22 = vld [vmem:[%s13639_s17 + $0x6c8] sm:$0xff] }
 0x347   : > { %5674 = vmatprep.subr.bf16.mxu0 %v10836_v23  ;;  %5838 = vmatprep.subr.bf16.mxu1 %v10838_v24  ;;  %v2730_v23 = vld [vmem:[%s13639_s17 + $0x6e8] sm:$0xff]  ;;  %v10875_v24 = vcombine.low %v2717_v6, %v2721_v7  ;;  %v10884_v27 = vcombine.high %v2725_v20, %v2729_v21 }
 0x348   : > { %v10886_v28 = vcombine.high %v2726_v22, %v2730_v23  ;;  %v10885_v41 = vcombine.low %v2726_v22, %v2730_v23  ;;  %v2762_v6 = vld [vmem:[%s13639_s17 + $0x7e8] sm:$0xff] }
 0x34a   : > { %5675 = vmatpush1.bf16.msra.mxu0 %v10835_v36  ;;  %5839 = vmatpush1.bf16.msra.mxu1 %v10837_v37  ;;  %v2737_v36 = vld [vmem:[%s13639_s17 + $0x720] sm:$0xff]  ;;  %v2734_v37 = vld [vmem:[%s13639_s17 + $0x708] sm:$0xff] }
 0x34b   : > { %5676 = vmatprep.subr.bf16.mxu0 %v10844_v38  ;;  %5840 = vmatprep.subr.bf16.mxu1 %v10846_v40  ;;  %v2738_v38 = vld [vmem:[%s13639_s17 + $0x728] sm:$0xff]  ;;  %v10883_v40 = vcombine.low %v2725_v20, %v2729_v21  ;;  %v10892_v42 = vcombine.high %v2733_v30, %v2737_v36 }
 0x34c   : > { %v10894_v43 = vcombine.high %v2734_v37, %v2738_v38  ;;  %v10893_v51 = vcombine.low %v2734_v37, %v2738_v38  ;;  %v2766_v20 = vld [vmem:[%s13639_s17 + $0x808] sm:$0xff] }
 0x34d   : > { %v2770_v21 = vld [vmem:[%s13639_s17 + $0x828] sm:$0xff] }
 0x34e   : > { %5677 = vmatpush1.bf16.msra.mxu0 %v10843_v47  ;;  %5841 = vmatpush1.bf16.msra.mxu1 %v10845_v48  ;;  %v2745_v47 = vld [vmem:[%s13639_s17 + $0x760] sm:$0xff]  ;;  %v2742_v48 = vld [vmem:[%s13639_s17 + $0x748] sm:$0xff]  ;;  %v10925_v38 = vcombine.low %v2766_v20, %v2770_v21 }
 0x34f   : > { %5678 = vmatprep.subr.bf16.mxu0 %v10852_v49  ;;  %5842 = vmatprep.subr.bf16.mxu1 %v10854_v50  ;;  %v2746_v49 = vld [vmem:[%s13639_s17 + $0x768] sm:$0xff]  ;;  %v10891_v50 = vcombine.low %v2733_v30, %v2737_v36  ;;  %v10900_v53 = vcombine.high %v2741_v46, %v2745_v47  ;;  %v10899_v61 = vcombine.low %v2741_v46, %v2745_v47  ;;  %v2785_v46 = vld [vmem:[%s13639_s17 + $0x8a0] sm:$0xff] }
 0x350   : > { %v10902_v54 = vcombine.high %v2742_v48, %v2746_v49  ;;  %v10901_v62 = vcombine.low %v2742_v48, %v2746_v49  ;;  %v2774_v30 = vld [vmem:[%s13639_s17 + $0x848] sm:$0xff] }
 0x351   : > { %v2778_v36 = vld [vmem:[%s13639_s17 + $0x868] sm:$0xff] }
 0x352   : > { %5679 = vmatpush1.bf16.msra.mxu0 %v10851_v57  ;;  %5843 = vmatpush1.bf16.msra.mxu1 %v10853_v58  ;;  %v2749_v57 = vld [vmem:[%s13639_s17 + $0x780] sm:$0xff]  ;;  %v2782_v47 = vld [vmem:[%s13639_s17 + $0x888] sm:$0xff] }
 0x353   : > { %5680 = vmatprep.subr.bf16.mxu0 %v10860_v59  ;;  %5844 = vmatprep.subr.bf16.mxu1 %v10862_v60  ;;  %v2753_v58 = vld [vmem:[%s13639_s17 + $0x7a0] sm:$0xff]  ;;  %v2750_v59 = vld [vmem:[%s13639_s17 + $0x788] sm:$0xff] }
 0x354   : > { %v2754_v60 = vld [vmem:[%s13639_s17 + $0x7a8] sm:$0xff]  ;;  %v10908_v29 = vcombine.high %v2749_v57, %v2753_v58  ;;  %v10907_v7 = vcombine.low %v2749_v57, %v2753_v58  ;;  %v2793_v57 = vld [vmem:[%s13639_s17 + $0x8e0] sm:$0xff] }
 0x355   : > { %v10909_v14 = vcombine.low %v2750_v59, %v2754_v60  ;;  %v2786_v48 = vld [vmem:[%s13639_s17 + $0x8a8] sm:$0xff] }
 0x356   : > { %5681 = vmatpush1.bf16.msra.mxu0 %v10859_v0  ;;  %5845 = vmatpush1.bf16.msra.mxu1 %v10861_v3  ;;  %v10910_v0 = vcombine.high %v2750_v59, %v2754_v60  ;;  %v2757_v3 = vld [vmem:[%s13639_s17 + $0x7c0] sm:$0xff]  ;;  %v2790_v58 = vld [vmem:[%s13639_s17 + $0x8c8] sm:$0xff] }
 0x357   : > { %5682 = vmatprep.subr.bf16.mxu0 %v10868_v4  ;;  %5846 = vmatprep.subr.bf16.mxu1 %v10870_v5  ;;  %v2761_v4 = vld [vmem:[%s13639_s17 + $0x7e0] sm:$0xff]  ;;  %v2758_v5 = vld [vmem:[%s13639_s17 + $0x7c8] sm:$0xff] }
 0x358   : > { %v10915_v22 = vcombine.low %v2757_v3, %v2761_v4  ;;  %v10917_v23 = vcombine.low %v2758_v5, %v2762_v6  ;;  %v2794_v59 = vld [vmem:[%s13639_s17 + $0x8e8] sm:$0xff] }
 0x359   : > { %v10950_v63 = vcombine.high %v2790_v58, %v2794_v59 }
 0x35a   : > { %5683 = vmatpush1.bf16.msra.mxu0 %v10867_v16  ;;  %5847 = vmatpush1.bf16.msra.mxu1 %v10869_v17  ;;  %v10916_v16 = vcombine.high %v2757_v3, %v2761_v4  ;;  %v10918_v17 = vcombine.high %v2758_v5, %v2762_v6  ;;  %v2798_v3 = vld [vmem:[%s13639_s17 + $0x908] sm:$0xff]  ;;  %v10949_v6 = vcombine.low %v2790_v58, %v2794_v59 }
 0x35b   : > { %5684 = vmatprep.subr.bf16.mxu0 %v10876_v18  ;;  %5848 = vmatprep.subr.bf16.mxu1 %v10878_v19  ;;  %v2765_v18 = vld [vmem:[%s13639_s17 + $0x800] sm:$0xff]  ;;  %v2802_v4 = vld [vmem:[%s13639_s17 + $0x928] sm:$0xff] }
 0x35c   : > { %v2769_v19 = vld [vmem:[%s13639_s17 + $0x820] sm:$0xff] }
 0x35d   : > { %v10924_v33 = vcombine.high %v2765_v18, %v2769_v19  ;;  %v10923_v37 = vcombine.low %v2765_v18, %v2769_v19  ;;  %v2810_v18 = vld [vmem:[%s13639_s17 + $0x968] sm:$0xff] }
 0x35e   : > { %5685 = vmatpush1.bf16.msra.mxu0 %v10875_v24  ;;  %5849 = vmatpush1.bf16.msra.mxu1 %v10877_v26  ;;  %v2495_v24 = vmax.f32 %v11706_v56, 0.0  ;;  %v10926_v26 = vcombine.high %v2766_v20, %v2770_v21  ;;  %v2805_v56 = vld [vmem:[%s13639_s17 + $0x940] sm:$0xff]  ;;  %v10957_v20 = vcombine.low %v2798_v3, %v2802_v4 }
 0x35f   : > { %5686 = vmatprep.subr.bf16.mxu0 %v10884_v27  ;;  %5850 = vmatprep.subr.bf16.mxu1 %v10886_v28  ;;  %v2773_v27 = vld [vmem:[%s13639_s17 + $0x840] sm:$0xff] }
 0x360   : > { %v2777_v28 = vld [vmem:[%s13639_s17 + $0x860] sm:$0xff] }
 0x361   : > { %v10931_v49 = vcombine.low %v2773_v27, %v2777_v28 }
 0x362   : > { %5687 = vmatpush1.bf16.msra.mxu0 %v10883_v40  ;;  %5851 = vmatpush1.bf16.msra.mxu1 %v10885_v41  ;;  %v14105_v40 = vpack.c.bf16 %v2495_v24, %v2495_v24  ;;  %v10932_v41 = vcombine.high %v2773_v27, %v2777_v28  ;;  %v2817_v24 = vld [vmem:[%s13639_s17 + $0x9a0] sm:$0xff] }
 0x363   : > { %5688 = vmatprep.subr.bf16.mxu0 %v10892_v42  ;;  %5852 = vmatprep.subr.bf16.mxu1 %v10894_v43  ;;  %v10934_v42 = vcombine.high %v2774_v30, %v2778_v36  ;;  %v2781_v43 = vld [vmem:[%s13639_s17 + $0x880] sm:$0xff] }
 0x364   : > { %v10939_v60 = vcombine.low %v2781_v43, %v2785_v46 }
 0x366   : > { %5689 = vmatpush1.bf16.msra.mxu0 %v10891_v50  ;;  %5853 = vmatpush1.bf16.msra.mxu1 %v10893_v51  ;;  %v10933_v50 = vcombine.low %v2774_v30, %v2778_v36  ;;  %v10940_v51 = vcombine.high %v2781_v43, %v2785_v46 }
 0x367   : > { %5690 = vmatprep.subr.bf16.mxu0 %v10900_v53  ;;  %5854 = vmatprep.subr.bf16.mxu1 %v10902_v54  ;;  %v10942_v53 = vcombine.high %v2782_v47, %v2786_v48  ;;  %v2789_v54 = vld [vmem:[%s13639_s17 + $0x8c0] sm:$0xff] }
 0x368   : > { %v10947_v5 = vcombine.low %v2789_v54, %v2793_v57 }
 0x36a   : > { %5691 = vmatpush1.bf16.msra.mxu0 %v10899_v61  ;;  %5855 = vmatpush1.bf16.msra.mxu1 %v10901_v62  ;;  %v10941_v61 = vcombine.low %v2782_v47, %v2786_v48  ;;  %v10948_v62 = vcombine.high %v2789_v54, %v2793_v57  ;;  %v1138_v47 = vsub.s32 5, %v13996_v10  ;;  %v2834_v54 = vld [vmem:[%s13639_s17 + $0xa28] sm:$0xff] }
 0x36b   : > { %5692 = vmatprep.subr.bf16.mxu0 %v10908_v29  ;;  %5856 = vmatprep.subr.bf16.mxu1 %v10910_v0  ;;  %v2797_v29 = vld [vmem:[%s13639_s17 + $0x900] sm:$0xff] }
 0x36c   : > { %v2801_v0 = vld [vmem:[%s13639_s17 + $0x920] sm:$0xff]  ;;  %v1139_v59 = vrot.slane %v14002_v12, %v1138_v47 }
 0x36d   : > { %v10955_v19 = vcombine.low %v2797_v29, %v2801_v0 }
 0x36e   : > { %5693 = vmatpush1.bf16.msra.mxu0 %v10907_v7  ;;  %5857 = vmatpush1.bf16.msra.mxu1 %v10909_v14  ;;  %v10956_v7 = vcombine.high %v2797_v29, %v2801_v0  ;;  %v10958_v14 = vcombine.high %v2798_v3, %v2802_v4  ;;  %v2841_v29 = vld [vmem:[%s13639_s17 + $0xa60] sm:$0xff]  ;;  %v2838_v0 = vld [vmem:[%s13639_s17 + $0xa48] sm:$0xff] }
 0x36f   : > { %5694 = vmatprep.subr.bf16.mxu0 %v10916_v16  ;;  %5858 = vmatprep.subr.bf16.mxu1 %v10918_v17  ;;  %v2809_v16 = vld [vmem:[%s13639_s17 + $0x960] sm:$0xff]  ;;  %v2806_v17 = vld [vmem:[%s13639_s17 + $0x948] sm:$0xff] }
 0x370   : > { %v10964_v21 = vcombine.high %v2805_v56, %v2809_v16  ;;  %v10963_v27 = vcombine.low %v2805_v56, %v2809_v16  ;;  %v10965_v28 = vcombine.low %v2806_v17, %v2810_v18  ;;  %v2842_v3 = vld [vmem:[%s13639_s17 + $0xa68] sm:$0xff] }
 0x372   : > { %5695 = vmatpush1.bf16.msra.mxu0 %v10915_v22  ;;  %5859 = vmatpush1.bf16.msra.mxu1 %v10917_v23  ;;  %v10966_v22 = vcombine.high %v2806_v17, %v2810_v18  ;;  %v2813_v23 = vld [vmem:[%s13639_s17 + $0x980] sm:$0xff]  ;;  %v10998_v17 = vcombine.high %v2838_v0, %v2842_v3 }
 0x373   : > { %5705 = vmatprep.subr.bf16.mxu0 %v10924_v33  ;;  %5869 = vmatprep.subr.bf16.mxu1 %v10926_v26  ;;  %v2814_v33 = vld [vmem:[%s13639_s17 + $0x988] sm:$0xff]  ;;  %v10972_v30 = vcombine.high %v2813_v23, %v2817_v24  ;;  %v10971_v43 = vcombine.low %v2813_v23, %v2817_v24  ;;  %v2845_v18 = vld [vmem:[%s13639_s17 + $0xa80] sm:$0xff] }
 0x374   : > { %v2818_v26 = vld [vmem:[%s13639_s17 + $0x9a8] sm:$0xff] }
 0x375   : > { %5697 = vmatmul.mubr.bf16.vlgmr.msra.gmra.mrb[8].mxu0 %v14105_v40  ;;  %5861 = vmatmul.mubr.bf16.vlgmr.msra.gmra.mrb[8].mxu1 %v14105_v40  ;;  %v10974_v36 = vcombine.high %v2814_v33, %v2818_v26  ;;  %v10973_v46 = vcombine.low %v2814_v33, %v2818_v26  ;;  %v10997_v26 = vcombine.low %v2838_v0, %v2842_v3  ;;  %v2870_v0 = vld [vmem:[%s13639_s17 + $0xb48] sm:$0xff] }
 0x376   : > { %5706 = vmatpush1.bf16.msra.mxu0 %v10923_v37  ;;  %5870 = vmatpush1.bf16.msra.mxu1 %v10925_v38  ;;  %v2821_v37 = vld [vmem:[%s13639_s17 + $0x9c0] sm:$0xff]  ;;  %v2874_v3 = vld [vmem:[%s13639_s17 + $0xb68] sm:$0xff] }
 0x377   : > { %5707 = vmatprep.subr.bf16.mxu0 %v10932_v41  ;;  %5871 = vmatprep.subr.bf16.mxu1 %v10934_v42  ;;  %v2825_v38 = vld [vmem:[%s13639_s17 + $0x9e0] sm:$0xff]  ;;  %v2822_v41 = vld [vmem:[%s13639_s17 + $0x9c8] sm:$0xff] }
 0x378   : > { %v2826_v42 = vld [vmem:[%s13639_s17 + $0x9e8] sm:$0xff]  ;;  %v10980_v48 = vcombine.high %v2821_v37, %v2825_v38  ;;  %v10979_v57 = vcombine.low %v2821_v37, %v2825_v38  ;;  %v2857_v38 = vld [vmem:[%s13639_s17 + $0xae0] sm:$0xff] }
 0x379   : > { %v10981_v58 = vcombine.low %v2822_v41, %v2826_v42 }
 0x37a   : > { %5708 = vmatpush1.bf16.msra.mxu0 %v10931_v49  ;;  %5872 = vmatpush1.bf16.msra.mxu1 %v10933_v50  ;;  %v10982_v49 = vcombine.high %v2822_v41, %v2826_v42  ;;  %v2829_v50 = vld [vmem:[%s13639_s17 + $0xa00] sm:$0xff]  ;;  %v2854_v41 = vld [vmem:[%s13639_s17 + $0xac8] sm:$0xff] }
 0x37b   : > { %5709 = vmatprep.subr.bf16.mxu0 %v10940_v51  ;;  %5873 = vmatprep.subr.bf16.mxu1 %v10942_v53  ;;  %v2833_v51 = vld [vmem:[%s13639_s17 + $0xa20] sm:$0xff]  ;;  %v2830_v53 = vld [vmem:[%s13639_s17 + $0xa08] sm:$0xff] }
 0x37c   : > { %v2858_v42 = vld [vmem:[%s13639_s17 + $0xae8] sm:$0xff] }
 0x37e   : > { %5710 = vmatpush1.bf16.msra.mxu0 %v10939_v60  ;;  %5874 = vmatpush1.bf16.msra.mxu1 %v10941_v61  ;;  %v10988_v60 = vcombine.high %v2829_v50, %v2833_v51  ;;  %v10990_v61 = vcombine.high %v2830_v53, %v2834_v54 }
 0x37f   : > { %5711 = vmatprep.subr.bf16.mxu0 %v10948_v62  ;;  %5875 = vmatprep.subr.bf16.mxu1 %v10950_v63  ;;  %v2837_v62 = vld [vmem:[%s13639_s17 + $0xa40] sm:$0xff] }
 0x380   : > { %v10996_v16 = vcombine.high %v2837_v62, %v2841_v29  ;;  %v10995_v33 = vcombine.low %v2837_v62, %v2841_v29  ;;  %v2869_v62 = vld [vmem:[%s13639_s17 + $0xb40] sm:$0xff] }
 0x381   : > { %v2873_v29 = vld [vmem:[%s13639_s17 + $0xb60] sm:$0xff] }
 0x382   : > { %5712 = vmatpush1.bf16.msra.mxu0 %v10947_v5  ;;  %5876 = vmatpush1.bf16.msra.mxu1 %v10949_v6 }
 0x383   : > { %5713 = vmatprep.subr.bf16.mxu0 %v10956_v7  ;;  %5877 = vmatprep.subr.bf16.mxu1 %v10958_v14  ;;  %v10987_v7 = vcombine.low %v2829_v50, %v2833_v51  ;;  %v10989_v14 = vcombine.low %v2830_v53, %v2834_v54  ;;  %v11014_v50 = vcombine.high %v2854_v41, %v2858_v42  ;;  %v2861_v51 = vld [vmem:[%s13639_s17 + $0xb00] sm:$0xff]  ;;  %v2862_v54 = vld [vmem:[%s13639_s17 + $0xb08] sm:$0xff] }
 0x384   : > { %v2865_v53 = vld [vmem:[%s13639_s17 + $0xb20] sm:$0xff] }
 0x386   : > { %5714 = vmatpush1.bf16.msra.mxu0 %v10955_v19  ;;  %5878 = vmatpush1.bf16.msra.mxu1 %v10957_v20  ;;  %v2849_v20 = vld [vmem:[%s13639_s17 + $0xaa0] sm:$0xff] }
 0x387   : > { %5715 = vmatprep.subr.bf16.mxu0 %v10964_v21  ;;  %5879 = vmatprep.subr.bf16.mxu1 %v10966_v22  ;;  %v2846_v21 = vld [vmem:[%s13639_s17 + $0xa88] sm:$0xff] }
 0x388   : > { %v2850_v22 = vld [vmem:[%s13639_s17 + $0xaa8] sm:$0xff] }
 0x38a   : > { %5716 = vmatpush1.bf16.msra.mxu0 %v10963_v27  ;;  %5880 = vmatpush1.bf16.msra.mxu1 %v10965_v28  ;;  %v11004_v28 = vcombine.high %v2845_v18, %v2849_v20 }
 0x38b   : > { %5717 = vmatprep.subr.bf16.mxu0 %v10972_v30  ;;  %5881 = vmatprep.subr.bf16.mxu1 %v10974_v36  ;;  %v11006_v30 = vcombine.high %v2846_v21, %v2850_v22  ;;  %v2853_v36 = vld [vmem:[%s13639_s17 + $0xac0] sm:$0xff] }
 0x38e   : > { %5718 = vmatpush1.bf16.msra.mxu0 %v10971_v43  ;;  %5882 = vmatpush1.bf16.msra.mxu1 %v10973_v46  ;;  %v11003_v46 = vcombine.low %v2845_v18, %v2849_v20  ;;  %v2882_v18 = vld [vmem:[%s13639_s17 + $0xba8] sm:$0xff]  ;;  %v11027_v20 = vcombine.low %v2869_v62, %v2873_v29 }
 0x38f   : > { %5719 = vmatprep.subr.bf16.mxu0 %v10980_v48  ;;  %5883 = vmatprep.subr.bf16.mxu1 %v10982_v49  ;;  %v11005_v48 = vcombine.low %v2846_v21, %v2850_v22  ;;  %v11012_v49 = vcombine.high %v2853_v36, %v2857_v38  ;;  %v11029_v21 = vcombine.low %v2870_v0, %v2874_v3 }
 0x390   : > { %v14142_v63 = vpop.f32.mrb[4].mxu0 }
 0x391   : > { %v2406_v4 = vpop.f32.mrb[5].mxu0 }
 0x392   : > { %v11709_v5 = vadd.f32 %v2406_v4, %v1139_v59  ;;  %5720 = vmatpush1.bf16.msra.mxu0 %v10979_v57  ;;  %5884 = vmatpush1.bf16.msra.mxu1 %v10981_v58  ;;  %v2408_v6 = vpop.f32.mrb[6].mxu0  ;;  %v14151_v23 = vpop.f32.mrb[4].mxu1  ;;  %v2866_v57 = vld [vmem:[%s13639_s17 + $0xb28] sm:$0xff]  ;;  %v11011_v58 = vcombine.low %v2853_v36, %v2857_v38  ;;  %v11013_v59 = vcombine.low %v2854_v41, %v2858_v42 }
 0x393   : > { %v2409_v56 = vpop.f32.mrb[7].mxu0  ;;  %5721 = vmatprep.subr.bf16.mxu0 %v10988_v60  ;;  %5885 = vmatprep.subr.bf16.mxu1 %v10990_v61  ;;  %v14155_v27 = vpop.f32.mrb[5].mxu1  ;;  %v11020_v60 = vcombine.high %v2861_v51, %v2865_v53  ;;  %v11022_v61 = vcombine.high %v2862_v54, %v2866_v57  ;;  %v11019_v4 = vcombine.low %v2861_v51, %v2865_v53  ;;  %v1134_v6 = vsub.s32 4, %v13996_v10  ;;  %v2886_v36 = vld [vmem:[%s13639_s17 + $0xbc8] sm:$0xff] }
 0x394   : > { %v2498_v19 = vmax.f32 %v11709_v5, 0.0  ;;  %v2490_v37 = vpop.f32.mrb[6].mxu1  ;;  %v11021_v5 = vcombine.low %v2862_v54, %v2866_v57  ;;  %v2877_v56 = vld [vmem:[%s13639_s17 + $0xb80] sm:$0xff]  ;;  %v2894_v51 = vld [vmem:[%s13639_s17 + $0xc08] sm:$0xff] }
 0x395   : > { %v2491_v43 = vpop.f32.mrb[7].mxu1  ;;  %v1135_v22 = vrot.slane %v14002_v12, %v1134_v6  ;;  %v2890_v37 = vld [vmem:[%s13639_s17 + $0xbe8] sm:$0xff] }
 0x396   : > { %v14153_v24 = vpack.c.bf16 %v2498_v19, %v2498_v19  ;;  %5722 = vmatpush1.bf16.msra.mxu0 %v10987_v7  ;;  %5886 = vmatpush1.bf16.msra.mxu1 %v10989_v14  ;;  %v11028_v7 = vcombine.high %v2869_v62, %v2873_v29  ;;  %v11030_v14 = vcombine.high %v2870_v0, %v2874_v3  ;;  %v1146_v19 = vsub.s32 7, %v13996_v10  ;;  %v2898_v53 = vld [vmem:[%s13639_s17 + $0xc28] sm:$0xff] }
 0x397   : > { %5723 = vmatprep.subr.bf16.mxu0 %v10996_v16  ;;  %5887 = vmatprep.subr.bf16.mxu1 %v10998_v17  ;;  %v2881_v16 = vld [vmem:[%s13639_s17 + $0xba0] sm:$0xff]  ;;  %v2878_v17 = vld [vmem:[%s13639_s17 + $0xb88] sm:$0xff]  ;;  %v11708_v43 = vadd.f32 %v14142_v63, %v1135_v22  ;;  %v11045_v57 = vcombine.low %v2886_v36, %v2890_v37  ;;  %v11053_v3 = vcombine.low %v2894_v51, %v2898_v53 }
 0x398   : > { %5737 = vmatprep.mubr.bf16.mxu0 %v14153_v24  ;;  %5901 = vmatprep.mubr.bf16.mxu1 %v14153_v24  ;;  %v1147_v38 = vrot.slane %v14002_v12, %v1146_v19  ;;  %v11035_v41 = vcombine.low %v2877_v56, %v2881_v16  ;;  %v11037_v42 = vcombine.low %v2878_v17, %v2882_v18  ;;  %v2902_v62 = vld [vmem:[%s13639_s17 + $0xc48] sm:$0xff] }
 0x399   : > { %v2906_v29 = vld [vmem:[%s13639_s17 + $0xc68] sm:$0xff] }
 0x39a   : > { %5724 = vmatpush1.bf16.msra.mxu0 %v10995_v33  ;;  %5888 = vmatpush1.bf16.msra.mxu1 %v10997_v26  ;;  %v11036_v33 = vcombine.high %v2877_v56, %v2881_v16  ;;  %v11038_v26 = vcombine.high %v2878_v17, %v2882_v18  ;;  %v11711_v12 = vadd.f32 %v14155_v27, %v1147_v38  ;;  %v2913_v56 = vld [vmem:[%s13639_s17 + $0xca0] sm:$0xff]  ;;  %v2910_v16 = vld [vmem:[%s13639_s17 + $0xc88] sm:$0xff] }
 0x39b   : > { %5725 = vmatprep.subr.bf16.mxu0 %v11004_v28  ;;  %5889 = vmatprep.subr.bf16.mxu1 %v11006_v30  ;;  %v2885_v28 = vld [vmem:[%s13639_s17 + $0xbc0] sm:$0xff]  ;;  %v2914_v17 = vld [vmem:[%s13639_s17 + $0xca8] sm:$0xff] }
 0x39c   : > { %v2889_v30 = vld [vmem:[%s13639_s17 + $0xbe0] sm:$0xff]  ;;  %v2500_v0 = vmax.f32 %v11711_v12, 0.0  ;;  %v11069_v38 = vcombine.low %v2910_v16, %v2914_v17 }
 0x39d   : > { %v11043_v54 = vcombine.low %v2885_v28, %v2889_v30 }
 0x39e   : > { %5726 = vmatpush1.bf16.msra.mxu0 %v11003_v46  ;;  %5890 = vmatpush1.bf16.msra.mxu1 %v11005_v48  ;;  %v11044_v46 = vcombine.high %v2885_v28, %v2889_v30  ;;  %v11046_v48 = vcombine.high %v2886_v36, %v2890_v37  ;;  %v14203_v18 = vpack.c.bf16 %v2500_v0, %v2500_v0  ;;  %v2921_v28 = vld [vmem:[%s13639_s17 + $0xce0] sm:$0xff]  ;;  %v2918_v30 = vld [vmem:[%s13639_s17 + $0xcc8] sm:$0xff] }
 0x39f   : > { %5727 = vmatprep.subr.bf16.mxu0 %v11012_v49  ;;  %5891 = vmatprep.subr.bf16.mxu1 %v11014_v50  ;;  %v2893_v49 = vld [vmem:[%s13639_s17 + $0xc00] sm:$0xff]  ;;  %v2922_v36 = vld [vmem:[%s13639_s17 + $0xce8] sm:$0xff] }
 0x3a0   : > { %v2897_v50 = vld [vmem:[%s13639_s17 + $0xc20] sm:$0xff] }
 0x3a1   : > { %v11052_v63 = vcombine.high %v2893_v49, %v2897_v50  ;;  %v11051_v27 = vcombine.low %v2893_v49, %v2897_v50  ;;  %v2930_v49 = vld [vmem:[%s13639_s17 + $0xd28] sm:$0xff]  ;;  %v2945_v0 = vld [vmem:[%s13639_s17 + $0xda0] sm:$0xff] }
 0x3a2   : > { %5728 = vmatpush1.bf16.msra.mxu0 %v11011_v58  ;;  %5892 = vmatpush1.bf16.msra.mxu1 %v11013_v59  ;;  %v2497_v58 = vmax.f32 %v11708_v43, 0.0  ;;  %v11054_v59 = vcombine.high %v2894_v51, %v2898_v53  ;;  %v2925_v43 = vld [vmem:[%s13639_s17 + $0xd00] sm:$0xff]  ;;  %v11077_v51 = vcombine.low %v2918_v30, %v2922_v36 }
 0x3a3   : > { %5729 = vmatprep.subr.bf16.mxu0 %v11020_v60  ;;  %5893 = vmatprep.subr.bf16.mxu1 %v11022_v61  ;;  %v2901_v60 = vld [vmem:[%s13639_s17 + $0xc40] sm:$0xff] }
 0x3a4   : > { %v2905_v61 = vld [vmem:[%s13639_s17 + $0xc60] sm:$0xff] }
 0x3a6   : > { %5730 = vmatpush1.bf16.msra.mxu0 %v11019_v4  ;;  %5894 = vmatpush1.bf16.msra.mxu1 %v11021_v5  ;;  %v14197_v4 = vpack.c.bf16 %v2497_v58, %v2497_v58  ;;  %v11060_v5 = vcombine.high %v2901_v60, %v2905_v61  ;;  %v2934_v58 = vld [vmem:[%s13639_s17 + $0xd48] sm:$0xff] }
 0x3a7   : > { %5731 = vmatprep.subr.bf16.mxu0 %v11028_v7  ;;  %5895 = vmatprep.subr.bf16.mxu1 %v11030_v14  ;;  %v11062_v7 = vcombine.high %v2902_v62, %v2906_v29  ;;  %v2909_v14 = vld [vmem:[%s13639_s17 + $0xc80] sm:$0xff] }
 0x3a8   : > { %v11068_v22 = vcombine.high %v2909_v14, %v2913_v56  ;;  %v11067_v37 = vcombine.low %v2909_v14, %v2913_v56 }
 0x3aa   : > { %5732 = vmatpush1.bf16.msra.mxu0 %v11027_v20  ;;  %5896 = vmatpush1.bf16.msra.mxu1 %v11029_v21  ;;  %v11059_v20 = vcombine.low %v2901_v60, %v2905_v61  ;;  %v11061_v21 = vcombine.low %v2902_v62, %v2906_v29  ;;  %v2941_v29 = vld [vmem:[%s13639_s17 + $0xd80] sm:$0xff] }
 0x3ab   : > { %5733 = vmatprep.subr.bf16.mxu0 %v11036_v33  ;;  %5897 = vmatprep.subr.bf16.mxu1 %v11038_v26  ;;  %v11070_v33 = vcombine.high %v2910_v16, %v2914_v17  ;;  %v2917_v26 = vld [vmem:[%s13639_s17 + $0xcc0] sm:$0xff]  ;;  %v11100_v14 = vcombine.high %v2941_v29, %v2945_v0 }
 0x3ac   : > { %v11075_v50 = vcombine.low %v2917_v26, %v2921_v28  ;;  %v2949_v16 = vld [vmem:[%s13639_s17 + $0xdc0] sm:$0xff] }
 0x3ad   : > { %v2953_v17 = vld [vmem:[%s13639_s17 + $0xde0] sm:$0xff] }
 0x3ae   : > { %5734 = vmatpush1.bf16.msra.mxu0 %v11035_v41  ;;  %5898 = vmatpush1.bf16.msra.mxu1 %v11037_v42  ;;  %v11076_v41 = vcombine.high %v2917_v26, %v2921_v28  ;;  %v11078_v42 = vcombine.high %v2918_v30, %v2922_v36  ;;  %v11108_v26 = vcombine.high %v2949_v16, %v2953_v17  ;;  %v2957_v30 = vld [vmem:[%s13639_s17 + $0xe00] sm:$0xff] }
 0x3af   : > { %5735 = vmatprep.subr.bf16.mxu0 %v11044_v46  ;;  %5899 = vmatprep.subr.bf16.mxu1 %v11046_v48  ;;  %v2929_v46 = vld [vmem:[%s13639_s17 + $0xd20] sm:$0xff]  ;;  %v2926_v48 = vld [vmem:[%s13639_s17 + $0xd08] sm:$0xff] }
 0x3b0   : > { %v11084_v53 = vcombine.high %v2925_v43, %v2929_v46  ;;  %v11086_v12 = vcombine.high %v2926_v48, %v2930_v49  ;;  %v11085_v60 = vcombine.low %v2926_v48, %v2930_v49  ;;  %v2961_v36 = vld [vmem:[%s13639_s17 + $0xe20] sm:$0xff] }
 0x3b1   : > { %v2965_v48 = vld [vmem:[%s13639_s17 + $0xe40] sm:$0xff] }
 0x3b2   : > { %5736 = vmatpush1.bf16.msra.mxu0 %v11043_v54  ;;  %5900 = vmatpush1.bf16.msra.mxu1 %v11045_v57  ;;  %v2933_v54 = vld [vmem:[%s13639_s17 + $0xd40] sm:$0xff] }
 0x3b3   : > { %5746 = vmatprep.subr.bf16.mxu0 %v11052_v63  ;;  %5910 = vmatprep.subr.bf16.mxu1 %v11054_v59  ;;  %v2937_v57 = vld [vmem:[%s13639_s17 + $0xd60] sm:$0xff]  ;;  %v2938_v63 = vld [vmem:[%s13639_s17 + $0xd68] sm:$0xff]  ;;  %v11083_v59 = vcombine.low %v2925_v43, %v2929_v46  ;;  %v11116_v43 = vcombine.high %v2957_v30, %v2961_v36 }
 0x3b4   : > { %v11092_v61 = vcombine.high %v2933_v54, %v2937_v57  ;;  %v11094_v62 = vcombine.high %v2934_v58, %v2938_v63  ;;  %v2969_v49 = vld [vmem:[%s13639_s17 + $0xe60] sm:$0xff] }
 0x3b5   : > { %5738 = vmatmul.mubr.bf16.vlgmr.msra.gmra.mrb[8].mxu0 %v14197_v4  ;;  %5902 = vmatmul.mubr.bf16.vlgmr.msra.gmra.mrb[8].mxu1 %v14197_v4 }
 0x3b6   : > { %5747 = vmatpush1.bf16.msra.mxu0 %v11051_v27  ;;  %5911 = vmatpush1.bf16.msra.mxu1 %v11053_v3  ;;  %v2942_v27 = vld [vmem:[%s13639_s17 + $0xd88] sm:$0xff] }
 0x3b7   : > { %5748 = vmatprep.subr.bf16.mxu0 %v11060_v5  ;;  %5912 = vmatprep.subr.bf16.mxu1 %v11062_v7  ;;  %v2946_v3 = vld [vmem:[%s13639_s17 + $0xda8] sm:$0xff]  ;;  %v11091_v5 = vcombine.low %v2933_v54, %v2937_v57  ;;  %v11093_v7 = vcombine.low %v2934_v58, %v2938_v63  ;;  %v11124_v54 = vcombine.high %v2965_v48, %v2969_v49  ;;  %v2973_v58 = vld [vmem:[%s13639_s17 + $0xe80] sm:$0xff] }
 0x3b8   : > { %5778 = vmatprep.mubr.bf16.mxu0 %v14203_v18  ;;  %5942 = vmatprep.mubr.bf16.mxu1 %v14203_v18  ;;  %v11102_v56 = vcombine.high %v2942_v27, %v2946_v3  ;;  %v2977_v63 = vld [vmem:[%s13639_s17 + $0xea0] sm:$0xff] }
 0x3ba   : > { %5749 = vmatpush1.bf16.msra.mxu0 %v11059_v20  ;;  %5913 = vmatpush1.bf16.msra.mxu1 %v11061_v21  ;;  %v2950_v20 = vld [vmem:[%s13639_s17 + $0xdc8] sm:$0xff] }
 0x3bb   : > { %5750 = vmatprep.subr.bf16.mxu0 %v11068_v22  ;;  %5914 = vmatprep.subr.bf16.mxu1 %v11070_v33  ;;  %v2954_v21 = vld [vmem:[%s13639_s17 + $0xde8] sm:$0xff]  ;;  %v11099_v22 = vcombine.low %v2941_v29, %v2945_v0  ;;  %v11101_v33 = vcombine.low %v2942_v27, %v2946_v3  ;;  %v11132_v29 = vcombine.high %v2973_v58, %v2977_v63  ;;  %v2981_v27 = vld [vmem:[%s13639_s17 + $0xec0] sm:$0xff] }
 0x3bc   : > { %v11110_v28 = vcombine.high %v2950_v20, %v2954_v21  ;;  %v2985_v3 = vld [vmem:[%s13639_s17 + $0xee0] sm:$0xff] }
 0x3be   : > { %5751 = vmatpush1.bf16.msra.mxu0 %v11067_v37  ;;  %5915 = vmatpush1.bf16.msra.mxu1 %v11069_v38  ;;  %v2958_v37 = vld [vmem:[%s13639_s17 + $0xe08] sm:$0xff] }
 0x3bf   : > { %5752 = vmatprep.subr.bf16.mxu0 %v11076_v41  ;;  %5916 = vmatprep.subr.bf16.mxu1 %v11078_v42  ;;  %v2962_v38 = vld [vmem:[%s13639_s17 + $0xe28] sm:$0xff]  ;;  %v11107_v41 = vcombine.low %v2949_v16, %v2953_v17  ;;  %v11109_v42 = vcombine.low %v2950_v20, %v2954_v21  ;;  %v11140_v16 = vcombine.high %v2981_v27, %v2985_v3  ;;  %v2989_v20 = vld [vmem:[%s13639_s17 + $0xf00] sm:$0xff] }
 0x3c0   : > { %v11118_v46 = vcombine.high %v2958_v37, %v2962_v38  ;;  %v2993_v21 = vld [vmem:[%s13639_s17 + $0xf20] sm:$0xff] }
 0x3c2   : > { %5753 = vmatpush1.bf16.msra.mxu0 %v11075_v50  ;;  %5917 = vmatpush1.bf16.msra.mxu1 %v11077_v51  ;;  %v2966_v50 = vld [vmem:[%s13639_s17 + $0xe48] sm:$0xff] }
 0x3c3   : > { %5754 = vmatprep.subr.bf16.mxu0 %v11084_v53  ;;  %5918 = vmatprep.subr.bf16.mxu1 %v11086_v12  ;;  %v2970_v51 = vld [vmem:[%s13639_s17 + $0xe68] sm:$0xff]  ;;  %v11115_v53 = vcombine.low %v2957_v30, %v2961_v36  ;;  %v11117_v12 = vcombine.low %v2958_v37, %v2962_v38  ;;  %v11148_v30 = vcombine.high %v2989_v20, %v2993_v21  ;;  %v2997_v37 = vld [vmem:[%s13639_s17 + $0xf40] sm:$0xff] }
 0x3c4   : > { %v11126_v57 = vcombine.high %v2966_v50, %v2970_v51  ;;  %v3001_v38 = vld [vmem:[%s13639_s17 + $0xf60] sm:$0xff] }
 0x3c6   : > { %5755 = vmatpush1.bf16.msra.mxu0 %v11083_v59  ;;  %5919 = vmatpush1.bf16.msra.mxu1 %v11085_v60  ;;  %v2974_v59 = vld [vmem:[%s13639_s17 + $0xe88] sm:$0xff] }
 0x3c7   : > { %5756 = vmatprep.subr.bf16.mxu0 %v11092_v61  ;;  %5920 = vmatprep.subr.bf16.mxu1 %v11094_v62  ;;  %v2978_v60 = vld [vmem:[%s13639_s17 + $0xea8] sm:$0xff]  ;;  %v11123_v61 = vcombine.low %v2965_v48, %v2969_v49  ;;  %v11125_v62 = vcombine.low %v2966_v50, %v2970_v51  ;;  %v1142_v48 = vsub.s32 6, %v13996_v10  ;;  %v11156_v49 = vcombine.high %v2997_v37, %v3001_v38  ;;  %v3005_v51 = vld [vmem:[%s13639_s17 + $0xf80] sm:$0xff] }
 0x3c8   : > { %v11134_v0 = vcombine.high %v2974_v59, %v2978_v60  ;;  %v12368_v10 = vld [vmem:[%s13630_s26 + $0x7ec] ss:$16 sps:$4 sm:$0xff]  }
 0x3ca   : > { %5757 = vmatpush1.bf16.msra.mxu0 %v11091_v5  ;;  %5921 = vmatpush1.bf16.msra.mxu1 %v11093_v7  ;;  %v2982_v5 = vld [vmem:[%s13639_s17 + $0xec8] sm:$0xff] }
 0x3cb   : > { %5758 = vmatprep.subr.bf16.mxu0 %v11100_v14  ;;  %5922 = vmatprep.subr.bf16.mxu1 %v11102_v56  ;;  %v2986_v7 = vld [vmem:[%s13639_s17 + $0xee8] sm:$0xff]  ;;  %v11131_v14 = vcombine.low %v2973_v58, %v2977_v63  ;;  %v11133_v56 = vcombine.low %v2974_v59, %v2978_v60  ;;  %v12769_v63 = vld [vmem:[%s13637_s13] sm:$0xff] }
 0x3cc   : > { %v11142_v17 = vcombine.high %v2982_v5, %v2986_v7  ;;  %v1143_v59 = vrot.slane %v12769_v63, %v1142_v48 }
 0x3ce   : > { %5759 = vmatpush1.bf16.msra.mxu0 %v11099_v22  ;;  %5923 = vmatpush1.bf16.msra.mxu1 %v11101_v33  ;;  %v2990_v22 = vld [vmem:[%s13639_s17 + $0xf08] sm:$0xff] }
 0x3cf   : > { %5760 = vmatprep.subr.bf16.mxu0 %v11108_v26  ;;  %5924 = vmatprep.subr.bf16.mxu1 %v11110_v28  ;;  %v2994_v33 = vld [vmem:[%s13639_s17 + $0xf28] sm:$0xff]  ;;  %v11139_v26 = vcombine.low %v2981_v27, %v2985_v3  ;;  %v11141_v28 = vcombine.low %v2982_v5, %v2986_v7  ;;  %v11710_v7 = vadd.f32 %v14151_v23, %v1143_v59  ;;  %v2535_v59 = vld [vmem:[%s13639_s17 + $0xd0] sm:$0xff] }
 0x3d0   : > { %v11150_v36 = vcombine.high %v2990_v22, %v2994_v33  ;;  %v3018_v27 = vld [vmem:[%s13639_s17 + $0xfe8] sm:$0xff] }
 0x3d2   : > { %5761 = vmatpush1.bf16.msra.mxu0 %v11107_v41  ;;  %5925 = vmatpush1.bf16.msra.mxu1 %v11109_v42  ;;  %v2998_v41 = vld [vmem:[%s13639_s17 + $0xf48] sm:$0xff] }
 0x3d3   : > { %5762 = vmatprep.subr.bf16.mxu0 %v11116_v43  ;;  %5926 = vmatprep.subr.bf16.mxu1 %v11118_v46  ;;  %v3002_v42 = vld [vmem:[%s13639_s17 + $0xf68] sm:$0xff]  ;;  %v11147_v43 = vcombine.low %v2989_v20, %v2993_v21  ;;  %v11149_v46 = vcombine.low %v2990_v22, %v2994_v33  ;;  %v2512_v20 = vld [vmem:[%s13639_s17 + $0x18] sm:$0xff] }
 0x3d4   : > { %v11158_v50 = vcombine.high %v2998_v41, %v3002_v42  ;;  %v11157_v58 = vcombine.low %v2998_v41, %v3002_v42  ;;  %v2516_v21 = vld [vmem:[%s13639_s17 + $0x38] sm:$0xff] }
 0x3d6   : > { %5763 = vmatpush1.bf16.msra.mxu0 %v11115_v53  ;;  %5927 = vmatpush1.bf16.msra.mxu1 %v11117_v12  ;;  %v3009_v53 = vld [vmem:[%s13639_s17 + $0xfa0] sm:$0xff]  ;;  %v3006_v12 = vld [vmem:[%s13639_s17 + $0xf88] sm:$0xff] }
 0x3d7   : > { %5764 = vmatprep.subr.bf16.mxu0 %v11124_v54  ;;  %5928 = vmatprep.subr.bf16.mxu1 %v11126_v57  ;;  %v3010_v54 = vld [vmem:[%s13639_s17 + $0xfa8] sm:$0xff]  ;;  %v11155_v57 = vcombine.low %v2997_v37, %v3001_v38  ;;  %v11164_v60 = vcombine.high %v3005_v51, %v3009_v53  ;;  %v11163_v3 = vcombine.low %v3005_v51, %v3009_v53  ;;  %v2520_v37 = vld [vmem:[%s13639_s17 + $0x58] sm:$0xff]  ;;  %v2531_v51 = vld [vmem:[%s13639_s17 + $0xb0] sm:$0xff] }
 0x3d8   : > { %v11165_v5 = vcombine.low %v3006_v12, %v3010_v54  ;;  %v2524_v38 = vld [vmem:[%s13639_s17 + $0x78] sm:$0xff] }
 0x3d9   : > { %v2528_v53 = vld [vmem:[%s13639_s17 + $0x98] sm:$0xff] }
 0x3da   : > { %5765 = vmatpush1.bf16.msra.mxu0 %v11123_v61  ;;  %5929 = vmatpush1.bf16.msra.mxu1 %v11125_v62  ;;  %v11166_v61 = vcombine.high %v3006_v12, %v3010_v54  ;;  %v3013_v62 = vld [vmem:[%s13639_s17 + $0xfc0] sm:$0xff]  ;;  %v2532_v12 = vld [vmem:[%s13639_s17 + $0xb8] sm:$0xff] }
 0x3db   : > { %5766 = vmatprep.subr.bf16.mxu0 %v11132_v29  ;;  %5930 = vmatprep.subr.bf16.mxu1 %v11134_v0  ;;  %v3017_v29 = vld [vmem:[%s13639_s17 + $0xfe0] sm:$0xff]  ;;  %v3014_v0 = vld [vmem:[%s13639_s17 + $0xfc8] sm:$0xff]  ;;  %v10690_v63 = vcombine.high %v2528_v53, %v2532_v12 }
 0x3dc   : > { %v11171_v22 = vcombine.low %v3013_v62, %v3017_v29  ;;  %v11173_v33 = vcombine.low %v3014_v0, %v3018_v27 }
 0x3de   : > { %5767 = vmatpush1.bf16.msra.mxu0 %v11131_v14  ;;  %5931 = vmatpush1.bf16.msra.mxu1 %v11133_v56  ;;  %v11172_v14 = vcombine.high %v3013_v62, %v3017_v29  ;;  %v11174_v56 = vcombine.high %v3014_v0, %v3018_v27  ;;  %v2540_v62 = vld [vmem:[%s13639_s17 + $0xf8] sm:$0xff]  ;;  %v10689_v0 = vcombine.low %v2528_v53, %v2532_v12  ;;  %v2567_v53 = vld [vmem:[%s13639_s17 + $0x1d0] sm:$0xff] }
 0x3df   : > { %5768 = vmatprep.subr.bf16.mxu0 %v11140_v16  ;;  %5932 = vmatprep.subr.bf16.mxu1 %v11142_v17  ;;  %v2511_v16 = vld [vmem:[%s13639_s17 + $0x10] sm:$0xff] }
 0x3e0   : > { %v2515_v17 = vld [vmem:[%s13639_s17 + $0x30] sm:$0xff] }
 0x3e1   : > { %v10672_v23 = vcombine.high %v2511_v16, %v2515_v17  ;;  %v10671_v41 = vcombine.low %v2511_v16, %v2515_v17  ;;  %v2571_v12 = vld [vmem:[%s13639_s17 + $0x1f0] sm:$0xff] }
 0x3e2   : > { %5769 = vmatpush1.bf16.msra.mxu0 %v11139_v26  ;;  %5933 = vmatpush1.bf16.msra.mxu1 %v11141_v28  ;;  %v2499_v26 = vmax.f32 %v11710_v7, 0.0  ;;  %v10674_v28 = vcombine.high %v2512_v20, %v2516_v21  ;;  %v2544_v7 = vld [vmem:[%s13639_s17 + $0x118] sm:$0xff] }
 0x3e3   : > { %5770 = vmatprep.subr.bf16.mxu0 %v11148_v30  ;;  %5934 = vmatprep.subr.bf16.mxu1 %v11150_v36  ;;  %v2519_v30 = vld [vmem:[%s13639_s17 + $0x50] sm:$0xff] }
 0x3e4   : > { %v2523_v36 = vld [vmem:[%s13639_s17 + $0x70] sm:$0xff]  ;;  %v14274_v42 = vpack.c.bf16 %v2499_v26, %v2499_v26  ;;  %v2556_v26 = vld [vmem:[%s13639_s17 + $0x178] sm:$0xff] }
 0x3e5   : > { %v10679_v54 = vcombine.low %v2519_v30, %v2523_v36 }
 0x3e6   : > { %5771 = vmatpush1.bf16.msra.mxu0 %v11147_v43  ;;  %5935 = vmatpush1.bf16.msra.mxu1 %v11149_v46  ;;  %v10673_v43 = vcombine.low %v2512_v20, %v2516_v21  ;;  %v10680_v46 = vcombine.high %v2519_v30, %v2523_v36  ;;  %v2551_v21 = vld [vmem:[%s13639_s17 + $0x150] sm:$0xff] }
 0x3e7   : > { %5772 = vmatprep.subr.bf16.mxu0 %v11156_v49  ;;  %5936 = vmatprep.subr.bf16.mxu1 %v11158_v50  ;;  %v10682_v49 = vcombine.high %v2520_v37, %v2524_v38  ;;  %v2527_v50 = vld [vmem:[%s13639_s17 + $0x90] sm:$0xff] }
 0x3e8   : > { %v10687_v29 = vcombine.low %v2527_v50, %v2531_v51 }
 0x3ea   : > { %5773 = vmatpush1.bf16.msra.mxu0 %v11155_v57  ;;  %5937 = vmatpush1.bf16.msra.mxu1 %v11157_v58  ;;  %v10681_v57 = vcombine.low %v2520_v37, %v2524_v38  ;;  %v10688_v58 = vcombine.high %v2527_v50, %v2531_v51  ;;  %v2559_v37 = vld [vmem:[%s13639_s17 + $0x190] sm:$0xff] }
 0x3eb   : > { %5774 = vmatprep.subr.bf16.mxu0 %v11164_v60  ;;  %5938 = vmatprep.subr.bf16.mxu1 %v11166_v61  ;;  %v2539_v60 = vld [vmem:[%s13639_s17 + $0xf0] sm:$0xff]  ;;  %v2536_v61 = vld [vmem:[%s13639_s17 + $0xd8] sm:$0xff] }
 0x3ec   : > { %v10698_v27 = vcombine.high %v2536_v61, %v2540_v62  ;;  %v10697_v16 = vcombine.low %v2536_v61, %v2540_v62  ;;  %v2563_v38 = vld [vmem:[%s13639_s17 + $0x1b0] sm:$0xff] }
 0x3ed   : > { %v10720_v50 = vcombine.high %v2559_v37, %v2563_v38  ;;  %v2575_v61 = vld [vmem:[%s13639_s17 + $0x210] sm:$0xff] }
 0x3ee   : > { %5775 = vmatpush1.bf16.msra.mxu0 %v11163_v3  ;;  %5939 = vmatpush1.bf16.msra.mxu1 %v11165_v5  ;;  %v2543_v3 = vld [vmem:[%s13639_s17 + $0x110] sm:$0xff] }
 0x3ef   : > { %5776 = vmatprep.subr.bf16.mxu0 %v11172_v14  ;;  %5940 = vmatprep.subr.bf16.mxu1 %v11174_v56  ;;  %v2547_v5 = vld [vmem:[%s13639_s17 + $0x130] sm:$0xff]  ;;  %v2548_v14 = vld [vmem:[%s13639_s17 + $0x138] sm:$0xff]  ;;  %v10695_v56 = vcombine.low %v2535_v59, %v2539_v60 }
 0x3f0   : > { %v10704_v17 = vcombine.high %v2543_v3, %v2547_v5  ;;  %v10706_v20 = vcombine.high %v2544_v7, %v2548_v14  ;;  %v2579_v62 = vld [vmem:[%s13639_s17 + $0x230] sm:$0xff] }
 0x3f2   : > { %5777 = vmatpush1.bf16.msra.mxu0 %v11171_v22  ;;  %5941 = vmatpush1.bf16.msra.mxu1 %v11173_v33  ;;  %v2555_v22 = vld [vmem:[%s13639_s17 + $0x170] sm:$0xff]  ;;  %v2552_v33 = vld [vmem:[%s13639_s17 + $0x158] sm:$0xff] }
 0x3f3   : > { %5951 = vmatprep.subr.bf16.mxu0 %v10672_v23  ;;  %6115 = vmatprep.subr.bf16.mxu1 %v10674_v28  ;;  %v10703_v23 = vcombine.low %v2543_v3, %v2547_v5  ;;  %v10705_v28 = vcombine.low %v2544_v7, %v2548_v14  ;;  %v10712_v30 = vcombine.high %v2551_v21, %v2555_v22  ;;  %v2583_v7 = vld [vmem:[%s13639_s17 + $0x250] sm:$0xff] }
 0x3f4   : > { %v10714_v36 = vcombine.high %v2552_v33, %v2556_v26  ;;  %v10736_v3 = vcombine.high %v2575_v61, %v2579_v62  ;;  %v2587_v14 = vld [vmem:[%s13639_s17 + $0x270] sm:$0xff] }
 0x3f5   : > { %5779 = vmatmul.mubr.bf16.vlgmr.msra.gmra.mrb[8].mxu0 %v14274_v42  ;;  %5943 = vmatmul.mubr.bf16.vlgmr.msra.gmra.mrb[8].mxu1 %v14274_v42 }
 0x3f6   : > { %5952 = vmatpush1.bf16.msra.mxu0 %v10671_v41  ;;  %5983 = vmatprep.mubr.bf16.mxu0 %v14022_v55  ;;  %v2560_v41 = vld [vmem:[%s13639_s17 + $0x198] sm:$0xff] }
 0x3f7   : > { %6116 = vmatpush1.bf16.msra.mxu1 %v10673_v43  ;;  %6147 = vmatprep.mubr.bf16.mxu1 %v14022_v55  ;;  %v10696_v55 = vcombine.high %v2535_v59, %v2539_v60  ;;  %v2564_v43 = vld [vmem:[%s13639_s17 + $0x1b8] sm:$0xff]  ;;  %v10728_v59 = vcombine.high %v2567_v53, %v2571_v12 }
 0x3f8   : > { %5953 = vmatprep.subr.bf16.mxu0 %v10680_v46  ;;  %6117 = vmatprep.subr.bf16.mxu1 %v10682_v49  ;;  %v10711_v46 = vcombine.low %v2551_v21, %v2555_v22  ;;  %v10713_v49 = vcombine.low %v2552_v33, %v2556_v26  ;;  %v10722_v51 = vcombine.high %v2560_v41, %v2564_v43  ;;  %v2591_v33 = vld [vmem:[%s13639_s17 + $0x290] sm:$0xff] }
 0x3f9   : > { %v10744_v21 = vcombine.high %v2583_v7, %v2587_v14  ;;  %v2595_v26 = vld [vmem:[%s13639_s17 + $0x2b0] sm:$0xff] }
 0x3fa   : > { %5954 = vmatpush1.bf16.msra.mxu0 %v10679_v54  ;;  %v2568_v54 = vld [vmem:[%s13639_s17 + $0x1d8] sm:$0xff] }
 0x3fb   : > { %6118 = vmatpush1.bf16.msra.mxu1 %v10681_v57  ;;  %5955 = vmatprep.subr.bf16.mxu0 %v10688_v58  ;;  %v2572_v57 = vld [vmem:[%s13639_s17 + $0x1f8] sm:$0xff]  ;;  %v10719_v58 = vcombine.low %v2559_v37, %v2563_v38  ;;  %v10752_v37 = vcombine.high %v2591_v33, %v2595_v26 }
 0x3fc   : > { %6119 = vmatprep.subr.bf16.mxu1 %v10690_v63  ;;  %v10721_v63 = vcombine.low %v2560_v41, %v2564_v43  ;;  %v10730_v60 = vcombine.high %v2568_v54, %v2572_v57  ;;  %v2599_v41 = vld [vmem:[%s13639_s17 + $0x2d0] sm:$0xff] }
 0x3fd   : > { %v2603_v43 = vld [vmem:[%s13639_s17 + $0x2f0] sm:$0xff] }
 0x3fe   : > { %5956 = vmatpush1.bf16.msra.mxu0 %v10687_v29  ;;  %v2576_v29 = vld [vmem:[%s13639_s17 + $0x218] sm:$0xff] }
 0x3ff   : > { %6120 = vmatpush1.bf16.msra.mxu1 %v10689_v0  ;;  %5957 = vmatprep.subr.bf16.mxu0 %v10696_v55  ;;  %v2580_v0 = vld [vmem:[%s13639_s17 + $0x238] sm:$0xff]  ;;  %v10727_v55 = vcombine.low %v2567_v53, %v2571_v12  ;;  %v10760_v53 = vcombine.high %v2599_v41, %v2603_v43 }
 0x400   : > { %6121 = vmatprep.subr.bf16.mxu1 %v10698_v27  ;;  %v10729_v27 = vcombine.low %v2568_v54, %v2572_v57  ;;  %v10738_v5 = vcombine.high %v2576_v29, %v2580_v0  ;;  %v2607_v54 = vld [vmem:[%s13639_s17 + $0x310] sm:$0xff] }
 0x401   : > { %v2611_v57 = vld [vmem:[%s13639_s17 + $0x330] sm:$0xff] }
 0x402   : > { %5958 = vmatpush1.bf16.msra.mxu0 %v10695_v56  ;;  %v2584_v56 = vld [vmem:[%s13639_s17 + $0x258] sm:$0xff] }
 0x403   : > { %6122 = vmatpush1.bf16.msra.mxu1 %v10697_v16  ;;  %5959 = vmatprep.subr.bf16.mxu0 %v10704_v17  ;;  %v2588_v16 = vld [vmem:[%s13639_s17 + $0x278] sm:$0xff]  ;;  %v10735_v17 = vcombine.low %v2575_v61, %v2579_v62  ;;  %v10768_v61 = vcombine.high %v2607_v54, %v2611_v57 }
 0x404   : > { %6123 = vmatprep.subr.bf16.mxu1 %v10706_v20  ;;  %v10737_v20 = vcombine.low %v2576_v29, %v2580_v0  ;;  %v10746_v22 = vcombine.high %v2584_v56, %v2588_v16  ;;  %v2615_v29 = vld [vmem:[%s13639_s17 + $0x350] sm:$0xff] }
 0x405   : > { %v2619_v0 = vld [vmem:[%s13639_s17 + $0x370] sm:$0xff] }
 0x406   : > { %5960 = vmatpush1.bf16.msra.mxu0 %v10703_v23  ;;  %v2592_v23 = vld [vmem:[%s13639_s17 + $0x298] sm:$0xff] }
 0x407   : > { %6124 = vmatpush1.bf16.msra.mxu1 %v10705_v28  ;;  %5961 = vmatprep.subr.bf16.mxu0 %v10712_v30  ;;  %v2596_v28 = vld [vmem:[%s13639_s17 + $0x2b8] sm:$0xff]  ;;  %v10743_v30 = vcombine.low %v2583_v7, %v2587_v14  ;;  %v10776_v7 = vcombine.high %v2615_v29, %v2619_v0 }
 0x408   : > { %6125 = vmatprep.subr.bf16.mxu1 %v10714_v36  ;;  %v10745_v36 = vcombine.low %v2584_v56, %v2588_v16  ;;  %v10754_v38 = vcombine.high %v2592_v23, %v2596_v28  ;;  %v2623_v56 = vld [vmem:[%s13639_s17 + $0x390] sm:$0xff] }
 0x409   : > { %v2627_v16 = vld [vmem:[%s13639_s17 + $0x3b0] sm:$0xff] }
 0x40a   : > { %5962 = vmatpush1.bf16.msra.mxu0 %v10711_v46  ;;  %v2600_v46 = vld [vmem:[%s13639_s17 + $0x2d8] sm:$0xff] }
 0x40b   : > { %6126 = vmatpush1.bf16.msra.mxu1 %v10713_v49  ;;  %5963 = vmatprep.subr.bf16.mxu0 %v10720_v50  ;;  %v2604_v49 = vld [vmem:[%s13639_s17 + $0x2f8] sm:$0xff]  ;;  %v10751_v50 = vcombine.low %v2591_v33, %v2595_v26  ;;  %v10784_v33 = vcombine.high %v2623_v56, %v2627_v16 }
 0x40c   : > { %6127 = vmatprep.subr.bf16.mxu1 %v10722_v51  ;;  %v10753_v51 = vcombine.low %v2592_v23, %v2596_v28  ;;  %v10762_v12 = vcombine.high %v2600_v46, %v2604_v49  ;;  %v2631_v23 = vld [vmem:[%s13639_s17 + $0x3d0] sm:$0xff] }
 0x40d   : > { %v2635_v28 = vld [vmem:[%s13639_s17 + $0x3f0] sm:$0xff] }
 0x40e   : > { %5964 = vmatpush1.bf16.msra.mxu0 %v10719_v58  ;;  %v2608_v58 = vld [vmem:[%s13639_s17 + $0x318] sm:$0xff] }
 0x40f   : > { %6128 = vmatpush1.bf16.msra.mxu1 %v10721_v63  ;;  %5965 = vmatprep.subr.bf16.mxu0 %v10728_v59  ;;  %v2612_v63 = vld [vmem:[%s13639_s17 + $0x338] sm:$0xff]  ;;  %v10759_v59 = vcombine.low %v2599_v41, %v2603_v43  ;;  %v10792_v41 = vcombine.high %v2631_v23, %v2635_v28 }
 0x410   : > { %6129 = vmatprep.subr.bf16.mxu1 %v10730_v60  ;;  %v10761_v60 = vcombine.low %v2600_v46, %v2604_v49  ;;  %v10770_v62 = vcombine.high %v2608_v58, %v2612_v63  ;;  %v2639_v46 = vld [vmem:[%s13639_s17 + $0x410] sm:$0xff] }
 0x411   : > { %v2643_v49 = vld [vmem:[%s13639_s17 + $0x430] sm:$0xff] }
 0x412   : > { %5966 = vmatpush1.bf16.msra.mxu0 %v10727_v55  ;;  %v2616_v55 = vld [vmem:[%s13639_s17 + $0x358] sm:$0xff] }
 0x413   : > { %6130 = vmatpush1.bf16.msra.mxu1 %v10729_v27  ;;  %5967 = vmatprep.subr.bf16.mxu0 %v10736_v3  ;;  %v2620_v27 = vld [vmem:[%s13639_s17 + $0x378] sm:$0xff]  ;;  %v10767_v3 = vcombine.low %v2607_v54, %v2611_v57  ;;  %v10800_v54 = vcombine.high %v2639_v46, %v2643_v49 }
 0x414   : > { %6131 = vmatprep.subr.bf16.mxu1 %v10738_v5  ;;  %v10769_v5 = vcombine.low %v2608_v58, %v2612_v63  ;;  %v10778_v14 = vcombine.high %v2616_v55, %v2620_v27  ;;  %v2647_v58 = vld [vmem:[%s13639_s17 + $0x450] sm:$0xff] }
 0x415   : > { %v2651_v63 = vld [vmem:[%s13639_s17 + $0x470] sm:$0xff] }
 0x416   : > { %5968 = vmatpush1.bf16.msra.mxu0 %v10735_v17  ;;  %v2624_v17 = vld [vmem:[%s13639_s17 + $0x398] sm:$0xff] }
 0x417   : > { %6132 = vmatpush1.bf16.msra.mxu1 %v10737_v20  ;;  %5969 = vmatprep.subr.bf16.mxu0 %v10744_v21  ;;  %v2628_v20 = vld [vmem:[%s13639_s17 + $0x3b8] sm:$0xff]  ;;  %v10775_v21 = vcombine.low %v2615_v29, %v2619_v0  ;;  %v10808_v29 = vcombine.high %v2647_v58, %v2651_v63  ;;  %v2655_v0 = vld [vmem:[%s13639_s17 + $0x490] sm:$0xff] }
 0x418   : > { %6133 = vmatprep.subr.bf16.mxu1 %v10746_v22  ;;  %v10777_v22 = vcombine.low %v2616_v55, %v2620_v27  ;;  %v10786_v26 = vcombine.high %v2624_v17, %v2628_v20  ;;  %v2659_v55 = vld [vmem:[%s13639_s17 + $0x4b0] sm:$0xff] }
 0x41a   : > { %5970 = vmatpush1.bf16.msra.mxu0 %v10743_v30  ;;  %v2632_v30 = vld [vmem:[%s13639_s17 + $0x3d8] sm:$0xff] }
 0x41b   : > { %6134 = vmatpush1.bf16.msra.mxu1 %v10745_v36  ;;  %5971 = vmatprep.subr.bf16.mxu0 %v10752_v37  ;;  %v2636_v36 = vld [vmem:[%s13639_s17 + $0x3f8] sm:$0xff]  ;;  %v10783_v37 = vcombine.low %v2623_v56, %v2627_v16  ;;  %v10816_v56 = vcombine.high %v2655_v0, %v2659_v55 }
 0x41c   : > { %6135 = vmatprep.subr.bf16.mxu1 %v10754_v38  ;;  %v10785_v38 = vcombine.low %v2624_v17, %v2628_v20  ;;  %v10794_v43 = vcombine.high %v2632_v30, %v2636_v36  ;;  %v2663_v17 = vld [vmem:[%s13639_s17 + $0x4d0] sm:$0xff] }
 0x41d   : > { %v2667_v20 = vld [vmem:[%s13639_s17 + $0x4f0] sm:$0xff] }
 0x41e   : > { %5972 = vmatpush1.bf16.msra.mxu0 %v10751_v50  ;;  %v2640_v50 = vld [vmem:[%s13639_s17 + $0x418] sm:$0xff] }
 0x41f   : > { %6136 = vmatpush1.bf16.msra.mxu1 %v10753_v51  ;;  %5973 = vmatprep.subr.bf16.mxu0 %v10760_v53  ;;  %v2644_v51 = vld [vmem:[%s13639_s17 + $0x438] sm:$0xff]  ;;  %v10791_v53 = vcombine.low %v2631_v23, %v2635_v28  ;;  %v2671_v23 = vld [vmem:[%s13639_s17 + $0x510] sm:$0xff] }
 0x420   : > { %6137 = vmatprep.subr.bf16.mxu1 %v10762_v12  ;;  %v10793_v12 = vcombine.low %v2632_v30, %v2636_v36  ;;  %v10802_v57 = vcombine.high %v2640_v50, %v2644_v51  ;;  %v2675_v28 = vld [vmem:[%s13639_s17 + $0x530] sm:$0xff]  ;;  %v2672_v30 = vld [vmem:[%s13639_s17 + $0x518] sm:$0xff] }
 0x421   : > { %v2676_v36 = vld [vmem:[%s13639_s17 + $0x538] sm:$0xff] }
 0x422   : > { %5974 = vmatpush1.bf16.msra.mxu0 %v10759_v59  ;;  %v10799_v59 = vcombine.low %v2639_v46, %v2643_v49  ;;  %v2679_v46 = vld [vmem:[%s13639_s17 + $0x550] sm:$0xff] }
 0x423   : > { %6138 = vmatpush1.bf16.msra.mxu1 %v10761_v60  ;;  %5975 = vmatprep.subr.bf16.mxu0 %v10768_v61  ;;  %v2648_v60 = vld [vmem:[%s13639_s17 + $0x458] sm:$0xff]  ;;  %v2683_v49 = vld [vmem:[%s13639_s17 + $0x570] sm:$0xff] }
 0x424   : > { %6139 = vmatprep.subr.bf16.mxu1 %v10770_v62  ;;  %v2652_v61 = vld [vmem:[%s13639_s17 + $0x478] sm:$0xff]  ;;  %v10801_v62 = vcombine.low %v2640_v50, %v2644_v51 }
 0x425   : > { %v10810_v27 = vcombine.high %v2648_v60, %v2652_v61  ;;  %v2680_v50 = vld [vmem:[%s13639_s17 + $0x558] sm:$0xff] }
 0x426   : > { %5976 = vmatpush1.bf16.msra.mxu0 %v10767_v3  ;;  %v2656_v3 = vld [vmem:[%s13639_s17 + $0x498] sm:$0xff] }
 0x427   : > { %6140 = vmatpush1.bf16.msra.mxu1 %v10769_v5  ;;  %5977 = vmatprep.subr.bf16.mxu0 %v10776_v7  ;;  %v2660_v5 = vld [vmem:[%s13639_s17 + $0x4b8] sm:$0xff]  ;;  %v10807_v7 = vcombine.low %v2647_v58, %v2651_v63  ;;  %v2687_v58 = vld [vmem:[%s13639_s17 + $0x590] sm:$0xff] }
 0x428   : > { %6141 = vmatprep.subr.bf16.mxu1 %v10778_v14  ;;  %v10809_v14 = vcombine.low %v2648_v60, %v2652_v61  ;;  %v10818_v16 = vcombine.high %v2656_v3, %v2660_v5  ;;  %v2684_v51 = vld [vmem:[%s13639_s17 + $0x578] sm:$0xff]  ;;  %v2691_v63 = vld [vmem:[%s13639_s17 + $0x5b0] sm:$0xff]  ;;  %v10839_v61 = vcombine.low %v2679_v46, %v2683_v49 }
 0x429   : > { %v2692_v60 = vld [vmem:[%s13639_s17 + $0x5b8] sm:$0xff] }
 0x42a   : > { %5978 = vmatpush1.bf16.msra.mxu0 %v10775_v21  ;;  %v2664_v21 = vld [vmem:[%s13639_s17 + $0x4d8] sm:$0xff] }
 0x42b   : > { %6142 = vmatpush1.bf16.msra.mxu1 %v10777_v22  ;;  %5979 = vmatprep.subr.bf16.mxu0 %v10784_v33  ;;  %v10815_v22 = vcombine.low %v2655_v0, %v2659_v55  ;;  %v10817_v33 = vcombine.low %v2656_v3, %v2660_v5  ;;  %v2695_v55 = vld [vmem:[%s13639_s17 + $0x5d0] sm:$0xff]  ;;  %v2696_v3 = vld [vmem:[%s13639_s17 + $0x5d8] sm:$0xff] }
 0x42c   : > { %6143 = vmatprep.subr.bf16.mxu1 %v10786_v26  ;;  %v10824_v26 = vcombine.high %v2663_v17, %v2667_v20  ;;  %v2700_v5 = vld [vmem:[%s13639_s17 + $0x5f8] sm:$0xff] }
 0x42e   : > { %5980 = vmatpush1.bf16.msra.mxu0 %v10783_v37  ;;  %v10823_v37 = vcombine.low %v2663_v17, %v2667_v20  ;;  %v2703_v17 = vld [vmem:[%s13639_s17 + $0x610] sm:$0xff] }
 0x42f   : > { %6144 = vmatpush1.bf16.msra.mxu1 %v10785_v38  ;;  %5981 = vmatprep.subr.bf16.mxu0 %v10792_v41  ;;  %v10832_v41 = vcombine.high %v2671_v23, %v2675_v28  ;;  %v2707_v20 = vld [vmem:[%s13639_s17 + $0x630] sm:$0xff] }
 0x430   : > { %6145 = vmatprep.subr.bf16.mxu1 %v10794_v43  ;;  %v10834_v43 = vcombine.high %v2672_v30, %v2676_v36 }
 0x432   : > { %5982 = vmatpush1.bf16.msra.mxu0 %v10791_v53  ;;  %v10831_v53 = vcombine.low %v2671_v23, %v2675_v28  ;;  %v2711_v23 = vld [vmem:[%s13639_s17 + $0x650] sm:$0xff] }
 0x433   : > { %6146 = vmatpush1.bf16.msra.mxu1 %v10793_v12  ;;  %5992 = vmatprep.subr.bf16.mxu0 %v10800_v54  ;;  %v10833_v12 = vcombine.low %v2672_v30, %v2676_v36  ;;  %v10840_v54 = vcombine.high %v2679_v46, %v2683_v49  ;;  %v2715_v28 = vld [vmem:[%s13639_s17 + $0x670] sm:$0xff]  ;;  %v2712_v30 = vld [vmem:[%s13639_s17 + $0x658] sm:$0xff] }
 0x434   : > { %6156 = vmatprep.subr.bf16.mxu1 %v10802_v57  ;;  %v10842_v57 = vcombine.high %v2680_v50, %v2684_v51  ;;  %v2716_v36 = vld [vmem:[%s13639_s17 + $0x678] sm:$0xff]  ;;  %v2719_v46 = vld [vmem:[%s13639_s17 + $0x690] sm:$0xff] }
 0x435   : > { %5984 = vmatmul.mubr.bf16.vlgmr.msra.gmra.mrb[12].mxu0 %v14025_v39  ;;  %v2723_v49 = vld [vmem:[%s13639_s17 + $0x6b0] sm:$0xff] }
 0x436   : > { %6148 = vmatmul.mubr.bf16.vlgmr.msra.gmra.mrb[12].mxu1 %v14025_v39  ;;  %5993 = vmatpush1.bf16.msra.mxu0 %v10799_v59  ;;  %v2668_v39 = vld [vmem:[%s13639_s17 + $0x4f8] sm:$0xff] }
 0x437   : > { %6024 = vmatprep.mubr.bf16.mxu0 %v14036_v25  ;;  %6157 = vmatpush1.bf16.msra.mxu1 %v10801_v62  ;;  %v10825_v38 = vcombine.low %v2664_v21, %v2668_v39  ;;  %v2688_v59 = vld [vmem:[%s13639_s17 + $0x598] sm:$0xff]  ;;  %v10841_v62 = vcombine.low %v2680_v50, %v2684_v51 }
 0x438   : > { %6188 = vmatprep.mubr.bf16.mxu1 %v14036_v25  ;;  %5994 = vmatprep.subr.bf16.mxu0 %v10808_v29  ;;  %v10826_v25 = vcombine.high %v2664_v21, %v2668_v39  ;;  %v10848_v29 = vcombine.high %v2687_v58, %v2691_v63  ;;  %v10850_v0 = vcombine.high %v2688_v59, %v2692_v60  ;;  %v2704_v21 = vld [vmem:[%s13639_s17 + $0x618] sm:$0xff] }
 0x439   : > { %6158 = vmatprep.subr.bf16.mxu1 %v10810_v27  ;;  %v2699_v27 = vld [vmem:[%s13639_s17 + $0x5f0] sm:$0xff]  ;;  %v2708_v39 = vld [vmem:[%s13639_s17 + $0x638] sm:$0xff] }
 0x43a   : > { %5995 = vmatpush1.bf16.msra.mxu0 %v10807_v7  ;;  %v10847_v7 = vcombine.low %v2687_v58, %v2691_v63  ;;  %v2720_v50 = vld [vmem:[%s13639_s17 + $0x698] sm:$0xff]  ;;  %v2727_v58 = vld [vmem:[%s13639_s17 + $0x6d0] sm:$0xff] }
 0x43b   : > { %6159 = vmatpush1.bf16.msra.mxu1 %v10809_v14  ;;  %5996 = vmatprep.subr.bf16.mxu0 %v10816_v56  ;;  %v10849_v14 = vcombine.low %v2688_v59, %v2692_v60  ;;  %v10856_v56 = vcombine.high %v2695_v55, %v2699_v27  ;;  %v2724_v51 = vld [vmem:[%s13639_s17 + $0x6b8] sm:$0xff]  ;;  %v2731_v63 = vld [vmem:[%s13639_s17 + $0x6f0] sm:$0xff] }
 0x43c   : > { %6160 = vmatprep.subr.bf16.mxu1 %v10818_v16  ;;  %v10858_v16 = vcombine.high %v2696_v3, %v2700_v5  ;;  %v2728_v59 = vld [vmem:[%s13639_s17 + $0x6d8] sm:$0xff] }
 0x43d   : > { %v2732_v60 = vld [vmem:[%s13639_s17 + $0x6f8] sm:$0xff] }
 0x43e   : > { %5997 = vmatpush1.bf16.msra.mxu0 %v10815_v22  ;;  %v10855_v22 = vcombine.low %v2695_v55, %v2699_v27  ;;  %v2735_v55 = vld [vmem:[%s13639_s17 + $0x710] sm:$0xff] }
 0x43f   : > { %6161 = vmatpush1.bf16.msra.mxu1 %v10817_v33  ;;  %5998 = vmatprep.subr.bf16.mxu0 %v10824_v26  ;;  %v10857_v33 = vcombine.low %v2696_v3, %v2700_v5  ;;  %v10864_v26 = vcombine.high %v2703_v17, %v2707_v20  ;;  %v2739_v27 = vld [vmem:[%s13639_s17 + $0x730] sm:$0xff]  ;;  %v2736_v3 = vld [vmem:[%s13639_s17 + $0x718] sm:$0xff] }
 0x440   : > { %6162 = vmatprep.subr.bf16.mxu1 %v10826_v25  ;;  %v10866_v25 = vcombine.high %v2704_v21, %v2708_v39  ;;  %v2740_v5 = vld [vmem:[%s13639_s17 + $0x738] sm:$0xff] }
 0x442   : > { %5999 = vmatpush1.bf16.msra.mxu0 %v10823_v37  ;;  %v10863_v37 = vcombine.low %v2703_v17, %v2707_v20  ;;  %v2743_v17 = vld [vmem:[%s13639_s17 + $0x750] sm:$0xff] }
 0x443   : > { %6163 = vmatpush1.bf16.msra.mxu1 %v10825_v38  ;;  %6000 = vmatprep.subr.bf16.mxu0 %v10832_v41  ;;  %v10865_v38 = vcombine.low %v2704_v21, %v2708_v39  ;;  %v10872_v41 = vcombine.high %v2711_v23, %v2715_v28  ;;  %v2747_v20 = vld [vmem:[%s13639_s17 + $0x770] sm:$0xff]  ;;  %v2744_v21 = vld [vmem:[%s13639_s17 + $0x758] sm:$0xff] }
 0x444   : > { %6164 = vmatprep.subr.bf16.mxu1 %v10834_v43  ;;  %v10874_v43 = vcombine.high %v2712_v30, %v2716_v36  ;;  %v2748_v39 = vld [vmem:[%s13639_s17 + $0x778] sm:$0xff] }
 0x446   : > { %6001 = vmatpush1.bf16.msra.mxu0 %v10831_v53  ;;  %v10871_v53 = vcombine.low %v2711_v23, %v2715_v28  ;;  %v2751_v23 = vld [vmem:[%s13639_s17 + $0x790] sm:$0xff] }
 0x447   : > { %6165 = vmatpush1.bf16.msra.mxu1 %v10833_v12  ;;  %6002 = vmatprep.subr.bf16.mxu0 %v10840_v54  ;;  %v10873_v12 = vcombine.low %v2712_v30, %v2716_v36  ;;  %v10880_v54 = vcombine.high %v2719_v46, %v2723_v49  ;;  %v2755_v28 = vld [vmem:[%s13639_s17 + $0x7b0] sm:$0xff]  ;;  %v2752_v30 = vld [vmem:[%s13639_s17 + $0x798] sm:$0xff] }
 0x448   : > { %6166 = vmatprep.subr.bf16.mxu1 %v10842_v57  ;;  %v10882_v57 = vcombine.high %v2720_v50, %v2724_v51  ;;  %v2756_v36 = vld [vmem:[%s13639_s17 + $0x7b8] sm:$0xff] }
 0x44a   : > { %6003 = vmatpush1.bf16.msra.mxu0 %v10839_v61  ;;  %v10879_v61 = vcombine.low %v2719_v46, %v2723_v49  ;;  %v2759_v46 = vld [vmem:[%s13639_s17 + $0x7d0] sm:$0xff] }
 0x44b   : > { %6167 = vmatpush1.bf16.msra.mxu1 %v10841_v62  ;;  %6004 = vmatprep.subr.bf16.mxu0 %v10848_v29  ;;  %v10881_v62 = vcombine.low %v2720_v50, %v2724_v51  ;;  %v10888_v29 = vcombine.high %v2727_v58, %v2731_v63  ;;  %v2763_v49 = vld [vmem:[%s13639_s17 + $0x7f0] sm:$0xff]  ;;  %v2760_v50 = vld [vmem:[%s13639_s17 + $0x7d8] sm:$0xff] }
 0x44c   : > { %6168 = vmatprep.subr.bf16.mxu1 %v10850_v0  ;;  %v10890_v0 = vcombine.high %v2728_v59, %v2732_v60  ;;  %v2764_v51 = vld [vmem:[%s13639_s17 + $0x7f8] sm:$0xff] }
 0x44e   : > { %6005 = vmatpush1.bf16.msra.mxu0 %v10847_v7  ;;  %v10887_v7 = vcombine.low %v2727_v58, %v2731_v63  ;;  %v2767_v58 = vld [vmem:[%s13639_s17 + $0x810] sm:$0xff] }
 0x44f   : > { %6169 = vmatpush1.bf16.msra.mxu1 %v10849_v14  ;;  %6006 = vmatprep.subr.bf16.mxu0 %v10856_v56  ;;  %v10889_v14 = vcombine.low %v2728_v59, %v2732_v60  ;;  %v10896_v56 = vcombine.high %v2735_v55, %v2739_v27  ;;  %v2771_v63 = vld [vmem:[%s13639_s17 + $0x830] sm:$0xff]  ;;  %v2768_v59 = vld [vmem:[%s13639_s17 + $0x818] sm:$0xff] }
 0x450   : > { %6170 = vmatprep.subr.bf16.mxu1 %v10858_v16  ;;  %v10898_v16 = vcombine.high %v2736_v3, %v2740_v5  ;;  %v2772_v60 = vld [vmem:[%s13639_s17 + $0x838] sm:$0xff] }
 0x452   : > { %6007 = vmatpush1.bf16.msra.mxu0 %v10855_v22  ;;  %v10895_v22 = vcombine.low %v2735_v55, %v2739_v27  ;;  %v2775_v55 = vld [vmem:[%s13639_s17 + $0x850] sm:$0xff] }
 0x453   : > { %6171 = vmatpush1.bf16.msra.mxu1 %v10857_v33  ;;  %6008 = vmatprep.subr.bf16.mxu0 %v10864_v26  ;;  %v10897_v33 = vcombine.low %v2736_v3, %v2740_v5  ;;  %v10904_v26 = vcombine.high %v2743_v17, %v2747_v20  ;;  %v2779_v27 = vld [vmem:[%s13639_s17 + $0x870] sm:$0xff]  ;;  %v10927_v3 = vcombine.low %v2767_v58, %v2771_v63  ;;  %v2776_v5 = vld [vmem:[%s13639_s17 + $0x858] sm:$0xff] }
 0x454   : > { %6172 = vmatprep.subr.bf16.mxu1 %v10866_v25  ;;  %v10906_v25 = vcombine.high %v2744_v21, %v2748_v39 }
 0x456   : > { %6009 = vmatpush1.bf16.msra.mxu0 %v10863_v37  ;;  %v10903_v37 = vcombine.low %v2743_v17, %v2747_v20  ;;  %v2787_v17 = vld [vmem:[%s13639_s17 + $0x8b0] sm:$0xff] }
 0x457   : > { %6173 = vmatpush1.bf16.msra.mxu1 %v10865_v38  ;;  %6010 = vmatprep.subr.bf16.mxu0 %v10872_v41  ;;  %v10905_v38 = vcombine.low %v2744_v21, %v2748_v39  ;;  %v10912_v41 = vcombine.high %v2751_v23, %v2755_v28  ;;  %v2784_v21 = vld [vmem:[%s13639_s17 + $0x898] sm:$0xff] }
 0x458   : > { %6174 = vmatprep.subr.bf16.mxu1 %v10874_v43  ;;  %v10914_v43 = vcombine.high %v2752_v30, %v2756_v36  ;;  %v2788_v39 = vld [vmem:[%s13639_s17 + $0x8b8] sm:$0xff] }
 0x45a   : > { %6011 = vmatpush1.bf16.msra.mxu0 %v10871_v53  ;;  %v10911_v53 = vcombine.low %v2751_v23, %v2755_v28  ;;  %v2791_v23 = vld [vmem:[%s13639_s17 + $0x8d0] sm:$0xff] }
 0x45b   : > { %6175 = vmatpush1.bf16.msra.mxu1 %v10873_v12  ;;  %6012 = vmatprep.subr.bf16.mxu0 %v10880_v54  ;;  %v10913_v12 = vcombine.low %v2752_v30, %v2756_v36  ;;  %v10920_v54 = vcombine.high %v2759_v46, %v2763_v49  ;;  %v2795_v28 = vld [vmem:[%s13639_s17 + $0x8f0] sm:$0xff]  ;;  %v2792_v30 = vld [vmem:[%s13639_s17 + $0x8d8] sm:$0xff] }
 0x45c   : > { %6176 = vmatprep.subr.bf16.mxu1 %v10882_v57  ;;  %v10922_v57 = vcombine.high %v2760_v50, %v2764_v51 }
 0x45e   : > { %6013 = vmatpush1.bf16.msra.mxu0 %v10879_v61  ;;  %v10919_v61 = vcombine.low %v2759_v46, %v2763_v49  ;;  %v2800_v46 = vld [vmem:[%s13639_s17 + $0x918] sm:$0xff] }
 0x45f   : > { %6177 = vmatpush1.bf16.msra.mxu1 %v10881_v62  ;;  %6014 = vmatprep.subr.bf16.mxu0 %v10888_v29  ;;  %v10921_v62 = vcombine.low %v2760_v50, %v2764_v51  ;;  %v10928_v29 = vcombine.high %v2767_v58, %v2771_v63  ;;  %v2804_v49 = vld [vmem:[%s13639_s17 + $0x938] sm:$0xff]  ;;  %v10951_v50 = vcombine.low %v2791_v23, %v2795_v28 }
 0x460   : > { %6178 = vmatprep.subr.bf16.mxu1 %v10890_v0  ;;  %v10930_v0 = vcombine.high %v2768_v59, %v2772_v60  ;;  %v2808_v58 = vld [vmem:[%s13639_s17 + $0x958] sm:$0xff] }
 0x461   : > { %v2812_v63 = vld [vmem:[%s13639_s17 + $0x978] sm:$0xff] }
 0x462   : > { %6015 = vmatpush1.bf16.msra.mxu0 %v10887_v7  ;;  %v2780_v7 = vld [vmem:[%s13639_s17 + $0x878] sm:$0xff] }
 0x463   : > { %6179 = vmatpush1.bf16.msra.mxu1 %v10889_v14  ;;  %6016 = vmatprep.subr.bf16.mxu0 %v10896_v56  ;;  %v10929_v14 = vcombine.low %v2768_v59, %v2772_v60  ;;  %v10936_v56 = vcombine.high %v2775_v55, %v2779_v27  ;;  %v10938_v20 = vcombine.high %v2776_v5, %v2780_v7 }
 0x464   : > { %6180 = vmatprep.subr.bf16.mxu1 %v10898_v16  ;;  %v2783_v16 = vld [vmem:[%s13639_s17 + $0x890] sm:$0xff]  ;;  %v10961_v60 = vcombine.low %v2800_v46, %v2804_v49 }
 0x465   : > { %v10943_v36 = vcombine.low %v2783_v16, %v2787_v17 }
 0x466   : > { %6017 = vmatpush1.bf16.msra.mxu0 %v10895_v22  ;;  %v10935_v22 = vcombine.low %v2775_v55, %v2779_v27  ;;  %v2816_v55 = vld [vmem:[%s13639_s17 + $0x998] sm:$0xff] }
 0x467   : > { %6181 = vmatpush1.bf16.msra.mxu1 %v10897_v33  ;;  %6018 = vmatprep.subr.bf16.mxu0 %v10904_v26  ;;  %v10937_v33 = vcombine.low %v2776_v5, %v2780_v7  ;;  %v10944_v26 = vcombine.high %v2783_v16, %v2787_v17  ;;  %v2820_v27 = vld [vmem:[%s13639_s17 + $0x9b8] sm:$0xff]  ;;  %v10969_v5 = vcombine.low %v2808_v58, %v2812_v63  ;;  %v2827_v16 = vld [vmem:[%s13639_s17 + $0x9f0] sm:$0xff] }
 0x468   : > { %6182 = vmatprep.subr.bf16.mxu1 %v10906_v25  ;;  %v10946_v25 = vcombine.high %v2784_v21, %v2788_v39  ;;  %v2824_v17 = vld [vmem:[%s13639_s17 + $0x9d8] sm:$0xff] }
 0x46a   : > { %6019 = vmatpush1.bf16.msra.mxu0 %v10903_v37  ;;  %v10945_v37 = vcombine.low %v2784_v21, %v2788_v39  ;;  %v10977_v39 = vcombine.low %v2816_v55, %v2820_v27 }
 0x46b   : > { %6183 = vmatpush1.bf16.msra.mxu1 %v10905_v38  ;;  %6020 = vmatprep.subr.bf16.mxu0 %v10912_v41  ;;  %v10952_v38 = vcombine.high %v2791_v23, %v2795_v28  ;;  %v2799_v41 = vld [vmem:[%s13639_s17 + $0x910] sm:$0xff]  ;;  %v2832_v23 = vld [vmem:[%s13639_s17 + $0xa18] sm:$0xff] }
 0x46c   : > { %6184 = vmatprep.subr.bf16.mxu1 %v10914_v43  ;;  %v2803_v43 = vld [vmem:[%s13639_s17 + $0x930] sm:$0xff]  ;;  %v2836_v28 = vld [vmem:[%s13639_s17 + $0xa38] sm:$0xff] }
 0x46d   : > { %v10959_v59 = vcombine.low %v2799_v41, %v2803_v43 }
 0x46e   : > { %6021 = vmatpush1.bf16.msra.mxu0 %v10911_v53  ;;  %v10960_v53 = vcombine.high %v2799_v41, %v2803_v43  ;;  %v2840_v41 = vld [vmem:[%s13639_s17 + $0xa58] sm:$0xff] }
 0x46f   : > { %6185 = vmatpush1.bf16.msra.mxu1 %v10913_v12  ;;  %6022 = vmatprep.subr.bf16.mxu0 %v10920_v54  ;;  %v10962_v12 = vcombine.high %v2800_v46, %v2804_v49  ;;  %v2807_v54 = vld [vmem:[%s13639_s17 + $0x950] sm:$0xff]  ;;  %v2844_v43 = vld [vmem:[%s13639_s17 + $0xa78] sm:$0xff]  ;;  %v10993_v49 = vcombine.low %v2832_v23, %v2836_v28 }
 0x470   : > { %6186 = vmatprep.subr.bf16.mxu1 %v10922_v57  ;;  %v2811_v57 = vld [vmem:[%s13639_s17 + $0x970] sm:$0xff] }
 0x472   : > { %6023 = vmatpush1.bf16.msra.mxu0 %v10919_v61  ;;  %v10968_v61 = vcombine.high %v2807_v54, %v2811_v57 }
 0x473   : > { %6187 = vmatpush1.bf16.msra.mxu1 %v10921_v62  ;;  %6033 = vmatprep.subr.bf16.mxu0 %v10928_v29  ;;  %v10970_v62 = vcombine.high %v2808_v58, %v2812_v63  ;;  %v2815_v29 = vld [vmem:[%s13639_s17 + $0x990] sm:$0xff]  ;;  %v11001_v63 = vcombine.low %v2840_v41, %v2844_v43 }
 0x474   : > { %6197 = vmatprep.subr.bf16.mxu1 %v10930_v0  ;;  %v2819_v0 = vld [vmem:[%s13639_s17 + $0x9b0] sm:$0xff] }
 0x475   : > { %6025 = vmatmul.mubr.bf16.vlgmr.msra.gmra.mrb[12].mxu0 %v14105_v40  ;;  %v10976_v7 = vcombine.high %v2815_v29, %v2819_v0  ;;  %v10975_v21 = vcombine.low %v2815_v29, %v2819_v0  ;;  %v2856_v29 = vld [vmem:[%s13639_s17 + $0xad8] sm:$0xff] }
 0x476   : > { %6189 = vmatmul.mubr.bf16.vlgmr.msra.gmra.mrb[12].mxu1 %v14105_v40  ;;  %6034 = vmatpush1.bf16.msra.mxu0 %v10927_v3  ;;  %v2796_v40 = vld [vmem:[%s13639_s17 + $0x8f8] sm:$0xff]  ;;  %v10967_v3 = vcombine.low %v2807_v54, %v2811_v57 }
 0x477   : > { %6065 = vmatprep.mubr.bf16.mxu0 %v14153_v24  ;;  %6198 = vmatpush1.bf16.msra.mxu1 %v10929_v14  ;;  %v10953_v51 = vcombine.low %v2792_v30, %v2796_v40  ;;  %v10978_v14 = vcombine.high %v2816_v55, %v2820_v27  ;;  %v2848_v54 = vld [vmem:[%s13639_s17 + $0xa98] sm:$0xff] }
 0x478   : > { %6229 = vmatprep.mubr.bf16.mxu1 %v14153_v24  ;;  %6035 = vmatprep.subr.bf16.mxu0 %v10936_v56  ;;  %v10954_v24 = vcombine.high %v2792_v30, %v2796_v40  ;;  %v2823_v56 = vld [vmem:[%s13639_s17 + $0x9d0] sm:$0xff]  ;;  %v2852_v57 = vld [vmem:[%s13639_s17 + $0xab8] sm:$0xff] }
 0x479   : > { %6199 = vmatprep.subr.bf16.mxu1 %v10938_v20  ;;  %v2828_v20 = vld [vmem:[%s13639_s17 + $0x9f8] sm:$0xff]  ;;  %v10983_v30 = vcombine.low %v2823_v56, %v2827_v16  ;;  %v11009_v27 = vcombine.low %v2848_v54, %v2852_v57 }
 0x47a   : > { %6036 = vmatpush1.bf16.msra.mxu0 %v10935_v22  ;;  %v10984_v22 = vcombine.high %v2823_v56, %v2827_v16  ;;  %v10985_v40 = vcombine.low %v2824_v17, %v2828_v20  ;;  %v2860_v0 = vld [vmem:[%s13639_s17 + $0xaf8] sm:$0xff] }
 0x47b   : > { %6200 = vmatpush1.bf16.msra.mxu1 %v10937_v33  ;;  %6037 = vmatprep.subr.bf16.mxu0 %v10944_v26  ;;  %v10986_v33 = vcombine.high %v2824_v17, %v2828_v20  ;;  %v2831_v26 = vld [vmem:[%s13639_s17 + $0xa10] sm:$0xff]  ;;  %v2864_v56 = vld [vmem:[%s13639_s17 + $0xb18] sm:$0xff]  ;;  %v11017_v20 = vcombine.low %v2856_v29, %v2860_v0 }
 0x47c   : > { %6201 = vmatprep.subr.bf16.mxu1 %v10946_v25  ;;  %v2835_v25 = vld [vmem:[%s13639_s17 + $0xa30] sm:$0xff]  ;;  %v2868_v16 = vld [vmem:[%s13639_s17 + $0xb38] sm:$0xff] }
 0x47d   : > { %v10991_v46 = vcombine.low %v2831_v26, %v2835_v25 }
 0x47e   : > { %6038 = vmatpush1.bf16.msra.mxu0 %v10943_v36  ;;  %v10992_v36 = vcombine.high %v2831_v26, %v2835_v25  ;;  %v2872_v26 = vld [vmem:[%s13639_s17 + $0xb58] sm:$0xff] }
 0x47f   : > { %6202 = vmatpush1.bf16.msra.mxu1 %v10945_v37  ;;  %6039 = vmatprep.subr.bf16.mxu0 %v10952_v38  ;;  %v10994_v37 = vcombine.high %v2832_v23, %v2836_v28  ;;  %v2839_v38 = vld [vmem:[%s13639_s17 + $0xa50] sm:$0xff]  ;;  %v2876_v25 = vld [vmem:[%s13639_s17 + $0xb78] sm:$0xff]  ;;  %v11025_v28 = vcombine.low %v2864_v56, %v2868_v16 }
 0x480   : > { %6203 = vmatprep.subr.bf16.mxu1 %v10954_v24  ;;  %v2843_v24 = vld [vmem:[%s13639_s17 + $0xa70] sm:$0xff] }
 0x481   : > { %v10999_v58 = vcombine.low %v2839_v38, %v2843_v24 }
 0x482   : > { %6040 = vmatpush1.bf16.msra.mxu0 %v10951_v50  ;;  %v11000_v50 = vcombine.high %v2839_v38, %v2843_v24  ;;  %v2880_v38 = vld [vmem:[%s13639_s17 + $0xb98] sm:$0xff] }
 0x483   : > { %6204 = vmatpush1.bf16.msra.mxu1 %v10953_v51  ;;  %6041 = vmatprep.subr.bf16.mxu0 %v10960_v53  ;;  %v11002_v51 = vcombine.high %v2840_v41, %v2844_v43  ;;  %v2847_v53 = vld [vmem:[%s13639_s17 + $0xa90] sm:$0xff]  ;;  %v2884_v24 = vld [vmem:[%s13639_s17 + $0xbb8] sm:$0xff]  ;;  %v11033_v43 = vcombine.low %v2872_v26, %v2876_v25 }
 0x484   : > { %6205 = vmatprep.subr.bf16.mxu1 %v10962_v12  ;;  %v2851_v12 = vld [vmem:[%s13639_s17 + $0xab0] sm:$0xff] }
 0x485   : > { %v11007_v55 = vcombine.low %v2847_v53, %v2851_v12 }
 0x486   : > { %6042 = vmatpush1.bf16.msra.mxu0 %v10959_v59  ;;  %v11008_v59 = vcombine.high %v2847_v53, %v2851_v12  ;;  %v2888_v53 = vld [vmem:[%s13639_s17 + $0xbd8] sm:$0xff] }
 0x487   : > { %6206 = vmatpush1.bf16.msra.mxu1 %v10961_v60  ;;  %6043 = vmatprep.subr.bf16.mxu0 %v10968_v61  ;;  %v11010_v60 = vcombine.high %v2848_v54, %v2852_v57  ;;  %v2855_v61 = vld [vmem:[%s13639_s17 + $0xad0] sm:$0xff]  ;;  %v2892_v12 = vld [vmem:[%s13639_s17 + $0xbf8] sm:$0xff]  ;;  %v11041_v57 = vcombine.low %v2880_v38, %v2884_v24 }
 0x488   : > { %6207 = vmatprep.subr.bf16.mxu1 %v10970_v62  ;;  %v2859_v62 = vld [vmem:[%s13639_s17 + $0xaf0] sm:$0xff] }
 0x489   : > { %v11015_v17 = vcombine.low %v2855_v61, %v2859_v62 }
 0x48a   : > { %6044 = vmatpush1.bf16.msra.mxu0 %v10967_v3  ;;  %v11016_v3 = vcombine.high %v2855_v61, %v2859_v62  ;;  %v2896_v61 = vld [vmem:[%s13639_s17 + $0xc18] sm:$0xff] }
 0x48b   : > { %6208 = vmatpush1.bf16.msra.mxu1 %v10969_v5  ;;  %6045 = vmatprep.subr.bf16.mxu0 %v10976_v7  ;;  %v11018_v5 = vcombine.high %v2856_v29, %v2860_v0  ;;  %v2863_v7 = vld [vmem:[%s13639_s17 + $0xb10] sm:$0xff]  ;;  %v2900_v62 = vld [vmem:[%s13639_s17 + $0xc38] sm:$0xff]  ;;  %v11049_v0 = vcombine.low %v2888_v53, %v2892_v12 }
 0x48c   : > { %6209 = vmatprep.subr.bf16.mxu1 %v10978_v14  ;;  %v2867_v14 = vld [vmem:[%s13639_s17 + $0xb30] sm:$0xff] }
 0x48d   : > { %v11023_v23 = vcombine.low %v2863_v7, %v2867_v14 }
 0x48e   : > { %6046 = vmatpush1.bf16.msra.mxu0 %v10975_v21  ;;  %v11024_v21 = vcombine.high %v2863_v7, %v2867_v14  ;;  %v2904_v14 = vld [vmem:[%s13639_s17 + $0xc58] sm:$0xff] }
 0x48f   : > { %6210 = vmatpush1.bf16.msra.mxu1 %v10977_v39  ;;  %6047 = vmatprep.subr.bf16.mxu0 %v10984_v22  ;;  %v11026_v39 = vcombine.high %v2864_v56, %v2868_v16  ;;  %v2871_v22 = vld [vmem:[%s13639_s17 + $0xb50] sm:$0xff]  ;;  %v2908_v56 = vld [vmem:[%s13639_s17 + $0xc78] sm:$0xff]  ;;  %v11057_v16 = vcombine.low %v2896_v61, %v2900_v62 }
 0x490   : > { %6211 = vmatprep.subr.bf16.mxu1 %v10986_v33  ;;  %v2875_v33 = vld [vmem:[%s13639_s17 + $0xb70] sm:$0xff] }
 0x491   : > { %v11031_v41 = vcombine.low %v2871_v22, %v2875_v33 }
 0x492   : > { %6048 = vmatpush1.bf16.msra.mxu0 %v10983_v30  ;;  %v11032_v30 = vcombine.high %v2871_v22, %v2875_v33  ;;  %v2912_v22 = vld [vmem:[%s13639_s17 + $0xc98] sm:$0xff] }
 0x493   : > { %6212 = vmatpush1.bf16.msra.mxu1 %v10985_v40  ;;  %6049 = vmatprep.subr.bf16.mxu0 %v10992_v36  ;;  %v11034_v40 = vcombine.high %v2872_v26, %v2876_v25  ;;  %v2879_v36 = vld [vmem:[%s13639_s17 + $0xb90] sm:$0xff]  ;;  %v2916_v33 = vld [vmem:[%s13639_s17 + $0xcb8] sm:$0xff]  ;;  %v11065_v25 = vcombine.low %v2904_v14, %v2908_v56 }
 0x494   : > { %6213 = vmatprep.subr.bf16.mxu1 %v10994_v37  ;;  %v2883_v37 = vld [vmem:[%s13639_s17 + $0xbb0] sm:$0xff] }
 0x495   : > { %v11039_v54 = vcombine.low %v2879_v36, %v2883_v37 }
 0x496   : > { %6050 = vmatpush1.bf16.msra.mxu0 %v10991_v46  ;;  %v11040_v46 = vcombine.high %v2879_v36, %v2883_v37  ;;  %v2920_v36 = vld [vmem:[%s13639_s17 + $0xcd8] sm:$0xff] }
 0x497   : > { %6214 = vmatpush1.bf16.msra.mxu1 %v10993_v49  ;;  %6051 = vmatprep.subr.bf16.mxu0 %v11000_v50  ;;  %v11042_v49 = vcombine.high %v2880_v38, %v2884_v24  ;;  %v2887_v50 = vld [vmem:[%s13639_s17 + $0xbd0] sm:$0xff]  ;;  %v11073_v38 = vcombine.low %v2912_v22, %v2916_v33 }
 0x498   : > { %6215 = vmatprep.subr.bf16.mxu1 %v11002_v51  ;;  %v2891_v51 = vld [vmem:[%s13639_s17 + $0xbf0] sm:$0xff] }
 0x499   : > { %v11047_v29 = vcombine.low %v2887_v50, %v2891_v51 }
 0x49a   : > { %6052 = vmatpush1.bf16.msra.mxu0 %v10999_v58  ;;  %v11048_v58 = vcombine.high %v2887_v50, %v2891_v51 }
 0x49b   : > { %6216 = vmatpush1.bf16.msra.mxu1 %v11001_v63  ;;  %6053 = vmatprep.subr.bf16.mxu0 %v11008_v59  ;;  %v11050_v63 = vcombine.high %v2888_v53, %v2892_v12  ;;  %v2895_v59 = vld [vmem:[%s13639_s17 + $0xc10] sm:$0xff] }
 0x49c   : > { %6217 = vmatprep.subr.bf16.mxu1 %v11010_v60  ;;  %v2899_v60 = vld [vmem:[%s13639_s17 + $0xc30] sm:$0xff] }
 0x49d   : > { %v11055_v7 = vcombine.low %v2895_v59, %v2899_v60 }
 0x49e   : > { %6054 = vmatpush1.bf16.msra.mxu0 %v11007_v55  ;;  %v11056_v55 = vcombine.high %v2895_v59, %v2899_v60 }
 0x49f   : > { %6218 = vmatpush1.bf16.msra.mxu1 %v11009_v27  ;;  %6055 = vmatprep.subr.bf16.mxu0 %v11016_v3  ;;  %v11058_v27 = vcombine.high %v2896_v61, %v2900_v62  ;;  %v2903_v3 = vld [vmem:[%s13639_s17 + $0xc50] sm:$0xff] }
 0x4a0   : > { %6219 = vmatprep.subr.bf16.mxu1 %v11018_v5  ;;  %v2907_v5 = vld [vmem:[%s13639_s17 + $0xc70] sm:$0xff] }
 0x4a1   : > { %v11063_v26 = vcombine.low %v2903_v3, %v2907_v5 }
 0x4a2   : > { %6056 = vmatpush1.bf16.msra.mxu0 %v11015_v17  ;;  %v11064_v17 = vcombine.high %v2903_v3, %v2907_v5 }
 0x4a3   : > { %6220 = vmatpush1.bf16.msra.mxu1 %v11017_v20  ;;  %6057 = vmatprep.subr.bf16.mxu0 %v11024_v21  ;;  %v2911_v20 = vld [vmem:[%s13639_s17 + $0xc90] sm:$0xff] }
 0x4a4   : > { %6221 = vmatprep.subr.bf16.mxu1 %v11026_v39  ;;  %v2915_v21 = vld [vmem:[%s13639_s17 + $0xcb0] sm:$0xff]  ;;  %v11066_v39 = vcombine.high %v2904_v14, %v2908_v56 }
 0x4a5   : > { %v11071_v37 = vcombine.low %v2911_v20, %v2915_v21 }
 0x4a6   : > { %6058 = vmatpush1.bf16.msra.mxu0 %v11023_v23  ;;  %v11072_v23 = vcombine.high %v2911_v20, %v2915_v21  ;;  %v2955_v20 = vld [vmem:[%s13639_s17 + $0xdf0] sm:$0xff] }
 0x4a7   : > { %6222 = vmatpush1.bf16.msra.mxu1 %v11025_v28  ;;  %6059 = vmatprep.subr.bf16.mxu0 %v11032_v30  ;;  %v11074_v28 = vcombine.high %v2912_v22, %v2916_v33  ;;  %v2919_v30 = vld [vmem:[%s13639_s17 + $0xcd0] sm:$0xff]  ;;  %v2952_v22 = vld [vmem:[%s13639_s17 + $0xdd8] sm:$0xff] }
 0x4a8   : > { %6223 = vmatprep.subr.bf16.mxu1 %v11034_v40  ;;  %v2923_v40 = vld [vmem:[%s13639_s17 + $0xcf0] sm:$0xff]  ;;  %v2956_v33 = vld [vmem:[%s13639_s17 + $0xdf8] sm:$0xff] }
 0x4a9   : > { %v11080_v24 = vcombine.high %v2919_v30, %v2923_v40  ;;  %v11079_v50 = vcombine.low %v2919_v30, %v2923_v40 }
 0x4aa   : > { %6060 = vmatpush1.bf16.msra.mxu0 %v11031_v41  ;;  %v2927_v41 = vld [vmem:[%s13639_s17 + $0xd10] sm:$0xff] }
 0x4ab   : > { %6224 = vmatpush1.bf16.msra.mxu1 %v11033_v43  ;;  %6061 = vmatprep.subr.bf16.mxu0 %v11040_v46  ;;  %v2931_v43 = vld [vmem:[%s13639_s17 + $0xd30] sm:$0xff]  ;;  %v2928_v46 = vld [vmem:[%s13639_s17 + $0xd18] sm:$0xff] }
 0x4ac   : > { %6225 = vmatprep.subr.bf16.mxu1 %v11042_v49  ;;  %v2932_v49 = vld [vmem:[%s13639_s17 + $0xd38] sm:$0xff]  ;;  %v11088_v53 = vcombine.high %v2927_v41, %v2931_v43  ;;  %v11087_v59 = vcombine.low %v2927_v41, %v2931_v43  ;;  %v11113_v43 = vcombine.low %v2952_v22, %v2956_v33 }
 0x4ad   : > { %v11090_v12 = vcombine.high %v2928_v46, %v2932_v49  ;;  %v11089_v60 = vcombine.low %v2928_v46, %v2932_v49 }
 0x4ae   : > { %6062 = vmatpush1.bf16.msra.mxu0 %v11039_v54  ;;  %v2935_v54 = vld [vmem:[%s13639_s17 + $0xd50] sm:$0xff] }
 0x4af   : > { %6226 = vmatpush1.bf16.msra.mxu1 %v11041_v57  ;;  %6063 = vmatprep.subr.bf16.mxu0 %v11048_v58  ;;  %v2939_v57 = vld [vmem:[%s13639_s17 + $0xd70] sm:$0xff]  ;;  %v2936_v58 = vld [vmem:[%s13639_s17 + $0xd58] sm:$0xff] }
 0x4b0   : > { %6227 = vmatprep.subr.bf16.mxu1 %v11050_v63  ;;  %v2940_v63 = vld [vmem:[%s13639_s17 + $0xd78] sm:$0xff]  ;;  %v11096_v61 = vcombine.high %v2935_v54, %v2939_v57  ;;  %v11095_v3 = vcombine.low %v2935_v54, %v2939_v57 }
 0x4b1   : > { %v11098_v62 = vcombine.high %v2936_v58, %v2940_v63  ;;  %v11097_v5 = vcombine.low %v2936_v58, %v2940_v63 }
 0x4b2   : > { %6064 = vmatpush1.bf16.msra.mxu0 %v11047_v29  ;;  %v2943_v29 = vld [vmem:[%s13639_s17 + $0xd90] sm:$0xff] }
 0x4b3   : > { %6228 = vmatpush1.bf16.msra.mxu1 %v11049_v0  ;;  %6074 = vmatprep.subr.bf16.mxu0 %v11056_v55  ;;  %v2947_v0 = vld [vmem:[%s13639_s17 + $0xdb0] sm:$0xff]  ;;  %v2944_v55 = vld [vmem:[%s13639_s17 + $0xd98] sm:$0xff] }
 0x4b4   : > { %6238 = vmatprep.subr.bf16.mxu1 %v11058_v27  ;;  %v2948_v27 = vld [vmem:[%s13639_s17 + $0xdb8] sm:$0xff] }
 0x4b5   : > { %6066 = vmatmul.mubr.bf16.vlgmr.msra.gmra.mrb[12].mxu0 %v14197_v4  ;;  %v11105_v40 = vcombine.low %v2944_v55, %v2948_v27 }
 0x4b6   : > { %6230 = vmatmul.mubr.bf16.vlgmr.msra.gmra.mrb[12].mxu1 %v14197_v4  ;;  %6075 = vmatpush1.bf16.msra.mxu0 %v11055_v7  ;;  %v2924_v4 = vld [vmem:[%s13639_s17 + $0xcf8] sm:$0xff]  ;;  %v11104_v7 = vcombine.high %v2943_v29, %v2947_v0 }
 0x4b7   : > { %6106 = vmatprep.mubr.bf16.mxu0 %v14203_v18  ;;  %6239 = vmatpush1.bf16.msra.mxu1 %v11057_v16  ;;  %v11081_v51 = vcombine.low %v2920_v36, %v2924_v4  ;;  %v11106_v16 = vcombine.high %v2944_v55, %v2948_v27 }
 0x4b8   : > { %6270 = vmatprep.mubr.bf16.mxu1 %v14203_v18  ;;  %6076 = vmatprep.subr.bf16.mxu0 %v11064_v17  ;;  %v11082_v18 = vcombine.high %v2920_v36, %v2924_v4  ;;  %v2951_v17 = vld [vmem:[%s13639_s17 + $0xdd0] sm:$0xff]  ;;  %v11114_v4 = vcombine.high %v2952_v22, %v2956_v33 }
 0x4b9   : > { %6240 = vmatprep.subr.bf16.mxu1 %v11066_v39  ;;  %v11112_v36 = vcombine.high %v2951_v17, %v2955_v20  ;;  %v11111_v41 = vcombine.low %v2951_v17, %v2955_v20 }
 0x4ba   : > { %6077 = vmatpush1.bf16.msra.mxu0 %v11063_v26 }
 0x4bb   : > { %6241 = vmatpush1.bf16.msra.mxu1 %v11065_v25  ;;  %6078 = vmatprep.subr.bf16.mxu0 %v11072_v23  ;;  %v11103_v23 = vcombine.low %v2943_v29, %v2947_v0 }
 0x4bc   : > { %6242 = vmatprep.subr.bf16.mxu1 %v11074_v28 }
 0x4be   : > { %6079 = vmatpush1.bf16.msra.mxu0 %v11071_v37  ;;  %v2959_v37 = vld [vmem:[%s13639_s17 + $0xe10] sm:$0xff] }
 0x4bf   : > { %6243 = vmatpush1.bf16.msra.mxu1 %v11073_v38  ;;  %6080 = vmatprep.subr.bf16.mxu0 %v11080_v24  ;;  %v2963_v38 = vld [vmem:[%s13639_s17 + $0xe30] sm:$0xff]  ;;  %v2960_v24 = vld [vmem:[%s13639_s17 + $0xe18] sm:$0xff] }
 0x4c0   : > { %6244 = vmatprep.subr.bf16.mxu1 %v11082_v18  ;;  %v2964_v18 = vld [vmem:[%s13639_s17 + $0xe38] sm:$0xff]  ;;  %v11120_v46 = vcombine.high %v2959_v37, %v2963_v38  ;;  %v11119_v54 = vcombine.low %v2959_v37, %v2963_v38  ;;  %v2999_v37 = vld [vmem:[%s13639_s17 + $0xf50] sm:$0xff] }
 0x4c1   : > { %v11122_v49 = vcombine.high %v2960_v24, %v2964_v18  ;;  %v11121_v57 = vcombine.low %v2960_v24, %v2964_v18  ;;  %v3003_v38 = vld [vmem:[%s13639_s17 + $0xf70] sm:$0xff]  ;;  %v3000_v24 = vld [vmem:[%s13639_s17 + $0xf58] sm:$0xff] }
 0x4c2   : > { %6081 = vmatpush1.bf16.msra.mxu0 %v11079_v50  ;;  %v2967_v50 = vld [vmem:[%s13639_s17 + $0xe50] sm:$0xff]  ;;  %v3004_v18 = vld [vmem:[%s13639_s17 + $0xf78] sm:$0xff] }
 0x4c3   : > { %6245 = vmatpush1.bf16.msra.mxu1 %v11081_v51  ;;  %6082 = vmatprep.subr.bf16.mxu0 %v11088_v53  ;;  %v2971_v51 = vld [vmem:[%s13639_s17 + $0xe70] sm:$0xff]  ;;  %v2968_v53 = vld [vmem:[%s13639_s17 + $0xe58] sm:$0xff] }
 0x4c4   : > { %6246 = vmatprep.subr.bf16.mxu1 %v11090_v12  ;;  %v2972_v12 = vld [vmem:[%s13639_s17 + $0xe78] sm:$0xff]  ;;  %v11128_v58 = vcombine.high %v2967_v50, %v2971_v51  ;;  %v11127_v29 = vcombine.low %v2967_v50, %v2971_v51  ;;  %v3007_v50 = vld [vmem:[%s13639_s17 + $0xf90] sm:$0xff] }
 0x4c5   : > { %v11130_v63 = vcombine.high %v2968_v53, %v2972_v12  ;;  %v11129_v0 = vcombine.low %v2968_v53, %v2972_v12  ;;  %v3011_v51 = vld [vmem:[%s13639_s17 + $0xfb0] sm:$0xff]  ;;  %v3008_v53 = vld [vmem:[%s13639_s17 + $0xf98] sm:$0xff] }
 0x4c6   : > { %6083 = vmatpush1.bf16.msra.mxu0 %v11087_v59  ;;  %v2975_v59 = vld [vmem:[%s13639_s17 + $0xe90] sm:$0xff]  ;;  %v3012_v12 = vld [vmem:[%s13639_s17 + $0xfb8] sm:$0xff] }
 0x4c7   : > { %6247 = vmatpush1.bf16.msra.mxu1 %v11089_v60  ;;  %6084 = vmatprep.subr.bf16.mxu0 %v11096_v61  ;;  %v2979_v60 = vld [vmem:[%s13639_s17 + $0xeb0] sm:$0xff]  ;;  %v2976_v61 = vld [vmem:[%s13639_s17 + $0xe98] sm:$0xff] }
 0x4c8   : > { %v14504_v14 = vpop.f32.mrb[8].mxu0  ;;  %v14506_v56 = vpop.f32.mrb[8].mxu1  ;;  %6248 = vmatprep.subr.bf16.mxu1 %v11098_v62  ;;  %v2980_v62 = vld [vmem:[%s13639_s17 + $0xeb8] sm:$0xff]  ;;  %v11136_v55 = vcombine.high %v2975_v59, %v2979_v60  ;;  %v11135_v17 = vcombine.low %v2975_v59, %v2979_v60  ;;  %v11170_v59 = vcombine.high %v3008_v53, %v3012_v12  ;;  %v3015_v60 = vld [vmem:[%s13639_s17 + $0xfd0] sm:$0xff] }
 0x4c9   : > { %v14510_v21 = vpop.f32.mrb[9].mxu0  ;;  %v14512_v39 = vpop.f32.mrb[9].mxu1  ;;  %v11138_v27 = vcombine.high %v2976_v61, %v2980_v62  ;;  %v11137_v20 = vcombine.low %v2976_v61, %v2980_v62  ;;  %v3019_v61 = vld [vmem:[%s13639_s17 + $0xff0] sm:$0xff] }
 0x4ca   : > { %v5784_v26 = vpop.f32.mrb[10].mxu0  ;;  %v5948_v25 = vpop.f32.mrb[10].mxu1  ;;  %6085 = vmatpush1.bf16.msra.mxu0 %v11095_v3  ;;  %v2983_v3 = vld [vmem:[%s13639_s17 + $0xed0] sm:$0xff] }
 0x4cb   : > { %6249 = vmatpush1.bf16.msra.mxu1 %v11097_v5  ;;  %v5785_v28 = vpop.f32.mrb[11].mxu0  ;;  %v5949_v30 = vpop.f32.mrb[11].mxu1  ;;  %6086 = vmatprep.subr.bf16.mxu0 %v11104_v7  ;;  %v2987_v5 = vld [vmem:[%s13639_s17 + $0xef0] sm:$0xff]  ;;  %v2984_v7 = vld [vmem:[%s13639_s17 + $0xed8] sm:$0xff] }
 0x4cc   : > { %6250 = vmatprep.subr.bf16.mxu1 %v11106_v16  ;;  %v2988_v16 = vld [vmem:[%s13639_s17 + $0xef8] sm:$0xff]  ;;  %v11144_v22 = vcombine.high %v2983_v3, %v2987_v5  ;;  %v2991_v26 = vld [vmem:[%s13639_s17 + $0xf10] sm:$0xff]  ;;  %v11143_v30 = vcombine.low %v2983_v3, %v2987_v5  ;;  %v11176_v3 = vcombine.high %v3015_v60, %v3019_v61 }
 0x4cd   : > { %v11146_v33 = vcombine.high %v2984_v7, %v2988_v16  ;;  %v2995_v25 = vld [vmem:[%s13639_s17 + $0xf30] sm:$0xff]  ;;  %v2996_v28 = vld [vmem:[%s13639_s17 + $0xf38] sm:$0xff] }
 0x4ce   : > { %6087 = vmatpush1.bf16.msra.mxu0 %v11103_v23  ;;  %v2992_v23 = vld [vmem:[%s13639_s17 + $0xf18] sm:$0xff] }
 0x4cf   : > { %6251 = vmatpush1.bf16.msra.mxu1 %v11105_v40  ;;  %6088 = vmatprep.subr.bf16.mxu0 %v11112_v36  ;;  %v11145_v40 = vcombine.low %v2984_v7, %v2988_v16  ;;  %v11152_v36 = vcombine.high %v2991_v26, %v2995_v25  ;;  %v11175_v16 = vcombine.low %v3015_v60, %v3019_v61  ;;  %v12024_v60 = vld [vmem:[%s13630_s26 + $0xc8] ss:$16 sps:$4 sm:$0xff]   ;;  %v12029_v61 = vld [vmem:[%s13630_s26 + $0xe4] ss:$16 sps:$4 sm:$0xff]  }
 0x4d0   : > { %6252 = vmatprep.subr.bf16.mxu1 %v11114_v4  ;;  %v11154_v4 = vcombine.high %v2992_v23, %v2996_v28 }
 0x4d2   : > { %6089 = vmatpush1.bf16.msra.mxu0 %v11111_v41  ;;  %v11151_v41 = vcombine.low %v2991_v26, %v2995_v25  ;;  %v11985_v26 = vld [vmem:[%s13630_s26] ss:$16 sps:$4 sm:$0xff]   ;;  %v11993_v25 = vld [vmem:[%s13630_s26 + $0x24] ss:$16 sps:$4 sm:$0xff]  }
 0x4d3   : > { %6253 = vmatpush1.bf16.msra.mxu1 %v11113_v43  ;;  %6090 = vmatprep.subr.bf16.mxu0 %v11120_v46  ;;  %v11153_v43 = vcombine.low %v2992_v23, %v2996_v28  ;;  %v11160_v46 = vcombine.high %v2999_v37, %v3003_v38  ;;  %v11996_v28 = vld [vmem:[%s13630_s26 + $0x2c] ss:$16 sps:$4 sm:$0xff]  }
 0x4d4   : > { %6254 = vmatprep.subr.bf16.mxu1 %v11122_v49  ;;  %v11162_v49 = vcombine.high %v3000_v24, %v3004_v18 }
 0x4d6   : > { %6091 = vmatpush1.bf16.msra.mxu0 %v11119_v54  ;;  %v14545_v54 = vld [vmem:[%s13641_s29] sm:$0xff] }
 0x4d7   : > { %6255 = vmatpush1.bf16.msra.mxu1 %v11121_v57  ;;  %6092 = vmatprep.subr.bf16.mxu0 %v11128_v58  ;;  %v11159_v57 = vcombine.low %v2999_v37, %v3003_v38  ;;  %v11161_v58 = vcombine.low %v3000_v24, %v3004_v18  ;;  %v3030_v62 = vrot.slane %v14545_v54, %v14005_v13  ;;  %v12000_v37 = vld [vmem:[%s13630_s26 + $0x48] ss:$16 sps:$4 sm:$0xff]   ;;  %v12005_v38 = vld [vmem:[%s13630_s26 + $0x64] ss:$16 sps:$4 sm:$0xff]   ;;  %v12008_v24 = vld [vmem:[%s13630_s26 + $0x6c] ss:$16 sps:$4 sm:$0xff]  }
 0x4d8   : > { %6256 = vmatprep.subr.bf16.mxu1 %v11130_v63  ;;  %v11168_v63 = vcombine.high %v3007_v50, %v3011_v51  ;;  %v12003_v18 = vld [vmem:[%s13630_s26 + $0x60] ss:$16 sps:$4 sm:$0xff]  }
 0x4d9   : > { %v11713_v7 = vadd.f32 %v14510_v21, %v3030_v62  ;;  %v11988_v21 = vld [vmem:[%s13630_s26 + $0x8] ss:$16 sps:$4 sm:$0xff]   ;;  %v12032_v62 = vld [vmem:[%s13630_s26 + $0xec] ss:$16 sps:$4 sm:$0xff]  }
 0x4da   : > { %6093 = vmatpush1.bf16.msra.mxu0 %v11127_v29  ;;  %v3016_v29 = vld [vmem:[%s13639_s17 + $0xfd8] sm:$0xff] }
 0x4db   : > { %6257 = vmatpush1.bf16.msra.mxu1 %v11129_v0  ;;  %6094 = vmatprep.subr.bf16.mxu0 %v11136_v55  ;;  %v3020_v0 = vld [vmem:[%s13639_s17 + $0xff8] sm:$0xff]  ;;  %v11167_v55 = vcombine.low %v3007_v50, %v3011_v51  ;;  %v12012_v50 = vld [vmem:[%s13630_s26 + $0x88] ss:$16 sps:$4 sm:$0xff]  }
 0x4dc   : > { %6258 = vmatprep.subr.bf16.mxu1 %v11138_v27  ;;  %v11169_v27 = vcombine.low %v3008_v53, %v3012_v12  ;;  %v11178_v5 = vcombine.high %v3016_v29, %v3020_v0  ;;  %v12017_v51 = vld [vmem:[%s13630_s26 + $0xa4] ss:$16 sps:$4 sm:$0xff]   ;;  %v12020_v53 = vld [vmem:[%s13630_s26 + $0xac] ss:$16 sps:$4 sm:$0xff]   ;;  %v12015_v12 = vld [vmem:[%s13630_s26 + $0xa0] ss:$16 sps:$4 sm:$0xff]  }
 0x4de   : > { %6095 = vmatpush1.bf16.msra.mxu0 %v11135_v17  ;;  %v11177_v17 = vcombine.low %v3016_v29, %v3020_v0  ;;  %v12027_v29 = vld [vmem:[%s13630_s26 + $0xe0] ss:$16 sps:$4 sm:$0xff]   ;;  %v12030_v0 = vld [vmem:[%s13630_s26 + $0xe8] ss:$16 sps:$4 sm:$0xff]  }
 0x4df   : > { %6259 = vmatpush1.bf16.msra.mxu1 %v11137_v20  ;;  %6096 = vmatprep.subr.bf16.mxu0 %v11144_v22  ;;  %v11987_v20 = vld [vmem:[%s13630_s26 + $0x4] ss:$16 sps:$4 sm:$0xff]   ;;  %v11990_v22 = vld [vmem:[%s13630_s26 + $0xc] ss:$16 sps:$4 sm:$0xff]  }
 0x4e0   : > { %6260 = vmatprep.subr.bf16.mxu1 %v11146_v33  ;;  %v6280_v33 = vmax.f32 %v11713_v7, 0.0  ;;  %v12041_v7 = vld [vmem:[%s13630_s26 + $0x124] ss:$16 sps:$4 sm:$0xff]  }
 0x4e2   : > { %6097 = vmatpush1.bf16.msra.mxu0 %v11143_v30  ;;  %v14559_v23 = vpack.c.bf16 %v6280_v33, %v6280_v33  ;;  %v11991_v30 = vld [vmem:[%s13630_s26 + $0x20] ss:$16 sps:$4 sm:$0xff]   ;;  %v12050_v33 = vld [vmem:[%s13630_s26 + $0x14c] ss:$16 sps:$4 sm:$0xff]  }
 0x4e3   : > { %6261 = vmatpush1.bf16.msra.mxu1 %v11145_v40  ;;  %6098 = vmatprep.subr.bf16.mxu0 %v11152_v36  ;;  %v11994_v40 = vld [vmem:[%s13630_s26 + $0x28] ss:$16 sps:$4 sm:$0xff]   ;;  %v11999_v36 = vld [vmem:[%s13630_s26 + $0x44] ss:$16 sps:$4 sm:$0xff]  }
 0x4e4   : > { %6262 = vmatprep.subr.bf16.mxu1 %v11154_v4  ;;  %v12002_v4 = vld [vmem:[%s13630_s26 + $0x4c] ss:$16 sps:$4 sm:$0xff]  }
 0x4e6   : > { %6099 = vmatpush1.bf16.msra.mxu0 %v11151_v41  ;;  %v12006_v41 = vld [vmem:[%s13630_s26 + $0x68] ss:$16 sps:$4 sm:$0xff]  }
 0x4e7   : > { %6263 = vmatpush1.bf16.msra.mxu1 %v11153_v43  ;;  %6100 = vmatprep.subr.bf16.mxu0 %v11160_v46  ;;  %v12011_v43 = vld [vmem:[%s13630_s26 + $0x84] ss:$16 sps:$4 sm:$0xff]   ;;  %v12014_v46 = vld [vmem:[%s13630_s26 + $0x8c] ss:$16 sps:$4 sm:$0xff]  }
 0x4e8   : > { %6264 = vmatprep.subr.bf16.mxu1 %v11162_v49  ;;  %v12009_v49 = vld [vmem:[%s13630_s26 + $0x80] ss:$16 sps:$4 sm:$0xff]  }
 0x4ea   : > { %6101 = vmatpush1.bf16.msra.mxu0 %v11159_v57  ;;  %v12018_v57 = vld [vmem:[%s13630_s26 + $0xa8] ss:$16 sps:$4 sm:$0xff]  }
 0x4eb   : > { %6265 = vmatpush1.bf16.msra.mxu1 %v11161_v58  ;;  %6102 = vmatprep.subr.bf16.mxu0 %v11168_v63  ;;  %v12023_v58 = vld [vmem:[%s13630_s26 + $0xc4] ss:$16 sps:$4 sm:$0xff]   ;;  %v12026_v63 = vld [vmem:[%s13630_s26 + $0xcc] ss:$16 sps:$4 sm:$0xff]  }
 0x4ec   : > { %6266 = vmatprep.subr.bf16.mxu1 %v11170_v59  ;;  %v12021_v59 = vld [vmem:[%s13630_s26 + $0xc0] ss:$16 sps:$4 sm:$0xff]  }
 0x4ee   : > { %6103 = vmatpush1.bf16.msra.mxu0 %v11167_v55  ;;  %v12035_v55 = vld [vmem:[%s13630_s26 + $0x104] ss:$16 sps:$4 sm:$0xff]  }
 0x4ef   : > { %6267 = vmatpush1.bf16.msra.mxu1 %v11169_v27  ;;  %6104 = vmatprep.subr.bf16.mxu0 %v11176_v3  ;;  %v12038_v27 = vld [vmem:[%s13630_s26 + $0x10c] ss:$16 sps:$4 sm:$0xff]   ;;  %v12033_v3 = vld [vmem:[%s13630_s26 + $0x100] ss:$16 sps:$4 sm:$0xff]  }
 0x4f0   : > { %6268 = vmatprep.subr.bf16.mxu1 %v11178_v5  ;;  %v12036_v5 = vld [vmem:[%s13630_s26 + $0x108] ss:$16 sps:$4 sm:$0xff]  }
 0x4f2   : > { %6105 = vmatpush1.bf16.msra.mxu0 %v11175_v16  ;;  %v12044_v16 = vld [vmem:[%s13630_s26 + $0x12c] ss:$16 sps:$4 sm:$0xff]  }
 0x4f3   : > { %6269 = vmatpush1.bf16.msra.mxu1 %v11177_v17  ;;  %7853 = vmatprep.subr.bf16.mxu0 %v11987_v20  ;;  %v12039_v17 = vld [vmem:[%s13630_s26 + $0x120] ss:$16 sps:$4 sm:$0xff]   ;;  %v12042_v20 = vld [vmem:[%s13630_s26 + $0x128] ss:$16 sps:$4 sm:$0xff]  }
 0x4f4   : > { %8017 = vmatprep.subr.bf16.mxu1 %v11990_v22  ;;  %v12047_v22 = vld [vmem:[%s13630_s26 + $0x144] ss:$16 sps:$4 sm:$0xff]  }
 0x4f5   : > { %6107 = vmatmul.mubr.bf16.vlgmr.msra.gmra.mrb[12].mxu0 %v14274_v42 }
 0x4f6   : > { %6271 = vmatmul.mubr.bf16.vlgmr.msra.gmra.mrb[12].mxu1 %v14274_v42  ;;  %7854 = vmatpush1.bf16.msra.mxu0 %v11985_v26  ;;  %v11997_v42 = vld [vmem:[%s13630_s26 + $0x40] ss:$16 sps:$4 sm:$0xff]  }
 0x4f7   : > { %7885 = vmatprep.mubr.bf16.mxu0 %v14559_v23  ;;  %8018 = vmatpush1.bf16.msra.mxu1 %v11988_v21  ;;  %v12045_v26 = vld [vmem:[%s13630_s26 + $0x140] ss:$16 sps:$4 sm:$0xff]   ;;  %v12048_v21 = vld [vmem:[%s13630_s26 + $0x148] ss:$16 sps:$4 sm:$0xff]  }
 0x4f8   : > { %8049 = vmatprep.mubr.bf16.mxu1 %v14559_v23  ;;  %7855 = vmatprep.subr.bf16.mxu0 %v11993_v25  ;;  %v12053_v25 = vld [vmem:[%s13630_s26 + $0x164] ss:$16 sps:$4 sm:$0xff]  }
 0x4f9   : > { %8019 = vmatprep.subr.bf16.mxu1 %v11996_v28  ;;  %v12056_v28 = vld [vmem:[%s13630_s26 + $0x16c] ss:$16 sps:$4 sm:$0xff]  }
 0x4fa   : > { %7856 = vmatpush1.bf16.msra.mxu0 %v11991_v30  ;;  %v12051_v30 = vld [vmem:[%s13630_s26 + $0x160] ss:$16 sps:$4 sm:$0xff]  }
 0x4fb   : > { %8020 = vmatpush1.bf16.msra.mxu1 %v11994_v40  ;;  %7857 = vmatprep.subr.bf16.mxu0 %v11999_v36  ;;  %v12054_v40 = vld [vmem:[%s13630_s26 + $0x168] ss:$16 sps:$4 sm:$0xff]   ;;  %v12059_v36 = vld [vmem:[%s13630_s26 + $0x184] ss:$16 sps:$4 sm:$0xff]  }
 0x4fc   : > { %8021 = vmatprep.subr.bf16.mxu1 %v12002_v4  ;;  %v12062_v4 = vld [vmem:[%s13630_s26 + $0x18c] ss:$16 sps:$4 sm:$0xff]  }
 0x4fe   : > { %7858 = vmatpush1.bf16.msra.mxu0 %v11997_v42  ;;  %v12057_v42 = vld [vmem:[%s13630_s26 + $0x180] ss:$16 sps:$4 sm:$0xff]  }
 0x4ff   : > { %8022 = vmatpush1.bf16.msra.mxu1 %v12000_v37  ;;  %7859 = vmatprep.subr.bf16.mxu0 %v12005_v38  ;;  %v12060_v37 = vld [vmem:[%s13630_s26 + $0x188] ss:$16 sps:$4 sm:$0xff]   ;;  %v12065_v38 = vld [vmem:[%s13630_s26 + $0x1a4] ss:$16 sps:$4 sm:$0xff]  }
 0x500   : > { %8023 = vmatprep.subr.bf16.mxu1 %v12008_v24  ;;  %v12068_v24 = vld [vmem:[%s13630_s26 + $0x1ac] ss:$16 sps:$4 sm:$0xff]  }
 0x502   : > { %7860 = vmatpush1.bf16.msra.mxu0 %v12003_v18  ;;  %v12063_v18 = vld [vmem:[%s13630_s26 + $0x1a0] ss:$16 sps:$4 sm:$0xff]  }
 0x503   : > { %8024 = vmatpush1.bf16.msra.mxu1 %v12006_v41  ;;  %7861 = vmatprep.subr.bf16.mxu0 %v12011_v43  ;;  %v3026_v41 = vrot.slane %v14545_v54, %v13999_v11  ;;  %v12066_v43 = vld [vmem:[%s13630_s26 + $0x1a8] ss:$16 sps:$4 sm:$0xff]  }
 0x504   : > { %8025 = vmatprep.subr.bf16.mxu1 %v12014_v46  ;;  %v12071_v46 = vld [vmem:[%s13630_s26 + $0x1c4] ss:$16 sps:$4 sm:$0xff]  }
 0x506   : > { %7862 = vmatpush1.bf16.msra.mxu0 %v12009_v49  ;;  %v12074_v49 = vld [vmem:[%s13630_s26 + $0x1cc] ss:$16 sps:$4 sm:$0xff]  }
 0x507   : > { %8026 = vmatpush1.bf16.msra.mxu1 %v12012_v50  ;;  %7863 = vmatprep.subr.bf16.mxu0 %v12017_v51  ;;  %v3038_v50 = vrot.slane %v14545_v54, %v14012_v15  ;;  %v12069_v51 = vld [vmem:[%s13630_s26 + $0x1c0] ss:$16 sps:$4 sm:$0xff]  }
 0x508   : > { %8027 = vmatprep.subr.bf16.mxu1 %v12020_v53  ;;  %v11712_v53 = vadd.f32 %v14504_v14, %v3026_v41  ;;  %v12083_v14 = vld [vmem:[%s13630_s26 + $0x204] ss:$16 sps:$4 sm:$0xff]   ;;  %v12122_v41 = vld [vmem:[%s13630_s26 + $0x2cc] ss:$16 sps:$4 sm:$0xff]  }
 0x50a   : > { %7864 = vmatpush1.bf16.msra.mxu0 %v12015_v12  ;;  %v12072_v12 = vld [vmem:[%s13630_s26 + $0x1c8] ss:$16 sps:$4 sm:$0xff]  }
 0x50b   : > { %8028 = vmatpush1.bf16.msra.mxu1 %v12018_v57  ;;  %7865 = vmatprep.subr.bf16.mxu0 %v12023_v58  ;;  %v12077_v57 = vld [vmem:[%s13630_s26 + $0x1e4] ss:$16 sps:$4 sm:$0xff]   ;;  %v12080_v58 = vld [vmem:[%s13630_s26 + $0x1ec] ss:$16 sps:$4 sm:$0xff]  }
 0x50c   : > { %8029 = vmatprep.subr.bf16.mxu1 %v12026_v63  ;;  %v11715_v63 = vadd.f32 %v14512_v39, %v3038_v50  ;;  %v12084_v39 = vld [vmem:[%s13630_s26 + $0x208] ss:$16 sps:$4 sm:$0xff]   ;;  %v12128_v50 = vld [vmem:[%s13630_s26 + $0x2ec] ss:$16 sps:$4 sm:$0xff]  }
 0x50e   : > { %7866 = vmatpush1.bf16.msra.mxu0 %v12021_v59  ;;  %v12075_v59 = vld [vmem:[%s13630_s26 + $0x1e0] ss:$16 sps:$4 sm:$0xff]  }
 0x50f   : > { %8030 = vmatpush1.bf16.msra.mxu1 %v12024_v60  ;;  %7867 = vmatprep.subr.bf16.mxu0 %v12029_v61  ;;  %v6279_v60 = vmax.f32 %v11712_v53, 0.0  ;;  %v12078_v61 = vld [vmem:[%s13630_s26 + $0x1e8] ss:$16 sps:$4 sm:$0xff]  }
 0x510   : > { %8031 = vmatprep.subr.bf16.mxu1 %v12032_v62  ;;  %v12086_v62 = vld [vmem:[%s13630_s26 + $0x20c] ss:$16 sps:$4 sm:$0xff]   ;;  %v12126_v53 = vld [vmem:[%s13630_s26 + $0x2e8] ss:$16 sps:$4 sm:$0xff]  }
 0x512   : > { %7868 = vmatpush1.bf16.msra.mxu0 %v12027_v29  ;;  %v6282_v29 = vmax.f32 %v11715_v63, 0.0  ;;  %v12132_v63 = vld [vmem:[%s13630_s26 + $0x308] ss:$16 sps:$4 sm:$0xff]  }
 0x513   : > { %8032 = vmatpush1.bf16.msra.mxu1 %v12030_v0  ;;  %7869 = vmatprep.subr.bf16.mxu0 %v12035_v55  ;;  %v12081_v0 = vld [vmem:[%s13630_s26 + $0x200] ss:$16 sps:$4 sm:$0xff]   ;;  %v14633_v55 = vpack.c.bf16 %v6279_v60, %v6279_v60  ;;  %v12140_v60 = vld [vmem:[%s13630_s26 + $0x32c] ss:$16 sps:$4 sm:$0xff]  }
 0x514   : > { %8033 = vmatprep.subr.bf16.mxu1 %v12038_v27  ;;  %v12089_v27 = vld [vmem:[%s13630_s26 + $0x224] ss:$16 sps:$4 sm:$0xff]  }
 0x516   : > { %7870 = vmatpush1.bf16.msra.mxu0 %v12033_v3  ;;  %v14637_v3 = vpack.c.bf16 %v6282_v29, %v6282_v29  ;;  %v12146_v29 = vld [vmem:[%s13630_s26 + $0x34c] ss:$16 sps:$4 sm:$0xff]  }
 0x517   : > { %8034 = vmatpush1.bf16.msra.mxu1 %v12036_v5  ;;  %7871 = vmatprep.subr.bf16.mxu0 %v12041_v7  ;;  %v12092_v5 = vld [vmem:[%s13630_s26 + $0x22c] ss:$16 sps:$4 sm:$0xff]   ;;  %v12087_v7 = vld [vmem:[%s13630_s26 + $0x220] ss:$16 sps:$4 sm:$0xff]  }
 0x518   : > { %8035 = vmatprep.subr.bf16.mxu1 %v12044_v16  ;;  %v12090_v16 = vld [vmem:[%s13630_s26 + $0x228] ss:$16 sps:$4 sm:$0xff]  }
 0x51a   : > { %7872 = vmatpush1.bf16.msra.mxu0 %v12039_v17  ;;  %v12095_v17 = vld [vmem:[%s13630_s26 + $0x244] ss:$16 sps:$4 sm:$0xff]  }
 0x51b   : > { %8036 = vmatpush1.bf16.msra.mxu1 %v12042_v20  ;;  %7873 = vmatprep.subr.bf16.mxu0 %v12047_v22  ;;  %v12098_v20 = vld [vmem:[%s13630_s26 + $0x24c] ss:$16 sps:$4 sm:$0xff]   ;;  %v12093_v22 = vld [vmem:[%s13630_s26 + $0x240] ss:$16 sps:$4 sm:$0xff]  }
 0x51c   : > { %8037 = vmatprep.subr.bf16.mxu1 %v12050_v33  ;;  %v12096_v33 = vld [vmem:[%s13630_s26 + $0x248] ss:$16 sps:$4 sm:$0xff]  }
 0x51e   : > { %7874 = vmatpush1.bf16.msra.mxu0 %v12045_v26  ;;  %v12101_v26 = vld [vmem:[%s13630_s26 + $0x264] ss:$16 sps:$4 sm:$0xff]  }
 0x51f   : > { %8038 = vmatpush1.bf16.msra.mxu1 %v12048_v21  ;;  %7875 = vmatprep.subr.bf16.mxu0 %v12053_v25  ;;  %v12104_v21 = vld [vmem:[%s13630_s26 + $0x26c] ss:$16 sps:$4 sm:$0xff]   ;;  %v12099_v25 = vld [vmem:[%s13630_s26 + $0x260] ss:$16 sps:$4 sm:$0xff]  }
 0x520   : > { %8039 = vmatprep.subr.bf16.mxu1 %v12056_v28  ;;  %v12102_v28 = vld [vmem:[%s13630_s26 + $0x268] ss:$16 sps:$4 sm:$0xff]  }
 0x522   : > { %7876 = vmatpush1.bf16.msra.mxu0 %v12051_v30  ;;  %v12107_v30 = vld [vmem:[%s13630_s26 + $0x284] ss:$16 sps:$4 sm:$0xff]  }
 0x523   : > { %8040 = vmatpush1.bf16.msra.mxu1 %v12054_v40  ;;  %7877 = vmatprep.subr.bf16.mxu0 %v12059_v36  ;;  %v12110_v40 = vld [vmem:[%s13630_s26 + $0x28c] ss:$16 sps:$4 sm:$0xff]   ;;  %v12105_v36 = vld [vmem:[%s13630_s26 + $0x280] ss:$16 sps:$4 sm:$0xff]  }
 0x524   : > { %8041 = vmatprep.subr.bf16.mxu1 %v12062_v4  ;;  %v12108_v4 = vld [vmem:[%s13630_s26 + $0x288] ss:$16 sps:$4 sm:$0xff]  }
 0x526   : > { %7878 = vmatpush1.bf16.msra.mxu0 %v12057_v42  ;;  %v12113_v42 = vld [vmem:[%s13630_s26 + $0x2a4] ss:$16 sps:$4 sm:$0xff]  }
 0x527   : > { %8042 = vmatpush1.bf16.msra.mxu1 %v12060_v37  ;;  %7879 = vmatprep.subr.bf16.mxu0 %v12065_v38  ;;  %v12116_v37 = vld [vmem:[%s13630_s26 + $0x2ac] ss:$16 sps:$4 sm:$0xff]   ;;  %v12111_v38 = vld [vmem:[%s13630_s26 + $0x2a0] ss:$16 sps:$4 sm:$0xff]  }
 0x528   : > { %8043 = vmatprep.subr.bf16.mxu1 %v12068_v24  ;;  %v12114_v24 = vld [vmem:[%s13630_s26 + $0x2a8] ss:$16 sps:$4 sm:$0xff]  }
 0x52a   : > { %7880 = vmatpush1.bf16.msra.mxu0 %v12063_v18  ;;  %v12119_v18 = vld [vmem:[%s13630_s26 + $0x2c4] ss:$16 sps:$4 sm:$0xff]  }
 0x52b   : > { %8044 = vmatpush1.bf16.msra.mxu1 %v12066_v43  ;;  %7881 = vmatprep.subr.bf16.mxu0 %v12071_v46  ;;  %v12117_v43 = vld [vmem:[%s13630_s26 + $0x2c0] ss:$16 sps:$4 sm:$0xff]   ;;  %v12120_v46 = vld [vmem:[%s13630_s26 + $0x2c8] ss:$16 sps:$4 sm:$0xff]  }
 0x52c   : > { %8045 = vmatprep.subr.bf16.mxu1 %v12074_v49  ;;  %v12125_v49 = vld [vmem:[%s13630_s26 + $0x2e4] ss:$16 sps:$4 sm:$0xff]  }
 0x52e   : > { %7882 = vmatpush1.bf16.msra.mxu0 %v12069_v51  ;;  %v12123_v51 = vld [vmem:[%s13630_s26 + $0x2e0] ss:$16 sps:$4 sm:$0xff]  }
 0x52f   : > { %8046 = vmatpush1.bf16.msra.mxu1 %v12072_v12  ;;  %7883 = vmatprep.subr.bf16.mxu0 %v12077_v57  ;;  %v12131_v12 = vld [vmem:[%s13630_s26 + $0x304] ss:$16 sps:$4 sm:$0xff]   ;;  %v12134_v57 = vld [vmem:[%s13630_s26 + $0x30c] ss:$16 sps:$4 sm:$0xff]  }
 0x530   : > { %8047 = vmatprep.subr.bf16.mxu1 %v12080_v58  ;;  %v12129_v58 = vld [vmem:[%s13630_s26 + $0x300] ss:$16 sps:$4 sm:$0xff]  }
 0x532   : > { %7884 = vmatpush1.bf16.msra.mxu0 %v12075_v59  ;;  %v12137_v59 = vld [vmem:[%s13630_s26 + $0x324] ss:$16 sps:$4 sm:$0xff]  }
 0x533   : > { %8048 = vmatpush1.bf16.msra.mxu1 %v12078_v61  ;;  %7894 = vmatprep.subr.bf16.mxu0 %v12083_v14  ;;  %v12135_v61 = vld [vmem:[%s13630_s26 + $0x320] ss:$16 sps:$4 sm:$0xff]   ;;  %v12138_v14 = vld [vmem:[%s13630_s26 + $0x328] ss:$16 sps:$4 sm:$0xff]  }
 0x534   : > { %8058 = vmatprep.subr.bf16.mxu1 %v12086_v62  ;;  %v12143_v62 = vld [vmem:[%s13630_s26 + $0x344] ss:$16 sps:$4 sm:$0xff]  }
 0x535   : > { %7886 = vmatmul.mubr.bf16.vlgmr.msra.gmra.mrb[16].mxu0 %v14633_v55 }
 0x536   : > { %8050 = vmatmul.mubr.bf16.vlgmr.msra.gmra.mrb[16].mxu1 %v14633_v55  ;;  %7895 = vmatpush1.bf16.msra.mxu0 %v12081_v0  ;;  %v12141_v0 = vld [vmem:[%s13630_s26 + $0x340] ss:$16 sps:$4 sm:$0xff]  }
 0x537   : > { %7926 = vmatprep.mubr.bf16.mxu0 %v14637_v3  ;;  %8059 = vmatpush1.bf16.msra.mxu1 %v12084_v39  ;;  %v12144_v39 = vld [vmem:[%s13630_s26 + $0x348] ss:$16 sps:$4 sm:$0xff]  }
 0x538   : > { %8090 = vmatprep.mubr.bf16.mxu1 %v14637_v3  ;;  %7896 = vmatprep.subr.bf16.mxu0 %v12089_v27  ;;  %v12149_v27 = vld [vmem:[%s13630_s26 + $0x364] ss:$16 sps:$4 sm:$0xff]  }
 0x539   : > { %8060 = vmatprep.subr.bf16.mxu1 %v12092_v5  ;;  %v12152_v5 = vld [vmem:[%s13630_s26 + $0x36c] ss:$16 sps:$4 sm:$0xff]  }
 0x53a   : > { %7897 = vmatpush1.bf16.msra.mxu0 %v12087_v7  ;;  %v12147_v7 = vld [vmem:[%s13630_s26 + $0x360] ss:$16 sps:$4 sm:$0xff]  }
 0x53b   : > { %8061 = vmatpush1.bf16.msra.mxu1 %v12090_v16  ;;  %7898 = vmatprep.subr.bf16.mxu0 %v12095_v17  ;;  %v12150_v16 = vld [vmem:[%s13630_s26 + $0x368] ss:$16 sps:$4 sm:$0xff]   ;;  %v12155_v17 = vld [vmem:[%s13630_s26 + $0x384] ss:$16 sps:$4 sm:$0xff]  }
 0x53c   : > { %8062 = vmatprep.subr.bf16.mxu1 %v12098_v20  ;;  %v12158_v20 = vld [vmem:[%s13630_s26 + $0x38c] ss:$16 sps:$4 sm:$0xff]  }
 0x53e   : > { %7899 = vmatpush1.bf16.msra.mxu0 %v12093_v22  ;;  %v12153_v22 = vld [vmem:[%s13630_s26 + $0x380] ss:$16 sps:$4 sm:$0xff]  }
 0x53f   : > { %8063 = vmatpush1.bf16.msra.mxu1 %v12096_v33  ;;  %7900 = vmatprep.subr.bf16.mxu0 %v12101_v26  ;;  %v12156_v33 = vld [vmem:[%s13630_s26 + $0x388] ss:$16 sps:$4 sm:$0xff]   ;;  %v12161_v26 = vld [vmem:[%s13630_s26 + $0x3a4] ss:$16 sps:$4 sm:$0xff]  }
 0x540   : > { %8064 = vmatprep.subr.bf16.mxu1 %v12104_v21  ;;  %v12164_v21 = vld [vmem:[%s13630_s26 + $0x3ac] ss:$16 sps:$4 sm:$0xff]  }
 0x542   : > { %7901 = vmatpush1.bf16.msra.mxu0 %v12099_v25  ;;  %v12159_v25 = vld [vmem:[%s13630_s26 + $0x3a0] ss:$16 sps:$4 sm:$0xff]  }
 0x543   : > { %8065 = vmatpush1.bf16.msra.mxu1 %v12102_v28  ;;  %7902 = vmatprep.subr.bf16.mxu0 %v12107_v30  ;;  %v3034_v28 = vrot.slane %v14545_v54, %v14084_v52  ;;  %v12162_v30 = vld [vmem:[%s13630_s26 + $0x3a8] ss:$16 sps:$4 sm:$0xff]  }
 0x544   : > { %8066 = vmatprep.subr.bf16.mxu1 %v12110_v40  ;;  %v12167_v40 = vld [vmem:[%s13630_s26 + $0x3c4] ss:$16 sps:$4 sm:$0xff]  }
 0x546   : > { %7903 = vmatpush1.bf16.msra.mxu0 %v12105_v36  ;;  %v12170_v36 = vld [vmem:[%s13630_s26 + $0x3cc] ss:$16 sps:$4 sm:$0xff]  }
 0x547   : > { %8067 = vmatpush1.bf16.msra.mxu1 %v12108_v4  ;;  %7904 = vmatprep.subr.bf16.mxu0 %v12113_v42  ;;  %v12165_v4 = vld [vmem:[%s13630_s26 + $0x3c0] ss:$16 sps:$4 sm:$0xff]   ;;  %v11714_v42 = vadd.f32 %v14506_v56, %v3034_v28  ;;  %v12182_v56 = vld [vmem:[%s13630_s26 + $0x40c] ss:$16 sps:$4 sm:$0xff]   ;;  %v12221_v28 = vld [vmem:[%s13630_s26 + $0x4e4] ss:$16 sps:$4 sm:$0xff]  }
 0x548   : > { %8068 = vmatprep.subr.bf16.mxu1 %v12116_v37  ;;  %v12168_v37 = vld [vmem:[%s13630_s26 + $0x3c8] ss:$16 sps:$4 sm:$0xff]  }
 0x54a   : > { %7905 = vmatpush1.bf16.msra.mxu0 %v12111_v38  ;;  %v12173_v38 = vld [vmem:[%s13630_s26 + $0x3e4] ss:$16 sps:$4 sm:$0xff]  }
 0x54b   : > { %8069 = vmatpush1.bf16.msra.mxu1 %v12114_v24  ;;  %7906 = vmatprep.subr.bf16.mxu0 %v12119_v18  ;;  %v12176_v24 = vld [vmem:[%s13630_s26 + $0x3ec] ss:$16 sps:$4 sm:$0xff]   ;;  %v12171_v18 = vld [vmem:[%s13630_s26 + $0x3e0] ss:$16 sps:$4 sm:$0xff]  }
 0x54c   : > { %8070 = vmatprep.subr.bf16.mxu1 %v12122_v41  ;;  %v6281_v41 = vmax.f32 %v11714_v42, 0.0  ;;  %v12230_v42 = vld [vmem:[%s13630_s26 + $0x50c] ss:$16 sps:$4 sm:$0xff]  }
 0x54e   : > { %7907 = vmatpush1.bf16.msra.mxu0 %v12117_v43  ;;  %v12174_v43 = vld [vmem:[%s13630_s26 + $0x3e8] ss:$16 sps:$4 sm:$0xff]  }
 0x54f   : > { %8071 = vmatpush1.bf16.msra.mxu1 %v12120_v46  ;;  %7908 = vmatprep.subr.bf16.mxu0 %v12125_v49  ;;  %v12179_v46 = vld [vmem:[%s13630_s26 + $0x404] ss:$16 sps:$4 sm:$0xff]   ;;  %v12177_v49 = vld [vmem:[%s13630_s26 + $0x400] ss:$16 sps:$4 sm:$0xff]  }
 0x550   : > { %8072 = vmatprep.subr.bf16.mxu1 %v12128_v50  ;;  %v14708_v50 = vpack.c.bf16 %v6281_v41, %v6281_v41  ;;  %v12231_v41 = vld [vmem:[%s13630_s26 + $0x520] ss:$16 sps:$4 sm:$0xff]  }
 0x552   : > { %7909 = vmatpush1.bf16.msra.mxu0 %v12123_v51  ;;  %v12180_v51 = vld [vmem:[%s13630_s26 + $0x408] ss:$16 sps:$4 sm:$0xff]  }
 0x553   : > { %8073 = vmatpush1.bf16.msra.mxu1 %v12126_v53  ;;  %7910 = vmatprep.subr.bf16.mxu0 %v12131_v12  ;;  %v12185_v53 = vld [vmem:[%s13630_s26 + $0x424] ss:$16 sps:$4 sm:$0xff]   ;;  %v12188_v12 = vld [vmem:[%s13630_s26 + $0x42c] ss:$16 sps:$4 sm:$0xff]  }
 0x554   : > { %8074 = vmatprep.subr.bf16.mxu1 %v12134_v57  ;;  %v12183_v57 = vld [vmem:[%s13630_s26 + $0x420] ss:$16 sps:$4 sm:$0xff]  }
 0x556   : > { %7911 = vmatpush1.bf16.msra.mxu0 %v12129_v58  ;;  %v12186_v58 = vld [vmem:[%s13630_s26 + $0x428] ss:$16 sps:$4 sm:$0xff]  }
 0x557   : > { %8075 = vmatpush1.bf16.msra.mxu1 %v12132_v63  ;;  %7912 = vmatprep.subr.bf16.mxu0 %v12137_v59  ;;  %v12191_v63 = vld [vmem:[%s13630_s26 + $0x444] ss:$16 sps:$4 sm:$0xff]   ;;  %v12194_v59 = vld [vmem:[%s13630_s26 + $0x44c] ss:$16 sps:$4 sm:$0xff]  }
 0x558   : > { %8076 = vmatprep.subr.bf16.mxu1 %v12140_v60  ;;  %v12189_v60 = vld [vmem:[%s13630_s26 + $0x440] ss:$16 sps:$4 sm:$0xff]  }
 0x55a   : > { %7913 = vmatpush1.bf16.msra.mxu0 %v12135_v61  ;;  %v12192_v61 = vld [vmem:[%s13630_s26 + $0x448] ss:$16 sps:$4 sm:$0xff]  }
 0x55b   : > { %8077 = vmatpush1.bf16.msra.mxu1 %v12138_v14  ;;  %7914 = vmatprep.subr.bf16.mxu0 %v12143_v62  ;;  %v12197_v14 = vld [vmem:[%s13630_s26 + $0x464] ss:$16 sps:$4 sm:$0xff]   ;;  %v12200_v62 = vld [vmem:[%s13630_s26 + $0x46c] ss:$16 sps:$4 sm:$0xff]  }
 0x55c   : > { %8078 = vmatprep.subr.bf16.mxu1 %v12146_v29  ;;  %v12195_v29 = vld [vmem:[%s13630_s26 + $0x460] ss:$16 sps:$4 sm:$0xff]  }
 0x55e   : > { %7915 = vmatpush1.bf16.msra.mxu0 %v12141_v0  ;;  %v12198_v0 = vld [vmem:[%s13630_s26 + $0x468] ss:$16 sps:$4 sm:$0xff]  }
 0x55f   : > { %8079 = vmatpush1.bf16.msra.mxu1 %v12144_v39  ;;  %7916 = vmatprep.subr.bf16.mxu0 %v12149_v27  ;;  %v12203_v39 = vld [vmem:[%s13630_s26 + $0x484] ss:$16 sps:$4 sm:$0xff]   ;;  %v12206_v27 = vld [vmem:[%s13630_s26 + $0x48c] ss:$16 sps:$4 sm:$0xff]  }
 0x560   : > { %8080 = vmatprep.subr.bf16.mxu1 %v12152_v5  ;;  %v12201_v5 = vld [vmem:[%s13630_s26 + $0x480] ss:$16 sps:$4 sm:$0xff]  }
 0x562   : > { %7917 = vmatpush1.bf16.msra.mxu0 %v12147_v7  ;;  %v12204_v7 = vld [vmem:[%s13630_s26 + $0x488] ss:$16 sps:$4 sm:$0xff]  }
 0x563   : > { %8081 = vmatpush1.bf16.msra.mxu1 %v12150_v16  ;;  %7918 = vmatprep.subr.bf16.mxu0 %v12155_v17  ;;  %v12209_v16 = vld [vmem:[%s13630_s26 + $0x4a4] ss:$16 sps:$4 sm:$0xff]   ;;  %v12212_v17 = vld [vmem:[%s13630_s26 + $0x4ac] ss:$16 sps:$4 sm:$0xff]  }
 0x564   : > { %8082 = vmatprep.subr.bf16.mxu1 %v12158_v20  ;;  %v12207_v20 = vld [vmem:[%s13630_s26 + $0x4a0] ss:$16 sps:$4 sm:$0xff]  }
 0x566   : > { %7919 = vmatpush1.bf16.msra.mxu0 %v12153_v22  ;;  %v12210_v22 = vld [vmem:[%s13630_s26 + $0x4a8] ss:$16 sps:$4 sm:$0xff]  }
 0x567   : > { %8083 = vmatpush1.bf16.msra.mxu1 %v12156_v33  ;;  %7920 = vmatprep.subr.bf16.mxu0 %v12161_v26  ;;  %v12215_v33 = vld [vmem:[%s13630_s26 + $0x4c4] ss:$16 sps:$4 sm:$0xff]   ;;  %v12218_v26 = vld [vmem:[%s13630_s26 + $0x4cc] ss:$16 sps:$4 sm:$0xff]  }
 0x568   : > { %8084 = vmatprep.subr.bf16.mxu1 %v12164_v21  ;;  %v12213_v21 = vld [vmem:[%s13630_s26 + $0x4c0] ss:$16 sps:$4 sm:$0xff]  }
 0x56a   : > { %7921 = vmatpush1.bf16.msra.mxu0 %v12159_v25  ;;  %v12216_v25 = vld [vmem:[%s13630_s26 + $0x4c8] ss:$16 sps:$4 sm:$0xff]  }
 0x56b   : > { %8085 = vmatpush1.bf16.msra.mxu1 %v12162_v30  ;;  %7922 = vmatprep.subr.bf16.mxu0 %v12167_v40  ;;  %v12224_v30 = vld [vmem:[%s13630_s26 + $0x4ec] ss:$16 sps:$4 sm:$0xff]   ;;  %v12219_v40 = vld [vmem:[%s13630_s26 + $0x4e0] ss:$16 sps:$4 sm:$0xff]  }
 0x56c   : > { %8086 = vmatprep.subr.bf16.mxu1 %v12170_v36  ;;  %v12222_v36 = vld [vmem:[%s13630_s26 + $0x4e8] ss:$16 sps:$4 sm:$0xff]  }
 0x56e   : > { %7923 = vmatpush1.bf16.msra.mxu0 %v12165_v4  ;;  %v12227_v4 = vld [vmem:[%s13630_s26 + $0x504] ss:$16 sps:$4 sm:$0xff]  }
 0x56f   : > { %8087 = vmatpush1.bf16.msra.mxu1 %v12168_v37  ;;  %7924 = vmatprep.subr.bf16.mxu0 %v12173_v38  ;;  %v12225_v37 = vld [vmem:[%s13630_s26 + $0x500] ss:$16 sps:$4 sm:$0xff]   ;;  %v12228_v38 = vld [vmem:[%s13630_s26 + $0x508] ss:$16 sps:$4 sm:$0xff]  }
 0x570   : > { %8088 = vmatprep.subr.bf16.mxu1 %v12176_v24  ;;  %v12233_v24 = vld [vmem:[%s13630_s26 + $0x524] ss:$16 sps:$4 sm:$0xff]  }
 0x572   : > { %7925 = vmatpush1.bf16.msra.mxu0 %v12171_v18  ;;  %v12236_v18 = vld [vmem:[%s13630_s26 + $0x52c] ss:$16 sps:$4 sm:$0xff]  }
 0x573   : > { %8089 = vmatpush1.bf16.msra.mxu1 %v12174_v43  ;;  %7935 = vmatprep.subr.bf16.mxu0 %v12179_v46  ;;  %v12234_v43 = vld [vmem:[%s13630_s26 + $0x528] ss:$16 sps:$4 sm:$0xff]   ;;  %v12239_v46 = vld [vmem:[%s13630_s26 + $0x544] ss:$16 sps:$4 sm:$0xff]  }
 0x574   : > { %8099 = vmatprep.subr.bf16.mxu1 %v12182_v56  ;;  %v12242_v56 = vld [vmem:[%s13630_s26 + $0x54c] ss:$16 sps:$4 sm:$0xff]  }
 0x575   : > { %7927 = vmatmul.mubr.bf16.vlgmr.msra.gmra.mrb[16].mxu0 %v14708_v50 }
 0x576   : > { %8091 = vmatmul.mubr.bf16.vlgmr.msra.gmra.mrb[16].mxu1 %v14708_v50  ;;  %7936 = vmatpush1.bf16.msra.mxu0 %v12177_v49  ;;  %v12237_v49 = vld [vmem:[%s13630_s26 + $0x540] ss:$16 sps:$4 sm:$0xff]  }
 0x577   : > { %8100 = vmatpush1.bf16.msra.mxu1 %v12180_v51  ;;  %7937 = vmatprep.subr.bf16.mxu0 %v12185_v53  ;;  %v12240_v51 = vld [vmem:[%s13630_s26 + $0x548] ss:$16 sps:$4 sm:$0xff]   ;;  %v12245_v53 = vld [vmem:[%s13630_s26 + $0x564] ss:$16 sps:$4 sm:$0xff]  }
 0x578   : > { %8101 = vmatprep.subr.bf16.mxu1 %v12188_v12  ;;  %v12248_v12 = vld [vmem:[%s13630_s26 + $0x56c] ss:$16 sps:$4 sm:$0xff]  }
 0x57a   : > { %7938 = vmatpush1.bf16.msra.mxu0 %v12183_v57  ;;  %v12243_v57 = vld [vmem:[%s13630_s26 + $0x560] ss:$16 sps:$4 sm:$0xff]  }
 0x57b   : > { %8102 = vmatpush1.bf16.msra.mxu1 %v12186_v58  ;;  %7939 = vmatprep.subr.bf16.mxu0 %v12191_v63  ;;  %v12246_v58 = vld [vmem:[%s13630_s26 + $0x568] ss:$16 sps:$4 sm:$0xff]   ;;  %v12251_v63 = vld [vmem:[%s13630_s26 + $0x584] ss:$16 sps:$4 sm:$0xff]  }
 0x57c   : > { %8103 = vmatprep.subr.bf16.mxu1 %v12194_v59  ;;  %v12254_v59 = vld [vmem:[%s13630_s26 + $0x58c] ss:$16 sps:$4 sm:$0xff]  }
 0x57e   : > { %7940 = vmatpush1.bf16.msra.mxu0 %v12189_v60  ;;  %v12249_v60 = vld [vmem:[%s13630_s26 + $0x580] ss:$16 sps:$4 sm:$0xff]  }
 0x57f   : > { %8104 = vmatpush1.bf16.msra.mxu1 %v12192_v61  ;;  %7941 = vmatprep.subr.bf16.mxu0 %v12197_v14  ;;  %v12252_v61 = vld [vmem:[%s13630_s26 + $0x588] ss:$16 sps:$4 sm:$0xff]   ;;  %v12257_v14 = vld [vmem:[%s13630_s26 + $0x5a4] ss:$16 sps:$4 sm:$0xff]  }
 0x580   : > { %8105 = vmatprep.subr.bf16.mxu1 %v12200_v62  ;;  %v12260_v62 = vld [vmem:[%s13630_s26 + $0x5ac] ss:$16 sps:$4 sm:$0xff]  }
 0x582   : > { %7942 = vmatpush1.bf16.msra.mxu0 %v12195_v29  ;;  %v12255_v29 = vld [vmem:[%s13630_s26 + $0x5a0] ss:$16 sps:$4 sm:$0xff]  }
 0x583   : > { %8106 = vmatpush1.bf16.msra.mxu1 %v12198_v0  ;;  %7943 = vmatprep.subr.bf16.mxu0 %v12203_v39  ;;  %v12258_v0 = vld [vmem:[%s13630_s26 + $0x5a8] ss:$16 sps:$4 sm:$0xff]   ;;  %v12263_v39 = vld [vmem:[%s13630_s26 + $0x5c4] ss:$16 sps:$4 sm:$0xff]  }
 0x584   : > { %8107 = vmatprep.subr.bf16.mxu1 %v12206_v27  ;;  %v12266_v27 = vld [vmem:[%s13630_s26 + $0x5cc] ss:$16 sps:$4 sm:$0xff]  }
 0x586   : > { %7944 = vmatpush1.bf16.msra.mxu0 %v12201_v5  ;;  %v12261_v5 = vld [vmem:[%s13630_s26 + $0x5c0] ss:$16 sps:$4 sm:$0xff]  }
 0x587   : > { %8108 = vmatpush1.bf16.msra.mxu1 %v12204_v7  ;;  %7945 = vmatprep.subr.bf16.mxu0 %v12209_v16  ;;  %v12264_v7 = vld [vmem:[%s13630_s26 + $0x5c8] ss:$16 sps:$4 sm:$0xff]   ;;  %v12269_v16 = vld [vmem:[%s13630_s26 + $0x5e4] ss:$16 sps:$4 sm:$0xff]  }
 0x588   : > { %8109 = vmatprep.subr.bf16.mxu1 %v12212_v17  ;;  %v12272_v17 = vld [vmem:[%s13630_s26 + $0x5ec] ss:$16 sps:$4 sm:$0xff]  }
 0x58a   : > { %7946 = vmatpush1.bf16.msra.mxu0 %v12207_v20  ;;  %v12267_v20 = vld [vmem:[%s13630_s26 + $0x5e0] ss:$16 sps:$4 sm:$0xff]  }
 0x58b   : > { %8110 = vmatpush1.bf16.msra.mxu1 %v12210_v22  ;;  %7947 = vmatprep.subr.bf16.mxu0 %v12215_v33  ;;  %v12270_v22 = vld [vmem:[%s13630_s26 + $0x5e8] ss:$16 sps:$4 sm:$0xff]   ;;  %v12275_v33 = vld [vmem:[%s13630_s26 + $0x604] ss:$16 sps:$4 sm:$0xff]  }
 0x58c   : > { %8111 = vmatprep.subr.bf16.mxu1 %v12218_v26  ;;  %v12278_v26 = vld [vmem:[%s13630_s26 + $0x60c] ss:$16 sps:$4 sm:$0xff]  }
 0x58e   : > { %7948 = vmatpush1.bf16.msra.mxu0 %v12213_v21  ;;  %v3042_v21 = vrot.slane %v14545_v54, %v1134_v6 }
 0x58f   : > { %8112 = vmatpush1.bf16.msra.mxu1 %v12216_v25  ;;  %7949 = vmatprep.subr.bf16.mxu0 %v12221_v28  ;;  %v3046_v25 = vrot.slane %v14545_v54, %v1138_v47  ;;  %v3054_v28 = vrot.slane %v14545_v54, %v1146_v19 }
 0x590   : > { %8113 = vmatprep.subr.bf16.mxu1 %v12224_v30 }
 0x592   : > { %7950 = vmatpush1.bf16.msra.mxu0 %v12219_v40 }
 0x593   : > { %8114 = vmatpush1.bf16.msra.mxu1 %v12222_v36  ;;  %7951 = vmatprep.subr.bf16.mxu0 %v12227_v4 }
 0x594   : > { %8115 = vmatprep.subr.bf16.mxu1 %v12230_v42 }
 0x596   : > { %7952 = vmatpush1.bf16.msra.mxu0 %v12225_v37 }
 0x597   : > { %8116 = vmatpush1.bf16.msra.mxu1 %v12228_v38  ;;  %7953 = vmatprep.subr.bf16.mxu0 %v12233_v24 }
 0x598   : > { %8117 = vmatprep.subr.bf16.mxu1 %v12236_v18 }
 0x59a   : > { %7954 = vmatpush1.bf16.msra.mxu0 %v12231_v41 }
 0x59b   : > { %8118 = vmatpush1.bf16.msra.mxu1 %v12234_v43  ;;  %7955 = vmatprep.subr.bf16.mxu0 %v12239_v46  ;;  %v12273_v46 = vld [vmem:[%s13630_s26 + $0x600] ss:$16 sps:$4 sm:$0xff]  }
 0x59c   : > { %8119 = vmatprep.subr.bf16.mxu1 %v12242_v56  ;;  %v12276_v56 = vld [vmem:[%s13630_s26 + $0x608] ss:$16 sps:$4 sm:$0xff]  }
 0x59e   : > { %7956 = vmatpush1.bf16.msra.mxu0 %v12237_v49 }
 0x59f   : > { %8120 = vmatpush1.bf16.msra.mxu1 %v12240_v51  ;;  %7957 = vmatprep.subr.bf16.mxu0 %v12245_v53  ;;  %v12281_v51 = vld [vmem:[%s13630_s26 + $0x624] ss:$16 sps:$4 sm:$0xff]   ;;  %v12284_v53 = vld [vmem:[%s13630_s26 + $0x62c] ss:$16 sps:$4 sm:$0xff]  }
 0x5a0   : > { %8121 = vmatprep.subr.bf16.mxu1 %v12248_v12 }
 0x5a2   : > { %7958 = vmatpush1.bf16.msra.mxu0 %v12243_v57  ;;  %v12279_v57 = vld [vmem:[%s13630_s26 + $0x620] ss:$16 sps:$4 sm:$0xff]  }
 0x5a3   : > { %8122 = vmatpush1.bf16.msra.mxu1 %v12246_v58  ;;  %7959 = vmatprep.subr.bf16.mxu0 %v12251_v63  ;;  %v12282_v58 = vld [vmem:[%s13630_s26 + $0x628] ss:$16 sps:$4 sm:$0xff]   ;;  %v12287_v63 = vld [vmem:[%s13630_s26 + $0x644] ss:$16 sps:$4 sm:$0xff]  }
 0x5a4   : > { %8123 = vmatprep.subr.bf16.mxu1 %v12254_v59  ;;  %v12290_v59 = vld [vmem:[%s13630_s26 + $0x64c] ss:$16 sps:$4 sm:$0xff]  }
 0x5a6   : > { %7960 = vmatpush1.bf16.msra.mxu0 %v12249_v60  ;;  %v12285_v60 = vld [vmem:[%s13630_s26 + $0x640] ss:$16 sps:$4 sm:$0xff]  }
 0x5a7   : > { %8124 = vmatpush1.bf16.msra.mxu1 %v12252_v61  ;;  %7961 = vmatprep.subr.bf16.mxu0 %v12257_v14  ;;  %v12288_v61 = vld [vmem:[%s13630_s26 + $0x648] ss:$16 sps:$4 sm:$0xff]   ;;  %v12293_v14 = vld [vmem:[%s13630_s26 + $0x664] ss:$16 sps:$4 sm:$0xff]  }
 0x5a8   : > { %8125 = vmatprep.subr.bf16.mxu1 %v12260_v62  ;;  %v12296_v62 = vld [vmem:[%s13630_s26 + $0x66c] ss:$16 sps:$4 sm:$0xff]  }
 0x5aa   : > { %7962 = vmatpush1.bf16.msra.mxu0 %v12255_v29  ;;  %v12291_v29 = vld [vmem:[%s13630_s26 + $0x660] ss:$16 sps:$4 sm:$0xff]  }
 0x5ab   : > { %8126 = vmatpush1.bf16.msra.mxu1 %v12258_v0  ;;  %7963 = vmatprep.subr.bf16.mxu0 %v12263_v39  ;;  %v12294_v0 = vld [vmem:[%s13630_s26 + $0x668] ss:$16 sps:$4 sm:$0xff]   ;;  %v12299_v39 = vld [vmem:[%s13630_s26 + $0x684] ss:$16 sps:$4 sm:$0xff]  }
 0x5ac   : > { %8127 = vmatprep.subr.bf16.mxu1 %v12266_v27  ;;  %v12302_v27 = vld [vmem:[%s13630_s26 + $0x68c] ss:$16 sps:$4 sm:$0xff]  }
 0x5ae   : > { %7964 = vmatpush1.bf16.msra.mxu0 %v12261_v5  ;;  %v12297_v5 = vld [vmem:[%s13630_s26 + $0x680] ss:$16 sps:$4 sm:$0xff]  }
 0x5af   : > { %8128 = vmatpush1.bf16.msra.mxu1 %v12264_v7  ;;  %7965 = vmatprep.subr.bf16.mxu0 %v12269_v16  ;;  %v12300_v7 = vld [vmem:[%s13630_s26 + $0x688] ss:$16 sps:$4 sm:$0xff]   ;;  %v12305_v16 = vld [vmem:[%s13630_s26 + $0x6a4] ss:$16 sps:$4 sm:$0xff]  }
 0x5b0   : > { %8129 = vmatprep.subr.bf16.mxu1 %v12272_v17  ;;  %v12308_v17 = vld [vmem:[%s13630_s26 + $0x6ac] ss:$16 sps:$4 sm:$0xff]  }
 0x5b2   : > { %7966 = vmatpush1.bf16.msra.mxu0 %v12267_v20  ;;  %v12303_v20 = vld [vmem:[%s13630_s26 + $0x6a0] ss:$16 sps:$4 sm:$0xff]  }
 0x5b3   : > { %8130 = vmatpush1.bf16.msra.mxu1 %v12270_v22  ;;  %7976 = vmatprep.subr.bf16.mxu0 %v12275_v33  ;;  %v12306_v22 = vld [vmem:[%s13630_s26 + $0x6a8] ss:$16 sps:$4 sm:$0xff]   ;;  %v12311_v33 = vld [vmem:[%s13630_s26 + $0x6c4] ss:$16 sps:$4 sm:$0xff]  }
 0x5b4   : > { %8140 = vmatprep.subr.bf16.mxu1 %v12278_v26  ;;  %v12314_v26 = vld [vmem:[%s13630_s26 + $0x6cc] ss:$16 sps:$4 sm:$0xff]  }
 0x5c8   : > { %v6108_v30 = vpop.f32.mrb[12].mxu0 }
 0x5c9   : > { %v11716_v40 = vadd.f32 %v6108_v30, %v3042_v21  ;;  %v14784_v36 = vpop.f32.mrb[12].mxu1  ;;  %v6110_v4 = vpop.f32.mrb[13].mxu0  ;;  %v12309_v21 = vld [vmem:[%s13630_s26 + $0x6c0] ss:$16 sps:$4 sm:$0xff]   ;;  %v12320_v30 = vld [vmem:[%s13630_s26 + $0x6ec] ss:$16 sps:$4 sm:$0xff]  }
 0x5ca   : > { %v11717_v42 = vadd.f32 %v6110_v4, %v3046_v25  ;;  %v6274_v37 = vpop.f32.mrb[13].mxu1  ;;  %v6112_v6 = vpop.f32.mrb[14].mxu0  ;;  %v12312_v25 = vld [vmem:[%s13630_s26 + $0x6c8] ss:$16 sps:$4 sm:$0xff]  }
 0x5cb   : > { %v6283_v38 = vmax.f32 %v11716_v40, 0.0  ;;  %v11719_v24 = vadd.f32 %v6274_v37, %v3054_v28  ;;  %v6276_v18 = vpop.f32.mrb[14].mxu1  ;;  %v6113_v47 = vpop.f32.mrb[15].mxu0  ;;  %v12317_v28 = vld [vmem:[%s13630_s26 + $0x6e4] ss:$16 sps:$4 sm:$0xff]  }
 0x5cc   : > { %v6284_v41 = vmax.f32 %v11717_v42, 0.0  ;;  %v6277_v43 = vpop.f32.mrb[15].mxu1  ;;  %v12315_v40 = vld [vmem:[%s13630_s26 + $0x6e0] ss:$16 sps:$4 sm:$0xff]   ;;  %v12318_v4 = vld [vmem:[%s13630_s26 + $0x6e8] ss:$16 sps:$4 sm:$0xff]  }
 0x5cd   : > { %v6286_v19 = vmax.f32 %v11719_v24, 0.0  ;;  %v14790_v49 = vpack.c.bf16 %v6283_v38, %v6283_v38  ;;  %v12323_v42 = vld [vmem:[%s13630_s26 + $0x704] ss:$16 sps:$4 sm:$0xff]   ;;  %v12326_v37 = vld [vmem:[%s13630_s26 + $0x70c] ss:$16 sps:$4 sm:$0xff]  }
 0x5ce   : > { %v14786_v54 = vpack.c.bf16 %v6284_v41, %v6284_v41  ;;  %v12321_v6 = vld [vmem:[%s13630_s26 + $0x700] ss:$16 sps:$4 sm:$0xff]   ;;  %v12324_v38 = vld [vmem:[%s13630_s26 + $0x708] ss:$16 sps:$4 sm:$0xff]   ;;  %v12329_v24 = vld [vmem:[%s13630_s26 + $0x724] ss:$16 sps:$4 sm:$0xff]  }
 0x5cf   : > { %v14796_v12 = vpack.c.bf16 %v6286_v19, %v6286_v19  ;;  %v12332_v18 = vld [vmem:[%s13630_s26 + $0x72c] ss:$16 sps:$4 sm:$0xff]   ;;  %v12327_v47 = vld [vmem:[%s13630_s26 + $0x720] ss:$16 sps:$4 sm:$0xff]   ;;  %v12330_v41 = vld [vmem:[%s13630_s26 + $0x728] ss:$16 sps:$4 sm:$0xff]  }
 0x5d0   : > { %7967 = vmatprep.mubr.bf16.mxu0 %v14786_v54  ;;  %8131 = vmatprep.mubr.bf16.mxu1 %v14786_v54  ;;  %v12335_v43 = vld [vmem:[%s13630_s26 + $0x744] ss:$16 sps:$4 sm:$0xff]   ;;  %v12338_v19 = vld [vmem:[%s13630_s26 + $0x74c] ss:$16 sps:$4 sm:$0xff]  }
 0x5d1   : > { %7968 = vmatmul.mubr.bf16.vlgmr.msra.gmra.mrb[16].mxu0 %v14790_v49  ;;  %8132 = vmatmul.mubr.bf16.vlgmr.msra.gmra.mrb[16].mxu1 %v14790_v49 }
 0x5d2   : > { %7977 = vmatpush1.bf16.msra.mxu0 %v12273_v46  ;;  %8141 = vmatpush1.bf16.msra.mxu1 %v12276_v56  ;;  %v12333_v46 = vld [vmem:[%s13630_s26 + $0x740] ss:$16 sps:$4 sm:$0xff]   ;;  %v12336_v56 = vld [vmem:[%s13630_s26 + $0x748] ss:$16 sps:$4 sm:$0xff]  }
 0x5d3   : > { %8008 = vmatprep.mubr.bf16.mxu0 %v14796_v12  ;;  %8172 = vmatprep.mubr.bf16.mxu1 %v14796_v12 }
 0x5d4   : > { %7978 = vmatprep.subr.bf16.mxu0 %v12281_v51  ;;  %8142 = vmatprep.subr.bf16.mxu1 %v12284_v53  ;;  %v12341_v51 = vld [vmem:[%s13630_s26 + $0x764] ss:$16 sps:$4 sm:$0xff]   ;;  %v12344_v53 = vld [vmem:[%s13630_s26 + $0x76c] ss:$16 sps:$4 sm:$0xff]  }
 0x5d6   : > { %7979 = vmatpush1.bf16.msra.mxu0 %v12279_v57  ;;  %8143 = vmatpush1.bf16.msra.mxu1 %v12282_v58  ;;  %v12339_v57 = vld [vmem:[%s13630_s26 + $0x760] ss:$16 sps:$4 sm:$0xff]   ;;  %v12342_v58 = vld [vmem:[%s13630_s26 + $0x768] ss:$16 sps:$4 sm:$0xff]  }
 0x5d7   : > { %7980 = vmatprep.subr.bf16.mxu0 %v12287_v63  ;;  %8144 = vmatprep.subr.bf16.mxu1 %v12290_v59  ;;  %v12347_v63 = vld [vmem:[%s13630_s26 + $0x784] ss:$16 sps:$4 sm:$0xff]   ;;  %v12350_v59 = vld [vmem:[%s13630_s26 + $0x78c] ss:$16 sps:$4 sm:$0xff]  }
 0x5da   : > { %7981 = vmatpush1.bf16.msra.mxu0 %v12285_v60  ;;  %8145 = vmatpush1.bf16.msra.mxu1 %v12288_v61  ;;  %v12345_v60 = vld [vmem:[%s13630_s26 + $0x780] ss:$16 sps:$4 sm:$0xff]   ;;  %v12348_v61 = vld [vmem:[%s13630_s26 + $0x788] ss:$16 sps:$4 sm:$0xff]  }
 0x5db   : > { %7982 = vmatprep.subr.bf16.mxu0 %v12293_v14  ;;  %8146 = vmatprep.subr.bf16.mxu1 %v12296_v62  ;;  %v12353_v14 = vld [vmem:[%s13630_s26 + $0x7a4] ss:$16 sps:$4 sm:$0xff]   ;;  %v12356_v62 = vld [vmem:[%s13630_s26 + $0x7ac] ss:$16 sps:$4 sm:$0xff]  }
 0x5de   : > { %7983 = vmatpush1.bf16.msra.mxu0 %v12291_v29  ;;  %8147 = vmatpush1.bf16.msra.mxu1 %v12294_v0  ;;  %v12351_v29 = vld [vmem:[%s13630_s26 + $0x7a0] ss:$16 sps:$4 sm:$0xff]   ;;  %v12354_v0 = vld [vmem:[%s13630_s26 + $0x7a8] ss:$16 sps:$4 sm:$0xff]  }
 0x5df   : > { %7984 = vmatprep.subr.bf16.mxu0 %v12299_v39  ;;  %8148 = vmatprep.subr.bf16.mxu1 %v12302_v27  ;;  %v12770_v39 = vld [vmem:[%s13641_s29] sm:$0xff] }
 0x5e0   : > { %v3050_v27 = vrot.slane %v12770_v39, %v1142_v48  ;;  %v12363_v48 = vld [vmem:[%s13630_s26 + $0x7e0] ss:$16 sps:$4 sm:$0xff]  }
 0x5e1   : > { %v12411_v39 = vld [vmem:[%s13635_s14 + $0xe0] ss:$16 sps:$4 sm:$0xff]  }
 0x5e2   : > { %7985 = vmatpush1.bf16.msra.mxu0 %v12297_v5  ;;  %8149 = vmatpush1.bf16.msra.mxu1 %v12300_v7  ;;  %v12359_v5 = vld [vmem:[%s13630_s26 + $0x7c4] ss:$16 sps:$4 sm:$0xff]   ;;  %v12362_v7 = vld [vmem:[%s13630_s26 + $0x7cc] ss:$16 sps:$4 sm:$0xff]  }
 0x5e3   : > { %7986 = vmatprep.subr.bf16.mxu0 %v12305_v16  ;;  %8150 = vmatprep.subr.bf16.mxu1 %v12308_v17  ;;  %v12357_v16 = vld [vmem:[%s13630_s26 + $0x7c0] ss:$16 sps:$4 sm:$0xff]   ;;  %v12360_v17 = vld [vmem:[%s13630_s26 + $0x7c8] ss:$16 sps:$4 sm:$0xff]  }
 0x5e6   : > { %7987 = vmatpush1.bf16.msra.mxu0 %v12303_v20  ;;  %8151 = vmatpush1.bf16.msra.mxu1 %v12306_v22  ;;  %v11718_v20 = vadd.f32 %v14784_v36, %v3050_v27  ;;  %v12365_v22 = vld [vmem:[%s13630_s26 + $0x7e4] ss:$16 sps:$4 sm:$0xff]   ;;  %v12369_v36 = vld [vmem:[%s13635_s14] ss:$16 sps:$4 sm:$0xff]  }
 0x5e7   : > { %7988 = vmatprep.subr.bf16.mxu0 %v12311_v33  ;;  %8152 = vmatprep.subr.bf16.mxu1 %v12314_v26  ;;  %v12366_v33 = vld [vmem:[%s13630_s26 + $0x7e8] ss:$16 sps:$4 sm:$0xff]   ;;  %v12414_v27 = vld [vmem:[%s13635_s14 + $0x2e0] ss:$16 sps:$4 sm:$0xff]  }
 0x5e8   : > { %v6285_v26 = vmax.f32 %v11718_v20, 0.0  ;;  %v12425_v20 = vld [vmem:[%s13635_s14 + $0x124] ss:$16 sps:$4 sm:$0xff]  }
 0x5ea   : > { %7989 = vmatpush1.bf16.msra.mxu0 %v12309_v21  ;;  %8153 = vmatpush1.bf16.msra.mxu1 %v12312_v25  ;;  %v12371_v21 = vld [vmem:[%s13635_s14 + $0x4] ss:$16 sps:$4 sm:$0xff]  }
 0x5eb   : > { %7990 = vmatprep.subr.bf16.mxu0 %v12317_v28  ;;  %8154 = vmatprep.subr.bf16.mxu1 %v12320_v30  ;;  %v12374_v25 = vld [vmem:[%s13635_s14 + $0x204] ss:$16 sps:$4 sm:$0xff]   ;;  %v14867_v28 = vpack.c.bf16 %v6285_v26, %v6285_v26  ;;  %v12372_v30 = vld [vmem:[%s13635_s14 + $0x200] ss:$16 sps:$4 sm:$0xff]  }
 0x5ec   : > { %v12434_v26 = vld [vmem:[%s13635_s14 + $0x344] ss:$16 sps:$4 sm:$0xff]  }
 0x5ee   : > { %7991 = vmatpush1.bf16.msra.mxu0 %v12315_v40  ;;  %8155 = vmatpush1.bf16.msra.mxu1 %v12318_v4  ;;  %v12377_v40 = vld [vmem:[%s13635_s14 + $0x24] ss:$16 sps:$4 sm:$0xff]  }
 0x5ef   : > { %7992 = vmatprep.subr.bf16.mxu0 %v12323_v42  ;;  %8156 = vmatprep.subr.bf16.mxu1 %v12326_v37  ;;  %v12380_v4 = vld [vmem:[%s13635_s14 + $0x224] ss:$16 sps:$4 sm:$0xff]   ;;  %v12375_v42 = vld [vmem:[%s13635_s14 + $0x20] ss:$16 sps:$4 sm:$0xff]  }
 0x5f0   : > { %v12378_v37 = vld [vmem:[%s13635_s14 + $0x220] ss:$16 sps:$4 sm:$0xff]  }
 0x5f2   : > { %7993 = vmatpush1.bf16.msra.mxu0 %v12321_v6  ;;  %8157 = vmatpush1.bf16.msra.mxu1 %v12324_v38  ;;  %v12383_v6 = vld [vmem:[%s13635_s14 + $0x44] ss:$16 sps:$4 sm:$0xff]  }
 0x5f3   : > { %7994 = vmatprep.subr.bf16.mxu0 %v12329_v24  ;;  %8158 = vmatprep.subr.bf16.mxu1 %v12332_v18  ;;  %v12386_v38 = vld [vmem:[%s13635_s14 + $0x244] ss:$16 sps:$4 sm:$0xff]   ;;  %v12381_v24 = vld [vmem:[%s13635_s14 + $0x40] ss:$16 sps:$4 sm:$0xff]  }
 0x5f4   : > { %v12384_v18 = vld [vmem:[%s13635_s14 + $0x240] ss:$16 sps:$4 sm:$0xff]  }
 0x5f6   : > { %7995 = vmatpush1.bf16.msra.mxu0 %v12327_v47  ;;  %8159 = vmatpush1.bf16.msra.mxu1 %v12330_v41  ;;  %v12389_v47 = vld [vmem:[%s13635_s14 + $0x64] ss:$16 sps:$4 sm:$0xff]  }
 0x5f7   : > { %7996 = vmatprep.subr.bf16.mxu0 %v12335_v43  ;;  %8160 = vmatprep.subr.bf16.mxu1 %v12338_v19  ;;  %v12392_v41 = vld [vmem:[%s13635_s14 + $0x264] ss:$16 sps:$4 sm:$0xff]   ;;  %v12387_v43 = vld [vmem:[%s13635_s14 + $0x60] ss:$16 sps:$4 sm:$0xff]  }
 0x5f8   : > { %v12390_v19 = vld [vmem:[%s13635_s14 + $0x260] ss:$16 sps:$4 sm:$0xff]  }
 0x5fa   : > { %7997 = vmatpush1.bf16.msra.mxu0 %v12333_v46  ;;  %8161 = vmatpush1.bf16.msra.mxu1 %v12336_v56  ;;  %v12395_v46 = vld [vmem:[%s13635_s14 + $0x84] ss:$16 sps:$4 sm:$0xff]  }
 0x5fb   : > { %7998 = vmatprep.subr.bf16.mxu0 %v12341_v51  ;;  %8162 = vmatprep.subr.bf16.mxu1 %v12344_v53  ;;  %v12398_v56 = vld [vmem:[%s13635_s14 + $0x284] ss:$16 sps:$4 sm:$0xff]   ;;  %v12393_v51 = vld [vmem:[%s13635_s14 + $0x80] ss:$16 sps:$4 sm:$0xff]  }
 0x5fc   : > { %v12396_v53 = vld [vmem:[%s13635_s14 + $0x280] ss:$16 sps:$4 sm:$0xff]  }
 0x5fe   : > { %7999 = vmatpush1.bf16.msra.mxu0 %v12339_v57  ;;  %8163 = vmatpush1.bf16.msra.mxu1 %v12342_v58  ;;  %v12401_v57 = vld [vmem:[%s13635_s14 + $0xa4] ss:$16 sps:$4 sm:$0xff]  }
 0x5ff   : > { %8000 = vmatprep.subr.bf16.mxu0 %v12347_v63  ;;  %8164 = vmatprep.subr.bf16.mxu1 %v12350_v59  ;;  %v12404_v58 = vld [vmem:[%s13635_s14 + $0x2a4] ss:$16 sps:$4 sm:$0xff]   ;;  %v12399_v63 = vld [vmem:[%s13635_s14 + $0xa0] ss:$16 sps:$4 sm:$0xff]  }
 0x600   : > { %v12402_v59 = vld [vmem:[%s13635_s14 + $0x2a0] ss:$16 sps:$4 sm:$0xff]  }
 0x602   : > { %8001 = vmatpush1.bf16.msra.mxu0 %v12345_v60  ;;  %8165 = vmatpush1.bf16.msra.mxu1 %v12348_v61  ;;  %v12407_v60 = vld [vmem:[%s13635_s14 + $0xc4] ss:$16 sps:$4 sm:$0xff]  }
 0x603   : > { %8002 = vmatprep.subr.bf16.mxu0 %v12353_v14  ;;  %8166 = vmatprep.subr.bf16.mxu1 %v12356_v62  ;;  %v12410_v61 = vld [vmem:[%s13635_s14 + $0x2c4] ss:$16 sps:$4 sm:$0xff]   ;;  %v12405_v14 = vld [vmem:[%s13635_s14 + $0xc0] ss:$16 sps:$4 sm:$0xff]  }
 0x604   : > { %v12408_v62 = vld [vmem:[%s13635_s14 + $0x2c0] ss:$16 sps:$4 sm:$0xff]  }
 0x606   : > { %8003 = vmatpush1.bf16.msra.mxu0 %v12351_v29  ;;  %8167 = vmatpush1.bf16.msra.mxu1 %v12354_v0  ;;  %v12413_v29 = vld [vmem:[%s13635_s14 + $0xe4] ss:$16 sps:$4 sm:$0xff]  }
 0x607   : > { %8004 = vmatprep.subr.bf16.mxu0 %v12359_v5  ;;  %8168 = vmatprep.subr.bf16.mxu1 %v12362_v7  ;;  %v12416_v0 = vld [vmem:[%s13635_s14 + $0x2e4] ss:$16 sps:$4 sm:$0xff]  }
 0x608   : > { %v12419_v5 = vld [vmem:[%s13635_s14 + $0x104] ss:$16 sps:$4 sm:$0xff]  }
 0x609   : > { %v12422_v7 = vld [vmem:[%s13635_s14 + $0x304] ss:$16 sps:$4 sm:$0xff]  }
 0x60a   : > { %8005 = vmatpush1.bf16.msra.mxu0 %v12357_v16  ;;  %8169 = vmatpush1.bf16.msra.mxu1 %v12360_v17  ;;  %v12417_v16 = vld [vmem:[%s13635_s14 + $0x100] ss:$16 sps:$4 sm:$0xff]  }
 0x60b   : > { %8006 = vmatprep.subr.bf16.mxu0 %v12365_v22  ;;  %8170 = vmatprep.subr.bf16.mxu1 %v12368_v10  ;;  %v12420_v17 = vld [vmem:[%s13635_s14 + $0x300] ss:$16 sps:$4 sm:$0xff]   ;;  %v12428_v22 = vld [vmem:[%s13635_s14 + $0x324] ss:$16 sps:$4 sm:$0xff]  }
 0x60c   : > { %v12423_v10 = vld [vmem:[%s13635_s14 + $0x120] ss:$16 sps:$4 sm:$0xff]  }
 0x60e   : > { %8007 = vmatpush1.bf16.msra.mxu0 %v12363_v48  ;;  %8171 = vmatpush1.bf16.msra.mxu1 %v12366_v33  ;;  %v12426_v48 = vld [vmem:[%s13635_s14 + $0x320] ss:$16 sps:$4 sm:$0xff]   ;;  %v12431_v33 = vld [vmem:[%s13635_s14 + $0x144] ss:$16 sps:$4 sm:$0xff]  }
 0x60f   : > { %9739 = vmatprep.subr.bf16.mxu0 %v12371_v21  ;;  %9780 = vmatprep.subr.bf16.mxu1 %v12374_v25  ;;  %v12429_v21 = vld [vmem:[%s13635_s14 + $0x140] ss:$16 sps:$4 sm:$0xff]  }
 0x610   : > { %v12432_v25 = vld [vmem:[%s13635_s14 + $0x340] ss:$16 sps:$4 sm:$0xff]  }
 0x611   : > { %8009 = vmatmul.mubr.bf16.vlgmr.msra.gmra.mrb[16].mxu0 %v14867_v28  ;;  %8173 = vmatmul.mubr.bf16.vlgmr.msra.gmra.mrb[16].mxu1 %v14867_v28 }
 0x612   : > { %9740 = vmatpush1.bf16.msra.mxu0 %v12369_v36  ;;  %9771 = vmatprep.mubr.bf16.mxu0 %v14559_v23  ;;  %v12437_v36 = vld [vmem:[%s13635_s14 + $0x164] ss:$16 sps:$4 sm:$0xff]  }
 0x613   : > { %9781 = vmatpush1.bf16.msra.mxu1 %v12372_v30  ;;  %9812 = vmatprep.mubr.bf16.mxu1 %v14637_v3  ;;  %v12440_v30 = vld [vmem:[%s13635_s14 + $0x364] ss:$16 sps:$4 sm:$0xff]  }
 0x614   : > { %9741 = vmatprep.subr.bf16.mxu0 %v12377_v40  ;;  %9782 = vmatprep.subr.bf16.mxu1 %v12380_v4  ;;  %v12435_v40 = vld [vmem:[%s13635_s14 + $0x160] ss:$16 sps:$4 sm:$0xff]  }
 0x615   : > { %v12438_v4 = vld [vmem:[%s13635_s14 + $0x360] ss:$16 sps:$4 sm:$0xff]  }
 0x616   : > { %9742 = vmatpush1.bf16.msra.mxu0 %v12375_v42  ;;  %v12443_v42 = vld [vmem:[%s13635_s14 + $0x184] ss:$16 sps:$4 sm:$0xff]  }
 0x617   : > { %9783 = vmatpush1.bf16.msra.mxu1 %v12378_v37  ;;  %9743 = vmatprep.subr.bf16.mxu0 %v12383_v6  ;;  %v12446_v37 = vld [vmem:[%s13635_s14 + $0x384] ss:$16 sps:$4 sm:$0xff]   ;;  %v12441_v6 = vld [vmem:[%s13635_s14 + $0x180] ss:$16 sps:$4 sm:$0xff]  }
 0x618   : > { %9784 = vmatprep.subr.bf16.mxu1 %v12386_v38  ;;  %v12444_v38 = vld [vmem:[%s13635_s14 + $0x380] ss:$16 sps:$4 sm:$0xff]  }
 0x61a   : > { %9744 = vmatpush1.bf16.msra.mxu0 %v12381_v24  ;;  %v12449_v24 = vld [vmem:[%s13635_s14 + $0x1a4] ss:$16 sps:$4 sm:$0xff]  }
 0x61b   : > { %9785 = vmatpush1.bf16.msra.mxu1 %v12384_v18  ;;  %9745 = vmatprep.subr.bf16.mxu0 %v12389_v47  ;;  %v12452_v18 = vld [vmem:[%s13635_s14 + $0x3a4] ss:$16 sps:$4 sm:$0xff]   ;;  %v12447_v47 = vld [vmem:[%s13635_s14 + $0x1a0] ss:$16 sps:$4 sm:$0xff]  }
 0x61c   : > { %9786 = vmatprep.subr.bf16.mxu1 %v12392_v41  ;;  %v12450_v41 = vld [vmem:[%s13635_s14 + $0x3a0] ss:$16 sps:$4 sm:$0xff]  }
 0x61e   : > { %9746 = vmatpush1.bf16.msra.mxu0 %v12387_v43  ;;  %v12455_v43 = vld [vmem:[%s13635_s14 + $0x1c4] ss:$16 sps:$4 sm:$0xff]  }
 0x61f   : > { %9787 = vmatpush1.bf16.msra.mxu1 %v12390_v19  ;;  %9747 = vmatprep.subr.bf16.mxu0 %v12395_v46  ;;  %v12458_v19 = vld [vmem:[%s13635_s14 + $0x3c4] ss:$16 sps:$4 sm:$0xff]   ;;  %v12453_v46 = vld [vmem:[%s13635_s14 + $0x1c0] ss:$16 sps:$4 sm:$0xff]  }
 0x620   : > { %9788 = vmatprep.subr.bf16.mxu1 %v12398_v56  ;;  %v12456_v56 = vld [vmem:[%s13635_s14 + $0x3c0] ss:$16 sps:$4 sm:$0xff]  }
 0x622   : > { %9748 = vmatpush1.bf16.msra.mxu0 %v12393_v51  ;;  %v12461_v51 = vld [vmem:[%s13635_s14 + $0x1e4] ss:$16 sps:$4 sm:$0xff]  }
 0x623   : > { %9789 = vmatpush1.bf16.msra.mxu1 %v12396_v53  ;;  %9749 = vmatprep.subr.bf16.mxu0 %v12401_v57  ;;  %v12464_v53 = vld [vmem:[%s13635_s14 + $0x3e4] ss:$16 sps:$4 sm:$0xff]   ;;  %v12459_v57 = vld [vmem:[%s13635_s14 + $0x1e0] ss:$16 sps:$4 sm:$0xff]  }
 0x624   : > { %9790 = vmatprep.subr.bf16.mxu1 %v12404_v58  ;;  %v12462_v58 = vld [vmem:[%s13635_s14 + $0x3e0] ss:$16 sps:$4 sm:$0xff]  }
 0x626   : > { %9750 = vmatpush1.bf16.msra.mxu0 %v12399_v63  ;;  %v12467_v63 = vld [vmem:[%s13635_s14 + $0x404] ss:$16 sps:$4 sm:$0xff]  }
 0x627   : > { %9791 = vmatpush1.bf16.msra.mxu1 %v12402_v59  ;;  %9751 = vmatprep.subr.bf16.mxu0 %v12407_v60  ;;  %v12470_v59 = vld [vmem:[%s13635_s14 + $0x604] ss:$16 sps:$4 sm:$0xff]   ;;  %v12465_v60 = vld [vmem:[%s13635_s14 + $0x400] ss:$16 sps:$4 sm:$0xff]  }
 0x628   : > { %9792 = vmatprep.subr.bf16.mxu1 %v12410_v61  ;;  %v12468_v61 = vld [vmem:[%s13635_s14 + $0x600] ss:$16 sps:$4 sm:$0xff]  }
 0x62a   : > { %9752 = vmatpush1.bf16.msra.mxu0 %v12405_v14  ;;  %v12473_v14 = vld [vmem:[%s13635_s14 + $0x424] ss:$16 sps:$4 sm:$0xff]  }
 0x62b   : > { %9793 = vmatpush1.bf16.msra.mxu1 %v12408_v62  ;;  %9753 = vmatprep.subr.bf16.mxu0 %v12413_v29  ;;  %v12476_v62 = vld [vmem:[%s13635_s14 + $0x624] ss:$16 sps:$4 sm:$0xff]   ;;  %v12471_v29 = vld [vmem:[%s13635_s14 + $0x420] ss:$16 sps:$4 sm:$0xff]  }
 0x62c   : > { %9794 = vmatprep.subr.bf16.mxu1 %v12416_v0  ;;  %v12474_v0 = vld [vmem:[%s13635_s14 + $0x620] ss:$16 sps:$4 sm:$0xff]  }
 0x62e   : > { %9754 = vmatpush1.bf16.msra.mxu0 %v12411_v39  ;;  %v12479_v39 = vld [vmem:[%s13635_s14 + $0x444] ss:$16 sps:$4 sm:$0xff]  }
 0x62f   : > { %9795 = vmatpush1.bf16.msra.mxu1 %v12414_v27  ;;  %9755 = vmatprep.subr.bf16.mxu0 %v12419_v5  ;;  %v12482_v27 = vld [vmem:[%s13635_s14 + $0x644] ss:$16 sps:$4 sm:$0xff]   ;;  %v12477_v5 = vld [vmem:[%s13635_s14 + $0x440] ss:$16 sps:$4 sm:$0xff]  }
 0x630   : > { %9796 = vmatprep.subr.bf16.mxu1 %v12422_v7  ;;  %v12480_v7 = vld [vmem:[%s13635_s14 + $0x640] ss:$16 sps:$4 sm:$0xff]  }
 0x632   : > { %9756 = vmatpush1.bf16.msra.mxu0 %v12417_v16  ;;  %v12485_v16 = vld [vmem:[%s13635_s14 + $0x464] ss:$16 sps:$4 sm:$0xff]  }
 0x633   : > { %9797 = vmatpush1.bf16.msra.mxu1 %v12420_v17  ;;  %9757 = vmatprep.subr.bf16.mxu0 %v12425_v20  ;;  %v12488_v17 = vld [vmem:[%s13635_s14 + $0x664] ss:$16 sps:$4 sm:$0xff]   ;;  %v12483_v20 = vld [vmem:[%s13635_s14 + $0x460] ss:$16 sps:$4 sm:$0xff]  }
 0x634   : > { %9798 = vmatprep.subr.bf16.mxu1 %v12428_v22  ;;  %v12486_v22 = vld [vmem:[%s13635_s14 + $0x660] ss:$16 sps:$4 sm:$0xff]  }
 0x636   : > { %9758 = vmatpush1.bf16.msra.mxu0 %v12423_v10  ;;  %v12491_v10 = vld [vmem:[%s13635_s14 + $0x484] ss:$16 sps:$4 sm:$0xff]  }
 0x637   : > { %9799 = vmatpush1.bf16.msra.mxu1 %v12426_v48  ;;  %9759 = vmatprep.subr.bf16.mxu0 %v12431_v33  ;;  %v12494_v48 = vld [vmem:[%s13635_s14 + $0x684] ss:$16 sps:$4 sm:$0xff]   ;;  %v12489_v33 = vld [vmem:[%s13635_s14 + $0x480] ss:$16 sps:$4 sm:$0xff]  }
 0x638   : > { %9800 = vmatprep.subr.bf16.mxu1 %v12434_v26  ;;  %v12492_v26 = vld [vmem:[%s13635_s14 + $0x680] ss:$16 sps:$4 sm:$0xff]  }
 0x63a   : > { %9760 = vmatpush1.bf16.msra.mxu0 %v12429_v21  ;;  %v12497_v21 = vld [vmem:[%s13635_s14 + $0x4a4] ss:$16 sps:$4 sm:$0xff]  }
 0x63b   : > { %9801 = vmatpush1.bf16.msra.mxu1 %v12432_v25  ;;  %9761 = vmatprep.subr.bf16.mxu0 %v12437_v36  ;;  %v12500_v25 = vld [vmem:[%s13635_s14 + $0x6a4] ss:$16 sps:$4 sm:$0xff]   ;;  %v12495_v36 = vld [vmem:[%s13635_s14 + $0x4a0] ss:$16 sps:$4 sm:$0xff]  }
 0x63c   : > { %9802 = vmatprep.subr.bf16.mxu1 %v12440_v30  ;;  %v12498_v30 = vld [vmem:[%s13635_s14 + $0x6a0] ss:$16 sps:$4 sm:$0xff]  }
 0x63e   : > { %9762 = vmatpush1.bf16.msra.mxu0 %v12435_v40  ;;  %v12503_v40 = vld [vmem:[%s13635_s14 + $0x4c4] ss:$16 sps:$4 sm:$0xff]  }
 0x63f   : > { %9803 = vmatpush1.bf16.msra.mxu1 %v12438_v4  ;;  %9763 = vmatprep.subr.bf16.mxu0 %v12443_v42  ;;  %v12506_v4 = vld [vmem:[%s13635_s14 + $0x6c4] ss:$16 sps:$4 sm:$0xff]   ;;  %v12501_v42 = vld [vmem:[%s13635_s14 + $0x4c0] ss:$16 sps:$4 sm:$0xff]  }
 0x640   : > { %9804 = vmatprep.subr.bf16.mxu1 %v12446_v37  ;;  %v12504_v37 = vld [vmem:[%s13635_s14 + $0x6c0] ss:$16 sps:$4 sm:$0xff]  }
 0x642   : > { %9764 = vmatpush1.bf16.msra.mxu0 %v12441_v6  ;;  %v12509_v6 = vld [vmem:[%s13635_s14 + $0x4e4] ss:$16 sps:$4 sm:$0xff]  }
 0x643   : > { %9805 = vmatpush1.bf16.msra.mxu1 %v12444_v38  ;;  %9765 = vmatprep.subr.bf16.mxu0 %v12449_v24  ;;  %v12512_v38 = vld [vmem:[%s13635_s14 + $0x6e4] ss:$16 sps:$4 sm:$0xff]   ;;  %v12507_v24 = vld [vmem:[%s13635_s14 + $0x4e0] ss:$16 sps:$4 sm:$0xff]  }
 0x644   : > { %9806 = vmatprep.subr.bf16.mxu1 %v12452_v18  ;;  %v12510_v18 = vld [vmem:[%s13635_s14 + $0x6e0] ss:$16 sps:$4 sm:$0xff]  }
 0x646   : > { %9766 = vmatpush1.bf16.msra.mxu0 %v12447_v47  ;;  %v12515_v47 = vld [vmem:[%s13635_s14 + $0x504] ss:$16 sps:$4 sm:$0xff]  }
 0x647   : > { %9807 = vmatpush1.bf16.msra.mxu1 %v12450_v41  ;;  %9767 = vmatprep.subr.bf16.mxu0 %v12455_v43  ;;  %v12518_v41 = vld [vmem:[%s13635_s14 + $0x704] ss:$16 sps:$4 sm:$0xff]   ;;  %v12513_v43 = vld [vmem:[%s13635_s14 + $0x500] ss:$16 sps:$4 sm:$0xff]  }
 0x648   : > { %9808 = vmatprep.subr.bf16.mxu1 %v12458_v19  ;;  %v12516_v19 = vld [vmem:[%s13635_s14 + $0x700] ss:$16 sps:$4 sm:$0xff]  }
 0x64a   : > { %9768 = vmatpush1.bf16.msra.mxu0 %v12453_v46  ;;  %v12521_v46 = vld [vmem:[%s13635_s14 + $0x524] ss:$16 sps:$4 sm:$0xff]  }
 0x64b   : > { %9809 = vmatpush1.bf16.msra.mxu1 %v12456_v56  ;;  %9769 = vmatprep.subr.bf16.mxu0 %v12461_v51  ;;  %v12524_v56 = vld [vmem:[%s13635_s14 + $0x724] ss:$16 sps:$4 sm:$0xff]   ;;  %v12519_v51 = vld [vmem:[%s13635_s14 + $0x520] ss:$16 sps:$4 sm:$0xff]  }
 0x64c   : > { %9810 = vmatprep.subr.bf16.mxu1 %v12464_v53  ;;  %v12522_v53 = vld [vmem:[%s13635_s14 + $0x720] ss:$16 sps:$4 sm:$0xff]  }
 0x64e   : > { %9770 = vmatpush1.bf16.msra.mxu0 %v12459_v57  ;;  %v12527_v57 = vld [vmem:[%s13635_s14 + $0x544] ss:$16 sps:$4 sm:$0xff]  }
 0x64f   : > { %9811 = vmatpush1.bf16.msra.mxu1 %v12462_v58  ;;  %9821 = vmatprep.subr.bf16.mxu0 %v12467_v63  ;;  %v12530_v58 = vld [vmem:[%s13635_s14 + $0x744] ss:$16 sps:$4 sm:$0xff]   ;;  %v12525_v63 = vld [vmem:[%s13635_s14 + $0x540] ss:$16 sps:$4 sm:$0xff]  }
 0x650   : > { %9862 = vmatprep.subr.bf16.mxu1 %v12470_v59  ;;  %v12528_v59 = vld [vmem:[%s13635_s14 + $0x740] ss:$16 sps:$4 sm:$0xff]  }
 0x651   : > { %9772 = vmatmul.mubr.bf16.vlgmr.msra.gmra.mrb[20].mxu0 %v14633_v55 }
 0x652   : > { %9813 = vmatmul.mubr.bf16.vlgmr.msra.gmra.mrb[20].mxu1 %v14708_v50  ;;  %9822 = vmatpush1.bf16.msra.mxu0 %v12465_v60  ;;  %v12533_v60 = vld [vmem:[%s13635_s14 + $0x564] ss:$16 sps:$4 sm:$0xff]  }
 0x653   : > { %9853 = vmatprep.mubr.bf16.mxu0 %v14786_v54  ;;  %9863 = vmatpush1.bf16.msra.mxu1 %v12468_v61  ;;  %v12536_v61 = vld [vmem:[%s13635_s14 + $0x764] ss:$16 sps:$4 sm:$0xff]  }
 0x654   : > { %9894 = vmatprep.mubr.bf16.mxu1 %v14796_v12  ;;  %9823 = vmatprep.subr.bf16.mxu0 %v12473_v14  ;;  %v12531_v14 = vld [vmem:[%s13635_s14 + $0x560] ss:$16 sps:$4 sm:$0xff]  }
 0x655   : > { %9864 = vmatprep.subr.bf16.mxu1 %v12476_v62  ;;  %v12534_v62 = vld [vmem:[%s13635_s14 + $0x760] ss:$16 sps:$4 sm:$0xff]  }
 0x656   : > { %9824 = vmatpush1.bf16.msra.mxu0 %v12471_v29  ;;  %v12539_v29 = vld [vmem:[%s13635_s14 + $0x584] ss:$16 sps:$4 sm:$0xff]  }
 0x657   : > { %9865 = vmatpush1.bf16.msra.mxu1 %v12474_v0  ;;  %9825 = vmatprep.subr.bf16.mxu0 %v12479_v39  ;;  %v12542_v0 = vld [vmem:[%s13635_s14 + $0x784] ss:$16 sps:$4 sm:$0xff]   ;;  %v12537_v39 = vld [vmem:[%s13635_s14 + $0x580] ss:$16 sps:$4 sm:$0xff]  }
 0x658   : > { %9866 = vmatprep.subr.bf16.mxu1 %v12482_v27  ;;  %v12540_v27 = vld [vmem:[%s13635_s14 + $0x780] ss:$16 sps:$4 sm:$0xff]  }
 0x65a   : > { %9826 = vmatpush1.bf16.msra.mxu0 %v12477_v5  ;;  %v12545_v5 = vld [vmem:[%s13635_s14 + $0x5a4] ss:$16 sps:$4 sm:$0xff]  }
 0x65b   : > { %9867 = vmatpush1.bf16.msra.mxu1 %v12480_v7  ;;  %9827 = vmatprep.subr.bf16.mxu0 %v12485_v16  ;;  %v12548_v7 = vld [vmem:[%s13635_s14 + $0x7a4] ss:$16 sps:$4 sm:$0xff]   ;;  %v12543_v16 = vld [vmem:[%s13635_s14 + $0x5a0] ss:$16 sps:$4 sm:$0xff]  }
 0x65c   : > { %9868 = vmatprep.subr.bf16.mxu1 %v12488_v17  ;;  %v12546_v17 = vld [vmem:[%s13635_s14 + $0x7a0] ss:$16 sps:$4 sm:$0xff]  }
 0x65e   : > { %9828 = vmatpush1.bf16.msra.mxu0 %v12483_v20  ;;  %v12551_v20 = vld [vmem:[%s13635_s14 + $0x5c4] ss:$16 sps:$4 sm:$0xff]  }
 0x65f   : > { %9869 = vmatpush1.bf16.msra.mxu1 %v12486_v22  ;;  %9829 = vmatprep.subr.bf16.mxu0 %v12491_v10  ;;  %v12554_v22 = vld [vmem:[%s13635_s14 + $0x7c4] ss:$16 sps:$4 sm:$0xff]   ;;  %v12549_v10 = vld [vmem:[%s13635_s14 + $0x5c0] ss:$16 sps:$4 sm:$0xff]  }
 0x660   : > { %9870 = vmatprep.subr.bf16.mxu1 %v12494_v48  ;;  %v12552_v48 = vld [vmem:[%s13635_s14 + $0x7c0] ss:$16 sps:$4 sm:$0xff]  }
 0x662   : > { %9830 = vmatpush1.bf16.msra.mxu0 %v12489_v33  ;;  %v12557_v33 = vld [vmem:[%s13635_s14 + $0x5e4] ss:$16 sps:$4 sm:$0xff]  }
 0x663   : > { %9871 = vmatpush1.bf16.msra.mxu1 %v12492_v26  ;;  %9831 = vmatprep.subr.bf16.mxu0 %v12497_v21  ;;  %v12560_v26 = vld [vmem:[%s13635_s14 + $0x7e4] ss:$16 sps:$4 sm:$0xff]   ;;  %v12555_v21 = vld [vmem:[%s13635_s14 + $0x5e0] ss:$16 sps:$4 sm:$0xff]  }
 0x664   : > { %9872 = vmatprep.subr.bf16.mxu1 %v12500_v25  ;;  %v12558_v25 = vld [vmem:[%s13635_s14 + $0x7e0] ss:$16 sps:$4 sm:$0xff]  }
 0x666   : > { %9832 = vmatpush1.bf16.msra.mxu0 %v12495_v36  ;;  %v12563_v36 = vld [vmem:[%s13635_s14 + $0xc] ss:$16 sps:$4 sm:$0xff]  }
 0x667   : > { %9873 = vmatpush1.bf16.msra.mxu1 %v12498_v30  ;;  %9833 = vmatprep.subr.bf16.mxu0 %v12503_v40  ;;  %v12566_v30 = vld [vmem:[%s13635_s14 + $0x20c] ss:$16 sps:$4 sm:$0xff]   ;;  %v12561_v40 = vld [vmem:[%s13635_s14 + $0x8] ss:$16 sps:$4 sm:$0xff]  }
 0x668   : > { %9874 = vmatprep.subr.bf16.mxu1 %v12506_v4  ;;  %v12564_v4 = vld [vmem:[%s13635_s14 + $0x208] ss:$16 sps:$4 sm:$0xff]  }
 0x66a   : > { %9834 = vmatpush1.bf16.msra.mxu0 %v12501_v42  ;;  %v12569_v42 = vld [vmem:[%s13635_s14 + $0x2c] ss:$16 sps:$4 sm:$0xff]  }
 0x66b   : > { %9875 = vmatpush1.bf16.msra.mxu1 %v12504_v37  ;;  %9835 = vmatprep.subr.bf16.mxu0 %v12509_v6  ;;  %v12572_v37 = vld [vmem:[%s13635_s14 + $0x22c] ss:$16 sps:$4 sm:$0xff]   ;;  %v12567_v6 = vld [vmem:[%s13635_s14 + $0x28] ss:$16 sps:$4 sm:$0xff]  }
 0x66c   : > { %9876 = vmatprep.subr.bf16.mxu1 %v12512_v38  ;;  %v12570_v38 = vld [vmem:[%s13635_s14 + $0x228] ss:$16 sps:$4 sm:$0xff]  }
 0x66e   : > { %9836 = vmatpush1.bf16.msra.mxu0 %v12507_v24  ;;  %v12575_v24 = vld [vmem:[%s13635_s14 + $0x4c] ss:$16 sps:$4 sm:$0xff]  }
 0x66f   : > { %9877 = vmatpush1.bf16.msra.mxu1 %v12510_v18  ;;  %9837 = vmatprep.subr.bf16.mxu0 %v12515_v47  ;;  %v12578_v18 = vld [vmem:[%s13635_s14 + $0x24c] ss:$16 sps:$4 sm:$0xff]   ;;  %v12573_v47 = vld [vmem:[%s13635_s14 + $0x48] ss:$16 sps:$4 sm:$0xff]  }
 0x670   : > { %9878 = vmatprep.subr.bf16.mxu1 %v12518_v41  ;;  %v12576_v41 = vld [vmem:[%s13635_s14 + $0x248] ss:$16 sps:$4 sm:$0xff]  }
 0x672   : > { %9838 = vmatpush1.bf16.msra.mxu0 %v12513_v43  ;;  %v12584_v43 = vld [vmem:[%s13635_s14 + $0x26c] ss:$16 sps:$4 sm:$0xff]  }
 0x673   : > { %9879 = vmatpush1.bf16.msra.mxu1 %v12516_v19  ;;  %9839 = vmatprep.subr.bf16.mxu0 %v12521_v46  ;;  %v12582_v19 = vld [vmem:[%s13635_s14 + $0x268] ss:$16 sps:$4 sm:$0xff]   ;;  %v12587_v46 = vld [vmem:[%s13635_s14 + $0x8c] ss:$16 sps:$4 sm:$0xff]  }
 0x674   : > { %9880 = vmatprep.subr.bf16.mxu1 %v12524_v56  ;;  %v12590_v56 = vld [vmem:[%s13635_s14 + $0x28c] ss:$16 sps:$4 sm:$0xff]  }
 0x676   : > { %9840 = vmatpush1.bf16.msra.mxu0 %v12519_v51  ;;  %v12585_v51 = vld [vmem:[%s13635_s14 + $0x88] ss:$16 sps:$4 sm:$0xff]  }
 0x677   : > { %9881 = vmatpush1.bf16.msra.mxu1 %v12522_v53  ;;  %9841 = vmatprep.subr.bf16.mxu0 %v12527_v57  ;;  %v12588_v53 = vld [vmem:[%s13635_s14 + $0x288] ss:$16 sps:$4 sm:$0xff]   ;;  %v12593_v57 = vld [vmem:[%s13635_s14 + $0xac] ss:$16 sps:$4 sm:$0xff]  }
 0x678   : > { %9882 = vmatprep.subr.bf16.mxu1 %v12530_v58  ;;  %v12596_v58 = vld [vmem:[%s13635_s14 + $0x2ac] ss:$16 sps:$4 sm:$0xff]  }
 0x67a   : > { %9842 = vmatpush1.bf16.msra.mxu0 %v12525_v63  ;;  %v12591_v63 = vld [vmem:[%s13635_s14 + $0xa8] ss:$16 sps:$4 sm:$0xff]  }
 0x67b   : > { %9883 = vmatpush1.bf16.msra.mxu1 %v12528_v59  ;;  %9843 = vmatprep.subr.bf16.mxu0 %v12533_v60  ;;  %v12594_v59 = vld [vmem:[%s13635_s14 + $0x2a8] ss:$16 sps:$4 sm:$0xff]   ;;  %v12599_v60 = vld [vmem:[%s13635_s14 + $0xcc] ss:$16 sps:$4 sm:$0xff]  }
 0x67c   : > { %9884 = vmatprep.subr.bf16.mxu1 %v12536_v61  ;;  %v12602_v61 = vld [vmem:[%s13635_s14 + $0x2cc] ss:$16 sps:$4 sm:$0xff]  }
 0x67e   : > { %9844 = vmatpush1.bf16.msra.mxu0 %v12531_v14  ;;  %v12597_v14 = vld [vmem:[%s13635_s14 + $0xc8] ss:$16 sps:$4 sm:$0xff]  }
 0x67f   : > { %9885 = vmatpush1.bf16.msra.mxu1 %v12534_v62  ;;  %9845 = vmatprep.subr.bf16.mxu0 %v12539_v29  ;;  %v12600_v62 = vld [vmem:[%s13635_s14 + $0x2c8] ss:$16 sps:$4 sm:$0xff]   ;;  %v12605_v29 = vld [vmem:[%s13635_s14 + $0xec] ss:$16 sps:$4 sm:$0xff]  }
 0x680   : > { %9886 = vmatprep.subr.bf16.mxu1 %v12542_v0  ;;  %v12608_v0 = vld [vmem:[%s13635_s14 + $0x2ec] ss:$16 sps:$4 sm:$0xff]  }
 0x682   : > { %9846 = vmatpush1.bf16.msra.mxu0 %v12537_v39  ;;  %v12603_v39 = vld [vmem:[%s13635_s14 + $0xe8] ss:$16 sps:$4 sm:$0xff]  }
 0x683   : > { %9887 = vmatpush1.bf16.msra.mxu1 %v12540_v27  ;;  %9847 = vmatprep.subr.bf16.mxu0 %v12545_v5  ;;  %v12606_v27 = vld [vmem:[%s13635_s14 + $0x2e8] ss:$16 sps:$4 sm:$0xff]   ;;  %v12611_v5 = vld [vmem:[%s13635_s14 + $0x10c] ss:$16 sps:$4 sm:$0xff]  }
 0x684   : > { %9888 = vmatprep.subr.bf16.mxu1 %v12548_v7  ;;  %v12614_v7 = vld [vmem:[%s13635_s14 + $0x30c] ss:$16 sps:$4 sm:$0xff]  }
 0x686   : > { %9848 = vmatpush1.bf16.msra.mxu0 %v12543_v16  ;;  %v12609_v16 = vld [vmem:[%s13635_s14 + $0x108] ss:$16 sps:$4 sm:$0xff]  }
 0x687   : > { %9889 = vmatpush1.bf16.msra.mxu1 %v12546_v17  ;;  %9849 = vmatprep.subr.bf16.mxu0 %v12551_v20  ;;  %v12612_v17 = vld [vmem:[%s13635_s14 + $0x308] ss:$16 sps:$4 sm:$0xff]   ;;  %v12617_v20 = vld [vmem:[%s13635_s14 + $0x12c] ss:$16 sps:$4 sm:$0xff]  }
 0x688   : > { %9890 = vmatprep.subr.bf16.mxu1 %v12554_v22  ;;  %v12620_v22 = vld [vmem:[%s13635_s14 + $0x32c] ss:$16 sps:$4 sm:$0xff]  }
 0x68a   : > { %9850 = vmatpush1.bf16.msra.mxu0 %v12549_v10  ;;  %v12615_v10 = vld [vmem:[%s13635_s14 + $0x128] ss:$16 sps:$4 sm:$0xff]  }
 0x68b   : > { %9891 = vmatpush1.bf16.msra.mxu1 %v12552_v48  ;;  %9851 = vmatprep.subr.bf16.mxu0 %v12557_v33  ;;  %v12618_v48 = vld [vmem:[%s13635_s14 + $0x328] ss:$16 sps:$4 sm:$0xff]   ;;  %v12623_v33 = vld [vmem:[%s13635_s14 + $0x14c] ss:$16 sps:$4 sm:$0xff]  }
 0x68c   : > { %9892 = vmatprep.subr.bf16.mxu1 %v12560_v26  ;;  %v12626_v26 = vld [vmem:[%s13635_s14 + $0x34c] ss:$16 sps:$4 sm:$0xff]  }
 0x68e   : > { %9852 = vmatpush1.bf16.msra.mxu0 %v12555_v21  ;;  %v12621_v21 = vld [vmem:[%s13635_s14 + $0x148] ss:$16 sps:$4 sm:$0xff]  }
 0x68f   : > { %9893 = vmatpush1.bf16.msra.mxu1 %v12558_v25  ;;  %9903 = vmatprep.subr.bf16.mxu0 %v12563_v36  ;;  %v12624_v25 = vld [vmem:[%s13635_s14 + $0x348] ss:$16 sps:$4 sm:$0xff]   ;;  %v12629_v36 = vld [vmem:[%s13635_s14 + $0x16c] ss:$16 sps:$4 sm:$0xff]  }
 0x690   : > { %9944 = vmatprep.subr.bf16.mxu1 %v12566_v30  ;;  %v12632_v30 = vld [vmem:[%s13635_s14 + $0x36c] ss:$16 sps:$4 sm:$0xff]  }
 0x691   : > { %9854 = vmatmul.mubr.bf16.vlgmr.msra.gmra.mrb[24].mxu0 %v14790_v49 }
 0x692   : > { %9895 = vmatmul.mubr.bf16.vlgmr.msra.gmra.mrb[24].mxu1 %v14867_v28  ;;  %9904 = vmatpush1.bf16.msra.mxu0 %v12561_v40  ;;  %v12627_v40 = vld [vmem:[%s13635_s14 + $0x168] ss:$16 sps:$4 sm:$0xff]  }
 0x693   : > { %9935 = vmatprep.mubr.bf16.mxu0 %v14559_v23  ;;  %9945 = vmatpush1.bf16.msra.mxu1 %v12564_v4  ;;  %v12581_v23 = vld [vmem:[%s13635_s14 + $0x6c] ss:$16 sps:$4 sm:$0xff]   ;;  %v12630_v4 = vld [vmem:[%s13635_s14 + $0x368] ss:$16 sps:$4 sm:$0xff]  }
 0x694   : > { %9976 = vmatprep.mubr.bf16.mxu1 %v14637_v3  ;;  %9905 = vmatprep.subr.bf16.mxu0 %v12569_v42  ;;  %v12579_v3 = vld [vmem:[%s13635_s14 + $0x68] ss:$16 sps:$4 sm:$0xff]   ;;  %v12635_v42 = vld [vmem:[%s13635_s14 + $0x18c] ss:$16 sps:$4 sm:$0xff]  }
 0x695   : > { %9946 = vmatprep.subr.bf16.mxu1 %v12572_v37  ;;  %v12638_v37 = vld [vmem:[%s13635_s14 + $0x38c] ss:$16 sps:$4 sm:$0xff]  }
 0x696   : > { %9906 = vmatpush1.bf16.msra.mxu0 %v12567_v6  ;;  %v12633_v6 = vld [vmem:[%s13635_s14 + $0x188] ss:$16 sps:$4 sm:$0xff]  }
 0x697   : > { %9947 = vmatpush1.bf16.msra.mxu1 %v12570_v38  ;;  %9907 = vmatprep.subr.bf16.mxu0 %v12575_v24  ;;  %v12636_v38 = vld [vmem:[%s13635_s14 + $0x388] ss:$16 sps:$4 sm:$0xff]   ;;  %v12641_v24 = vld [vmem:[%s13635_s14 + $0x1ac] ss:$16 sps:$4 sm:$0xff]  }
 0x698   : > { %9948 = vmatprep.subr.bf16.mxu1 %v12578_v18  ;;  %v12644_v18 = vld [vmem:[%s13635_s14 + $0x3ac] ss:$16 sps:$4 sm:$0xff]  }
 0x69a   : > { %9908 = vmatpush1.bf16.msra.mxu0 %v12573_v47  ;;  %v12639_v47 = vld [vmem:[%s13635_s14 + $0x1a8] ss:$16 sps:$4 sm:$0xff]  }
 0x69b   : > { %9949 = vmatpush1.bf16.msra.mxu1 %v12576_v41  ;;  %9909 = vmatprep.subr.bf16.mxu0 %v12581_v23  ;;  %v12642_v41 = vld [vmem:[%s13635_s14 + $0x3a8] ss:$16 sps:$4 sm:$0xff]   ;;  %v12647_v23 = vld [vmem:[%s13635_s14 + $0x1cc] ss:$16 sps:$4 sm:$0xff]  }
 0x69c   : > { %9950 = vmatprep.subr.bf16.mxu1 %v12584_v43  ;;  %v12650_v43 = vld [vmem:[%s13635_s14 + $0x3cc] ss:$16 sps:$4 sm:$0xff]  }
 0x69e   : > { %9910 = vmatpush1.bf16.msra.mxu0 %v12579_v3  ;;  %v12645_v3 = vld [vmem:[%s13635_s14 + $0x1c8] ss:$16 sps:$4 sm:$0xff]  }
 0x69f   : > { %9951 = vmatpush1.bf16.msra.mxu1 %v12582_v19  ;;  %9911 = vmatprep.subr.bf16.mxu0 %v12587_v46  ;;  %v12648_v19 = vld [vmem:[%s13635_s14 + $0x3c8] ss:$16 sps:$4 sm:$0xff]   ;;  %v12653_v46 = vld [vmem:[%s13635_s14 + $0x1ec] ss:$16 sps:$4 sm:$0xff]  }
 0x6a0   : > { %9952 = vmatprep.subr.bf16.mxu1 %v12590_v56  ;;  %v12656_v56 = vld [vmem:[%s13635_s14 + $0x3ec] ss:$16 sps:$4 sm:$0xff]  }
 0x6a2   : > { %9912 = vmatpush1.bf16.msra.mxu0 %v12585_v51  ;;  %v12651_v51 = vld [vmem:[%s13635_s14 + $0x1e8] ss:$16 sps:$4 sm:$0xff]  }
 0x6a3   : > { %9953 = vmatpush1.bf16.msra.mxu1 %v12588_v53  ;;  %9913 = vmatprep.subr.bf16.mxu0 %v12593_v57  ;;  %v12654_v53 = vld [vmem:[%s13635_s14 + $0x3e8] ss:$16 sps:$4 sm:$0xff]   ;;  %v12659_v57 = vld [vmem:[%s13635_s14 + $0x40c] ss:$16 sps:$4 sm:$0xff]  }
 0x6a4   : > { %9954 = vmatprep.subr.bf16.mxu1 %v12596_v58  ;;  %v12662_v58 = vld [vmem:[%s13635_s14 + $0x60c] ss:$16 sps:$4 sm:$0xff]  }
 0x6a6   : > { %9914 = vmatpush1.bf16.msra.mxu0 %v12591_v63  ;;  %v12657_v63 = vld [vmem:[%s13635_s14 + $0x408] ss:$16 sps:$4 sm:$0xff]  }
 0x6a7   : > { %9955 = vmatpush1.bf16.msra.mxu1 %v12594_v59  ;;  %9915 = vmatprep.subr.bf16.mxu0 %v12599_v60  ;;  %v12660_v59 = vld [vmem:[%s13635_s14 + $0x608] ss:$16 sps:$4 sm:$0xff]   ;;  %v12665_v60 = vld [vmem:[%s13635_s14 + $0x42c] ss:$16 sps:$4 sm:$0xff]  }
 0x6a8   : > { %9956 = vmatprep.subr.bf16.mxu1 %v12602_v61  ;;  %v12668_v61 = vld [vmem:[%s13635_s14 + $0x62c] ss:$16 sps:$4 sm:$0xff]  }
 0x6aa   : > { %9916 = vmatpush1.bf16.msra.mxu0 %v12597_v14  ;;  %v12663_v14 = vld [vmem:[%s13635_s14 + $0x428] ss:$16 sps:$4 sm:$0xff]  }
 0x6ab   : > { %9957 = vmatpush1.bf16.msra.mxu1 %v12600_v62  ;;  %9917 = vmatprep.subr.bf16.mxu0 %v12605_v29  ;;  %v12666_v62 = vld [vmem:[%s13635_s14 + $0x628] ss:$16 sps:$4 sm:$0xff]   ;;  %v12671_v29 = vld [vmem:[%s13635_s14 + $0x44c] ss:$16 sps:$4 sm:$0xff]  }
 0x6ac   : > { %9958 = vmatprep.subr.bf16.mxu1 %v12608_v0  ;;  %v12672_v0 = vld [vmem:[%s13635_s14 + $0x648] ss:$16 sps:$4 sm:$0xff]  }
 0x6ae   : > { %9918 = vmatpush1.bf16.msra.mxu0 %v12603_v39  ;;  %v12680_v39 = vld [vmem:[%s13635_s14 + $0x66c] ss:$16 sps:$4 sm:$0xff]  }
 0x6af   : > { %9959 = vmatpush1.bf16.msra.mxu1 %v12606_v27  ;;  %9919 = vmatprep.subr.bf16.mxu0 %v12611_v5  ;;  %v12678_v27 = vld [vmem:[%s13635_s14 + $0x668] ss:$16 sps:$4 sm:$0xff]   ;;  %v12683_v5 = vld [vmem:[%s13635_s14 + $0x48c] ss:$16 sps:$4 sm:$0xff]  }
 0x6b0   : > { %9960 = vmatprep.subr.bf16.mxu1 %v12614_v7  ;;  %v12686_v7 = vld [vmem:[%s13635_s14 + $0x68c] ss:$16 sps:$4 sm:$0xff]  }
 0x6b2   : > { %9920 = vmatpush1.bf16.msra.mxu0 %v12609_v16  ;;  %v12681_v16 = vld [vmem:[%s13635_s14 + $0x488] ss:$16 sps:$4 sm:$0xff]  }
 0x6b3   : > { %9961 = vmatpush1.bf16.msra.mxu1 %v12612_v17  ;;  %9921 = vmatprep.subr.bf16.mxu0 %v12617_v20  ;;  %v6551_v17 = vld [vmem:[%s13643_s15] sm:$0xf] }
 0x6b4   : > { %9962 = vmatprep.subr.bf16.mxu1 %v12620_v22  ;;  %v12684_v20 = vld [vmem:[%s13635_s14 + $0x688] ss:$16 sps:$4 sm:$0xff]   ;;  %v12689_v22 = vld [vmem:[%s13635_s14 + $0x4ac] ss:$16 sps:$4 sm:$0xff]  }
 0x6b6   : > { %9922 = vmatpush1.bf16.msra.mxu0 %v12615_v10  ;;  %v12692_v10 = vld [vmem:[%s13635_s14 + $0x6ac] ss:$16 sps:$4 sm:$0xff]  }
 0x6b7   : > { %9963 = vmatpush1.bf16.msra.mxu1 %v12618_v48  ;;  %9923 = vmatprep.subr.bf16.mxu0 %v12623_v33  ;;  %v6556_v48 = vrot.slane %v6551_v17, %v13999_v11  ;;  %v6560_v33 = vrot.slane %v6551_v17, %v14005_v13 }
 0x6b8   : > { %9964 = vmatprep.subr.bf16.mxu1 %v12626_v26  ;;  %v6568_v26 = vrot.slane %v6551_v17, %v14012_v15 }
 0x6ba   : > { %9924 = vmatpush1.bf16.msra.mxu0 %v12621_v21  ;;  %v12687_v21 = vld [vmem:[%s13635_s14 + $0x4a8] ss:$16 sps:$4 sm:$0xff]  }
 0x6bb   : > { %9965 = vmatpush1.bf16.msra.mxu1 %v12624_v25  ;;  %9925 = vmatprep.subr.bf16.mxu0 %v12629_v36  ;;  %v6564_v25 = vrot.slane %v6551_v17, %v14084_v52  ;;  %v12690_v36 = vld [vmem:[%s13635_s14 + $0x6a8] ss:$16 sps:$4 sm:$0xff]  }
 0x6bc   : > { %9966 = vmatprep.subr.bf16.mxu1 %v12632_v30  ;;  %v12695_v30 = vld [vmem:[%s13635_s14 + $0x4cc] ss:$16 sps:$4 sm:$0xff]  }
 0x6be   : > { %9926 = vmatpush1.bf16.msra.mxu0 %v12627_v40 }
 0x6bf   : > { %9967 = vmatpush1.bf16.msra.mxu1 %v12630_v4  ;;  %9927 = vmatprep.subr.bf16.mxu0 %v12635_v42  ;;  %v12698_v42 = vld [vmem:[%s13635_s14 + $0x6cc] ss:$16 sps:$4 sm:$0xff]  }
 0x6c0   : > { %9968 = vmatprep.subr.bf16.mxu1 %v12638_v37 }
 0x6c2   : > { %9928 = vmatpush1.bf16.msra.mxu0 %v12633_v6 }
 0x6c3   : > { %9969 = vmatpush1.bf16.msra.mxu1 %v12636_v38  ;;  %9929 = vmatprep.subr.bf16.mxu0 %v12641_v24 }
 0x6c4   : > { %9970 = vmatprep.subr.bf16.mxu1 %v12644_v18 }
 0x6c6   : > { %9930 = vmatpush1.bf16.msra.mxu0 %v12639_v47 }
 0x6c7   : > { %9971 = vmatpush1.bf16.msra.mxu1 %v12642_v41  ;;  %9931 = vmatprep.subr.bf16.mxu0 %v12647_v23  ;;  %v12693_v23 = vld [vmem:[%s13635_s14 + $0x4c8] ss:$16 sps:$4 sm:$0xff]  }
 0x6c8   : > { %9972 = vmatprep.subr.bf16.mxu1 %v12650_v43 }
 0x6ca   : > { %9932 = vmatpush1.bf16.msra.mxu0 %v12645_v3 }
 0x6cb   : > { %9973 = vmatpush1.bf16.msra.mxu1 %v12648_v19  ;;  %9933 = vmatprep.subr.bf16.mxu0 %v12653_v46  ;;  %v12696_v46 = vld [vmem:[%s13635_s14 + $0x6c8] ss:$16 sps:$4 sm:$0xff]  }
 0x6cc   : > { %9974 = vmatprep.subr.bf16.mxu1 %v12656_v56  ;;  %v12701_v56 = vld [vmem:[%s13635_s14 + $0x4ec] ss:$16 sps:$4 sm:$0xff]  }
 0x6ce   : > { %9934 = vmatpush1.bf16.msra.mxu0 %v12651_v51  ;;  %v12704_v51 = vld [vmem:[%s13635_s14 + $0x6ec] ss:$16 sps:$4 sm:$0xff]  }
 0x6cf   : > { %9975 = vmatpush1.bf16.msra.mxu1 %v12654_v53  ;;  %9985 = vmatprep.subr.bf16.mxu0 %v12659_v57  ;;  %v12699_v53 = vld [vmem:[%s13635_s14 + $0x4e8] ss:$16 sps:$4 sm:$0xff]  }
 0x6d0   : > { %10026 = vmatprep.subr.bf16.mxu1 %v12662_v58  ;;  %v12702_v57 = vld [vmem:[%s13635_s14 + $0x6e8] ss:$16 sps:$4 sm:$0xff]   ;;  %v12707_v58 = vld [vmem:[%s13635_s14 + $0x50c] ss:$16 sps:$4 sm:$0xff]  }
 0x6d1   : > { %9936 = vmatmul.mubr.bf16.vlgmr.msra.gmra.mrb[28].mxu0 %v14633_v55  ;;  %v12674_v55 = vld [vmem:[%s13635_s14 + $0x64c] ss:$16 sps:$4 sm:$0xff]  }
 0x6d2   : > { %9977 = vmatmul.mubr.bf16.vlgmr.msra.gmra.mrb[28].mxu1 %v14708_v50  ;;  %9986 = vmatpush1.bf16.msra.mxu0 %v12657_v63  ;;  %v12669_v50 = vld [vmem:[%s13635_s14 + $0x448] ss:$16 sps:$4 sm:$0xff]   ;;  %v12710_v63 = vld [vmem:[%s13635_s14 + $0x70c] ss:$16 sps:$4 sm:$0xff]  }
 0x6d3   : > { %10017 = vmatprep.mubr.bf16.mxu0 %v14786_v54  ;;  %10027 = vmatpush1.bf16.msra.mxu1 %v12660_v59  ;;  %v12677_v54 = vld [vmem:[%s13635_s14 + $0x46c] ss:$16 sps:$4 sm:$0xff]   ;;  %v12705_v59 = vld [vmem:[%s13635_s14 + $0x508] ss:$16 sps:$4 sm:$0xff]  }
 0x6d4   : > { %10058 = vmatprep.mubr.bf16.mxu1 %v14796_v12  ;;  %9987 = vmatprep.subr.bf16.mxu0 %v12665_v60  ;;  %v12675_v12 = vld [vmem:[%s13635_s14 + $0x468] ss:$16 sps:$4 sm:$0xff]  }
 0x6d5   : > { %10028 = vmatprep.subr.bf16.mxu1 %v12668_v61  ;;  %v12708_v60 = vld [vmem:[%s13635_s14 + $0x708] ss:$16 sps:$4 sm:$0xff]   ;;  %v12713_v61 = vld [vmem:[%s13635_s14 + $0x52c] ss:$16 sps:$4 sm:$0xff]  }
 0x6d6   : > { %9988 = vmatpush1.bf16.msra.mxu0 %v12663_v14  ;;  %v12716_v14 = vld [vmem:[%s13635_s14 + $0x72c] ss:$16 sps:$4 sm:$0xff]  }
 0x6d7   : > { %10029 = vmatpush1.bf16.msra.mxu1 %v12666_v62  ;;  %9989 = vmatprep.subr.bf16.mxu0 %v12671_v29  ;;  %v12711_v29 = vld [vmem:[%s13635_s14 + $0x528] ss:$16 sps:$4 sm:$0xff]  }
 0x6d8   : > { %10030 = vmatprep.subr.bf16.mxu1 %v12674_v55 }
 0x6da   : > { %9990 = vmatpush1.bf16.msra.mxu0 %v12669_v50  ;;  %v12714_v50 = vld [vmem:[%s13635_s14 + $0x728] ss:$16 sps:$4 sm:$0xff]  }
 0x6db   : > { %10031 = vmatpush1.bf16.msra.mxu1 %v12672_v0  ;;  %9991 = vmatprep.subr.bf16.mxu0 %v12677_v54  ;;  %v12719_v0 = vld [vmem:[%s13635_s14 + $0x54c] ss:$16 sps:$4 sm:$0xff]  }
 0x6dc   : > { %10032 = vmatprep.subr.bf16.mxu1 %v12680_v39  ;;  %v12722_v39 = vld [vmem:[%s13635_s14 + $0x74c] ss:$16 sps:$4 sm:$0xff]  }
 0x6de   : > { %9992 = vmatpush1.bf16.msra.mxu0 %v12675_v12 }
 0x6df   : > { %10033 = vmatpush1.bf16.msra.mxu1 %v12678_v27  ;;  %9993 = vmatprep.subr.bf16.mxu0 %v12683_v5  ;;  %v12717_v5 = vld [vmem:[%s13635_s14 + $0x548] ss:$16 sps:$4 sm:$0xff]  }
 0x6e0   : > { %10034 = vmatprep.subr.bf16.mxu1 %v12686_v7 }
 0x6e2   : > { %9994 = vmatpush1.bf16.msra.mxu0 %v12681_v16  ;;  %v12720_v16 = vld [vmem:[%s13635_s14 + $0x748] ss:$16 sps:$4 sm:$0xff]  }
 0x6e3   : > { %10035 = vmatpush1.bf16.msra.mxu1 %v12684_v20  ;;  %9995 = vmatprep.subr.bf16.mxu0 %v12689_v22  ;;  %v12725_v20 = vld [vmem:[%s13635_s14 + $0x56c] ss:$16 sps:$4 sm:$0xff]  }
 0x6e4   : > { %v8010_v40 = vpop.f32.mrb[16].mxu0  ;;  %v8174_v4 = vpop.f32.mrb[16].mxu1  ;;  %10036 = vmatprep.subr.bf16.mxu1 %v12692_v10  ;;  %v12728_v10 = vld [vmem:[%s13635_s14 + $0x76c] ss:$16 sps:$4 sm:$0xff]  }
 0x6e5   : > { %v11720_v37 = vadd.f32 %v8010_v40, %v6556_v48  ;;  %v8012_v6 = vpop.f32.mrb[17].mxu0  ;;  %v8176_v38 = vpop.f32.mrb[17].mxu1  ;;  %v11722_v43 = vadd.f32 %v8174_v4, %v6564_v25  ;;  %v12723_v48 = vld [vmem:[%s13635_s14 + $0x568] ss:$16 sps:$4 sm:$0xff]   ;;  %v12740_v40 = vld [vmem:[%s13635_s14 + $0x7ac] ss:$16 sps:$4 sm:$0xff]  }
 0x6e6   : > { %v11721_v24 = vadd.f32 %v8012_v6, %v6560_v33  ;;  %v11723_v18 = vadd.f32 %v8176_v38, %v6568_v26  ;;  %v8014_v47 = vpop.f32.mrb[18].mxu0  ;;  %v8178_v41 = vpop.f32.mrb[18].mxu1  ;;  %9996 = vmatpush1.bf16.msra.mxu0 %v12687_v21  ;;  %v12726_v33 = vld [vmem:[%s13635_s14 + $0x768] ss:$16 sps:$4 sm:$0xff]   ;;  %v12731_v26 = vld [vmem:[%s13635_s14 + $0x58c] ss:$16 sps:$4 sm:$0xff]  }
 0x6e7   : > { %12753 = vtanh.f32 %v11720_v37  ;;  %10037 = vmatpush1.bf16.msra.mxu1 %v12690_v36  ;;  %v8015_v3 = vpop.f32.mrb[19].mxu0  ;;  %v8179_v19 = vpop.f32.mrb[19].mxu1  ;;  %9997 = vmatprep.subr.bf16.mxu0 %v12695_v30  ;;  %v12734_v21 = vld [vmem:[%s13635_s14 + $0x78c] ss:$16 sps:$4 sm:$0xff]   ;;  %v12729_v25 = vld [vmem:[%s13635_s14 + $0x588] ss:$16 sps:$4 sm:$0xff]  }
 0x6e8   : > { %10038 = vmatprep.subr.bf16.mxu1 %v12698_v42  ;;  %12755 = vtanh.f32 %v11721_v24  ;;  %v12732_v36 = vld [vmem:[%s13635_s14 + $0x788] ss:$16 sps:$4 sm:$0xff]   ;;  %v12737_v30 = vld [vmem:[%s13635_s14 + $0x5ac] ss:$16 sps:$4 sm:$0xff]  }
 0x6e9   : > { %12757 = vtanh.f32 %v11723_v18  ;;  %v12735_v4 = vld [vmem:[%s13635_s14 + $0x5a8] ss:$16 sps:$4 sm:$0xff]   ;;  %v12743_v37 = vld [vmem:[%s13635_s14 + $0x5cc] ss:$16 sps:$4 sm:$0xff]  }
 0x6ea   : > { %9998 = vmatpush1.bf16.msra.mxu0 %v12693_v23  ;;  %12759 = vtanh.f32 %v11722_v43  ;;  %v12738_v42 = vld [vmem:[%s13635_s14 + $0x7a8] ss:$16 sps:$4 sm:$0xff]   ;;  %v12746_v6 = vld [vmem:[%s13635_s14 + $0x7cc] ss:$16 sps:$4 sm:$0xff]   ;;  %v15159_v43 = vld [vmem:[%s13645_s10] sm:$0xf] }
 0x6eb   : > { %10039 = vmatpush1.bf16.msra.mxu1 %v12696_v46  ;;  %9999 = vmatprep.subr.bf16.mxu0 %v12701_v56  ;;  %v12741_v38 = vld [vmem:[%s13635_s14 + $0x5c8] ss:$16 sps:$4 sm:$0xff]   ;;  %v12749_v18 = vld [vmem:[%s13635_s14 + $0x5ec] ss:$16 sps:$4 sm:$0xff]   ;;  %v8442_v3 = vrot.slane %v15159_v43, %v13999_v11  ;;  %v8446_v19 = vrot.slane %v15159_v43, %v14005_v13  ;;  %v12771_v11 = vld [vmem:[#allocation3] sm:$0xff] }
 0x6ec   : > { %10040 = vmatprep.subr.bf16.mxu1 %v12704_v51  ;;  %v12744_v24 = vld [vmem:[%s13635_s14 + $0x7c8] ss:$16 sps:$4 sm:$0xff]   ;;  %v12752_v47 = vld [vmem:[%s13635_s14 + $0x7ec] ss:$16 sps:$4 sm:$0xff]   ;;  %v10071_v13 = vmul.f32 %v12771_v11, %v13679_v34 }
 0x6ed   : > { %v12747_v41 = vld [vmem:[%s13635_s14 + $0x5e8] ss:$16 sps:$4 sm:$0xff]  }
 0x6ee   : > { %10000 = vmatpush1.bf16.msra.mxu0 %v12699_v53  ;;  %v12750_v23 = vld [vmem:[%s13635_s14 + $0x7e8] ss:$16 sps:$4 sm:$0xff]  }
 0x6ef   : > { %10041 = vmatpush1.bf16.msra.mxu1 %v12702_v57  ;;  %10001 = vmatprep.subr.bf16.mxu0 %v12707_v58 }
 0x6f0   : > { %10042 = vmatprep.subr.bf16.mxu1 %v12710_v63 }
 0x6f1   : > { %v15117_v62 = vpop.eup %12753 }
 0x6f2   : > { %10002 = vmatpush1.bf16.msra.mxu0 %v12705_v59  ;;  %v15120_v55 = vpop.eup %12755 }
 0x6f3   : > { %10043 = vmatpush1.bf16.msra.mxu1 %v12708_v60  ;;  %10003 = vmatprep.subr.bf16.mxu0 %v12713_v61  ;;  %v15124_v54 = vpop.eup %12757  ;;  %v10124_v12 = vadd.f32 %v15120_v55, %v15117_v62 }
 0x6f4   : > { %10044 = vmatprep.subr.bf16.mxu1 %v12716_v14  ;;  %v15129_v27 = vpop.eup %12759  ;;  %v10126_v17 = vsel %vm2136_vm2, %v15124_v54, 0.0  ;;  %v10083_v14 = vmul.f32 1.442695, %v15117_v62 }
 0x6f5   : > { %v10125_v7 = vadd.f32 %v15129_v27, %v10124_v12  ;;  %v10087_v11 = vmul.f32 1.442695, %v15129_v27 }
 0x6f6   : > { %10004 = vmatpush1.bf16.msra.mxu0 %v12711_v29  ;;  %v10085_v29 = vmul.f32 1.442695, %v15120_v55  ;;  %12761 = vpow2.f32 %v10083_v14 }
 0x6f7   : > { %10045 = vmatpush1.bf16.msra.mxu1 %v12714_v50  ;;  %10005 = vmatprep.subr.bf16.mxu0 %v12719_v0  ;;  %v10127_v22 = vadd.f32 %v10126_v17, %v10125_v7  ;;  %v12772_v50 = vld [vmem:[#allocation2] sm:$0xff] }
 0x6f8   : > { %10046 = vmatprep.subr.bf16.mxu1 %v12722_v39  ;;  %12763 = vpow2.f32 %v10085_v29  ;;  %v10075_v0 = vmul.f32 %v12772_v50, %v13681_v35  ;;  %v12773_v39 = vld [vmem:[#allocation3 + $0x8] sm:$0xff] }
 0x6f9   : > { %10128 = vadd.xlane.f32.xlu0 %v10127_v22  ;;  %v10072_v12 = vmul.f32 %v12773_v39, %v13679_v34  ;;  %12765 = vpow2.f32 %v10087_v11 }
 0x6fa   : > { %10006 = vmatpush1.bf16.msra.mxu0 %v12717_v5  ;;  %v12774_v5 = vld [vmem:[#allocation2 + $0x8] sm:$0xff] }
 0x6fb   : > { %10047 = vmatpush1.bf16.msra.mxu1 %v12720_v16  ;;  %10007 = vmatprep.subr.bf16.mxu0 %v12725_v20  ;;  %v10076_v7 = vmul.f32 %v12774_v5, %v13681_v35  ;;  %v10079_v16 = vadd.f32 %v10075_v0, %v10071_v13  ;;  %v10089_v13 = vmul.f32 1.442695, %v15124_v54  ;;  %v12777_v0 = vld [vmem:[#allocation3 + $0x18] sm:$0xff] }
 0x6fc   : > { %10048 = vmatprep.subr.bf16.mxu1 %v12728_v10  ;;  %v10074_v39 = vmul.f32 %v12777_v0, %v13679_v34 }
 0x6fd   : > { %v10080_v62 = vadd.f32 %v10076_v7, %v10072_v12  ;;  %12767 = vpow2.f32 %v10089_v13  ;;  %v12778_v12 = vld [vmem:[#allocation2 + $0x18] sm:$0xff] }
 0x6fe   : > { %10008 = vmatpush1.bf16.msra.mxu0 %v12723_v48  ;;  %v10078_v5 = vmul.f32 %v12778_v12, %v13681_v35 }
 0x6ff   : > { %10049 = vmatpush1.bf16.msra.mxu1 %v12726_v33  ;;  %10009 = vmatprep.subr.bf16.mxu0 %v12731_v26 }
 0x700   : > { %10050 = vmatprep.subr.bf16.mxu1 %v12734_v21  ;;  %v12762_v17 = vpop.eup %12761  ;;  %v10082_v27 = vadd.f32 %v10078_v5, %v10074_v39 }
 0x702   : > { %10010 = vmatpush1.bf16.msra.mxu0 %v12729_v25  ;;  %v12764_v22 = vpop.eup %12763 }
 0x703   : > { %10051 = vmatpush1.bf16.msra.mxu1 %v12732_v36  ;;  %10011 = vmatprep.subr.bf16.mxu0 %v12737_v30  ;;  %v10091_v36 = vmul.f32 %v12762_v17, %v10079_v16  ;;  %v12766_v16 = vpop.eup %12765 }
 0x704   : > { %10052 = vmatprep.subr.bf16.mxu1 %v12740_v40 }
 0x706   : > { %10012 = vmatpush1.bf16.msra.mxu0 %v12735_v4 }
 0x707   : > { %10053 = vmatpush1.bf16.msra.mxu1 %v12738_v42  ;;  %10013 = vmatprep.subr.bf16.mxu0 %v12743_v37  ;;  %v10092_v42 = vmul.f32 %v12764_v22, %v10080_v62 }
 0x708   : > { %10054 = vmatprep.subr.bf16.mxu1 %v12746_v6 }
 0x70a   : > { %10014 = vmatpush1.bf16.msra.mxu0 %v12741_v38 }
 0x70b   : > { %10055 = vmatpush1.bf16.msra.mxu1 %v12744_v24  ;;  %10015 = vmatprep.subr.bf16.mxu0 %v12749_v18 }
 0x70c   : > { %10056 = vmatprep.subr.bf16.mxu1 %v12752_v47 }
 0x70e   : > { %10016 = vmatpush1.bf16.msra.mxu0 %v12747_v41 }
 0x70f   : > { %10057 = vmatpush1.bf16.msra.mxu1 %v12750_v23 }
 0x711   : > { %10018 = vmatmul.mubr.bf16.vlgmr.msra.gmra.mrb[32].mxu0 %v14790_v49 }
 0x712   : > { %10059 = vmatmul.mubr.bf16.vlgmr.msra.gmra.mrb[32].mxu1 %v14867_v28 }
 0x724   : > { %v9773_v46 = vpop.f32.mrb[20].mxu0 }
 0x725   : > { %v9774_v56 = vadd.f32 %v9773_v46, %v8442_v3  ;;  %v9814_v51 = vpop.f32.mrb[20].mxu1  ;;  %v9775_v53 = vpop.f32.mrb[21].mxu0 }
 0x726   : > { %v9776_v57 = vadd.f32 %v9775_v53, %v8446_v19  ;;  %v9816_v58 = vpop.f32.mrb[21].mxu1  ;;  %v9777_v63 = vpop.f32.mrb[22].mxu0 }
 0x727   : > { %v9815_v59 = vadd.f32 %v9814_v51, %v9774_v56  ;;  %v9818_v60 = vpop.f32.mrb[22].mxu1  ;;  %v9778_v49 = vpop.f32.mrb[23].mxu0  ;;  %v10123_v56 = vld [vmem:[#allocation4] sm:$0xff] }
 0x728   : > { %v9817_v61 = vadd.f32 %v9816_v58, %v9776_v57  ;;  %v9819_v28 = vpop.f32.mrb[23].mxu1  ;;  %v8450_v57 = vrot.slane %v15159_v43, %v14084_v52  ;;  %v12775_v52 = vld [vmem:[#allocation3 + $0x10] sm:$0xff] }
 0x764   : > { %v9855_v20 = vpop.f32.mrb[24].mxu0 }
 0x765   : > { %v9856_v55 = vadd.f32 %v9855_v20, %v9815_v59  ;;  %v9896_v10 = vpop.f32.mrb[24].mxu1  ;;  %v9857_v48 = vpop.f32.mrb[25].mxu0 }
 0x766   : > { %v9858_v33 = vadd.f32 %v9857_v48, %v9817_v61  ;;  %v9898_v26 = vpop.f32.mrb[25].mxu1  ;;  %v9859_v21 = vpop.f32.mrb[26].mxu0 }
 0x767   : > { %v9897_v25 = vadd.f32 %v9896_v10, %v9856_v55  ;;  %v9900_v30 = vpop.f32.mrb[26].mxu1  ;;  %v9860_v40 = vpop.f32.mrb[27].mxu0 }
 0x768   : > { %v9899_v4 = vadd.f32 %v9898_v26, %v9858_v33  ;;  %v9901_v37 = vpop.f32.mrb[27].mxu1  ;;  %v12768_v20 = vpop.eup %12767 }
 0x769   : > { %v10095_v6 = vadd.f32 %v10091_v36, %v9897_v25  ;;  %v10094_v30 = vmul.f32 %v12768_v20, %v10082_v27 }
 0x76a   : > { %v10096_v38 = vadd.f32 %v10092_v42, %v9899_v4 }
 0x76b   : > { %v10099_v24 = vmul.f32 %v10095_v6, %v13681_v35  ;;  %v10111_v18 = vmul.f32 %v10095_v6, %v13679_v34 }
 0x76c   : > { %v10100_v47 = vmul.f32 %v10096_v38, %v13681_v35  ;;  %v10112_v41 = vmul.f32 %v10096_v38, %v13679_v34 }
 0x76d   : > { %v10103_v23 = vadd.f32 %v10099_v24, %v13734_v1  ;;  %v10115_v3 = vadd.f32 %v10111_v18, %v13737_v2  ;;  %v8454_v1 = vrot.slane %v15159_v43, %v14012_v15  ;;  %v10073_v15 = vmul.f32 %v12775_v52, %v13679_v34  ;;  %v12776_v43 = vld [vmem:[#allocation2 + $0x10] sm:$0xff] }
 0x76e   : > { %v10104_v19 = vadd.f32 %v10100_v47, %v13686_v44  ;;  %v10116_v46 = vadd.f32 %v10112_v41, %v13689_v45  ;;  %v10077_v50 = vmul.f32 %v12776_v43, %v13681_v35 }
 0x76f   : > { %10107 = vst [vmem:[#allocation2] sm:$0xff] %v10103_v23  ;;  %10119 = vst [vmem:[#allocation3] sm:$0xff] %v10115_v3 }
 0x770   : > { %10108 = vst [vmem:[#allocation2 + $0x8] sm:$0xff] %v10104_v19  ;;  %10120 = vst [vmem:[#allocation3 + $0x8] sm:$0xff] %v10116_v46  ;;  %v10081_v7 = vadd.f32 %v10077_v50, %v10073_v15 }
 0x772   : > { %v10093_v26 = vmul.f32 %v12766_v16, %v10081_v7 }
 0x777   : > { %v10138_v3 = vld [vmem:[#allocation2 + $0x8] sm:$0xff] (!%p11691_p1) }
 0x778   : > { %v10146_v46 = vmul.f32 (!%p11691_p1), -0.5, %v10138_v3 }
 0x786   : > { %v10129_v51 = vpop.xlane.xlu0 %10128 }
 0x787   : > { %v10130_v53 = vadd.f32 %v10129_v51, %v10123_v56  ;;  %v10141_v56 = vld [vmem:[#allocation3] sm:$0xff] (!%p11691_p1) }
 0x789   : > { %10132 = vst.msk [vmem:[#allocation4] sm:$0xff] %vm10131_vm4, %v10130_v53 }
 0x790   : > { %v10175_v5 = vld [vmem:[#allocation4] sm:$0xff] (!%p11691_p1) }
 0x7a4   : > { %v9937_v2 = vpop.f32.mrb[28].mxu0 }
 0x7a5   : > { %v9938_v44 = vadd.f32 %v9937_v2, %v8450_v57  ;;  %v9978_v58 = vpop.f32.mrb[28].mxu1  ;;  %v9939_v45 = vpop.f32.mrb[29].mxu0  ;;  %v10159_v57 = vmul.f32 (!%p11691_p1), -0.5, %v10141_v56 }
 0x7a6   : > { %v9940_v63 = vadd.f32 %v9939_v45, %v8454_v1  ;;  %v9980_v59 = vpop.f32.mrb[29].mxu1  ;;  %v9941_v60 = vpop.f32.mrb[30].mxu0 }
 0x7a7   : > { %v9979_v49 = vadd.f32 %v9978_v58, %v9938_v44  ;;  %v9982_v61 = vpop.f32.mrb[30].mxu1  ;;  %v9942_v28 = vpop.f32.mrb[31].mxu0  ;;  %v10150_v44 = vmul.f32 (!%p11691_p1), %v10146_v46, %v10138_v3  ;;  %v10163_v60 = vmul.f32 (!%p11691_p1), %v10159_v57, %v10141_v56 }
 0x7a8   : > { %v9981_v14 = vadd.f32 %v9980_v59, %v9940_v63  ;;  %v9983_v29 = vpop.f32.mrb[31].mxu1 }
 0x7e4   : > { %v10019_v17 = vpop.f32.mrb[32].mxu0 }
 0x7e5   : > { %v10020_v54 = vadd.f32 %v10019_v17, %v9979_v49  ;;  %v10060_v62 = vpop.f32.mrb[32].mxu1  ;;  %v10021_v22 = vpop.f32.mrb[33].mxu0 }
 0x7e6   : > { %v10022_v55 = vadd.f32 %v10021_v22, %v9981_v14  ;;  %v10062_v10 = vpop.f32.mrb[33].mxu1  ;;  %v10023_v48 = vpop.f32.mrb[34].mxu0 }
 0x7e7   : > { %v10061_v33 = vadd.f32 %v10060_v62, %v10020_v54  ;;  %v10064_v21 = vpop.f32.mrb[34].mxu1  ;;  %v10024_v25 = vpop.f32.mrb[35].mxu0 }
 0x7e8   : > { %v10063_v36 = vadd.f32 %v10062_v10, %v10022_v55  ;;  %v10065_v40 = vpop.f32.mrb[35].mxu1 }
 0x7e9   : > { %v10097_v4 = vadd.f32 %v10093_v26, %v10061_v33 }
 0x7ea   : > { %v10098_v42 = vadd.f32 %v10094_v30, %v10063_v36  ;;  %10136 = sbr.rel (%p11691_p1) target bundleno = 2200 (0x898), region = 116 }
 0x7eb   : > { %v10101_v37 = vmul.f32 %v10097_v4, %v13681_v35  ;;  %v10113_v6 = vmul.f32 %v10097_v4, %v13679_v34 }
 0x7ec   : > { %v10102_v38 = vmul.f32 %v10098_v42, %v13681_v35  ;;  %v10114_v24 = vmul.f32 %v10098_v42, %v13679_v34  ;;  %v10137_v35 = vld [vmem:[#allocation2] sm:$0xff] (!%p11691_p1) }
 0x7ed   : > { %v10105_v18 = vadd.f32 %v10101_v37, %v13797_v31  ;;  %v10117_v47 = vadd.f32 %v10113_v6, %v13800_v32  ;;  %v10145_v31 = vmul.f32 (!%p11691_p1), -0.5, %v10137_v35 }
 0x7ee   : > { %v10106_v41 = vadd.f32 %v10102_v38, %v13744_v8  ;;  %v10118_v23 = vadd.f32 %v10114_v24, %v13747_v9  ;;  %v10142_v8 = vld [vmem:[#allocation3 + $0x8] sm:$0xff] (!%p11691_p1) }
 0x7ef   : > { %10109 = vst [vmem:[#allocation2 + $0x10] sm:$0xff] %v10105_v18  ;;  %10121 = vst [vmem:[#allocation3 + $0x10] sm:$0xff] %v10117_v47  ;;  %v10160_v1 = vmul.f32 (!%p11691_p1), -0.5, %v10142_v8  ;;  %v10149_v2 = vmul.f32 (!%p11691_p1), %v10145_v31, %v10137_v35 }
 0x7f0   : > { %10110 = vst.msk [vmem:[#allocation2 + $0x18] sm:$0xff] %vm2136_vm2, %v10106_v41  ;;  %10122 = vst.msk [vmem:[#allocation3 + $0x18] sm:$0xff] %vm2136_vm2, %v10118_v23 }
 0x7f1   : > { %v10164_v49 = vmul.f32 %v10160_v1, %v10142_v8  ;;  %v10153_v61 = vadd.f32 %v10150_v44, %v10149_v2 }
 0x7f3   : > { %v10167_v11 = vadd.f32 %v10164_v49, %v10163_v60 }
 0x7f6   : > { %v10139_v34 = vld [vmem:[#allocation2 + $0x10] sm:$0xff] }
 0x7f7   : > { %v10140_v19 = vld [vmem:[#allocation2 + $0x18] sm:$0xff]  ;;  %v10147_v32 = vmul.f32 -0.5, %v10139_v34  ;;  %v10143_v9 = vld [vmem:[#allocation3 + $0x10] sm:$0xff] }
 0x7f8   : > { %v10148_v51 = vmul.f32 -0.5, %v10140_v19  ;;  %v10144_v53 = vld [vmem:[#allocation3 + $0x18] sm:$0xff]  ;;  %v10161_v45 = vmul.f32 -0.5, %v10143_v9 }
 0x7f9   : > { %v10151_v58 = vmul.f32 %v10147_v32, %v10139_v34  ;;  %v10162_v59 = vmul.f32 -0.5, %v10144_v53 }
 0x7fa   : > { %v10152_v63 = vmul.f32 %v10148_v51, %v10140_v19  ;;  %v10165_v28 = vmul.f32 %v10161_v45, %v10143_v9 }
 0x7fb   : > { %v10166_v29 = vmul.f32 %v10162_v59, %v10144_v53  ;;  %v10154_v13 = vadd.f32 %v10153_v61, %v10151_v58 }
 0x7fc   : > { %v10155_v14 = vsel %vm2136_vm2, %v10152_v63, 0.0  ;;  %v10168_v52 = vadd.f32 %v10167_v11, %v10165_v28 }
 0x7fd   : > { %v10169_v15 = vsel %vm2136_vm2, %v10166_v29, 0.0  ;;  %v10156_v43 = vadd.f32 %v10155_v14, %v10154_v13 }
 0x7fe   : > { %v10170_v50 = vadd.f32 %v10169_v15, %v10168_v52 }
 0x7ff   : > { %10157 = vadd.xlane.f32.xlu0 %v10156_v43 }
 0x803   : > { %10171 = vadd.xlane.f32.xlu0 %v10170_v50 }
 0x88c   : > { %v10158_v0 = vpop.xlane.xlu0 %10157 }
 0x890   : > { %v10172_v39 = vpop.xlane.xlu0 %10171 }
 0x891   : > { %v10173_v12 = vadd.f32 %v10172_v39, %v10158_v0 }
 0x893   : > { %v11692_v7 = vadd.f32 -720.4478, %v10173_v12 }
 0x895   : > { %v10176_v16 = vadd.f32 %v11692_v7, %v10175_v5 }
 0x897   : > { %10177 = vst.msk [vmem:[#allocation19] sm:$0xff] %vm10131_vm4, %v10176_v16 }
 0x898 PF: > { %p11888_p10 = scmp.eq.s32.totalorder %s13272_s27, 7  ;;  %s13177_s21 = smov [#allocation19]  }
 0x899   : > { %s10187_s26 = sshll.u32 %s13177_s21, 4  ;;  %s10188_s26 = int_to_ptr.vmem [resolvable:$true] %s10187_s26 }
 0x89a   : > { %s13071_s8 = scalar_lea.vmem %s10188_s26, 128  ;;  %p13078_p4 = scmp.lt.s32.totalorder %s10188_s26, %s10188_s26 }
 0x89b   : > { %p13072_p6 = scmp.ne.s32.totalorder %s10188_s26, %s13071_s8  ;;  %p13079_p12 = scmp.lt.s32.totalorder %s13071_s8, %s13071_s8 }
 0x89d   : > { %p13073_p13 = pnand %p13072_p6, %p11888_p10  ;;  %p13080_p5 = por %p13079_p12, %p13078_p4 }
 0x89f   : > { %p13074_p8 = pneg %p13073_p13 }
 0x8a1   : > { %p13081_p7 = pnand %p13080_p5, %p13074_p8 }
 0x8a3   : > { %13084 = shalt.err (!%p13081_p7)
}
 0x8a4   : > { %s15332_s14 = sld [smem:[#allocation35_spill]] }
 0x8aa   : > { %s13085_s13 = scalar_lea.hbm %s15332_s14, 128 }
 0x8ab   : > { %p13086_p11 = scmp.ne.s32.totalorder %s15332_s14, %s13085_s13  ;;  %p13091_p9 = scmp.lt.u32.totalorder %s13085_s13, %s15332_s14 }
 0x8ad   : > { %p13087_p3 = pnand %p13086_p11, %p11888_p10 }
 0x8af   : > { %p13088_p0 = pneg %p13087_p3 }
 0x8b1   : > { %p13093_p2 = pnand %p13091_p9, %p13088_p0 }
 0x8b3   : > { %13096 = shalt.err (!%p13093_p2)
}
 0x8b4   : > { %11844 = dma.vmem_to_hbm [thread:$0]  (%p11888_p10), %s10188_s26, 128, %s15332_s14, [#allocation7]  }
 0x8b5   : > { %13138 = dma.done.wait (%p11888_p10), [#allocation7], 128  }
 0x8b6   : > { %13140 = vsyncadd (%p11888_p10), [#allocation7], 4294967168 }
 0x8b7 PF: > { %s15333_s16 = sld [smem:[#allocation27_spill]]  ;;  %s15334_s24 = sld [smem:[#allocation25_spill]] }
 0x8b8   : > { %s15335_s23 = sld [smem:[#allocation30_spill]]  ;;  %s15336_s4 = sld [smem:[#allocation29_spill]] }
 0x8b9   : > { %s15337_s21 = smov %s13147_s22 }
 0x8bd   : > { %s26_s26 = sadd.s32 1, %s15333_s16   ;;  %s15338_s22 = smov %s15334_s24 }
 0x8be   : > { %p23_p1 = scmp.ge.s32.totalorder %s26_s26, 10   ;;  %s15339_s24 = smov %s13159_s25 }
 0x8bf   : > { %s15340_s25 = smov %s15336_s4 }
 0x8c0   :  { %25 = sbr.rel (!%p23_p1) target bundleno = 12 (0xc), region = 194 }
 0x8c7   :  { %10200 = vsyncpa [#allocation6], 1 }
 0x8c8   :  { %10202 = vsyncpa [#allocation6 + $0x1], 1 }
 0x8c9   :  { %10203 = vsyncpa [#allocation9], 1 }
 0x8ca   :  { %10204 = vsyncpa [#allocation12], 1 }
 0x8cb   :  { %10205 = vsyncpa [#allocation7], 1 }
 0x8cc   :  { %10207 = vsyncpa [#allocation7 + $0x1], 1 }

</bundles_post_ra>
